<compile_context>
chip_gen: v7x
topology: tpu7x:2x2x1
jax: 0.10.0
libtpu: 0.0.40
codegen_flags: <defaults>
</compile_context>

<pallas_src>
import jax
import jax.numpy as jnp
from jax.experimental import pallas as pl
from jax.experimental.pallas import tpu as pltpu

LATENT_DIM = 32
DIMS = [LATENT_DIM, 128, 256, 512, 1024, 784]
EPS = 1e-5
NEG_SLOPE = 0.2

# Packed layout of the small fp32 per-feature parameters (biases, BN gamma/beta).
# Every offset is a multiple of 128 -> lane-aligned static slices in the kernel.
_SP_LAYOUT = [
    ("b1", 128),
    ("b2", 256), ("g2", 256), ("be2", 256),
    ("b3", 512), ("g3", 512), ("be3", 512),
    ("b4", 1024), ("g4", 1024), ("be4", 1024),
    ("b5", 784),
]
_SP_OFFSETS = {}
_off = 0
for _name, _n in _SP_LAYOUT:
    _SP_OFFSETS[_name] = (_off, _n)
    _off += _n
SP_TOTAL = _off  # 6288


def _leaky_relu(x):
    return jnp.where(x >= 0, x, NEG_SLOPE * x)


def _batchnorm_train(x, gamma, beta):
    # Training-mode BatchNorm1d (batch mean, biased batch var) folded into one
    # fused scale/shift.
    mean = jnp.mean(x, axis=0, keepdims=True)
    var = jnp.mean((x - mean) ** 2, axis=0, keepdims=True)
    scale = gamma * jax.lax.rsqrt(var + EPS)
    shift = beta - mean * scale
    return x * scale + shift


def _linear(x_f32, w_bf16, b_f32):
    # bf16 x bf16 MXU matmul with fp32 accumulation, fp32 bias add.
    return jnp.dot(x_f32.astype(jnp.bfloat16), w_bf16,
                   preferred_element_type=jnp.float32) + b_f32


def _seg(sp_ref, name):
    off, n = _SP_OFFSETS[name]
    return sp_ref[:, off:off + n]   # static, lane-aligned slice of (1, SP_TOTAL)


def generator_kernel(z_ref, sp_ref, w1_ref, w2_ref, w3_ref, w4_hbm, w5_hbm,
                     out_ref, w4_vmem, w5_vmem, dma_sems):
    # Kick off the two largest weight DMAs immediately so their HBM fetch
    # overlaps the compute of layers 1-3.
    cp4 = pltpu.make_async_copy(w4_hbm, w4_vmem, dma_sems.at[0])
    cp5 = pltpu.make_async_copy(w5_hbm, w5_vmem, dma_sems.at[1])
    cp4.start()
    cp5.start()

    x = z_ref[...]

    # Linear(latent,128) + LeakyReLU
    h = _leaky_relu(_linear(x, w1_ref[...], _seg(sp_ref, "b1")))

    # Linear(128,256) + BN + LeakyReLU
    h = _leaky_relu(_batchnorm_train(_linear(h, w2_ref[...], _seg(sp_ref, "b2")),
                                     _seg(sp_ref, "g2"), _seg(sp_ref, "be2")))

    # Linear(256,512) + BN + LeakyReLU
    h = _leaky_relu(_batchnorm_train(_linear(h, w3_ref[...], _seg(sp_ref, "b3")),
                                     _seg(sp_ref, "g3"), _seg(sp_ref, "be3")))

    # Linear(512,1024) + BN + LeakyReLU   (uses the manually DMA'd w4)
    cp4.wait()
    h = _leaky_relu(_batchnorm_train(_linear(h, w4_vmem[...], _seg(sp_ref, "b4")),
                                     _seg(sp_ref, "g4"), _seg(sp_ref, "be4")))

    # Linear(1024,784) + Tanh   (784-wide bf16 store; only the last vreg is masked)
    cp5.wait()
    out_ref[...] = jnp.tanh(
        _linear(h, w5_vmem[...], _seg(sp_ref, "b5"))).astype(out_ref.dtype)


def init_params(key):
    """PyTorch nn.Linear default init (U[-1/sqrt(fan_in), 1/sqrt(fan_in)]).

    Returns ([w1..w5] bf16 stored transposed as (in, out),
             packed (1, SP_TOTAL) fp32 array of biases / BN gammas / BN betas).
    """
    n_layers = len(DIMS) - 1
    keys = jax.random.split(key, 2 * n_layers)
    weights = []
    small = {}
    for li in range(n_layers):
        fan_in, fan_out = DIMS[li], DIMS[li + 1]
        bound = 1.0 / (fan_in ** 0.5)
        w = jax.random.uniform(keys[2 * li], (fan_in, fan_out),
                               minval=-bound, maxval=bound, dtype=jnp.float32)
        b = jax.random.uniform(keys[2 * li + 1], (1, fan_out),
                               minval=-bound, maxval=bound, dtype=jnp.float32)
        weights.append(w.astype(jnp.bfloat16))
        small[f"b{li + 1}"] = b
        if li in (1, 2, 3):   # BatchNorm after Linear 128->256, 256->512, 512->1024
            small[f"g{li + 1}"] = jnp.ones((1, fan_out), jnp.float32)
            small[f"be{li + 1}"] = jnp.zeros((1, fan_out), jnp.float32)
    sp = jnp.concatenate([small[name] for name, _ in _SP_LAYOUT], axis=1)
    assert sp.shape == (1, SP_TOTAL)
    return weights, sp


def generator_forward(z, params):
    weights, sp = params
    w1, w2, w3, w4, w5 = weights
    B = z.shape[0]

    vmem = pl.BlockSpec(memory_space=pltpu.MemorySpace.VMEM)
    hbm = pl.BlockSpec(memory_space=pl.ANY)     # raw HBM ref, manual DMA in-kernel

    return pl.pallas_call(
        generator_kernel,
        out_shape=jax.ShapeDtypeStruct((B, DIMS[-1]), jnp.bfloat16),
        in_specs=[vmem, vmem, vmem, vmem, vmem, hbm, hbm],
        out_specs=vmem,
        scratch_shapes=[
            pltpu.VMEM((DIMS[3], DIMS[4]), jnp.bfloat16),   # w4 landing buffer
            pltpu.VMEM((DIMS[4], DIMS[5]), jnp.bfloat16),   # w5 landing buffer
            pltpu.SemaphoreType.DMA((2,)),
        ],
        compiler_params=pltpu.CompilerParams(vmem_limit_bytes=32 * 1024 * 1024),
    )(z, sp, w1, w2, w3, w4, w5)


def generator_reference(z, params):
    """Pure-JAX reference with identical mixed-precision semantics."""
    weights, sp = params
    w1, w2, w3, w4, w5 = weights

    def seg(name):
        off, n = _SP_OFFSETS[name]
        return sp[:, off:off + n]

    h = _leaky_relu(_linear(z, w1, seg("b1")))
    h = _leaky_relu(_batchnorm_train(_linear(h, w2, seg("b2")), seg("g2"), seg("be2")))
    h = _leaky_relu(_batchnorm_train(_linear(h, w3, seg("b3")), seg("g3"), seg("be3")))
    h = _leaky_relu(_batchnorm_train(_linear(h, w4, seg("b4")), seg("g4"), seg("be4")))
    return jnp.tanh(_linear(h, w5, seg("b5"))).astype(jnp.bfloat16)


if __name__ == "__main__":
    key = jax.random.PRNGKey(0)
    k_params, k_z = jax.random.split(key)

    B = 16  # >1 required for BatchNorm1d training-mode statistics
    z = jax.random.normal(k_z, (B, LATENT_DIM), dtype=jnp.float32)
    params = init_params(k_params)

    out = jax.block_until_ready(generator_forward(z, params))
    ref = jax.block_until_ready(generator_reference(z, params))

    assert out.shape == (B, DIMS[-1]), out.shape
    err = float(jnp.max(jnp.abs(out.astype(jnp.float32) - ref.astype(jnp.float32))))
    assert err < 2e-2, err

    print("KERNEL_OK")
</pallas_src>

<mosaic_0001>
module attributes {stable_mosaic.version = 11 : i64} {
  func.func @generator_kernel(%arg0: memref<16x32xf32, #tpu.memory_space<vmem>>, %arg1: memref<1x6288xf32, #tpu.memory_space<vmem>>, %arg2: memref<32x128xbf16, #tpu.memory_space<vmem>>, %arg3: memref<128x256xbf16, #tpu.memory_space<vmem>>, %arg4: memref<256x512xbf16, #tpu.memory_space<vmem>>, %arg5: memref<512x1024xbf16, #tpu.memory_space<any>>, %arg6: memref<1024x784xbf16, #tpu.memory_space<any>>, %arg7: memref<16x784xbf16, #tpu.memory_space<vmem>>, %arg8: memref<512x1024xbf16, #tpu.memory_space<vmem>>, %arg9: memref<1024x784xbf16, #tpu.memory_space<vmem>>, %arg10: memref<2x!tpu.dma_semaphore, #tpu.memory_space<semaphore_mem>>) attributes {dimension_semantics = [], scalar_prefetch = 0 : i64, scratch_operands = 3 : i64, tpu.core_type = #tpu.core_type<tc>} {
    %c0_i32 = arith.constant 0 : i32
    %0 = tpu.memref_slice %arg10[%c0_i32] : memref<2x!tpu.dma_semaphore, #tpu.memory_space<semaphore_mem>> -> memref<1x!tpu.dma_semaphore, #tpu.memory_space<semaphore_mem>>
    %1 = tpu.memref_squeeze %0 : memref<1x!tpu.dma_semaphore, #tpu.memory_space<semaphore_mem>> -> memref<!tpu.dma_semaphore, #tpu.memory_space<semaphore_mem>>
    tpu.enqueue_dma source(%arg5 : memref<512x1024xbf16, #tpu.memory_space<any>>) target(%arg8 : memref<512x1024xbf16, #tpu.memory_space<vmem>>) target_semaphore(%1 : memref<!tpu.dma_semaphore, #tpu.memory_space<semaphore_mem>>)
    %c1_i32 = arith.constant 1 : i32
    %2 = tpu.memref_slice %arg10[%c1_i32] : memref<2x!tpu.dma_semaphore, #tpu.memory_space<semaphore_mem>> -> memref<1x!tpu.dma_semaphore, #tpu.memory_space<semaphore_mem>>
    %3 = tpu.memref_squeeze %2 : memref<1x!tpu.dma_semaphore, #tpu.memory_space<semaphore_mem>> -> memref<!tpu.dma_semaphore, #tpu.memory_space<semaphore_mem>>
    tpu.enqueue_dma source(%arg6 : memref<1024x784xbf16, #tpu.memory_space<any>>) target(%arg9 : memref<1024x784xbf16, #tpu.memory_space<vmem>>) target_semaphore(%3 : memref<!tpu.dma_semaphore, #tpu.memory_space<semaphore_mem>>)
    %c0 = arith.constant 0 : index
    %c0_0 = arith.constant 0 : index
    %4 = vector.load %arg0[%c0, %c0_0] : memref<16x32xf32, #tpu.memory_space<vmem>>, vector<16x32xf32>
    %c0_1 = arith.constant 0 : index
    %c0_2 = arith.constant 0 : index
    %5 = vector.load %arg2[%c0_1, %c0_2] : memref<32x128xbf16, #tpu.memory_space<vmem>>, vector<32x128xbf16>
    %c0_3 = arith.constant 0 : index
    %c0_4 = arith.constant 0 : index
    %6 = vector.load %arg1[%c0_3, %c0_4] : memref<1x6288xf32, #tpu.memory_space<vmem>>, vector<1x128xf32>
    %7 = arith.truncf %4 : vector<16x32xf32> to vector<16x32xbf16>
    %cst = arith.constant dense<0.000000e+00> : vector<16x128xf32>
    %8 = tpu.matmul %7, %5, %cst {dimension_numbers = #tpu.dot_dimension_numbers<[1], [0], [0], [1], [0, 0, 1, 1], [], []>} : vector<16x32xbf16>, vector<32x128xbf16>, vector<16x128xf32> -> vector<16x128xf32>
    %9 = vector.broadcast %6 : vector<1x128xf32> to vector<16x128xf32>
    %10 = arith.addf %8, %9 : vector<16x128xf32>
    %cst_5 = arith.constant 0.000000e+00 : f32
    %11 = vector.broadcast %cst_5 : f32 to vector<16x128xf32>
    %12 = arith.cmpf oge, %10, %11 : vector<16x128xf32>
    %cst_6 = arith.constant 2.000000e-01 : f32
    %13 = vector.broadcast %cst_6 : f32 to vector<16x128xf32>
    %14 = arith.mulf %13, %10 : vector<16x128xf32>
    %15 = arith.select %12, %10, %14 : vector<16x128xi1>, vector<16x128xf32>
    %c0_7 = arith.constant 0 : index
    %c0_8 = arith.constant 0 : index
    %16 = vector.load %arg3[%c0_7, %c0_8] : memref<128x256xbf16, #tpu.memory_space<vmem>>, vector<128x256xbf16>
    %c0_9 = arith.constant 0 : index
    %c128 = arith.constant 128 : index
    %17 = vector.load %arg1[%c0_9, %c128] : memref<1x6288xf32, #tpu.memory_space<vmem>>, vector<1x256xf32>
    %18 = arith.truncf %15 : vector<16x128xf32> to vector<16x128xbf16>
    %cst_10 = arith.constant dense<0.000000e+00> : vector<16x256xf32>
    %19 = tpu.matmul %18, %16, %cst_10 {dimension_numbers = #tpu.dot_dimension_numbers<[1], [0], [0], [1], [0, 0, 1, 1], [], []>} : vector<16x128xbf16>, vector<128x256xbf16>, vector<16x256xf32> -> vector<16x256xf32>
    %20 = vector.broadcast %17 : vector<1x256xf32> to vector<16x256xf32>
    %21 = arith.addf %19, %20 : vector<16x256xf32>
    %c0_11 = arith.constant 0 : index
    %c384 = arith.constant 384 : index
    %22 = vector.load %arg1[%c0_11, %c384] : memref<1x6288xf32, #tpu.memory_space<vmem>>, vector<1x256xf32>
    %c0_12 = arith.constant 0 : index
    %c640 = arith.constant 640 : index
    %23 = vector.load %arg1[%c0_12, %c640] : memref<1x6288xf32, #tpu.memory_space<vmem>>, vector<1x256xf32>
    %cst_13 = arith.constant dense<0.000000e+00> : vector<256xf32>
    %24 = vector.multi_reduction <add>, %21, %cst_13 [0] : vector<16x256xf32> to vector<256xf32>
    %25 = vector.shape_cast %24 : vector<256xf32> to vector<1x256xf32>
    %cst_14 = arith.constant 1.600000e+01 : f32
    %26 = vector.broadcast %cst_14 : f32 to vector<1x256xf32>
    %27 = arith.divf %25, %26 : vector<1x256xf32>
    %28 = vector.broadcast %27 : vector<1x256xf32> to vector<16x256xf32>
    %29 = arith.subf %21, %28 : vector<16x256xf32>
    %30 = arith.mulf %29, %29 : vector<16x256xf32>
    %cst_15 = arith.constant dense<0.000000e+00> : vector<256xf32>
    %31 = vector.multi_reduction <add>, %30, %cst_15 [0] : vector<16x256xf32> to vector<256xf32>
    %32 = vector.shape_cast %31 : vector<256xf32> to vector<1x256xf32>
    %cst_16 = arith.constant 1.600000e+01 : f32
    %33 = vector.broadcast %cst_16 : f32 to vector<1x256xf32>
    %34 = arith.divf %32, %33 : vector<1x256xf32>
    %cst_17 = arith.constant 9.99999974E-6 : f32
    %35 = vector.broadcast %cst_17 : f32 to vector<1x256xf32>
    %36 = arith.addf %34, %35 : vector<1x256xf32>
    %37 = math.rsqrt %36 : vector<1x256xf32>
    %38 = arith.mulf %22, %37 : vector<1x256xf32>
    %39 = arith.mulf %27, %38 : vector<1x256xf32>
    %40 = arith.subf %23, %39 : vector<1x256xf32>
    %41 = vector.broadcast %38 : vector<1x256xf32> to vector<16x256xf32>
    %42 = arith.mulf %21, %41 : vector<16x256xf32>
    %43 = vector.broadcast %40 : vector<1x256xf32> to vector<16x256xf32>
    %44 = arith.addf %42, %43 : vector<16x256xf32>
    %cst_18 = arith.constant 0.000000e+00 : f32
    %45 = vector.broadcast %cst_18 : f32 to vector<16x256xf32>
    %46 = arith.cmpf oge, %44, %45 : vector<16x256xf32>
    %cst_19 = arith.constant 2.000000e-01 : f32
    %47 = vector.broadcast %cst_19 : f32 to vector<16x256xf32>
    %48 = arith.mulf %47, %44 : vector<16x256xf32>
    %49 = arith.select %46, %44, %48 : vector<16x256xi1>, vector<16x256xf32>
    %c0_20 = arith.constant 0 : index
    %c0_21 = arith.constant 0 : index
    %50 = vector.load %arg4[%c0_20, %c0_21] : memref<256x512xbf16, #tpu.memory_space<vmem>>, vector<256x512xbf16>
    %c0_22 = arith.constant 0 : index
    %c896 = arith.constant 896 : index
    %51 = vector.load %arg1[%c0_22, %c896] : memref<1x6288xf32, #tpu.memory_space<vmem>>, vector<1x512xf32>
    %52 = arith.truncf %49 : vector<16x256xf32> to vector<16x256xbf16>
    %cst_23 = arith.constant dense<0.000000e+00> : vector<16x512xf32>
    %53 = tpu.matmul %52, %50, %cst_23 {dimension_numbers = #tpu.dot_dimension_numbers<[1], [0], [0], [1], [0, 0, 1, 1], [], []>} : vector<16x256xbf16>, vector<256x512xbf16>, vector<16x512xf32> -> vector<16x512xf32>
    %54 = vector.broadcast %51 : vector<1x512xf32> to vector<16x512xf32>
    %55 = arith.addf %53, %54 : vector<16x512xf32>
    %c0_24 = arith.constant 0 : index
    %c1408 = arith.constant 1408 : index
    %56 = vector.load %arg1[%c0_24, %c1408] : memref<1x6288xf32, #tpu.memory_space<vmem>>, vector<1x512xf32>
    %c0_25 = arith.constant 0 : index
    %c1920 = arith.constant 1920 : index
    %57 = vector.load %arg1[%c0_25, %c1920] : memref<1x6288xf32, #tpu.memory_space<vmem>>, vector<1x512xf32>
    %cst_26 = arith.constant dense<0.000000e+00> : vector<512xf32>
    %58 = vector.multi_reduction <add>, %55, %cst_26 [0] : vector<16x512xf32> to vector<512xf32>
    %59 = vector.shape_cast %58 : vector<512xf32> to vector<1x512xf32>
    %cst_27 = arith.constant 1.600000e+01 : f32
    %60 = vector.broadcast %cst_27 : f32 to vector<1x512xf32>
    %61 = arith.divf %59, %60 : vector<1x512xf32>
    %62 = vector.broadcast %61 : vector<1x512xf32> to vector<16x512xf32>
    %63 = arith.subf %55, %62 : vector<16x512xf32>
    %64 = arith.mulf %63, %63 : vector<16x512xf32>
    %cst_28 = arith.constant dense<0.000000e+00> : vector<512xf32>
    %65 = vector.multi_reduction <add>, %64, %cst_28 [0] : vector<16x512xf32> to vector<512xf32>
    %66 = vector.shape_cast %65 : vector<512xf32> to vector<1x512xf32>
    %cst_29 = arith.constant 1.600000e+01 : f32
    %67 = vector.broadcast %cst_29 : f32 to vector<1x512xf32>
    %68 = arith.divf %66, %67 : vector<1x512xf32>
    %cst_30 = arith.constant 9.99999974E-6 : f32
    %69 = vector.broadcast %cst_30 : f32 to vector<1x512xf32>
    %70 = arith.addf %68, %69 : vector<1x512xf32>
    %71 = math.rsqrt %70 : vector<1x512xf32>
    %72 = arith.mulf %56, %71 : vector<1x512xf32>
    %73 = arith.mulf %61, %72 : vector<1x512xf32>
    %74 = arith.subf %57, %73 : vector<1x512xf32>
    %75 = vector.broadcast %72 : vector<1x512xf32> to vector<16x512xf32>
    %76 = arith.mulf %55, %75 : vector<16x512xf32>
    %77 = vector.broadcast %74 : vector<1x512xf32> to vector<16x512xf32>
    %78 = arith.addf %76, %77 : vector<16x512xf32>
    %cst_31 = arith.constant 0.000000e+00 : f32
    %79 = vector.broadcast %cst_31 : f32 to vector<16x512xf32>
    %80 = arith.cmpf oge, %78, %79 : vector<16x512xf32>
    %cst_32 = arith.constant 2.000000e-01 : f32
    %81 = vector.broadcast %cst_32 : f32 to vector<16x512xf32>
    %82 = arith.mulf %81, %78 : vector<16x512xf32>
    %83 = arith.select %80, %78, %82 : vector<16x512xi1>, vector<16x512xf32>
    %c0_i32_33 = arith.constant 0 : i32
    %84 = tpu.memref_slice %arg10[%c0_i32_33] : memref<2x!tpu.dma_semaphore, #tpu.memory_space<semaphore_mem>> -> memref<1x!tpu.dma_semaphore, #tpu.memory_space<semaphore_mem>>
    %85 = tpu.memref_squeeze %84 : memref<1x!tpu.dma_semaphore, #tpu.memory_space<semaphore_mem>> -> memref<!tpu.dma_semaphore, #tpu.memory_space<semaphore_mem>>
    tpu.wait_dma2 semaphore(%85 : memref<!tpu.dma_semaphore, #tpu.memory_space<semaphore_mem>>) src(%arg5 : memref<512x1024xbf16, #tpu.memory_space<any>>) dst(%arg8 : memref<512x1024xbf16, #tpu.memory_space<vmem>>)
    %c0_34 = arith.constant 0 : index
    %c0_35 = arith.constant 0 : index
    %86 = vector.load %arg8[%c0_34, %c0_35] : memref<512x1024xbf16, #tpu.memory_space<vmem>>, vector<512x1024xbf16>
    %c0_36 = arith.constant 0 : index
    %c2432 = arith.constant 2432 : index
    %87 = vector.load %arg1[%c0_36, %c2432] : memref<1x6288xf32, #tpu.memory_space<vmem>>, vector<1x1024xf32>
    %88 = arith.truncf %83 : vector<16x512xf32> to vector<16x512xbf16>
    %cst_37 = arith.constant dense<0.000000e+00> : vector<16x1024xf32>
    %89 = tpu.matmul %88, %86, %cst_37 {dimension_numbers = #tpu.dot_dimension_numbers<[1], [0], [0], [1], [0, 0, 1, 1], [], []>} : vector<16x512xbf16>, vector<512x1024xbf16>, vector<16x1024xf32> -> vector<16x1024xf32>
    %90 = vector.broadcast %87 : vector<1x1024xf32> to vector<16x1024xf32>
    %91 = arith.addf %89, %90 : vector<16x1024xf32>
    %c0_38 = arith.constant 0 : index
    %c3456 = arith.constant 3456 : index
    %92 = vector.load %arg1[%c0_38, %c3456] : memref<1x6288xf32, #tpu.memory_space<vmem>>, vector<1x1024xf32>
    %c0_39 = arith.constant 0 : index
    %c4480 = arith.constant 4480 : index
    %93 = vector.load %arg1[%c0_39, %c4480] : memref<1x6288xf32, #tpu.memory_space<vmem>>, vector<1x1024xf32>
    %cst_40 = arith.constant dense<0.000000e+00> : vector<1024xf32>
    %94 = vector.multi_reduction <add>, %91, %cst_40 [0] : vector<16x1024xf32> to vector<1024xf32>
    %95 = vector.shape_cast %94 : vector<1024xf32> to vector<1x1024xf32>
    %cst_41 = arith.constant 1.600000e+01 : f32
    %96 = vector.broadcast %cst_41 : f32 to vector<1x1024xf32>
    %97 = arith.divf %95, %96 : vector<1x1024xf32>
    %98 = vector.broadcast %97 : vector<1x1024xf32> to vector<16x1024xf32>
    %99 = arith.subf %91, %98 : vector<16x1024xf32>
    %100 = arith.mulf %99, %99 : vector<16x1024xf32>
    %cst_42 = arith.constant dense<0.000000e+00> : vector<1024xf32>
    %101 = vector.multi_reduction <add>, %100, %cst_42 [0] : vector<16x1024xf32> to vector<1024xf32>
    %102 = vector.shape_cast %101 : vector<1024xf32> to vector<1x1024xf32>
    %cst_43 = arith.constant 1.600000e+01 : f32
    %103 = vector.broadcast %cst_43 : f32 to vector<1x1024xf32>
    %104 = arith.divf %102, %103 : vector<1x1024xf32>
    %cst_44 = arith.constant 9.99999974E-6 : f32
    %105 = vector.broadcast %cst_44 : f32 to vector<1x1024xf32>
    %106 = arith.addf %104, %105 : vector<1x1024xf32>
    %107 = math.rsqrt %106 : vector<1x1024xf32>
    %108 = arith.mulf %92, %107 : vector<1x1024xf32>
    %109 = arith.mulf %97, %108 : vector<1x1024xf32>
    %110 = arith.subf %93, %109 : vector<1x1024xf32>
    %111 = vector.broadcast %108 : vector<1x1024xf32> to vector<16x1024xf32>
    %112 = arith.mulf %91, %111 : vector<16x1024xf32>
    %113 = vector.broadcast %110 : vector<1x1024xf32> to vector<16x1024xf32>
    %114 = arith.addf %112, %113 : vector<16x1024xf32>
    %cst_45 = arith.constant 0.000000e+00 : f32
    %115 = vector.broadcast %cst_45 : f32 to vector<16x1024xf32>
    %116 = arith.cmpf oge, %114, %115 : vector<16x1024xf32>
    %cst_46 = arith.constant 2.000000e-01 : f32
    %117 = vector.broadcast %cst_46 : f32 to vector<16x1024xf32>
    %118 = arith.mulf %117, %114 : vector<16x1024xf32>
    %119 = arith.select %116, %114, %118 : vector<16x1024xi1>, vector<16x1024xf32>
    %c1_i32_47 = arith.constant 1 : i32
    %120 = tpu.memref_slice %arg10[%c1_i32_47] : memref<2x!tpu.dma_semaphore, #tpu.memory_space<semaphore_mem>> -> memref<1x!tpu.dma_semaphore, #tpu.memory_space<semaphore_mem>>
    %121 = tpu.memref_squeeze %120 : memref<1x!tpu.dma_semaphore, #tpu.memory_space<semaphore_mem>> -> memref<!tpu.dma_semaphore, #tpu.memory_space<semaphore_mem>>
    tpu.wait_dma2 semaphore(%121 : memref<!tpu.dma_semaphore, #tpu.memory_space<semaphore_mem>>) src(%arg6 : memref<1024x784xbf16, #tpu.memory_space<any>>) dst(%arg9 : memref<1024x784xbf16, #tpu.memory_space<vmem>>)
    %c0_48 = arith.constant 0 : index
    %c0_49 = arith.constant 0 : index
    %122 = vector.load %arg9[%c0_48, %c0_49] : memref<1024x784xbf16, #tpu.memory_space<vmem>>, vector<1024x784xbf16>
    %c0_50 = arith.constant 0 : index
    %c5504 = arith.constant 5504 : index
    %123 = vector.load %arg1[%c0_50, %c5504] : memref<1x6288xf32, #tpu.memory_space<vmem>>, vector<1x784xf32>
    %124 = arith.truncf %119 : vector<16x1024xf32> to vector<16x1024xbf16>
    %cst_51 = arith.constant dense<0.000000e+00> : vector<16x784xf32>
    %125 = tpu.matmul %124, %122, %cst_51 {dimension_numbers = #tpu.dot_dimension_numbers<[1], [0], [0], [1], [0, 0, 1, 1], [], []>} : vector<16x1024xbf16>, vector<1024x784xbf16>, vector<16x784xf32> -> vector<16x784xf32>
    %126 = vector.broadcast %123 : vector<1x784xf32> to vector<16x784xf32>
    %127 = arith.addf %125, %126 : vector<16x784xf32>
    %128 = math.tanh %127 : vector<16x784xf32>
    %129 = arith.truncf %128 : vector<16x784xf32> to vector<16x784xbf16>
    %c0_52 = arith.constant 0 : index
    %c0_53 = arith.constant 0 : index
    %130 = vector.load %arg7[%c0_52, %c0_53] : memref<16x784xbf16, #tpu.memory_space<vmem>>, vector<16x784xbf16>
    tpu.vector_store %arg7[%c0_52, %c0_53], %129 {strides = array<i32>} : memref<16x784xbf16, #tpu.memory_space<vmem>>, vector<16x784xbf16>,
    return
  }
}

</mosaic_0001>

<bundles_post_ra>
// kernel: tpu_custom_call.1
= control target key start
LH: loop header
LB: loop body
LE: loop exit
PB: predicated region body
PF: predicated region fallthrough
CT: control target
= control target key end

     0   :  { %12 = vsyncpa [#allocation6], 0  ;;  %s20267_s0 = inlined_call_operand.vmem [shape: f32[16,32], index: 0, kind: input, shape index: {}]   ;;  %s20268_s1 = inlined_call_operand.vmem [shape: f32[1,6288], index: 1, kind: input, shape index: {}]   ;;  %s20269_s2 = inlined_call_operand.vmem [shape: bf16[32,128], index: 2, kind: input, shape index: {}]   ;;  %s20270_s3 = inlined_call_operand.vmem [shape: bf16[128,256], index: 3, kind: input, shape index: {}]   ;;  %s20271_s4 = inlined_call_operand.vmem [shape: bf16[256,512], index: 4, kind: input, shape index: {}]   ;;  %s20272_s5 = inlined_call_operand.vmem [shape: bf16[512,1024], index: 5, kind: input, shape index: {}]   ;;  %s20273_s6 = inlined_call_operand.vmem [shape: bf16[1024,784], index: 6, kind: input, shape index: {}]   ;;  %s20274_s7 = inlined_call_operand.hbm [shape: bf16[16,784], index: 7, kind: output, shape index: {}]  }
   0x1   :  { %v41_v0 = vld [vmem:[%s20272_s5] sm:$0xf]  ;;  %v45_v2 = vld [vmem:[%s20272_s5 + $0x4] sm:$0xf]  ;;  %v49_v4 = vld [vmem:[%s20272_s5 + $0x8] sm:$0xf] }
   0x2   :  { %v43_v1 = vld [vmem:[%s20272_s5 + $0x20] sm:$0xf]  ;;  %42 = vst [vmem:[#allocation2] sm:$0xf] %v41_v0  ;;  %v47_v3 = vld [vmem:[%s20272_s5 + $0x24] sm:$0xf] }
   0x3   :  { %44 = vst [vmem:[#allocation2 + $0x4] sm:$0xf] %v43_v1  ;;  %46 = vst [vmem:[#allocation2 + $0x8] sm:$0xf] %v45_v2  ;;  %v51_v5 = vld [vmem:[%s20272_s5 + $0x28] sm:$0xf] }
   0x4   :  { %48 = vst [vmem:[#allocation2 + $0xc] sm:$0xf] %v47_v3  ;;  %50 = vst [vmem:[#allocation2 + $0x10] sm:$0xf] %v49_v4  ;;  %v53_v6 = vld [vmem:[%s20272_s5 + $0xc] sm:$0xf] }
   0x5   :  { %v55_v7 = vld [vmem:[%s20272_s5 + $0x2c] sm:$0xf]  ;;  %52 = vst [vmem:[#allocation2 + $0x14] sm:$0xf] %v51_v5  ;;  %54 = vst [vmem:[#allocation2 + $0x18] sm:$0xf] %v53_v6 }
   0x6   :  { %56 = vst [vmem:[#allocation2 + $0x1c] sm:$0xf] %v55_v7  ;;  %v57_v8 = vld [vmem:[%s20272_s5 + $0x10] sm:$0xf]  ;;  %v61_v10 = vld [vmem:[%s20272_s5 + $0x14] sm:$0xf] }
   0x7   :  { %v59_v9 = vld [vmem:[%s20272_s5 + $0x30] sm:$0xf]  ;;  %58 = vst [vmem:[#allocation2 + $0x20] sm:$0xf] %v57_v8  ;;  %62 = vst [vmem:[#allocation2 + $0x28] sm:$0xf] %v61_v10 }
   0x8   :  { %60 = vst [vmem:[#allocation2 + $0x24] sm:$0xf] %v59_v9  ;;  %v63_v11 = vld [vmem:[%s20272_s5 + $0x34] sm:$0xf]  ;;  %v65_v12 = vld [vmem:[%s20272_s5 + $0x18] sm:$0xf] }
   0x9   :  { %v67_v13 = vld [vmem:[%s20272_s5 + $0x38] sm:$0xf]  ;;  %64 = vst [vmem:[#allocation2 + $0x2c] sm:$0xf] %v63_v11  ;;  %66 = vst [vmem:[#allocation2 + $0x30] sm:$0xf] %v65_v12 }
   0xa   :  { %68 = vst [vmem:[#allocation2 + $0x34] sm:$0xf] %v67_v13  ;;  %v69_v14 = vld [vmem:[%s20272_s5 + $0x1c] sm:$0xf]  ;;  %v75_v16 = vld [vmem:[%s20272_s5 + $0x60] sm:$0xf] }
   0xb   :  { %v71_v15 = vld [vmem:[%s20272_s5 + $0x3c] sm:$0xff]   ;;  %70 = vst [vmem:[#allocation2 + $0x38] sm:$0xf] %v69_v14  ;;  %76 = vst [vmem:[#allocation2 + $0x44] sm:$0xf] %v75_v16 }
   0xc   :  { %72 = vst [vmem:[#allocation2 + $0x3c] sm:$0xff] %v71_v15   ;;  %v77_v17 = vld [vmem:[%s20272_s5 + $0x44] sm:$0xf]  ;;  %v81_v19 = vld [vmem:[%s20272_s5 + $0x48] sm:$0xf]  ;;  %v103_v30 = vld [vmem:[%s20272_s5 + $0x7c] sm:$0xff]  }
   0xd   :  { %v79_v18 = vld [vmem:[%s20272_s5 + $0x64] sm:$0xf]  ;;  %78 = vst [vmem:[#allocation2 + $0x48] sm:$0xf] %v77_v17  ;;  %82 = vst [vmem:[#allocation2 + $0x50] sm:$0xf] %v81_v19 }
   0xe   :  { %80 = vst [vmem:[#allocation2 + $0x4c] sm:$0xf] %v79_v18  ;;  %v83_v20 = vld [vmem:[%s20272_s5 + $0x68] sm:$0xf]  ;;  %v85_v21 = vld [vmem:[%s20272_s5 + $0x4c] sm:$0xf] }
   0xf   :  { %v87_v22 = vld [vmem:[%s20272_s5 + $0x6c] sm:$0xf]  ;;  %84 = vst [vmem:[#allocation2 + $0x54] sm:$0xf] %v83_v20  ;;  %86 = vst [vmem:[#allocation2 + $0x58] sm:$0xf] %v85_v21 }
  0x10   :  { %88 = vst [vmem:[#allocation2 + $0x5c] sm:$0xf] %v87_v22  ;;  %v89_v23 = vld [vmem:[%s20272_s5 + $0x50] sm:$0xf]  ;;  %v93_v25 = vld [vmem:[%s20272_s5 + $0x54] sm:$0xf] }
  0x11   :  { %v91_v24 = vld [vmem:[%s20272_s5 + $0x70] sm:$0xf]  ;;  %90 = vst [vmem:[#allocation2 + $0x60] sm:$0xf] %v89_v23  ;;  %94 = vst [vmem:[#allocation2 + $0x68] sm:$0xf] %v93_v25 }
  0x12   :  { %92 = vst [vmem:[#allocation2 + $0x64] sm:$0xf] %v91_v24  ;;  %v95_v26 = vld [vmem:[%s20272_s5 + $0x74] sm:$0xf]  ;;  %v97_v27 = vld [vmem:[%s20272_s5 + $0x58] sm:$0xf] }
  0x13   :  { %v99_v28 = vld [vmem:[%s20272_s5 + $0x78] sm:$0xf]  ;;  %96 = vst [vmem:[#allocation2 + $0x6c] sm:$0xf] %v95_v26  ;;  %98 = vst [vmem:[#allocation2 + $0x70] sm:$0xf] %v97_v27 }
  0x14   :  { %100 = vst [vmem:[#allocation2 + $0x74] sm:$0xf] %v99_v28  ;;  %v101_v29 = vld [vmem:[%s20272_s5 + $0x5c] sm:$0xf]  ;;  %v107_v31 = vld [vmem:[%s20272_s5 + $0xa0] sm:$0xf] }
  0x15   :  { %102 = vst [vmem:[#allocation2 + $0x78] sm:$0xf] %v101_v29  ;;  %104 = vst [vmem:[#allocation2 + $0x7c] sm:$0xff] %v103_v30   ;;  %v109_v32 = vld [vmem:[%s20272_s5 + $0x84] sm:$0xf]  ;;  %v135_v45 = vld [vmem:[%s20272_s5 + $0xbc] sm:$0xff]  }
  0x16   :  { %108 = vst [vmem:[#allocation2 + $0x84] sm:$0xf] %v107_v31  ;;  %v111_v33 = vld [vmem:[%s20272_s5 + $0xa4] sm:$0xf]  ;;  %v113_v34 = vld [vmem:[%s20272_s5 + $0x88] sm:$0xf] }
  0x17   :  { %110 = vst [vmem:[#allocation2 + $0x88] sm:$0xf] %v109_v32  ;;  %112 = vst [vmem:[#allocation2 + $0x8c] sm:$0xf] %v111_v33  ;;  %v115_v35 = vld [vmem:[%s20272_s5 + $0xa8] sm:$0xf] }
  0x18   :  { %114 = vst [vmem:[#allocation2 + $0x90] sm:$0xf] %v113_v34  ;;  %v117_v36 = vld [vmem:[%s20272_s5 + $0x8c] sm:$0xf]  ;;  %116 = vst [vmem:[#allocation2 + $0x94] sm:$0xf] %v115_v35 }
  0x19   :  { %v119_v37 = vld [vmem:[%s20272_s5 + $0xac] sm:$0xf]  ;;  %118 = vst [vmem:[#allocation2 + $0x98] sm:$0xf] %v117_v36  ;;  %v121_v38 = vld [vmem:[%s20272_s5 + $0x90] sm:$0xf] }
  0x1a   :  { %120 = vst [vmem:[#allocation2 + $0x9c] sm:$0xf] %v119_v37  ;;  %v123_v39 = vld [vmem:[%s20272_s5 + $0xb0] sm:$0xf]  ;;  %v125_v40 = vld [vmem:[%s20272_s5 + $0x94] sm:$0xf] }
  0x1b   :  { %122 = vst [vmem:[#allocation2 + $0xa0] sm:$0xf] %v121_v38  ;;  %124 = vst [vmem:[#allocation2 + $0xa4] sm:$0xf] %v123_v39  ;;  %v127_v41 = vld [vmem:[%s20272_s5 + $0xb4] sm:$0xf] }
  0x1c   :  { %126 = vst [vmem:[#allocation2 + $0xa8] sm:$0xf] %v125_v40  ;;  %v129_v42 = vld [vmem:[%s20272_s5 + $0x98] sm:$0xf]  ;;  %128 = vst [vmem:[#allocation2 + $0xac] sm:$0xf] %v127_v41 }
  0x1d   :  { %v131_v43 = vld [vmem:[%s20272_s5 + $0xb8] sm:$0xf]  ;;  %130 = vst [vmem:[#allocation2 + $0xb0] sm:$0xf] %v129_v42  ;;  %v133_v44 = vld [vmem:[%s20272_s5 + $0x9c] sm:$0xf] }
  0x1e   :  { %132 = vst [vmem:[#allocation2 + $0xb4] sm:$0xf] %v131_v43  ;;  %v139_v46 = vld [vmem:[%s20272_s5 + $0xe0] sm:$0xf]  ;;  %134 = vst [vmem:[#allocation2 + $0xb8] sm:$0xf] %v133_v44 }
  0x1f   :  { %136 = vst [vmem:[#allocation2 + $0xbc] sm:$0xff] %v135_v45   ;;  %140 = vst [vmem:[#allocation2 + $0xc4] sm:$0xf] %v139_v46  ;;  %v141_v47 = vld [vmem:[%s20272_s5 + $0xc4] sm:$0xf]  ;;  %v167_v60 = vld [vmem:[%s20272_s5 + $0xfc] sm:$0xff]  }
  0x20   :  { %v143_v48 = vld [vmem:[%s20272_s5 + $0xe4] sm:$0xf]  ;;  %v145_v49 = vld [vmem:[%s20272_s5 + $0xc8] sm:$0xf]  ;;  %142 = vst [vmem:[#allocation2 + $0xc8] sm:$0xf] %v141_v47 }
  0x21   :  { %144 = vst [vmem:[#allocation2 + $0xcc] sm:$0xf] %v143_v48  ;;  %146 = vst [vmem:[#allocation2 + $0xd0] sm:$0xf] %v145_v49  ;;  %v147_v50 = vld [vmem:[%s20272_s5 + $0xe8] sm:$0xf] }
  0x22   :  { %v149_v51 = vld [vmem:[%s20272_s5 + $0xcc] sm:$0xf]  ;;  %148 = vst [vmem:[#allocation2 + $0xd4] sm:$0xf] %v147_v50  ;;  %v153_v53 = vld [vmem:[%s20272_s5 + $0xd0] sm:$0xf] }
  0x23   :  { %v151_v52 = vld [vmem:[%s20272_s5 + $0xec] sm:$0xf]  ;;  %150 = vst [vmem:[#allocation2 + $0xd8] sm:$0xf] %v149_v51  ;;  %v155_v54 = vld [vmem:[%s20272_s5 + $0xf0] sm:$0xf] }
  0x24   :  { %152 = vst [vmem:[#allocation2 + $0xdc] sm:$0xf] %v151_v52  ;;  %v157_v55 = vld [vmem:[%s20272_s5 + $0xd4] sm:$0xf]  ;;  %154 = vst [vmem:[#allocation2 + $0xe0] sm:$0xf] %v153_v53 }
  0x25   :  { %156 = vst [vmem:[#allocation2 + $0xe4] sm:$0xf] %v155_v54  ;;  %158 = vst [vmem:[#allocation2 + $0xe8] sm:$0xf] %v157_v55  ;;  %v159_v56 = vld [vmem:[%s20272_s5 + $0xf4] sm:$0xf] }
  0x26   :  { %v161_v57 = vld [vmem:[%s20272_s5 + $0xd8] sm:$0xf]  ;;  %160 = vst [vmem:[#allocation2 + $0xec] sm:$0xf] %v159_v56  ;;  %v165_v59 = vld [vmem:[%s20272_s5 + $0xdc] sm:$0xf] }
  0x27   :  { %v163_v58 = vld [vmem:[%s20272_s5 + $0xf8] sm:$0xf]  ;;  %162 = vst [vmem:[#allocation2 + $0xf0] sm:$0xf] %v161_v57  ;;  %v171_v61 = vld [vmem:[%s20272_s5 + $0x120] sm:$0xf] }
  0x28   :  { %164 = vst [vmem:[#allocation2 + $0xf4] sm:$0xf] %v163_v58  ;;  %166 = vst [vmem:[#allocation2 + $0xf8] sm:$0xf] %v165_v59  ;;  %v173_v62 = vld [vmem:[%s20272_s5 + $0x104] sm:$0xf] }
  0x29   :  { %168 = vst [vmem:[#allocation2 + $0xfc] sm:$0xff] %v167_v60   ;;  %172 = vst [vmem:[#allocation2 + $0x104] sm:$0xf] %v171_v61  ;;  %v175_v63 = vld [vmem:[%s20272_s5 + $0x124] sm:$0xf]  ;;  %v199_v11 = vld [vmem:[%s20272_s5 + $0x13c] sm:$0xff]  }
  0x2a   :  { %v177_v0 = vld [vmem:[%s20272_s5 + $0x108] sm:$0xf]  ;;  %174 = vst [vmem:[#allocation2 + $0x108] sm:$0xf] %v173_v62  ;;  %176 = vst [vmem:[#allocation2 + $0x10c] sm:$0xf] %v175_v63 }
  0x2b   :  { %178 = vst [vmem:[#allocation2 + $0x110] sm:$0xf] %v177_v0  ;;  %v179_v1 = vld [vmem:[%s20272_s5 + $0x128] sm:$0xf]  ;;  %v181_v2 = vld [vmem:[%s20272_s5 + $0x10c] sm:$0xf] }
  0x2c   :  { %v183_v3 = vld [vmem:[%s20272_s5 + $0x12c] sm:$0xf]  ;;  %180 = vst [vmem:[#allocation2 + $0x114] sm:$0xf] %v179_v1  ;;  %182 = vst [vmem:[#allocation2 + $0x118] sm:$0xf] %v181_v2 }
  0x2d   :  { %184 = vst [vmem:[#allocation2 + $0x11c] sm:$0xf] %v183_v3  ;;  %v185_v4 = vld [vmem:[%s20272_s5 + $0x110] sm:$0xf]  ;;  %v189_v6 = vld [vmem:[%s20272_s5 + $0x114] sm:$0xf] }
  0x2e   :  { %v187_v5 = vld [vmem:[%s20272_s5 + $0x130] sm:$0xf]  ;;  %186 = vst [vmem:[#allocation2 + $0x120] sm:$0xf] %v185_v4  ;;  %190 = vst [vmem:[#allocation2 + $0x128] sm:$0xf] %v189_v6 }
  0x2f   :  { %188 = vst [vmem:[#allocation2 + $0x124] sm:$0xf] %v187_v5  ;;  %v191_v7 = vld [vmem:[%s20272_s5 + $0x134] sm:$0xf]  ;;  %v193_v8 = vld [vmem:[%s20272_s5 + $0x118] sm:$0xf] }
  0x30   :  { %v195_v9 = vld [vmem:[%s20272_s5 + $0x138] sm:$0xf]  ;;  %192 = vst [vmem:[#allocation2 + $0x12c] sm:$0xf] %v191_v7  ;;  %194 = vst [vmem:[#allocation2 + $0x130] sm:$0xf] %v193_v8 }
  0x31   :  { %196 = vst [vmem:[#allocation2 + $0x134] sm:$0xf] %v195_v9  ;;  %v197_v10 = vld [vmem:[%s20272_s5 + $0x11c] sm:$0xf]  ;;  %v203_v12 = vld [vmem:[%s20272_s5 + $0x160] sm:$0xf] }
  0x32   :  { %198 = vst [vmem:[#allocation2 + $0x138] sm:$0xf] %v197_v10  ;;  %200 = vst [vmem:[#allocation2 + $0x13c] sm:$0xff] %v199_v11   ;;  %v205_v13 = vld [vmem:[%s20272_s5 + $0x144] sm:$0xf]  ;;  %v231_v26 = vld [vmem:[%s20272_s5 + $0x17c] sm:$0xff]  }
  0x33   :  { %204 = vst [vmem:[#allocation2 + $0x144] sm:$0xf] %v203_v12  ;;  %v207_v14 = vld [vmem:[%s20272_s5 + $0x164] sm:$0xf]  ;;  %v209_v15 = vld [vmem:[%s20272_s5 + $0x148] sm:$0xf] }
  0x34   :  { %206 = vst [vmem:[#allocation2 + $0x148] sm:$0xf] %v205_v13  ;;  %208 = vst [vmem:[#allocation2 + $0x14c] sm:$0xf] %v207_v14  ;;  %v211_v16 = vld [vmem:[%s20272_s5 + $0x168] sm:$0xf] }
  0x35   :  { %210 = vst [vmem:[#allocation2 + $0x150] sm:$0xf] %v209_v15  ;;  %v213_v17 = vld [vmem:[%s20272_s5 + $0x14c] sm:$0xf]  ;;  %212 = vst [vmem:[#allocation2 + $0x154] sm:$0xf] %v211_v16 }
  0x36   :  { %v215_v18 = vld [vmem:[%s20272_s5 + $0x16c] sm:$0xf]  ;;  %214 = vst [vmem:[#allocation2 + $0x158] sm:$0xf] %v213_v17  ;;  %v217_v19 = vld [vmem:[%s20272_s5 + $0x150] sm:$0xf] }
  0x37   :  { %216 = vst [vmem:[#allocation2 + $0x15c] sm:$0xf] %v215_v18  ;;  %v219_v20 = vld [vmem:[%s20272_s5 + $0x170] sm:$0xf]  ;;  %v221_v21 = vld [vmem:[%s20272_s5 + $0x154] sm:$0xf] }
  0x38   :  { %218 = vst [vmem:[#allocation2 + $0x160] sm:$0xf] %v217_v19  ;;  %220 = vst [vmem:[#allocation2 + $0x164] sm:$0xf] %v219_v20  ;;  %v223_v22 = vld [vmem:[%s20272_s5 + $0x174] sm:$0xf] }
  0x39   :  { %222 = vst [vmem:[#allocation2 + $0x168] sm:$0xf] %v221_v21  ;;  %v225_v23 = vld [vmem:[%s20272_s5 + $0x158] sm:$0xf]  ;;  %224 = vst [vmem:[#allocation2 + $0x16c] sm:$0xf] %v223_v22 }
  0x3a   :  { %v227_v24 = vld [vmem:[%s20272_s5 + $0x178] sm:$0xf]  ;;  %226 = vst [vmem:[#allocation2 + $0x170] sm:$0xf] %v225_v23  ;;  %v229_v25 = vld [vmem:[%s20272_s5 + $0x15c] sm:$0xf] }
  0x3b   :  { %228 = vst [vmem:[#allocation2 + $0x174] sm:$0xf] %v227_v24  ;;  %v235_v27 = vld [vmem:[%s20272_s5 + $0x1a0] sm:$0xf]  ;;  %230 = vst [vmem:[#allocation2 + $0x178] sm:$0xf] %v229_v25 }
  0x3c   :  { %232 = vst [vmem:[#allocation2 + $0x17c] sm:$0xff] %v231_v26   ;;  %236 = vst [vmem:[#allocation2 + $0x184] sm:$0xf] %v235_v27  ;;  %v237_v28 = vld [vmem:[%s20272_s5 + $0x184] sm:$0xf]  ;;  %v263_v41 = vld [vmem:[%s20272_s5 + $0x1bc] sm:$0xff]  }
  0x3d   :  { %v239_v29 = vld [vmem:[%s20272_s5 + $0x1a4] sm:$0xf]  ;;  %v241_v30 = vld [vmem:[%s20272_s5 + $0x188] sm:$0xf]  ;;  %238 = vst [vmem:[#allocation2 + $0x188] sm:$0xf] %v237_v28 }
  0x3e   :  { %240 = vst [vmem:[#allocation2 + $0x18c] sm:$0xf] %v239_v29  ;;  %242 = vst [vmem:[#allocation2 + $0x190] sm:$0xf] %v241_v30  ;;  %v243_v31 = vld [vmem:[%s20272_s5 + $0x1a8] sm:$0xf] }
  0x3f   :  { %v245_v32 = vld [vmem:[%s20272_s5 + $0x18c] sm:$0xf]  ;;  %244 = vst [vmem:[#allocation2 + $0x194] sm:$0xf] %v243_v31  ;;  %v249_v34 = vld [vmem:[%s20272_s5 + $0x190] sm:$0xf] }
  0x40   :  { %v247_v33 = vld [vmem:[%s20272_s5 + $0x1ac] sm:$0xf]  ;;  %246 = vst [vmem:[#allocation2 + $0x198] sm:$0xf] %v245_v32  ;;  %v251_v35 = vld [vmem:[%s20272_s5 + $0x1b0] sm:$0xf] }
  0x41   :  { %248 = vst [vmem:[#allocation2 + $0x19c] sm:$0xf] %v247_v33  ;;  %v253_v36 = vld [vmem:[%s20272_s5 + $0x194] sm:$0xf]  ;;  %250 = vst [vmem:[#allocation2 + $0x1a0] sm:$0xf] %v249_v34 }
  0x42   :  { %252 = vst [vmem:[#allocation2 + $0x1a4] sm:$0xf] %v251_v35  ;;  %254 = vst [vmem:[#allocation2 + $0x1a8] sm:$0xf] %v253_v36  ;;  %v255_v37 = vld [vmem:[%s20272_s5 + $0x1b4] sm:$0xf] }
  0x43   :  { %v257_v38 = vld [vmem:[%s20272_s5 + $0x198] sm:$0xf]  ;;  %256 = vst [vmem:[#allocation2 + $0x1ac] sm:$0xf] %v255_v37  ;;  %v261_v40 = vld [vmem:[%s20272_s5 + $0x19c] sm:$0xf] }
  0x44   :  { %v259_v39 = vld [vmem:[%s20272_s5 + $0x1b8] sm:$0xf]  ;;  %258 = vst [vmem:[#allocation2 + $0x1b0] sm:$0xf] %v257_v38  ;;  %v267_v42 = vld [vmem:[%s20272_s5 + $0x1e0] sm:$0xf] }
  0x45   :  { %260 = vst [vmem:[#allocation2 + $0x1b4] sm:$0xf] %v259_v39  ;;  %262 = vst [vmem:[#allocation2 + $0x1b8] sm:$0xf] %v261_v40  ;;  %v269_v43 = vld [vmem:[%s20272_s5 + $0x1c4] sm:$0xf] }
  0x46   :  { %264 = vst [vmem:[#allocation2 + $0x1bc] sm:$0xff] %v263_v41   ;;  %268 = vst [vmem:[#allocation2 + $0x1c4] sm:$0xf] %v267_v42  ;;  %v271_v44 = vld [vmem:[%s20272_s5 + $0x1e4] sm:$0xf]  ;;  %v295_v56 = vld [vmem:[%s20272_s5 + $0x1fc] sm:$0xff]  }
  0x47   :  { %v273_v45 = vld [vmem:[%s20272_s5 + $0x1c8] sm:$0xf]  ;;  %270 = vst [vmem:[#allocation2 + $0x1c8] sm:$0xf] %v269_v43  ;;  %272 = vst [vmem:[#allocation2 + $0x1cc] sm:$0xf] %v271_v44 }
  0x48   :  { %274 = vst [vmem:[#allocation2 + $0x1d0] sm:$0xf] %v273_v45  ;;  %v275_v46 = vld [vmem:[%s20272_s5 + $0x1e8] sm:$0xf]  ;;  %v277_v47 = vld [vmem:[%s20272_s5 + $0x1cc] sm:$0xf] }
  0x49   :  { %v279_v48 = vld [vmem:[%s20272_s5 + $0x1ec] sm:$0xf]  ;;  %276 = vst [vmem:[#allocation2 + $0x1d4] sm:$0xf] %v275_v46  ;;  %278 = vst [vmem:[#allocation2 + $0x1d8] sm:$0xf] %v277_v47 }
  0x4a   :  { %280 = vst [vmem:[#allocation2 + $0x1dc] sm:$0xf] %v279_v48  ;;  %v281_v49 = vld [vmem:[%s20272_s5 + $0x1d0] sm:$0xf]  ;;  %v285_v51 = vld [vmem:[%s20272_s5 + $0x1d4] sm:$0xf] }
  0x4b   :  { %v283_v50 = vld [vmem:[%s20272_s5 + $0x1f0] sm:$0xf]  ;;  %282 = vst [vmem:[#allocation2 + $0x1e0] sm:$0xf] %v281_v49  ;;  %286 = vst [vmem:[#allocation2 + $0x1e8] sm:$0xf] %v285_v51 }
  0x4c   :  { %284 = vst [vmem:[#allocation2 + $0x1e4] sm:$0xf] %v283_v50  ;;  %v287_v52 = vld [vmem:[%s20272_s5 + $0x1f4] sm:$0xf]  ;;  %v289_v53 = vld [vmem:[%s20272_s5 + $0x1d8] sm:$0xf] }
  0x4d   :  { %v291_v54 = vld [vmem:[%s20272_s5 + $0x1f8] sm:$0xf]  ;;  %288 = vst [vmem:[#allocation2 + $0x1ec] sm:$0xf] %v287_v52  ;;  %290 = vst [vmem:[#allocation2 + $0x1f0] sm:$0xf] %v289_v53 }
  0x4e   :  { %292 = vst [vmem:[#allocation2 + $0x1f4] sm:$0xf] %v291_v54  ;;  %v293_v55 = vld [vmem:[%s20272_s5 + $0x1dc] sm:$0xf]  ;;  %v299_v57 = vld [vmem:[%s20272_s5 + $0x220] sm:$0xf] }
  0x4f   :  { %294 = vst [vmem:[#allocation2 + $0x1f8] sm:$0xf] %v293_v55  ;;  %296 = vst [vmem:[#allocation2 + $0x1fc] sm:$0xff] %v295_v56   ;;  %v301_v58 = vld [vmem:[%s20272_s5 + $0x204] sm:$0xf]  ;;  %v327_v7 = vld [vmem:[%s20272_s5 + $0x23c] sm:$0xff]  }
  0x50   :  { %300 = vst [vmem:[#allocation2 + $0x204] sm:$0xf] %v299_v57  ;;  %v303_v59 = vld [vmem:[%s20272_s5 + $0x224] sm:$0xf]  ;;  %v305_v60 = vld [vmem:[%s20272_s5 + $0x208] sm:$0xf] }
  0x51   :  { %302 = vst [vmem:[#allocation2 + $0x208] sm:$0xf] %v301_v58  ;;  %304 = vst [vmem:[#allocation2 + $0x20c] sm:$0xf] %v303_v59  ;;  %v307_v61 = vld [vmem:[%s20272_s5 + $0x228] sm:$0xf] }
  0x52   :  { %306 = vst [vmem:[#allocation2 + $0x210] sm:$0xf] %v305_v60  ;;  %v309_v62 = vld [vmem:[%s20272_s5 + $0x20c] sm:$0xf]  ;;  %308 = vst [vmem:[#allocation2 + $0x214] sm:$0xf] %v307_v61 }
  0x53   :  { %v311_v63 = vld [vmem:[%s20272_s5 + $0x22c] sm:$0xf]  ;;  %310 = vst [vmem:[#allocation2 + $0x218] sm:$0xf] %v309_v62  ;;  %v313_v0 = vld [vmem:[%s20272_s5 + $0x210] sm:$0xf] }
  0x54   :  { %312 = vst [vmem:[#allocation2 + $0x21c] sm:$0xf] %v311_v63  ;;  %v315_v1 = vld [vmem:[%s20272_s5 + $0x230] sm:$0xf]  ;;  %v317_v2 = vld [vmem:[%s20272_s5 + $0x214] sm:$0xf] }
  0x55   :  { %314 = vst [vmem:[#allocation2 + $0x220] sm:$0xf] %v313_v0  ;;  %316 = vst [vmem:[#allocation2 + $0x224] sm:$0xf] %v315_v1  ;;  %v319_v3 = vld [vmem:[%s20272_s5 + $0x234] sm:$0xf] }
  0x56   :  { %318 = vst [vmem:[#allocation2 + $0x228] sm:$0xf] %v317_v2  ;;  %v321_v4 = vld [vmem:[%s20272_s5 + $0x218] sm:$0xf]  ;;  %320 = vst [vmem:[#allocation2 + $0x22c] sm:$0xf] %v319_v3 }
  0x57   :  { %v323_v5 = vld [vmem:[%s20272_s5 + $0x238] sm:$0xf]  ;;  %322 = vst [vmem:[#allocation2 + $0x230] sm:$0xf] %v321_v4  ;;  %v325_v6 = vld [vmem:[%s20272_s5 + $0x21c] sm:$0xf] }
  0x58   :  { %324 = vst [vmem:[#allocation2 + $0x234] sm:$0xf] %v323_v5  ;;  %v331_v8 = vld [vmem:[%s20272_s5 + $0x260] sm:$0xf]  ;;  %326 = vst [vmem:[#allocation2 + $0x238] sm:$0xf] %v325_v6 }
  0x59   :  { %328 = vst [vmem:[#allocation2 + $0x23c] sm:$0xff] %v327_v7   ;;  %332 = vst [vmem:[#allocation2 + $0x244] sm:$0xf] %v331_v8  ;;  %v333_v9 = vld [vmem:[%s20272_s5 + $0x244] sm:$0xf]  ;;  %v359_v22 = vld [vmem:[%s20272_s5 + $0x27c] sm:$0xff]  }
  0x5a   :  { %v335_v10 = vld [vmem:[%s20272_s5 + $0x264] sm:$0xf]  ;;  %v337_v11 = vld [vmem:[%s20272_s5 + $0x248] sm:$0xf]  ;;  %334 = vst [vmem:[#allocation2 + $0x248] sm:$0xf] %v333_v9 }
  0x5b   :  { %336 = vst [vmem:[#allocation2 + $0x24c] sm:$0xf] %v335_v10  ;;  %338 = vst [vmem:[#allocation2 + $0x250] sm:$0xf] %v337_v11  ;;  %v339_v12 = vld [vmem:[%s20272_s5 + $0x268] sm:$0xf] }
  0x5c   :  { %v341_v13 = vld [vmem:[%s20272_s5 + $0x24c] sm:$0xf]  ;;  %340 = vst [vmem:[#allocation2 + $0x254] sm:$0xf] %v339_v12  ;;  %v345_v15 = vld [vmem:[%s20272_s5 + $0x250] sm:$0xf] }
  0x5d   :  { %v343_v14 = vld [vmem:[%s20272_s5 + $0x26c] sm:$0xf]  ;;  %342 = vst [vmem:[#allocation2 + $0x258] sm:$0xf] %v341_v13  ;;  %v347_v16 = vld [vmem:[%s20272_s5 + $0x270] sm:$0xf] }
  0x5e   :  { %344 = vst [vmem:[#allocation2 + $0x25c] sm:$0xf] %v343_v14  ;;  %v349_v17 = vld [vmem:[%s20272_s5 + $0x254] sm:$0xf]  ;;  %346 = vst [vmem:[#allocation2 + $0x260] sm:$0xf] %v345_v15 }
  0x5f   :  { %348 = vst [vmem:[#allocation2 + $0x264] sm:$0xf] %v347_v16  ;;  %350 = vst [vmem:[#allocation2 + $0x268] sm:$0xf] %v349_v17  ;;  %v351_v18 = vld [vmem:[%s20272_s5 + $0x274] sm:$0xf] }
  0x60   :  { %v353_v19 = vld [vmem:[%s20272_s5 + $0x258] sm:$0xf]  ;;  %352 = vst [vmem:[#allocation2 + $0x26c] sm:$0xf] %v351_v18  ;;  %v357_v21 = vld [vmem:[%s20272_s5 + $0x25c] sm:$0xf] }
  0x61   :  { %v355_v20 = vld [vmem:[%s20272_s5 + $0x278] sm:$0xf]  ;;  %354 = vst [vmem:[#allocation2 + $0x270] sm:$0xf] %v353_v19  ;;  %v363_v23 = vld [vmem:[%s20272_s5 + $0x2a0] sm:$0xf] }
  0x62   :  { %356 = vst [vmem:[#allocation2 + $0x274] sm:$0xf] %v355_v20  ;;  %358 = vst [vmem:[#allocation2 + $0x278] sm:$0xf] %v357_v21  ;;  %v365_v24 = vld [vmem:[%s20272_s5 + $0x284] sm:$0xf] }
  0x63   :  { %360 = vst [vmem:[#allocation2 + $0x27c] sm:$0xff] %v359_v22   ;;  %364 = vst [vmem:[#allocation2 + $0x284] sm:$0xf] %v363_v23  ;;  %v367_v25 = vld [vmem:[%s20272_s5 + $0x2a4] sm:$0xf]  ;;  %v391_v37 = vld [vmem:[%s20272_s5 + $0x2bc] sm:$0xff]  }
  0x64   :  { %v369_v26 = vld [vmem:[%s20272_s5 + $0x288] sm:$0xf]  ;;  %366 = vst [vmem:[#allocation2 + $0x288] sm:$0xf] %v365_v24  ;;  %368 = vst [vmem:[#allocation2 + $0x28c] sm:$0xf] %v367_v25 }
  0x65   :  { %370 = vst [vmem:[#allocation2 + $0x290] sm:$0xf] %v369_v26  ;;  %v371_v27 = vld [vmem:[%s20272_s5 + $0x2a8] sm:$0xf]  ;;  %v373_v28 = vld [vmem:[%s20272_s5 + $0x28c] sm:$0xf] }
  0x66   :  { %v375_v29 = vld [vmem:[%s20272_s5 + $0x2ac] sm:$0xf]  ;;  %372 = vst [vmem:[#allocation2 + $0x294] sm:$0xf] %v371_v27  ;;  %374 = vst [vmem:[#allocation2 + $0x298] sm:$0xf] %v373_v28 }
  0x67   :  { %376 = vst [vmem:[#allocation2 + $0x29c] sm:$0xf] %v375_v29  ;;  %v377_v30 = vld [vmem:[%s20272_s5 + $0x290] sm:$0xf]  ;;  %v381_v32 = vld [vmem:[%s20272_s5 + $0x294] sm:$0xf] }
  0x68   :  { %v379_v31 = vld [vmem:[%s20272_s5 + $0x2b0] sm:$0xf]  ;;  %378 = vst [vmem:[#allocation2 + $0x2a0] sm:$0xf] %v377_v30  ;;  %382 = vst [vmem:[#allocation2 + $0x2a8] sm:$0xf] %v381_v32 }
  0x69   :  { %380 = vst [vmem:[#allocation2 + $0x2a4] sm:$0xf] %v379_v31  ;;  %v383_v33 = vld [vmem:[%s20272_s5 + $0x2b4] sm:$0xf]  ;;  %v385_v34 = vld [vmem:[%s20272_s5 + $0x298] sm:$0xf] }
  0x6a   :  { %v387_v35 = vld [vmem:[%s20272_s5 + $0x2b8] sm:$0xf]  ;;  %384 = vst [vmem:[#allocation2 + $0x2ac] sm:$0xf] %v383_v33  ;;  %386 = vst [vmem:[#allocation2 + $0x2b0] sm:$0xf] %v385_v34 }
  0x6b   :  { %388 = vst [vmem:[#allocation2 + $0x2b4] sm:$0xf] %v387_v35  ;;  %v389_v36 = vld [vmem:[%s20272_s5 + $0x29c] sm:$0xf]  ;;  %v395_v38 = vld [vmem:[%s20272_s5 + $0x2e0] sm:$0xf] }
  0x6c   :  { %390 = vst [vmem:[#allocation2 + $0x2b8] sm:$0xf] %v389_v36  ;;  %392 = vst [vmem:[#allocation2 + $0x2bc] sm:$0xff] %v391_v37   ;;  %v397_v39 = vld [vmem:[%s20272_s5 + $0x2c4] sm:$0xf]  ;;  %v423_v52 = vld [vmem:[%s20272_s5 + $0x2fc] sm:$0xff]  }
  0x6d   :  { %396 = vst [vmem:[#allocation2 + $0x2c4] sm:$0xf] %v395_v38  ;;  %v399_v40 = vld [vmem:[%s20272_s5 + $0x2e4] sm:$0xf]  ;;  %v401_v41 = vld [vmem:[%s20272_s5 + $0x2c8] sm:$0xf] }
  0x6e   :  { %398 = vst [vmem:[#allocation2 + $0x2c8] sm:$0xf] %v397_v39  ;;  %400 = vst [vmem:[#allocation2 + $0x2cc] sm:$0xf] %v399_v40  ;;  %v403_v42 = vld [vmem:[%s20272_s5 + $0x2e8] sm:$0xf] }
  0x6f   :  { %402 = vst [vmem:[#allocation2 + $0x2d0] sm:$0xf] %v401_v41  ;;  %v405_v43 = vld [vmem:[%s20272_s5 + $0x2cc] sm:$0xf]  ;;  %404 = vst [vmem:[#allocation2 + $0x2d4] sm:$0xf] %v403_v42 }
  0x70   :  { %v407_v44 = vld [vmem:[%s20272_s5 + $0x2ec] sm:$0xf]  ;;  %406 = vst [vmem:[#allocation2 + $0x2d8] sm:$0xf] %v405_v43  ;;  %v409_v45 = vld [vmem:[%s20272_s5 + $0x2d0] sm:$0xf] }
  0x71   :  { %408 = vst [vmem:[#allocation2 + $0x2dc] sm:$0xf] %v407_v44  ;;  %v411_v46 = vld [vmem:[%s20272_s5 + $0x2f0] sm:$0xf]  ;;  %v413_v47 = vld [vmem:[%s20272_s5 + $0x2d4] sm:$0xf] }
  0x72   :  { %410 = vst [vmem:[#allocation2 + $0x2e0] sm:$0xf] %v409_v45  ;;  %412 = vst [vmem:[#allocation2 + $0x2e4] sm:$0xf] %v411_v46  ;;  %v415_v48 = vld [vmem:[%s20272_s5 + $0x2f4] sm:$0xf] }
  0x73   :  { %414 = vst [vmem:[#allocation2 + $0x2e8] sm:$0xf] %v413_v47  ;;  %v417_v49 = vld [vmem:[%s20272_s5 + $0x2d8] sm:$0xf]  ;;  %416 = vst [vmem:[#allocation2 + $0x2ec] sm:$0xf] %v415_v48 }
  0x74   :  { %v419_v50 = vld [vmem:[%s20272_s5 + $0x2f8] sm:$0xf]  ;;  %418 = vst [vmem:[#allocation2 + $0x2f0] sm:$0xf] %v417_v49  ;;  %v421_v51 = vld [vmem:[%s20272_s5 + $0x2dc] sm:$0xf] }
  0x75   :  { %420 = vst [vmem:[#allocation2 + $0x2f4] sm:$0xf] %v419_v50  ;;  %v427_v53 = vld [vmem:[%s20272_s5 + $0x320] sm:$0xf]  ;;  %422 = vst [vmem:[#allocation2 + $0x2f8] sm:$0xf] %v421_v51 }
  0x76   :  { %424 = vst [vmem:[#allocation2 + $0x2fc] sm:$0xff] %v423_v52   ;;  %428 = vst [vmem:[#allocation2 + $0x304] sm:$0xf] %v427_v53  ;;  %v429_v54 = vld [vmem:[%s20272_s5 + $0x304] sm:$0xf]  ;;  %v455_v3 = vld [vmem:[%s20272_s5 + $0x33c] sm:$0xff]  }
  0x77   :  { %v431_v55 = vld [vmem:[%s20272_s5 + $0x324] sm:$0xf]  ;;  %v433_v56 = vld [vmem:[%s20272_s5 + $0x308] sm:$0xf]  ;;  %430 = vst [vmem:[#allocation2 + $0x308] sm:$0xf] %v429_v54 }
  0x78   :  { %432 = vst [vmem:[#allocation2 + $0x30c] sm:$0xf] %v431_v55  ;;  %434 = vst [vmem:[#allocation2 + $0x310] sm:$0xf] %v433_v56  ;;  %v435_v57 = vld [vmem:[%s20272_s5 + $0x328] sm:$0xf] }
  0x79   :  { %v437_v58 = vld [vmem:[%s20272_s5 + $0x30c] sm:$0xf]  ;;  %436 = vst [vmem:[#allocation2 + $0x314] sm:$0xf] %v435_v57  ;;  %v441_v60 = vld [vmem:[%s20272_s5 + $0x310] sm:$0xf] }
  0x7a   :  { %v439_v59 = vld [vmem:[%s20272_s5 + $0x32c] sm:$0xf]  ;;  %438 = vst [vmem:[#allocation2 + $0x318] sm:$0xf] %v437_v58  ;;  %v443_v61 = vld [vmem:[%s20272_s5 + $0x330] sm:$0xf] }
  0x7b   :  { %440 = vst [vmem:[#allocation2 + $0x31c] sm:$0xf] %v439_v59  ;;  %v445_v62 = vld [vmem:[%s20272_s5 + $0x314] sm:$0xf]  ;;  %442 = vst [vmem:[#allocation2 + $0x320] sm:$0xf] %v441_v60 }
  0x7c   :  { %444 = vst [vmem:[#allocation2 + $0x324] sm:$0xf] %v443_v61  ;;  %446 = vst [vmem:[#allocation2 + $0x328] sm:$0xf] %v445_v62  ;;  %v447_v63 = vld [vmem:[%s20272_s5 + $0x334] sm:$0xf] }
  0x7d   :  { %v449_v0 = vld [vmem:[%s20272_s5 + $0x318] sm:$0xf]  ;;  %448 = vst [vmem:[#allocation2 + $0x32c] sm:$0xf] %v447_v63  ;;  %v453_v2 = vld [vmem:[%s20272_s5 + $0x31c] sm:$0xf] }
  0x7e   :  { %v451_v1 = vld [vmem:[%s20272_s5 + $0x338] sm:$0xf]  ;;  %450 = vst [vmem:[#allocation2 + $0x330] sm:$0xf] %v449_v0  ;;  %v459_v4 = vld [vmem:[%s20272_s5 + $0x360] sm:$0xf] }
  0x7f   :  { %452 = vst [vmem:[#allocation2 + $0x334] sm:$0xf] %v451_v1  ;;  %454 = vst [vmem:[#allocation2 + $0x338] sm:$0xf] %v453_v2  ;;  %v461_v5 = vld [vmem:[%s20272_s5 + $0x344] sm:$0xf] }
  0x80   :  { %456 = vst [vmem:[#allocation2 + $0x33c] sm:$0xff] %v455_v3   ;;  %460 = vst [vmem:[#allocation2 + $0x344] sm:$0xf] %v459_v4  ;;  %v463_v6 = vld [vmem:[%s20272_s5 + $0x364] sm:$0xf]  ;;  %v487_v18 = vld [vmem:[%s20272_s5 + $0x37c] sm:$0xff]  }
  0x81   :  { %v465_v7 = vld [vmem:[%s20272_s5 + $0x348] sm:$0xf]  ;;  %462 = vst [vmem:[#allocation2 + $0x348] sm:$0xf] %v461_v5  ;;  %464 = vst [vmem:[#allocation2 + $0x34c] sm:$0xf] %v463_v6 }
  0x82   :  { %466 = vst [vmem:[#allocation2 + $0x350] sm:$0xf] %v465_v7  ;;  %v467_v8 = vld [vmem:[%s20272_s5 + $0x368] sm:$0xf]  ;;  %v469_v9 = vld [vmem:[%s20272_s5 + $0x34c] sm:$0xf] }
  0x83   :  { %v471_v10 = vld [vmem:[%s20272_s5 + $0x36c] sm:$0xf]  ;;  %468 = vst [vmem:[#allocation2 + $0x354] sm:$0xf] %v467_v8  ;;  %470 = vst [vmem:[#allocation2 + $0x358] sm:$0xf] %v469_v9 }
  0x84   :  { %472 = vst [vmem:[#allocation2 + $0x35c] sm:$0xf] %v471_v10  ;;  %v473_v11 = vld [vmem:[%s20272_s5 + $0x350] sm:$0xf]  ;;  %v477_v13 = vld [vmem:[%s20272_s5 + $0x354] sm:$0xf] }
  0x85   :  { %v475_v12 = vld [vmem:[%s20272_s5 + $0x370] sm:$0xf]  ;;  %474 = vst [vmem:[#allocation2 + $0x360] sm:$0xf] %v473_v11  ;;  %478 = vst [vmem:[#allocation2 + $0x368] sm:$0xf] %v477_v13 }
  0x86   :  { %476 = vst [vmem:[#allocation2 + $0x364] sm:$0xf] %v475_v12  ;;  %v479_v14 = vld [vmem:[%s20272_s5 + $0x374] sm:$0xf]  ;;  %v481_v15 = vld [vmem:[%s20272_s5 + $0x358] sm:$0xf] }
  0x87   :  { %v483_v16 = vld [vmem:[%s20272_s5 + $0x378] sm:$0xf]  ;;  %480 = vst [vmem:[#allocation2 + $0x36c] sm:$0xf] %v479_v14  ;;  %482 = vst [vmem:[#allocation2 + $0x370] sm:$0xf] %v481_v15 }
  0x88   :  { %484 = vst [vmem:[#allocation2 + $0x374] sm:$0xf] %v483_v16  ;;  %v485_v17 = vld [vmem:[%s20272_s5 + $0x35c] sm:$0xf]  ;;  %v491_v19 = vld [vmem:[%s20272_s5 + $0x3a0] sm:$0xf] }
  0x89   :  { %486 = vst [vmem:[#allocation2 + $0x378] sm:$0xf] %v485_v17  ;;  %488 = vst [vmem:[#allocation2 + $0x37c] sm:$0xff] %v487_v18   ;;  %v493_v20 = vld [vmem:[%s20272_s5 + $0x384] sm:$0xf]  ;;  %v519_v33 = vld [vmem:[%s20272_s5 + $0x3bc] sm:$0xff]  }
  0x8a   :  { %492 = vst [vmem:[#allocation2 + $0x384] sm:$0xf] %v491_v19  ;;  %v495_v21 = vld [vmem:[%s20272_s5 + $0x3a4] sm:$0xf]  ;;  %v497_v22 = vld [vmem:[%s20272_s5 + $0x388] sm:$0xf] }
  0x8b   :  { %494 = vst [vmem:[#allocation2 + $0x388] sm:$0xf] %v493_v20  ;;  %496 = vst [vmem:[#allocation2 + $0x38c] sm:$0xf] %v495_v21  ;;  %v499_v23 = vld [vmem:[%s20272_s5 + $0x3a8] sm:$0xf] }
  0x8c   :  { %498 = vst [vmem:[#allocation2 + $0x390] sm:$0xf] %v497_v22  ;;  %v501_v24 = vld [vmem:[%s20272_s5 + $0x38c] sm:$0xf]  ;;  %500 = vst [vmem:[#allocation2 + $0x394] sm:$0xf] %v499_v23 }
  0x8d   :  { %v503_v25 = vld [vmem:[%s20272_s5 + $0x3ac] sm:$0xf]  ;;  %502 = vst [vmem:[#allocation2 + $0x398] sm:$0xf] %v501_v24  ;;  %v505_v26 = vld [vmem:[%s20272_s5 + $0x390] sm:$0xf] }
  0x8e   :  { %504 = vst [vmem:[#allocation2 + $0x39c] sm:$0xf] %v503_v25  ;;  %v507_v27 = vld [vmem:[%s20272_s5 + $0x3b0] sm:$0xf]  ;;  %v509_v28 = vld [vmem:[%s20272_s5 + $0x394] sm:$0xf] }
  0x8f   :  { %506 = vst [vmem:[#allocation2 + $0x3a0] sm:$0xf] %v505_v26  ;;  %508 = vst [vmem:[#allocation2 + $0x3a4] sm:$0xf] %v507_v27  ;;  %v511_v29 = vld [vmem:[%s20272_s5 + $0x3b4] sm:$0xf] }
  0x90   :  { %510 = vst [vmem:[#allocation2 + $0x3a8] sm:$0xf] %v509_v28  ;;  %v513_v30 = vld [vmem:[%s20272_s5 + $0x398] sm:$0xf]  ;;  %512 = vst [vmem:[#allocation2 + $0x3ac] sm:$0xf] %v511_v29 }
  0x91   :  { %v515_v31 = vld [vmem:[%s20272_s5 + $0x3b8] sm:$0xf]  ;;  %514 = vst [vmem:[#allocation2 + $0x3b0] sm:$0xf] %v513_v30  ;;  %v517_v32 = vld [vmem:[%s20272_s5 + $0x39c] sm:$0xf] }
  0x92   :  { %516 = vst [vmem:[#allocation2 + $0x3b4] sm:$0xf] %v515_v31  ;;  %v523_v34 = vld [vmem:[%s20272_s5 + $0x3e0] sm:$0xf]  ;;  %518 = vst [vmem:[#allocation2 + $0x3b8] sm:$0xf] %v517_v32 }
  0x93   :  { %520 = vst [vmem:[#allocation2 + $0x3bc] sm:$0xff] %v519_v33   ;;  %524 = vst [vmem:[#allocation2 + $0x3c4] sm:$0xf] %v523_v34  ;;  %v525_v35 = vld [vmem:[%s20272_s5 + $0x3c4] sm:$0xf]  ;;  %v551_v48 = vld [vmem:[%s20272_s5 + $0x3fc] sm:$0xff]  }
  0x94   :  { %v527_v36 = vld [vmem:[%s20272_s5 + $0x3e4] sm:$0xf]  ;;  %v529_v37 = vld [vmem:[%s20272_s5 + $0x3c8] sm:$0xf]  ;;  %526 = vst [vmem:[#allocation2 + $0x3c8] sm:$0xf] %v525_v35 }
  0x95   :  { %528 = vst [vmem:[#allocation2 + $0x3cc] sm:$0xf] %v527_v36  ;;  %530 = vst [vmem:[#allocation2 + $0x3d0] sm:$0xf] %v529_v37  ;;  %v531_v38 = vld [vmem:[%s20272_s5 + $0x3e8] sm:$0xf] }
  0x96   :  { %v533_v39 = vld [vmem:[%s20272_s5 + $0x3cc] sm:$0xf]  ;;  %532 = vst [vmem:[#allocation2 + $0x3d4] sm:$0xf] %v531_v38  ;;  %v537_v41 = vld [vmem:[%s20272_s5 + $0x3d0] sm:$0xf] }
  0x97   :  { %v535_v40 = vld [vmem:[%s20272_s5 + $0x3ec] sm:$0xf]  ;;  %534 = vst [vmem:[#allocation2 + $0x3d8] sm:$0xf] %v533_v39  ;;  %v539_v42 = vld [vmem:[%s20272_s5 + $0x3f0] sm:$0xf] }
  0x98   :  { %536 = vst [vmem:[#allocation2 + $0x3dc] sm:$0xf] %v535_v40  ;;  %v541_v43 = vld [vmem:[%s20272_s5 + $0x3d4] sm:$0xf]  ;;  %538 = vst [vmem:[#allocation2 + $0x3e0] sm:$0xf] %v537_v41 }
  0x99   :  { %540 = vst [vmem:[#allocation2 + $0x3e4] sm:$0xf] %v539_v42  ;;  %542 = vst [vmem:[#allocation2 + $0x3e8] sm:$0xf] %v541_v43  ;;  %v543_v44 = vld [vmem:[%s20272_s5 + $0x3f4] sm:$0xf] }
  0x9a   :  { %v545_v45 = vld [vmem:[%s20272_s5 + $0x3d8] sm:$0xf]  ;;  %544 = vst [vmem:[#allocation2 + $0x3ec] sm:$0xf] %v543_v44  ;;  %v549_v47 = vld [vmem:[%s20272_s5 + $0x3dc] sm:$0xf] }
  0x9b   :  { %v547_v46 = vld [vmem:[%s20272_s5 + $0x3f8] sm:$0xf]  ;;  %546 = vst [vmem:[#allocation2 + $0x3f0] sm:$0xf] %v545_v45  ;;  %v555_v49 = vld [vmem:[%s20272_s5 + $0x420] sm:$0xf] }
  0x9c   :  { %548 = vst [vmem:[#allocation2 + $0x3f4] sm:$0xf] %v547_v46  ;;  %550 = vst [vmem:[#allocation2 + $0x3f8] sm:$0xf] %v549_v47  ;;  %v557_v50 = vld [vmem:[%s20272_s5 + $0x404] sm:$0xf] }
  0x9d   :  { %552 = vst [vmem:[#allocation2 + $0x3fc] sm:$0xff] %v551_v48   ;;  %556 = vst [vmem:[#allocation2 + $0x404] sm:$0xf] %v555_v49  ;;  %v559_v51 = vld [vmem:[%s20272_s5 + $0x424] sm:$0xf]  ;;  %v583_v63 = vld [vmem:[%s20272_s5 + $0x43c] sm:$0xff]  }
  0x9e   :  { %v561_v52 = vld [vmem:[%s20272_s5 + $0x408] sm:$0xf]  ;;  %558 = vst [vmem:[#allocation2 + $0x408] sm:$0xf] %v557_v50  ;;  %560 = vst [vmem:[#allocation2 + $0x40c] sm:$0xf] %v559_v51 }
  0x9f   :  { %562 = vst [vmem:[#allocation2 + $0x410] sm:$0xf] %v561_v52  ;;  %v563_v53 = vld [vmem:[%s20272_s5 + $0x428] sm:$0xf]  ;;  %v565_v54 = vld [vmem:[%s20272_s5 + $0x40c] sm:$0xf] }
  0xa0   :  { %v567_v55 = vld [vmem:[%s20272_s5 + $0x42c] sm:$0xf]  ;;  %564 = vst [vmem:[#allocation2 + $0x414] sm:$0xf] %v563_v53  ;;  %566 = vst [vmem:[#allocation2 + $0x418] sm:$0xf] %v565_v54 }
  0xa1   :  { %568 = vst [vmem:[#allocation2 + $0x41c] sm:$0xf] %v567_v55  ;;  %v569_v56 = vld [vmem:[%s20272_s5 + $0x410] sm:$0xf]  ;;  %v573_v58 = vld [vmem:[%s20272_s5 + $0x414] sm:$0xf] }
  0xa2   :  { %v571_v57 = vld [vmem:[%s20272_s5 + $0x430] sm:$0xf]  ;;  %570 = vst [vmem:[#allocation2 + $0x420] sm:$0xf] %v569_v56  ;;  %574 = vst [vmem:[#allocation2 + $0x428] sm:$0xf] %v573_v58 }
  0xa3   :  { %572 = vst [vmem:[#allocation2 + $0x424] sm:$0xf] %v571_v57  ;;  %v575_v59 = vld [vmem:[%s20272_s5 + $0x434] sm:$0xf]  ;;  %v577_v60 = vld [vmem:[%s20272_s5 + $0x418] sm:$0xf] }
  0xa4   :  { %v579_v61 = vld [vmem:[%s20272_s5 + $0x438] sm:$0xf]  ;;  %576 = vst [vmem:[#allocation2 + $0x42c] sm:$0xf] %v575_v59  ;;  %578 = vst [vmem:[#allocation2 + $0x430] sm:$0xf] %v577_v60 }
  0xa5   :  { %580 = vst [vmem:[#allocation2 + $0x434] sm:$0xf] %v579_v61  ;;  %v581_v62 = vld [vmem:[%s20272_s5 + $0x41c] sm:$0xf]  ;;  %v587_v0 = vld [vmem:[%s20272_s5 + $0x460] sm:$0xf] }
  0xa6   :  { %582 = vst [vmem:[#allocation2 + $0x438] sm:$0xf] %v581_v62  ;;  %584 = vst [vmem:[#allocation2 + $0x43c] sm:$0xff] %v583_v63   ;;  %v589_v1 = vld [vmem:[%s20272_s5 + $0x444] sm:$0xf]  ;;  %v615_v14 = vld [vmem:[%s20272_s5 + $0x47c] sm:$0xff]  }
  0xa7   :  { %588 = vst [vmem:[#allocation2 + $0x444] sm:$0xf] %v587_v0  ;;  %v591_v2 = vld [vmem:[%s20272_s5 + $0x464] sm:$0xf]  ;;  %v593_v3 = vld [vmem:[%s20272_s5 + $0x448] sm:$0xf] }
  0xa8   :  { %590 = vst [vmem:[#allocation2 + $0x448] sm:$0xf] %v589_v1  ;;  %592 = vst [vmem:[#allocation2 + $0x44c] sm:$0xf] %v591_v2  ;;  %v595_v4 = vld [vmem:[%s20272_s5 + $0x468] sm:$0xf] }
  0xa9   :  { %594 = vst [vmem:[#allocation2 + $0x450] sm:$0xf] %v593_v3  ;;  %v597_v5 = vld [vmem:[%s20272_s5 + $0x44c] sm:$0xf]  ;;  %596 = vst [vmem:[#allocation2 + $0x454] sm:$0xf] %v595_v4 }
  0xaa   :  { %v599_v6 = vld [vmem:[%s20272_s5 + $0x46c] sm:$0xf]  ;;  %598 = vst [vmem:[#allocation2 + $0x458] sm:$0xf] %v597_v5  ;;  %v601_v7 = vld [vmem:[%s20272_s5 + $0x450] sm:$0xf] }
  0xab   :  { %600 = vst [vmem:[#allocation2 + $0x45c] sm:$0xf] %v599_v6  ;;  %v603_v8 = vld [vmem:[%s20272_s5 + $0x470] sm:$0xf]  ;;  %v605_v9 = vld [vmem:[%s20272_s5 + $0x454] sm:$0xf] }
  0xac   :  { %602 = vst [vmem:[#allocation2 + $0x460] sm:$0xf] %v601_v7  ;;  %604 = vst [vmem:[#allocation2 + $0x464] sm:$0xf] %v603_v8  ;;  %v607_v10 = vld [vmem:[%s20272_s5 + $0x474] sm:$0xf] }
  0xad   :  { %606 = vst [vmem:[#allocation2 + $0x468] sm:$0xf] %v605_v9  ;;  %v609_v11 = vld [vmem:[%s20272_s5 + $0x458] sm:$0xf]  ;;  %608 = vst [vmem:[#allocation2 + $0x46c] sm:$0xf] %v607_v10 }
  0xae   :  { %v611_v12 = vld [vmem:[%s20272_s5 + $0x478] sm:$0xf]  ;;  %610 = vst [vmem:[#allocation2 + $0x470] sm:$0xf] %v609_v11  ;;  %v613_v13 = vld [vmem:[%s20272_s5 + $0x45c] sm:$0xf] }
  0xaf   :  { %612 = vst [vmem:[#allocation2 + $0x474] sm:$0xf] %v611_v12  ;;  %v619_v15 = vld [vmem:[%s20272_s5 + $0x4a0] sm:$0xf]  ;;  %614 = vst [vmem:[#allocation2 + $0x478] sm:$0xf] %v613_v13 }
  0xb0   :  { %616 = vst [vmem:[#allocation2 + $0x47c] sm:$0xff] %v615_v14   ;;  %620 = vst [vmem:[#allocation2 + $0x484] sm:$0xf] %v619_v15  ;;  %v621_v16 = vld [vmem:[%s20272_s5 + $0x484] sm:$0xf]  ;;  %v647_v29 = vld [vmem:[%s20272_s5 + $0x4bc] sm:$0xff]  }
  0xb1   :  { %v623_v17 = vld [vmem:[%s20272_s5 + $0x4a4] sm:$0xf]  ;;  %v625_v18 = vld [vmem:[%s20272_s5 + $0x488] sm:$0xf]  ;;  %622 = vst [vmem:[#allocation2 + $0x488] sm:$0xf] %v621_v16 }
  0xb2   :  { %624 = vst [vmem:[#allocation2 + $0x48c] sm:$0xf] %v623_v17  ;;  %626 = vst [vmem:[#allocation2 + $0x490] sm:$0xf] %v625_v18  ;;  %v627_v19 = vld [vmem:[%s20272_s5 + $0x4a8] sm:$0xf] }
  0xb3   :  { %v629_v20 = vld [vmem:[%s20272_s5 + $0x48c] sm:$0xf]  ;;  %628 = vst [vmem:[#allocation2 + $0x494] sm:$0xf] %v627_v19  ;;  %v633_v22 = vld [vmem:[%s20272_s5 + $0x490] sm:$0xf] }
  0xb4   :  { %v631_v21 = vld [vmem:[%s20272_s5 + $0x4ac] sm:$0xf]  ;;  %630 = vst [vmem:[#allocation2 + $0x498] sm:$0xf] %v629_v20  ;;  %v635_v23 = vld [vmem:[%s20272_s5 + $0x4b0] sm:$0xf] }
  0xb5   :  { %632 = vst [vmem:[#allocation2 + $0x49c] sm:$0xf] %v631_v21  ;;  %v637_v24 = vld [vmem:[%s20272_s5 + $0x494] sm:$0xf]  ;;  %634 = vst [vmem:[#allocation2 + $0x4a0] sm:$0xf] %v633_v22 }
  0xb6   :  { %636 = vst [vmem:[#allocation2 + $0x4a4] sm:$0xf] %v635_v23  ;;  %638 = vst [vmem:[#allocation2 + $0x4a8] sm:$0xf] %v637_v24  ;;  %v639_v25 = vld [vmem:[%s20272_s5 + $0x4b4] sm:$0xf] }
  0xb7   :  { %v641_v26 = vld [vmem:[%s20272_s5 + $0x498] sm:$0xf]  ;;  %640 = vst [vmem:[#allocation2 + $0x4ac] sm:$0xf] %v639_v25  ;;  %v645_v28 = vld [vmem:[%s20272_s5 + $0x49c] sm:$0xf] }
  0xb8   :  { %v643_v27 = vld [vmem:[%s20272_s5 + $0x4b8] sm:$0xf]  ;;  %642 = vst [vmem:[#allocation2 + $0x4b0] sm:$0xf] %v641_v26  ;;  %v651_v30 = vld [vmem:[%s20272_s5 + $0x4e0] sm:$0xf] }
  0xb9   :  { %644 = vst [vmem:[#allocation2 + $0x4b4] sm:$0xf] %v643_v27  ;;  %646 = vst [vmem:[#allocation2 + $0x4b8] sm:$0xf] %v645_v28  ;;  %v653_v31 = vld [vmem:[%s20272_s5 + $0x4c4] sm:$0xf] }
  0xba   :  { %648 = vst [vmem:[#allocation2 + $0x4bc] sm:$0xff] %v647_v29   ;;  %652 = vst [vmem:[#allocation2 + $0x4c4] sm:$0xf] %v651_v30  ;;  %v655_v32 = vld [vmem:[%s20272_s5 + $0x4e4] sm:$0xf]  ;;  %v679_v44 = vld [vmem:[%s20272_s5 + $0x4fc] sm:$0xff]  }
  0xbb   :  { %v657_v33 = vld [vmem:[%s20272_s5 + $0x4c8] sm:$0xf]  ;;  %654 = vst [vmem:[#allocation2 + $0x4c8] sm:$0xf] %v653_v31  ;;  %656 = vst [vmem:[#allocation2 + $0x4cc] sm:$0xf] %v655_v32 }
  0xbc   :  { %658 = vst [vmem:[#allocation2 + $0x4d0] sm:$0xf] %v657_v33  ;;  %v659_v34 = vld [vmem:[%s20272_s5 + $0x4e8] sm:$0xf]  ;;  %v661_v35 = vld [vmem:[%s20272_s5 + $0x4cc] sm:$0xf] }
  0xbd   :  { %v663_v36 = vld [vmem:[%s20272_s5 + $0x4ec] sm:$0xf]  ;;  %660 = vst [vmem:[#allocation2 + $0x4d4] sm:$0xf] %v659_v34  ;;  %662 = vst [vmem:[#allocation2 + $0x4d8] sm:$0xf] %v661_v35 }
  0xbe   :  { %664 = vst [vmem:[#allocation2 + $0x4dc] sm:$0xf] %v663_v36  ;;  %v665_v37 = vld [vmem:[%s20272_s5 + $0x4d0] sm:$0xf]  ;;  %v669_v39 = vld [vmem:[%s20272_s5 + $0x4d4] sm:$0xf] }
  0xbf   :  { %v667_v38 = vld [vmem:[%s20272_s5 + $0x4f0] sm:$0xf]  ;;  %666 = vst [vmem:[#allocation2 + $0x4e0] sm:$0xf] %v665_v37  ;;  %670 = vst [vmem:[#allocation2 + $0x4e8] sm:$0xf] %v669_v39 }
  0xc0   :  { %668 = vst [vmem:[#allocation2 + $0x4e4] sm:$0xf] %v667_v38  ;;  %v671_v40 = vld [vmem:[%s20272_s5 + $0x4f4] sm:$0xf]  ;;  %v673_v41 = vld [vmem:[%s20272_s5 + $0x4d8] sm:$0xf] }
  0xc1   :  { %v675_v42 = vld [vmem:[%s20272_s5 + $0x4f8] sm:$0xf]  ;;  %672 = vst [vmem:[#allocation2 + $0x4ec] sm:$0xf] %v671_v40  ;;  %674 = vst [vmem:[#allocation2 + $0x4f0] sm:$0xf] %v673_v41 }
  0xc2   :  { %676 = vst [vmem:[#allocation2 + $0x4f4] sm:$0xf] %v675_v42  ;;  %v677_v43 = vld [vmem:[%s20272_s5 + $0x4dc] sm:$0xf]  ;;  %v683_v45 = vld [vmem:[%s20272_s5 + $0x520] sm:$0xf] }
  0xc3   :  { %678 = vst [vmem:[#allocation2 + $0x4f8] sm:$0xf] %v677_v43  ;;  %680 = vst [vmem:[#allocation2 + $0x4fc] sm:$0xff] %v679_v44   ;;  %v685_v46 = vld [vmem:[%s20272_s5 + $0x504] sm:$0xf]  ;;  %v711_v59 = vld [vmem:[%s20272_s5 + $0x53c] sm:$0xff]  }
  0xc4   :  { %684 = vst [vmem:[#allocation2 + $0x504] sm:$0xf] %v683_v45  ;;  %v687_v47 = vld [vmem:[%s20272_s5 + $0x524] sm:$0xf]  ;;  %v689_v48 = vld [vmem:[%s20272_s5 + $0x508] sm:$0xf] }
  0xc5   :  { %686 = vst [vmem:[#allocation2 + $0x508] sm:$0xf] %v685_v46  ;;  %688 = vst [vmem:[#allocation2 + $0x50c] sm:$0xf] %v687_v47  ;;  %v691_v49 = vld [vmem:[%s20272_s5 + $0x528] sm:$0xf] }
  0xc6   :  { %690 = vst [vmem:[#allocation2 + $0x510] sm:$0xf] %v689_v48  ;;  %v693_v50 = vld [vmem:[%s20272_s5 + $0x50c] sm:$0xf]  ;;  %692 = vst [vmem:[#allocation2 + $0x514] sm:$0xf] %v691_v49 }
  0xc7   :  { %v695_v51 = vld [vmem:[%s20272_s5 + $0x52c] sm:$0xf]  ;;  %694 = vst [vmem:[#allocation2 + $0x518] sm:$0xf] %v693_v50  ;;  %v697_v52 = vld [vmem:[%s20272_s5 + $0x510] sm:$0xf] }
  0xc8   :  { %696 = vst [vmem:[#allocation2 + $0x51c] sm:$0xf] %v695_v51  ;;  %v699_v53 = vld [vmem:[%s20272_s5 + $0x530] sm:$0xf]  ;;  %v701_v54 = vld [vmem:[%s20272_s5 + $0x514] sm:$0xf] }
  0xc9   :  { %698 = vst [vmem:[#allocation2 + $0x520] sm:$0xf] %v697_v52  ;;  %700 = vst [vmem:[#allocation2 + $0x524] sm:$0xf] %v699_v53  ;;  %v703_v55 = vld [vmem:[%s20272_s5 + $0x534] sm:$0xf] }
  0xca   :  { %702 = vst [vmem:[#allocation2 + $0x528] sm:$0xf] %v701_v54  ;;  %v705_v56 = vld [vmem:[%s20272_s5 + $0x518] sm:$0xf]  ;;  %704 = vst [vmem:[#allocation2 + $0x52c] sm:$0xf] %v703_v55 }
  0xcb   :  { %v707_v57 = vld [vmem:[%s20272_s5 + $0x538] sm:$0xf]  ;;  %706 = vst [vmem:[#allocation2 + $0x530] sm:$0xf] %v705_v56  ;;  %v709_v58 = vld [vmem:[%s20272_s5 + $0x51c] sm:$0xf] }
  0xcc   :  { %708 = vst [vmem:[#allocation2 + $0x534] sm:$0xf] %v707_v57  ;;  %v715_v60 = vld [vmem:[%s20272_s5 + $0x560] sm:$0xf]  ;;  %710 = vst [vmem:[#allocation2 + $0x538] sm:$0xf] %v709_v58 }
  0xcd   :  { %712 = vst [vmem:[#allocation2 + $0x53c] sm:$0xff] %v711_v59   ;;  %716 = vst [vmem:[#allocation2 + $0x544] sm:$0xf] %v715_v60  ;;  %v717_v61 = vld [vmem:[%s20272_s5 + $0x544] sm:$0xf]  ;;  %v743_v10 = vld [vmem:[%s20272_s5 + $0x57c] sm:$0xff]  }
  0xce   :  { %v719_v62 = vld [vmem:[%s20272_s5 + $0x564] sm:$0xf]  ;;  %v721_v63 = vld [vmem:[%s20272_s5 + $0x548] sm:$0xf]  ;;  %718 = vst [vmem:[#allocation2 + $0x548] sm:$0xf] %v717_v61 }
  0xcf   :  { %720 = vst [vmem:[#allocation2 + $0x54c] sm:$0xf] %v719_v62  ;;  %722 = vst [vmem:[#allocation2 + $0x550] sm:$0xf] %v721_v63  ;;  %v723_v0 = vld [vmem:[%s20272_s5 + $0x568] sm:$0xf] }
  0xd0   :  { %v725_v1 = vld [vmem:[%s20272_s5 + $0x54c] sm:$0xf]  ;;  %724 = vst [vmem:[#allocation2 + $0x554] sm:$0xf] %v723_v0  ;;  %v729_v3 = vld [vmem:[%s20272_s5 + $0x550] sm:$0xf] }
  0xd1   :  { %v727_v2 = vld [vmem:[%s20272_s5 + $0x56c] sm:$0xf]  ;;  %726 = vst [vmem:[#allocation2 + $0x558] sm:$0xf] %v725_v1  ;;  %v731_v4 = vld [vmem:[%s20272_s5 + $0x570] sm:$0xf] }
  0xd2   :  { %728 = vst [vmem:[#allocation2 + $0x55c] sm:$0xf] %v727_v2  ;;  %v733_v5 = vld [vmem:[%s20272_s5 + $0x554] sm:$0xf]  ;;  %730 = vst [vmem:[#allocation2 + $0x560] sm:$0xf] %v729_v3 }
  0xd3   :  { %732 = vst [vmem:[#allocation2 + $0x564] sm:$0xf] %v731_v4  ;;  %734 = vst [vmem:[#allocation2 + $0x568] sm:$0xf] %v733_v5  ;;  %v735_v6 = vld [vmem:[%s20272_s5 + $0x574] sm:$0xf] }
  0xd4   :  { %v737_v7 = vld [vmem:[%s20272_s5 + $0x558] sm:$0xf]  ;;  %736 = vst [vmem:[#allocation2 + $0x56c] sm:$0xf] %v735_v6  ;;  %v741_v9 = vld [vmem:[%s20272_s5 + $0x55c] sm:$0xf] }
  0xd5   :  { %v739_v8 = vld [vmem:[%s20272_s5 + $0x578] sm:$0xf]  ;;  %738 = vst [vmem:[#allocation2 + $0x570] sm:$0xf] %v737_v7  ;;  %v747_v11 = vld [vmem:[%s20272_s5 + $0x5a0] sm:$0xf] }
  0xd6   :  { %740 = vst [vmem:[#allocation2 + $0x574] sm:$0xf] %v739_v8  ;;  %742 = vst [vmem:[#allocation2 + $0x578] sm:$0xf] %v741_v9  ;;  %v749_v12 = vld [vmem:[%s20272_s5 + $0x584] sm:$0xf] }
  0xd7   :  { %744 = vst [vmem:[#allocation2 + $0x57c] sm:$0xff] %v743_v10   ;;  %748 = vst [vmem:[#allocation2 + $0x584] sm:$0xf] %v747_v11  ;;  %v751_v13 = vld [vmem:[%s20272_s5 + $0x5a4] sm:$0xf]  ;;  %v775_v25 = vld [vmem:[%s20272_s5 + $0x5bc] sm:$0xff]  }
  0xd8   :  { %v753_v14 = vld [vmem:[%s20272_s5 + $0x588] sm:$0xf]  ;;  %750 = vst [vmem:[#allocation2 + $0x588] sm:$0xf] %v749_v12  ;;  %752 = vst [vmem:[#allocation2 + $0x58c] sm:$0xf] %v751_v13 }
  0xd9   :  { %754 = vst [vmem:[#allocation2 + $0x590] sm:$0xf] %v753_v14  ;;  %v755_v15 = vld [vmem:[%s20272_s5 + $0x5a8] sm:$0xf]  ;;  %v757_v16 = vld [vmem:[%s20272_s5 + $0x58c] sm:$0xf] }
  0xda   :  { %v759_v17 = vld [vmem:[%s20272_s5 + $0x5ac] sm:$0xf]  ;;  %756 = vst [vmem:[#allocation2 + $0x594] sm:$0xf] %v755_v15  ;;  %758 = vst [vmem:[#allocation2 + $0x598] sm:$0xf] %v757_v16 }
  0xdb   :  { %760 = vst [vmem:[#allocation2 + $0x59c] sm:$0xf] %v759_v17  ;;  %v761_v18 = vld [vmem:[%s20272_s5 + $0x590] sm:$0xf]  ;;  %v765_v20 = vld [vmem:[%s20272_s5 + $0x594] sm:$0xf] }
  0xdc   :  { %v763_v19 = vld [vmem:[%s20272_s5 + $0x5b0] sm:$0xf]  ;;  %762 = vst [vmem:[#allocation2 + $0x5a0] sm:$0xf] %v761_v18  ;;  %766 = vst [vmem:[#allocation2 + $0x5a8] sm:$0xf] %v765_v20 }
  0xdd   :  { %764 = vst [vmem:[#allocation2 + $0x5a4] sm:$0xf] %v763_v19  ;;  %v767_v21 = vld [vmem:[%s20272_s5 + $0x5b4] sm:$0xf]  ;;  %v769_v22 = vld [vmem:[%s20272_s5 + $0x598] sm:$0xf] }
  0xde   :  { %v771_v23 = vld [vmem:[%s20272_s5 + $0x5b8] sm:$0xf]  ;;  %768 = vst [vmem:[#allocation2 + $0x5ac] sm:$0xf] %v767_v21  ;;  %770 = vst [vmem:[#allocation2 + $0x5b0] sm:$0xf] %v769_v22 }
  0xdf   :  { %772 = vst [vmem:[#allocation2 + $0x5b4] sm:$0xf] %v771_v23  ;;  %v773_v24 = vld [vmem:[%s20272_s5 + $0x59c] sm:$0xf]  ;;  %v779_v26 = vld [vmem:[%s20272_s5 + $0x5e0] sm:$0xf] }
  0xe0   :  { %774 = vst [vmem:[#allocation2 + $0x5b8] sm:$0xf] %v773_v24  ;;  %776 = vst [vmem:[#allocation2 + $0x5bc] sm:$0xff] %v775_v25   ;;  %v781_v27 = vld [vmem:[%s20272_s5 + $0x5c4] sm:$0xf]  ;;  %v807_v40 = vld [vmem:[%s20272_s5 + $0x5fc] sm:$0xff]  }
  0xe1   :  { %780 = vst [vmem:[#allocation2 + $0x5c4] sm:$0xf] %v779_v26  ;;  %v783_v28 = vld [vmem:[%s20272_s5 + $0x5e4] sm:$0xf]  ;;  %v785_v29 = vld [vmem:[%s20272_s5 + $0x5c8] sm:$0xf] }
  0xe2   :  { %782 = vst [vmem:[#allocation2 + $0x5c8] sm:$0xf] %v781_v27  ;;  %784 = vst [vmem:[#allocation2 + $0x5cc] sm:$0xf] %v783_v28  ;;  %v787_v30 = vld [vmem:[%s20272_s5 + $0x5e8] sm:$0xf] }
  0xe3   :  { %786 = vst [vmem:[#allocation2 + $0x5d0] sm:$0xf] %v785_v29  ;;  %v789_v31 = vld [vmem:[%s20272_s5 + $0x5cc] sm:$0xf]  ;;  %788 = vst [vmem:[#allocation2 + $0x5d4] sm:$0xf] %v787_v30 }
  0xe4   :  { %v791_v32 = vld [vmem:[%s20272_s5 + $0x5ec] sm:$0xf]  ;;  %790 = vst [vmem:[#allocation2 + $0x5d8] sm:$0xf] %v789_v31  ;;  %v793_v33 = vld [vmem:[%s20272_s5 + $0x5d0] sm:$0xf] }
  0xe5   :  { %792 = vst [vmem:[#allocation2 + $0x5dc] sm:$0xf] %v791_v32  ;;  %v795_v34 = vld [vmem:[%s20272_s5 + $0x5f0] sm:$0xf]  ;;  %v797_v35 = vld [vmem:[%s20272_s5 + $0x5d4] sm:$0xf] }
  0xe6   :  { %794 = vst [vmem:[#allocation2 + $0x5e0] sm:$0xf] %v793_v33  ;;  %796 = vst [vmem:[#allocation2 + $0x5e4] sm:$0xf] %v795_v34  ;;  %v799_v36 = vld [vmem:[%s20272_s5 + $0x5f4] sm:$0xf] }
  0xe7   :  { %798 = vst [vmem:[#allocation2 + $0x5e8] sm:$0xf] %v797_v35  ;;  %v801_v37 = vld [vmem:[%s20272_s5 + $0x5d8] sm:$0xf]  ;;  %800 = vst [vmem:[#allocation2 + $0x5ec] sm:$0xf] %v799_v36 }
  0xe8   :  { %v803_v38 = vld [vmem:[%s20272_s5 + $0x5f8] sm:$0xf]  ;;  %802 = vst [vmem:[#allocation2 + $0x5f0] sm:$0xf] %v801_v37  ;;  %v805_v39 = vld [vmem:[%s20272_s5 + $0x5dc] sm:$0xf] }
  0xe9   :  { %804 = vst [vmem:[#allocation2 + $0x5f4] sm:$0xf] %v803_v38  ;;  %v811_v41 = vld [vmem:[%s20272_s5 + $0x620] sm:$0xf]  ;;  %806 = vst [vmem:[#allocation2 + $0x5f8] sm:$0xf] %v805_v39 }
  0xea   :  { %808 = vst [vmem:[#allocation2 + $0x5fc] sm:$0xff] %v807_v40   ;;  %812 = vst [vmem:[#allocation2 + $0x604] sm:$0xf] %v811_v41  ;;  %v813_v42 = vld [vmem:[%s20272_s5 + $0x604] sm:$0xf]  ;;  %v839_v55 = vld [vmem:[%s20272_s5 + $0x63c] sm:$0xff]  }
  0xeb   :  { %v815_v43 = vld [vmem:[%s20272_s5 + $0x624] sm:$0xf]  ;;  %v817_v44 = vld [vmem:[%s20272_s5 + $0x608] sm:$0xf]  ;;  %814 = vst [vmem:[#allocation2 + $0x608] sm:$0xf] %v813_v42 }
  0xec   :  { %816 = vst [vmem:[#allocation2 + $0x60c] sm:$0xf] %v815_v43  ;;  %818 = vst [vmem:[#allocation2 + $0x610] sm:$0xf] %v817_v44  ;;  %v819_v45 = vld [vmem:[%s20272_s5 + $0x628] sm:$0xf] }
  0xed   :  { %v821_v46 = vld [vmem:[%s20272_s5 + $0x60c] sm:$0xf]  ;;  %820 = vst [vmem:[#allocation2 + $0x614] sm:$0xf] %v819_v45  ;;  %v825_v48 = vld [vmem:[%s20272_s5 + $0x610] sm:$0xf] }
  0xee   :  { %v823_v47 = vld [vmem:[%s20272_s5 + $0x62c] sm:$0xf]  ;;  %822 = vst [vmem:[#allocation2 + $0x618] sm:$0xf] %v821_v46  ;;  %v827_v49 = vld [vmem:[%s20272_s5 + $0x630] sm:$0xf] }
  0xef   :  { %824 = vst [vmem:[#allocation2 + $0x61c] sm:$0xf] %v823_v47  ;;  %v829_v50 = vld [vmem:[%s20272_s5 + $0x614] sm:$0xf]  ;;  %826 = vst [vmem:[#allocation2 + $0x620] sm:$0xf] %v825_v48 }
  0xf0   :  { %828 = vst [vmem:[#allocation2 + $0x624] sm:$0xf] %v827_v49  ;;  %830 = vst [vmem:[#allocation2 + $0x628] sm:$0xf] %v829_v50  ;;  %v831_v51 = vld [vmem:[%s20272_s5 + $0x634] sm:$0xf] }
  0xf1   :  { %v833_v52 = vld [vmem:[%s20272_s5 + $0x618] sm:$0xf]  ;;  %832 = vst [vmem:[#allocation2 + $0x62c] sm:$0xf] %v831_v51  ;;  %v837_v54 = vld [vmem:[%s20272_s5 + $0x61c] sm:$0xf] }
  0xf2   :  { %v835_v53 = vld [vmem:[%s20272_s5 + $0x638] sm:$0xf]  ;;  %834 = vst [vmem:[#allocation2 + $0x630] sm:$0xf] %v833_v52  ;;  %v843_v56 = vld [vmem:[%s20272_s5 + $0x660] sm:$0xf] }
  0xf3   :  { %836 = vst [vmem:[#allocation2 + $0x634] sm:$0xf] %v835_v53  ;;  %838 = vst [vmem:[#allocation2 + $0x638] sm:$0xf] %v837_v54  ;;  %v845_v57 = vld [vmem:[%s20272_s5 + $0x644] sm:$0xf] }
  0xf4   :  { %840 = vst [vmem:[#allocation2 + $0x63c] sm:$0xff] %v839_v55   ;;  %844 = vst [vmem:[#allocation2 + $0x644] sm:$0xf] %v843_v56  ;;  %v847_v58 = vld [vmem:[%s20272_s5 + $0x664] sm:$0xf]  ;;  %v871_v6 = vld [vmem:[%s20272_s5 + $0x67c] sm:$0xff]  }
  0xf5   :  { %v849_v59 = vld [vmem:[%s20272_s5 + $0x648] sm:$0xf]  ;;  %846 = vst [vmem:[#allocation2 + $0x648] sm:$0xf] %v845_v57  ;;  %848 = vst [vmem:[#allocation2 + $0x64c] sm:$0xf] %v847_v58 }
  0xf6   :  { %850 = vst [vmem:[#allocation2 + $0x650] sm:$0xf] %v849_v59  ;;  %v851_v60 = vld [vmem:[%s20272_s5 + $0x668] sm:$0xf]  ;;  %v853_v61 = vld [vmem:[%s20272_s5 + $0x64c] sm:$0xf] }
  0xf7   :  { %v855_v62 = vld [vmem:[%s20272_s5 + $0x66c] sm:$0xf]  ;;  %852 = vst [vmem:[#allocation2 + $0x654] sm:$0xf] %v851_v60  ;;  %854 = vst [vmem:[#allocation2 + $0x658] sm:$0xf] %v853_v61 }
  0xf8   :  { %856 = vst [vmem:[#allocation2 + $0x65c] sm:$0xf] %v855_v62  ;;  %v857_v63 = vld [vmem:[%s20272_s5 + $0x650] sm:$0xf]  ;;  %v861_v1 = vld [vmem:[%s20272_s5 + $0x654] sm:$0xf] }
  0xf9   :  { %v859_v0 = vld [vmem:[%s20272_s5 + $0x670] sm:$0xf]  ;;  %858 = vst [vmem:[#allocation2 + $0x660] sm:$0xf] %v857_v63  ;;  %862 = vst [vmem:[#allocation2 + $0x668] sm:$0xf] %v861_v1 }
  0xfa   :  { %860 = vst [vmem:[#allocation2 + $0x664] sm:$0xf] %v859_v0  ;;  %v863_v2 = vld [vmem:[%s20272_s5 + $0x674] sm:$0xf]  ;;  %v865_v3 = vld [vmem:[%s20272_s5 + $0x658] sm:$0xf] }
  0xfb   :  { %v867_v4 = vld [vmem:[%s20272_s5 + $0x678] sm:$0xf]  ;;  %864 = vst [vmem:[#allocation2 + $0x66c] sm:$0xf] %v863_v2  ;;  %866 = vst [vmem:[#allocation2 + $0x670] sm:$0xf] %v865_v3 }
  0xfc   :  { %868 = vst [vmem:[#allocation2 + $0x674] sm:$0xf] %v867_v4  ;;  %v869_v5 = vld [vmem:[%s20272_s5 + $0x65c] sm:$0xf]  ;;  %v875_v7 = vld [vmem:[%s20272_s5 + $0x6a0] sm:$0xf] }
  0xfd   :  { %870 = vst [vmem:[#allocation2 + $0x678] sm:$0xf] %v869_v5  ;;  %872 = vst [vmem:[#allocation2 + $0x67c] sm:$0xff] %v871_v6   ;;  %v877_v8 = vld [vmem:[%s20272_s5 + $0x684] sm:$0xf]  ;;  %v903_v21 = vld [vmem:[%s20272_s5 + $0x6bc] sm:$0xff]  }
  0xfe   :  { %876 = vst [vmem:[#allocation2 + $0x684] sm:$0xf] %v875_v7  ;;  %v879_v9 = vld [vmem:[%s20272_s5 + $0x6a4] sm:$0xf]  ;;  %v881_v10 = vld [vmem:[%s20272_s5 + $0x688] sm:$0xf] }
  0xff   :  { %878 = vst [vmem:[#allocation2 + $0x688] sm:$0xf] %v877_v8  ;;  %880 = vst [vmem:[#allocation2 + $0x68c] sm:$0xf] %v879_v9  ;;  %v883_v11 = vld [vmem:[%s20272_s5 + $0x6a8] sm:$0xf] }
 0x100   :  { %882 = vst [vmem:[#allocation2 + $0x690] sm:$0xf] %v881_v10  ;;  %v885_v12 = vld [vmem:[%s20272_s5 + $0x68c] sm:$0xf]  ;;  %884 = vst [vmem:[#allocation2 + $0x694] sm:$0xf] %v883_v11 }
 0x101   :  { %v887_v13 = vld [vmem:[%s20272_s5 + $0x6ac] sm:$0xf]  ;;  %886 = vst [vmem:[#allocation2 + $0x698] sm:$0xf] %v885_v12  ;;  %v889_v14 = vld [vmem:[%s20272_s5 + $0x690] sm:$0xf] }
 0x102   :  { %888 = vst [vmem:[#allocation2 + $0x69c] sm:$0xf] %v887_v13  ;;  %v891_v15 = vld [vmem:[%s20272_s5 + $0x6b0] sm:$0xf]  ;;  %v893_v16 = vld [vmem:[%s20272_s5 + $0x694] sm:$0xf] }
 0x103   :  { %890 = vst [vmem:[#allocation2 + $0x6a0] sm:$0xf] %v889_v14  ;;  %892 = vst [vmem:[#allocation2 + $0x6a4] sm:$0xf] %v891_v15  ;;  %v895_v17 = vld [vmem:[%s20272_s5 + $0x6b4] sm:$0xf] }
 0x104   :  { %894 = vst [vmem:[#allocation2 + $0x6a8] sm:$0xf] %v893_v16  ;;  %v897_v18 = vld [vmem:[%s20272_s5 + $0x698] sm:$0xf]  ;;  %896 = vst [vmem:[#allocation2 + $0x6ac] sm:$0xf] %v895_v17 }
 0x105   :  { %v899_v19 = vld [vmem:[%s20272_s5 + $0x6b8] sm:$0xf]  ;;  %898 = vst [vmem:[#allocation2 + $0x6b0] sm:$0xf] %v897_v18  ;;  %v901_v20 = vld [vmem:[%s20272_s5 + $0x69c] sm:$0xf] }
 0x106   :  { %900 = vst [vmem:[#allocation2 + $0x6b4] sm:$0xf] %v899_v19  ;;  %v907_v22 = vld [vmem:[%s20272_s5 + $0x6e0] sm:$0xf]  ;;  %902 = vst [vmem:[#allocation2 + $0x6b8] sm:$0xf] %v901_v20 }
 0x107   :  { %904 = vst [vmem:[#allocation2 + $0x6bc] sm:$0xff] %v903_v21   ;;  %908 = vst [vmem:[#allocation2 + $0x6c4] sm:$0xf] %v907_v22  ;;  %v909_v23 = vld [vmem:[%s20272_s5 + $0x6c4] sm:$0xf]  ;;  %v935_v36 = vld [vmem:[%s20272_s5 + $0x6fc] sm:$0xff]  }
 0x108   :  { %v911_v24 = vld [vmem:[%s20272_s5 + $0x6e4] sm:$0xf]  ;;  %v913_v25 = vld [vmem:[%s20272_s5 + $0x6c8] sm:$0xf]  ;;  %910 = vst [vmem:[#allocation2 + $0x6c8] sm:$0xf] %v909_v23 }
 0x109   :  { %912 = vst [vmem:[#allocation2 + $0x6cc] sm:$0xf] %v911_v24  ;;  %914 = vst [vmem:[#allocation2 + $0x6d0] sm:$0xf] %v913_v25  ;;  %v915_v26 = vld [vmem:[%s20272_s5 + $0x6e8] sm:$0xf] }
 0x10a   :  { %v917_v27 = vld [vmem:[%s20272_s5 + $0x6cc] sm:$0xf]  ;;  %916 = vst [vmem:[#allocation2 + $0x6d4] sm:$0xf] %v915_v26  ;;  %v921_v29 = vld [vmem:[%s20272_s5 + $0x6d0] sm:$0xf] }
 0x10b   :  { %v919_v28 = vld [vmem:[%s20272_s5 + $0x6ec] sm:$0xf]  ;;  %918 = vst [vmem:[#allocation2 + $0x6d8] sm:$0xf] %v917_v27  ;;  %v923_v30 = vld [vmem:[%s20272_s5 + $0x6f0] sm:$0xf] }
 0x10c   :  { %920 = vst [vmem:[#allocation2 + $0x6dc] sm:$0xf] %v919_v28  ;;  %v925_v31 = vld [vmem:[%s20272_s5 + $0x6d4] sm:$0xf]  ;;  %922 = vst [vmem:[#allocation2 + $0x6e0] sm:$0xf] %v921_v29 }
 0x10d   :  { %924 = vst [vmem:[#allocation2 + $0x6e4] sm:$0xf] %v923_v30  ;;  %926 = vst [vmem:[#allocation2 + $0x6e8] sm:$0xf] %v925_v31  ;;  %v927_v32 = vld [vmem:[%s20272_s5 + $0x6f4] sm:$0xf] }
 0x10e   :  { %v929_v33 = vld [vmem:[%s20272_s5 + $0x6d8] sm:$0xf]  ;;  %928 = vst [vmem:[#allocation2 + $0x6ec] sm:$0xf] %v927_v32  ;;  %v933_v35 = vld [vmem:[%s20272_s5 + $0x6dc] sm:$0xf] }
 0x10f   :  { %v931_v34 = vld [vmem:[%s20272_s5 + $0x6f8] sm:$0xf]  ;;  %930 = vst [vmem:[#allocation2 + $0x6f0] sm:$0xf] %v929_v33  ;;  %v939_v37 = vld [vmem:[%s20272_s5 + $0x720] sm:$0xf] }
 0x110   :  { %932 = vst [vmem:[#allocation2 + $0x6f4] sm:$0xf] %v931_v34  ;;  %934 = vst [vmem:[#allocation2 + $0x6f8] sm:$0xf] %v933_v35  ;;  %v941_v38 = vld [vmem:[%s20272_s5 + $0x704] sm:$0xf] }
 0x111   :  { %936 = vst [vmem:[#allocation2 + $0x6fc] sm:$0xff] %v935_v36   ;;  %940 = vst [vmem:[#allocation2 + $0x704] sm:$0xf] %v939_v37  ;;  %v943_v39 = vld [vmem:[%s20272_s5 + $0x724] sm:$0xf]  ;;  %v967_v51 = vld [vmem:[%s20272_s5 + $0x73c] sm:$0xff]  }
 0x112   :  { %v945_v40 = vld [vmem:[%s20272_s5 + $0x708] sm:$0xf]  ;;  %942 = vst [vmem:[#allocation2 + $0x708] sm:$0xf] %v941_v38  ;;  %944 = vst [vmem:[#allocation2 + $0x70c] sm:$0xf] %v943_v39 }
 0x113   :  { %946 = vst [vmem:[#allocation2 + $0x710] sm:$0xf] %v945_v40  ;;  %v947_v41 = vld [vmem:[%s20272_s5 + $0x728] sm:$0xf]  ;;  %v949_v42 = vld [vmem:[%s20272_s5 + $0x70c] sm:$0xf] }
 0x114   :  { %v951_v43 = vld [vmem:[%s20272_s5 + $0x72c] sm:$0xf]  ;;  %948 = vst [vmem:[#allocation2 + $0x714] sm:$0xf] %v947_v41  ;;  %950 = vst [vmem:[#allocation2 + $0x718] sm:$0xf] %v949_v42 }
 0x115   :  { %952 = vst [vmem:[#allocation2 + $0x71c] sm:$0xf] %v951_v43  ;;  %v953_v44 = vld [vmem:[%s20272_s5 + $0x710] sm:$0xf]  ;;  %v957_v46 = vld [vmem:[%s20272_s5 + $0x714] sm:$0xf] }
 0x116   :  { %v955_v45 = vld [vmem:[%s20272_s5 + $0x730] sm:$0xf]  ;;  %954 = vst [vmem:[#allocation2 + $0x720] sm:$0xf] %v953_v44  ;;  %958 = vst [vmem:[#allocation2 + $0x728] sm:$0xf] %v957_v46 }
 0x117   :  { %956 = vst [vmem:[#allocation2 + $0x724] sm:$0xf] %v955_v45  ;;  %v959_v47 = vld [vmem:[%s20272_s5 + $0x734] sm:$0xf]  ;;  %v961_v48 = vld [vmem:[%s20272_s5 + $0x718] sm:$0xf] }
 0x118   :  { %v963_v49 = vld [vmem:[%s20272_s5 + $0x738] sm:$0xf]  ;;  %960 = vst [vmem:[#allocation2 + $0x72c] sm:$0xf] %v959_v47  ;;  %962 = vst [vmem:[#allocation2 + $0x730] sm:$0xf] %v961_v48 }
 0x119   :  { %964 = vst [vmem:[#allocation2 + $0x734] sm:$0xf] %v963_v49  ;;  %v965_v50 = vld [vmem:[%s20272_s5 + $0x71c] sm:$0xf]  ;;  %v971_v52 = vld [vmem:[%s20272_s5 + $0x760] sm:$0xf] }
 0x11a   :  { %966 = vst [vmem:[#allocation2 + $0x738] sm:$0xf] %v965_v50  ;;  %968 = vst [vmem:[#allocation2 + $0x73c] sm:$0xff] %v967_v51   ;;  %v973_v53 = vld [vmem:[%s20272_s5 + $0x744] sm:$0xf]  ;;  %v999_v2 = vld [vmem:[%s20272_s5 + $0x77c] sm:$0xff]  }
 0x11b   :  { %972 = vst [vmem:[#allocation2 + $0x744] sm:$0xf] %v971_v52  ;;  %v975_v54 = vld [vmem:[%s20272_s5 + $0x764] sm:$0xf]  ;;  %v977_v55 = vld [vmem:[%s20272_s5 + $0x748] sm:$0xf] }
 0x11c   :  { %974 = vst [vmem:[#allocation2 + $0x748] sm:$0xf] %v973_v53  ;;  %976 = vst [vmem:[#allocation2 + $0x74c] sm:$0xf] %v975_v54  ;;  %v979_v56 = vld [vmem:[%s20272_s5 + $0x768] sm:$0xf] }
 0x11d   :  { %978 = vst [vmem:[#allocation2 + $0x750] sm:$0xf] %v977_v55  ;;  %v981_v57 = vld [vmem:[%s20272_s5 + $0x74c] sm:$0xf]  ;;  %980 = vst [vmem:[#allocation2 + $0x754] sm:$0xf] %v979_v56 }
 0x11e   :  { %v983_v58 = vld [vmem:[%s20272_s5 + $0x76c] sm:$0xf]  ;;  %982 = vst [vmem:[#allocation2 + $0x758] sm:$0xf] %v981_v57  ;;  %v985_v59 = vld [vmem:[%s20272_s5 + $0x750] sm:$0xf] }
 0x11f   :  { %984 = vst [vmem:[#allocation2 + $0x75c] sm:$0xf] %v983_v58  ;;  %v987_v60 = vld [vmem:[%s20272_s5 + $0x770] sm:$0xf]  ;;  %v989_v61 = vld [vmem:[%s20272_s5 + $0x754] sm:$0xf] }
 0x120   :  { %986 = vst [vmem:[#allocation2 + $0x760] sm:$0xf] %v985_v59  ;;  %988 = vst [vmem:[#allocation2 + $0x764] sm:$0xf] %v987_v60  ;;  %v991_v62 = vld [vmem:[%s20272_s5 + $0x774] sm:$0xf] }
 0x121   :  { %990 = vst [vmem:[#allocation2 + $0x768] sm:$0xf] %v989_v61  ;;  %v993_v63 = vld [vmem:[%s20272_s5 + $0x758] sm:$0xf]  ;;  %992 = vst [vmem:[#allocation2 + $0x76c] sm:$0xf] %v991_v62 }
 0x122   :  { %v995_v0 = vld [vmem:[%s20272_s5 + $0x778] sm:$0xf]  ;;  %994 = vst [vmem:[#allocation2 + $0x770] sm:$0xf] %v993_v63  ;;  %v997_v1 = vld [vmem:[%s20272_s5 + $0x75c] sm:$0xf] }
 0x123   :  { %996 = vst [vmem:[#allocation2 + $0x774] sm:$0xf] %v995_v0  ;;  %v1003_v3 = vld [vmem:[%s20272_s5 + $0x7a0] sm:$0xf]  ;;  %998 = vst [vmem:[#allocation2 + $0x778] sm:$0xf] %v997_v1 }
 0x124   :  { %1000 = vst [vmem:[#allocation2 + $0x77c] sm:$0xff] %v999_v2   ;;  %1004 = vst [vmem:[#allocation2 + $0x784] sm:$0xf] %v1003_v3  ;;  %v1005_v4 = vld [vmem:[%s20272_s5 + $0x784] sm:$0xf]  ;;  %v1031_v17 = vld [vmem:[%s20272_s5 + $0x7bc] sm:$0xff]  }
 0x125   :  { %v1007_v5 = vld [vmem:[%s20272_s5 + $0x7a4] sm:$0xf]  ;;  %v1009_v6 = vld [vmem:[%s20272_s5 + $0x788] sm:$0xf]  ;;  %1006 = vst [vmem:[#allocation2 + $0x788] sm:$0xf] %v1005_v4 }
 0x126   :  { %1008 = vst [vmem:[#allocation2 + $0x78c] sm:$0xf] %v1007_v5  ;;  %1010 = vst [vmem:[#allocation2 + $0x790] sm:$0xf] %v1009_v6  ;;  %v1011_v7 = vld [vmem:[%s20272_s5 + $0x7a8] sm:$0xf] }
 0x127   :  { %v1013_v8 = vld [vmem:[%s20272_s5 + $0x78c] sm:$0xf]  ;;  %1012 = vst [vmem:[#allocation2 + $0x794] sm:$0xf] %v1011_v7  ;;  %v1017_v10 = vld [vmem:[%s20272_s5 + $0x790] sm:$0xf] }
 0x128   :  { %v1015_v9 = vld [vmem:[%s20272_s5 + $0x7ac] sm:$0xf]  ;;  %1014 = vst [vmem:[#allocation2 + $0x798] sm:$0xf] %v1013_v8  ;;  %v1019_v11 = vld [vmem:[%s20272_s5 + $0x7b0] sm:$0xf] }
 0x129   :  { %1016 = vst [vmem:[#allocation2 + $0x79c] sm:$0xf] %v1015_v9  ;;  %v1021_v12 = vld [vmem:[%s20272_s5 + $0x794] sm:$0xf]  ;;  %1018 = vst [vmem:[#allocation2 + $0x7a0] sm:$0xf] %v1017_v10 }
 0x12a   :  { %1020 = vst [vmem:[#allocation2 + $0x7a4] sm:$0xf] %v1019_v11  ;;  %1022 = vst [vmem:[#allocation2 + $0x7a8] sm:$0xf] %v1021_v12  ;;  %v1023_v13 = vld [vmem:[%s20272_s5 + $0x7b4] sm:$0xf] }
 0x12b   :  { %v1025_v14 = vld [vmem:[%s20272_s5 + $0x798] sm:$0xf]  ;;  %1024 = vst [vmem:[#allocation2 + $0x7ac] sm:$0xf] %v1023_v13  ;;  %v1029_v16 = vld [vmem:[%s20272_s5 + $0x79c] sm:$0xf] }
 0x12c   :  { %v1027_v15 = vld [vmem:[%s20272_s5 + $0x7b8] sm:$0xf]  ;;  %1026 = vst [vmem:[#allocation2 + $0x7b0] sm:$0xf] %v1025_v14  ;;  %v1035_v18 = vld [vmem:[%s20272_s5 + $0x7e0] sm:$0xf] }
 0x12d   :  { %1028 = vst [vmem:[#allocation2 + $0x7b4] sm:$0xf] %v1027_v15  ;;  %1030 = vst [vmem:[#allocation2 + $0x7b8] sm:$0xf] %v1029_v16  ;;  %v1037_v19 = vld [vmem:[%s20272_s5 + $0x7c4] sm:$0xf] }
 0x12e   :  { %1032 = vst [vmem:[#allocation2 + $0x7bc] sm:$0xff] %v1031_v17   ;;  %1036 = vst [vmem:[#allocation2 + $0x7c4] sm:$0xf] %v1035_v18  ;;  %v1039_v20 = vld [vmem:[%s20272_s5 + $0x7e4] sm:$0xf] }
 0x12f   :  { %v1041_v21 = vld [vmem:[%s20272_s5 + $0x7c8] sm:$0xf]  ;;  %1038 = vst [vmem:[#allocation2 + $0x7c8] sm:$0xf] %v1037_v19  ;;  %1040 = vst [vmem:[#allocation2 + $0x7cc] sm:$0xf] %v1039_v20 }
 0x130   :  { %1042 = vst [vmem:[#allocation2 + $0x7d0] sm:$0xf] %v1041_v21  ;;  %v1043_v22 = vld [vmem:[%s20272_s5 + $0x7e8] sm:$0xf]  ;;  %v1045_v23 = vld [vmem:[%s20272_s5 + $0x7cc] sm:$0xf] }
 0x131   :  { %v1047_v24 = vld [vmem:[%s20272_s5 + $0x7ec] sm:$0xf]  ;;  %1044 = vst [vmem:[#allocation2 + $0x7d4] sm:$0xf] %v1043_v22  ;;  %1046 = vst [vmem:[#allocation2 + $0x7d8] sm:$0xf] %v1045_v23 }
 0x132   :  { %1048 = vst [vmem:[#allocation2 + $0x7dc] sm:$0xf] %v1047_v24  ;;  %v1049_v25 = vld [vmem:[%s20272_s5 + $0x7d0] sm:$0xf]  ;;  %v1053_v27 = vld [vmem:[%s20272_s5 + $0x7d4] sm:$0xf] }
 0x133   :  { %v1051_v26 = vld [vmem:[%s20272_s5 + $0x7f0] sm:$0xf]  ;;  %1050 = vst [vmem:[#allocation2 + $0x7e0] sm:$0xf] %v1049_v25  ;;  %1054 = vst [vmem:[#allocation2 + $0x7e8] sm:$0xf] %v1053_v27 }
 0x134   :  { %1052 = vst [vmem:[#allocation2 + $0x7e4] sm:$0xf] %v1051_v26  ;;  %v1055_v28 = vld [vmem:[%s20272_s5 + $0x7f4] sm:$0xf]  ;;  %v1057_v29 = vld [vmem:[%s20272_s5 + $0x7d8] sm:$0xf] }
 0x135   :  { %v1059_v30 = vld [vmem:[%s20272_s5 + $0x7f8] sm:$0xf]  ;;  %1056 = vst [vmem:[#allocation2 + $0x7ec] sm:$0xf] %v1055_v28  ;;  %1058 = vst [vmem:[#allocation2 + $0x7f0] sm:$0xf] %v1057_v29 }
 0x136   :  { %1060 = vst [vmem:[#allocation2 + $0x7f4] sm:$0xf] %v1059_v30  ;;  %v1061_v31 = vld [vmem:[%s20272_s5 + $0x7dc] sm:$0xf] }
 0x137   :  { %v1063_v32 = vld [vmem:[%s20272_s5 + $0x7fc] sm:$0xf]  ;;  %1062 = vst [vmem:[#allocation2 + $0x7f8] sm:$0xf] %v1061_v31 }
 0x138   :  { %1064 = vst [vmem:[#allocation2 + $0x7fc] sm:$0xf] %v1063_v32 }
 0x139   :  { %4200 = vsyncadd [#allocation4], 32768  ;;  %v4219_v33 = vld [vmem:[%s20273_s6] sm:$0xf]  ;;  %v4221_v34 = vld [vmem:[%s20273_s6 + $0x1c] sm:$0xf] }
 0x13a   :  { %4220 = vst [vmem:[#allocation3] sm:$0xf] %v4219_v33  ;;  %4222 = vst [vmem:[#allocation3 + $0x4] sm:$0xf] %v4221_v34  ;;  %v4223_v35 = vld [vmem:[%s20273_s6 + $0x4] sm:$0xf] }
 0x13b   :  { %v4225_v36 = vld [vmem:[%s20273_s6 + $0x20] sm:$0xf]  ;;  %v4227_v37 = vld [vmem:[%s20273_s6 + $0x8] sm:$0xf]  ;;  %4224 = vst [vmem:[#allocation3 + $0x8] sm:$0xf] %v4223_v35 }
 0x13c   :  { %4226 = vst [vmem:[#allocation3 + $0xc] sm:$0xf] %v4225_v36  ;;  %4228 = vst [vmem:[#allocation3 + $0x10] sm:$0xf] %v4227_v37  ;;  %v4229_v38 = vld [vmem:[%s20273_s6 + $0x24] sm:$0xf] }
 0x13d   :  { %v4231_v39 = vld [vmem:[%s20273_s6 + $0xc] sm:$0xf]  ;;  %v4233_v40 = vld [vmem:[%s20273_s6 + $0x28] sm:$0xf]  ;;  %4230 = vst [vmem:[#allocation3 + $0x14] sm:$0xf] %v4229_v38 }
 0x13e   :  { %4232 = vst [vmem:[#allocation3 + $0x18] sm:$0xf] %v4231_v39  ;;  %4234 = vst [vmem:[#allocation3 + $0x1c] sm:$0xf] %v4233_v40  ;;  %v4235_v41 = vld [vmem:[%s20273_s6 + $0x10] sm:$0xf] }
 0x13f   :  { %v4237_v42 = vld [vmem:[%s20273_s6 + $0x2c] sm:$0xf]  ;;  %v4239_v43 = vld [vmem:[%s20273_s6 + $0x14] sm:$0xf]  ;;  %4236 = vst [vmem:[#allocation3 + $0x20] sm:$0xf] %v4235_v41 }
 0x140   :  { %4238 = vst [vmem:[#allocation3 + $0x24] sm:$0xf] %v4237_v42  ;;  %4240 = vst [vmem:[#allocation3 + $0x28] sm:$0xf] %v4239_v43  ;;  %v4241_v44 = vld [vmem:[%s20273_s6 + $0x30] sm:$0xf] }
 0x141   :  { %v4243_v45 = vld [vmem:[%s20273_s6 + $0x18] sm:$0xf]  ;;  %4242 = vst [vmem:[#allocation3 + $0x2c] sm:$0xf] %v4241_v44  ;;  %v4249_v47 = vld [vmem:[%s20273_s6 + $0x54] sm:$0xf] }
 0x142   :  { %v4245_v46 = vld [vmem:[%s20273_s6 + $0x34] sm:$0xff]   ;;  %4244 = vst [vmem:[#allocation3 + $0x30] sm:$0xf] %v4243_v45  ;;  %v4251_v48 = vld [vmem:[%s20273_s6 + $0x3c] sm:$0xf]  ;;  %v4273_v59 = vld [vmem:[%s20273_s6 + $0x6c] sm:$0xff]  }
 0x143   :  { %4246 = vst [vmem:[#allocation3 + $0x34] sm:$0xff] %v4245_v46   ;;  %v4253_v49 = vld [vmem:[%s20273_s6 + $0x58] sm:$0xf]  ;;  %4250 = vst [vmem:[#allocation3 + $0x3c] sm:$0xf] %v4249_v47  ;;  %v4301_v8 = vld [vmem:[%s20273_s6 + $0xa4] sm:$0xff]  }
 0x144   :  { %4252 = vst [vmem:[#allocation3 + $0x40] sm:$0xf] %v4251_v48  ;;  %4254 = vst [vmem:[#allocation3 + $0x44] sm:$0xf] %v4253_v49  ;;  %v4255_v50 = vld [vmem:[%s20273_s6 + $0x40] sm:$0xf] }
 0x145   :  { %v4257_v51 = vld [vmem:[%s20273_s6 + $0x5c] sm:$0xf]  ;;  %v4259_v52 = vld [vmem:[%s20273_s6 + $0x44] sm:$0xf]  ;;  %4256 = vst [vmem:[#allocation3 + $0x48] sm:$0xf] %v4255_v50 }
 0x146   :  { %4258 = vst [vmem:[#allocation3 + $0x4c] sm:$0xf] %v4257_v51  ;;  %4260 = vst [vmem:[#allocation3 + $0x50] sm:$0xf] %v4259_v52  ;;  %v4261_v53 = vld [vmem:[%s20273_s6 + $0x60] sm:$0xf] }
 0x147   :  { %v4263_v54 = vld [vmem:[%s20273_s6 + $0x48] sm:$0xf]  ;;  %v4265_v55 = vld [vmem:[%s20273_s6 + $0x64] sm:$0xf]  ;;  %4262 = vst [vmem:[#allocation3 + $0x54] sm:$0xf] %v4261_v53 }
 0x148   :  { %4264 = vst [vmem:[#allocation3 + $0x58] sm:$0xf] %v4263_v54  ;;  %4266 = vst [vmem:[#allocation3 + $0x5c] sm:$0xf] %v4265_v55  ;;  %v4267_v56 = vld [vmem:[%s20273_s6 + $0x4c] sm:$0xf] }
 0x149   :  { %v4269_v57 = vld [vmem:[%s20273_s6 + $0x68] sm:$0xf]  ;;  %v4271_v58 = vld [vmem:[%s20273_s6 + $0x50] sm:$0xf]  ;;  %4268 = vst [vmem:[#allocation3 + $0x60] sm:$0xf] %v4267_v56 }
 0x14a   :  { %4270 = vst [vmem:[#allocation3 + $0x64] sm:$0xf] %v4269_v57  ;;  %4272 = vst [vmem:[#allocation3 + $0x68] sm:$0xf] %v4271_v58  ;;  %v4277_v60 = vld [vmem:[%s20273_s6 + $0x8c] sm:$0xf] }
 0x14b   :  { %v4279_v61 = vld [vmem:[%s20273_s6 + $0x74] sm:$0xf]  ;;  %4274 = vst [vmem:[#allocation3 + $0x6c] sm:$0xff] %v4273_v59   ;;  %4278 = vst [vmem:[#allocation3 + $0x74] sm:$0xf] %v4277_v60  ;;  %v4329_v21 = vld [vmem:[%s20273_s6 + $0xdc] sm:$0xff]  }
 0x14c   :  { %4280 = vst [vmem:[#allocation3 + $0x78] sm:$0xf] %v4279_v61  ;;  %v4281_v62 = vld [vmem:[%s20273_s6 + $0x90] sm:$0xf]  ;;  %v4283_v63 = vld [vmem:[%s20273_s6 + $0x78] sm:$0xf] }
 0x14d   :  { %v4285_v0 = vld [vmem:[%s20273_s6 + $0x94] sm:$0xf]  ;;  %4282 = vst [vmem:[#allocation3 + $0x7c] sm:$0xf] %v4281_v62  ;;  %4284 = vst [vmem:[#allocation3 + $0x80] sm:$0xf] %v4283_v63 }
 0x14e   :  { %4286 = vst [vmem:[#allocation3 + $0x84] sm:$0xf] %v4285_v0  ;;  %v4287_v1 = vld [vmem:[%s20273_s6 + $0x7c] sm:$0xf]  ;;  %v4289_v2 = vld [vmem:[%s20273_s6 + $0x98] sm:$0xf] }
 0x14f   :  { %v4291_v3 = vld [vmem:[%s20273_s6 + $0x80] sm:$0xf]  ;;  %4288 = vst [vmem:[#allocation3 + $0x88] sm:$0xf] %v4287_v1  ;;  %4290 = vst [vmem:[#allocation3 + $0x8c] sm:$0xf] %v4289_v2 }
 0x150   :  { %4292 = vst [vmem:[#allocation3 + $0x90] sm:$0xf] %v4291_v3  ;;  %v4293_v4 = vld [vmem:[%s20273_s6 + $0x9c] sm:$0xf]  ;;  %v4295_v5 = vld [vmem:[%s20273_s6 + $0x84] sm:$0xf] }
 0x151   :  { %v4297_v6 = vld [vmem:[%s20273_s6 + $0xa0] sm:$0xf]  ;;  %4294 = vst [vmem:[#allocation3 + $0x94] sm:$0xf] %v4293_v4  ;;  %4296 = vst [vmem:[#allocation3 + $0x98] sm:$0xf] %v4295_v5 }
 0x152   :  { %4298 = vst [vmem:[#allocation3 + $0x9c] sm:$0xf] %v4297_v6  ;;  %v4299_v7 = vld [vmem:[%s20273_s6 + $0x88] sm:$0xf]  ;;  %v4305_v9 = vld [vmem:[%s20273_s6 + $0xc4] sm:$0xf] }
 0x153   :  { %4300 = vst [vmem:[#allocation3 + $0xa0] sm:$0xf] %v4299_v7  ;;  %4302 = vst [vmem:[#allocation3 + $0xa4] sm:$0xff] %v4301_v8   ;;  %v4307_v10 = vld [vmem:[%s20273_s6 + $0xac] sm:$0xf]  ;;  %v4357_v34 = vld [vmem:[%s20273_s6 + $0x114] sm:$0xff]  }
 0x154   :  { %4306 = vst [vmem:[#allocation3 + $0xac] sm:$0xf] %v4305_v9  ;;  %v4309_v11 = vld [vmem:[%s20273_s6 + $0xc8] sm:$0xf]  ;;  %v4311_v12 = vld [vmem:[%s20273_s6 + $0xb0] sm:$0xf] }
 0x155   :  { %4308 = vst [vmem:[#allocation3 + $0xb0] sm:$0xf] %v4307_v10  ;;  %4310 = vst [vmem:[#allocation3 + $0xb4] sm:$0xf] %v4309_v11  ;;  %v4313_v13 = vld [vmem:[%s20273_s6 + $0xcc] sm:$0xf] }
 0x156   :  { %4312 = vst [vmem:[#allocation3 + $0xb8] sm:$0xf] %v4311_v12  ;;  %v4315_v14 = vld [vmem:[%s20273_s6 + $0xb4] sm:$0xf]  ;;  %v4317_v15 = vld [vmem:[%s20273_s6 + $0xd0] sm:$0xf] }
 0x157   :  { %4314 = vst [vmem:[#allocation3 + $0xbc] sm:$0xf] %v4313_v13  ;;  %4316 = vst [vmem:[#allocation3 + $0xc0] sm:$0xf] %v4315_v14  ;;  %v4319_v16 = vld [vmem:[%s20273_s6 + $0xb8] sm:$0xf] }
 0x158   :  { %4318 = vst [vmem:[#allocation3 + $0xc4] sm:$0xf] %v4317_v15  ;;  %v4321_v17 = vld [vmem:[%s20273_s6 + $0xd4] sm:$0xf]  ;;  %v4323_v18 = vld [vmem:[%s20273_s6 + $0xbc] sm:$0xf] }
 0x159   :  { %4320 = vst [vmem:[#allocation3 + $0xc8] sm:$0xf] %v4319_v16  ;;  %4322 = vst [vmem:[#allocation3 + $0xcc] sm:$0xf] %v4321_v17  ;;  %v4325_v19 = vld [vmem:[%s20273_s6 + $0xd8] sm:$0xf] }
 0x15a   :  { %4324 = vst [vmem:[#allocation3 + $0xd0] sm:$0xf] %v4323_v18  ;;  %v4327_v20 = vld [vmem:[%s20273_s6 + $0xc0] sm:$0xf]  ;;  %4326 = vst [vmem:[#allocation3 + $0xd4] sm:$0xf] %v4325_v19 }
 0x15b   :  { %4328 = vst [vmem:[#allocation3 + $0xd8] sm:$0xf] %v4327_v20  ;;  %4330 = vst [vmem:[#allocation3 + $0xdc] sm:$0xff] %v4329_v21   ;;  %v4333_v22 = vld [vmem:[%s20273_s6 + $0xfc] sm:$0xf]  ;;  %v4385_v47 = vld [vmem:[%s20273_s6 + $0x14c] sm:$0xff]  }
 0x15c   :  { %v4335_v23 = vld [vmem:[%s20273_s6 + $0xe4] sm:$0xf]  ;;  %v4337_v24 = vld [vmem:[%s20273_s6 + $0x100] sm:$0xf]  ;;  %4334 = vst [vmem:[#allocation3 + $0xe4] sm:$0xf] %v4333_v22 }
 0x15d   :  { %4336 = vst [vmem:[#allocation3 + $0xe8] sm:$0xf] %v4335_v23  ;;  %4338 = vst [vmem:[#allocation3 + $0xec] sm:$0xf] %v4337_v24  ;;  %v4339_v25 = vld [vmem:[%s20273_s6 + $0xe8] sm:$0xf] }
 0x15e   :  { %v4341_v26 = vld [vmem:[%s20273_s6 + $0x104] sm:$0xf]  ;;  %v4343_v27 = vld [vmem:[%s20273_s6 + $0xec] sm:$0xf]  ;;  %4340 = vst [vmem:[#allocation3 + $0xf0] sm:$0xf] %v4339_v25 }
 0x15f   :  { %4342 = vst [vmem:[#allocation3 + $0xf4] sm:$0xf] %v4341_v26  ;;  %4344 = vst [vmem:[#allocation3 + $0xf8] sm:$0xf] %v4343_v27  ;;  %v4345_v28 = vld [vmem:[%s20273_s6 + $0x108] sm:$0xf] }
 0x160   :  { %v4347_v29 = vld [vmem:[%s20273_s6 + $0xf0] sm:$0xf]  ;;  %v4349_v30 = vld [vmem:[%s20273_s6 + $0x10c] sm:$0xf]  ;;  %4346 = vst [vmem:[#allocation3 + $0xfc] sm:$0xf] %v4345_v28 }
 0x161   :  { %4348 = vst [vmem:[#allocation3 + $0x100] sm:$0xf] %v4347_v29  ;;  %4350 = vst [vmem:[#allocation3 + $0x104] sm:$0xf] %v4349_v30  ;;  %v4351_v31 = vld [vmem:[%s20273_s6 + $0xf4] sm:$0xf] }
 0x162   :  { %v4353_v32 = vld [vmem:[%s20273_s6 + $0x110] sm:$0xf]  ;;  %v4355_v33 = vld [vmem:[%s20273_s6 + $0xf8] sm:$0xf]  ;;  %4352 = vst [vmem:[#allocation3 + $0x108] sm:$0xf] %v4351_v31 }
 0x163   :  { %4354 = vst [vmem:[#allocation3 + $0x10c] sm:$0xf] %v4353_v32  ;;  %4356 = vst [vmem:[#allocation3 + $0x110] sm:$0xf] %v4355_v33  ;;  %v4361_v35 = vld [vmem:[%s20273_s6 + $0x134] sm:$0xf] }
 0x164   :  { %v4363_v36 = vld [vmem:[%s20273_s6 + $0x11c] sm:$0xf]  ;;  %4358 = vst [vmem:[#allocation3 + $0x114] sm:$0xff] %v4357_v34   ;;  %4362 = vst [vmem:[#allocation3 + $0x11c] sm:$0xf] %v4361_v35  ;;  %v4413_v60 = vld [vmem:[%s20273_s6 + $0x184] sm:$0xff]  }
 0x165   :  { %4364 = vst [vmem:[#allocation3 + $0x120] sm:$0xf] %v4363_v36  ;;  %v4365_v37 = vld [vmem:[%s20273_s6 + $0x138] sm:$0xf]  ;;  %v4367_v38 = vld [vmem:[%s20273_s6 + $0x120] sm:$0xf] }
 0x166   :  { %v4369_v39 = vld [vmem:[%s20273_s6 + $0x13c] sm:$0xf]  ;;  %4366 = vst [vmem:[#allocation3 + $0x124] sm:$0xf] %v4365_v37  ;;  %4368 = vst [vmem:[#allocation3 + $0x128] sm:$0xf] %v4367_v38 }
 0x167   :  { %4370 = vst [vmem:[#allocation3 + $0x12c] sm:$0xf] %v4369_v39  ;;  %v4371_v40 = vld [vmem:[%s20273_s6 + $0x124] sm:$0xf]  ;;  %v4373_v41 = vld [vmem:[%s20273_s6 + $0x140] sm:$0xf] }
 0x168   :  { %v4375_v42 = vld [vmem:[%s20273_s6 + $0x128] sm:$0xf]  ;;  %4372 = vst [vmem:[#allocation3 + $0x130] sm:$0xf] %v4371_v40  ;;  %4374 = vst [vmem:[#allocation3 + $0x134] sm:$0xf] %v4373_v41 }
 0x169   :  { %4376 = vst [vmem:[#allocation3 + $0x138] sm:$0xf] %v4375_v42  ;;  %v4377_v43 = vld [vmem:[%s20273_s6 + $0x144] sm:$0xf]  ;;  %v4379_v44 = vld [vmem:[%s20273_s6 + $0x12c] sm:$0xf] }
 0x16a   :  { %v4381_v45 = vld [vmem:[%s20273_s6 + $0x148] sm:$0xf]  ;;  %4378 = vst [vmem:[#allocation3 + $0x13c] sm:$0xf] %v4377_v43  ;;  %4380 = vst [vmem:[#allocation3 + $0x140] sm:$0xf] %v4379_v44 }
 0x16b   :  { %4382 = vst [vmem:[#allocation3 + $0x144] sm:$0xf] %v4381_v45  ;;  %v4383_v46 = vld [vmem:[%s20273_s6 + $0x130] sm:$0xf]  ;;  %v4389_v48 = vld [vmem:[%s20273_s6 + $0x16c] sm:$0xf] }
 0x16c   :  { %4384 = vst [vmem:[#allocation3 + $0x148] sm:$0xf] %v4383_v46  ;;  %4386 = vst [vmem:[#allocation3 + $0x14c] sm:$0xff] %v4385_v47   ;;  %v4391_v49 = vld [vmem:[%s20273_s6 + $0x154] sm:$0xf]  ;;  %v4441_v9 = vld [vmem:[%s20273_s6 + $0x1bc] sm:$0xff]  }
 0x16d   :  { %4390 = vst [vmem:[#allocation3 + $0x154] sm:$0xf] %v4389_v48  ;;  %v4393_v50 = vld [vmem:[%s20273_s6 + $0x170] sm:$0xf]  ;;  %v4395_v51 = vld [vmem:[%s20273_s6 + $0x158] sm:$0xf] }
 0x16e   :  { %4392 = vst [vmem:[#allocation3 + $0x158] sm:$0xf] %v4391_v49  ;;  %4394 = vst [vmem:[#allocation3 + $0x15c] sm:$0xf] %v4393_v50  ;;  %v4397_v52 = vld [vmem:[%s20273_s6 + $0x174] sm:$0xf] }
 0x16f   :  { %4396 = vst [vmem:[#allocation3 + $0x160] sm:$0xf] %v4395_v51  ;;  %v4399_v53 = vld [vmem:[%s20273_s6 + $0x15c] sm:$0xf]  ;;  %v4401_v54 = vld [vmem:[%s20273_s6 + $0x178] sm:$0xf] }
 0x170   :  { %4398 = vst [vmem:[#allocation3 + $0x164] sm:$0xf] %v4397_v52  ;;  %4400 = vst [vmem:[#allocation3 + $0x168] sm:$0xf] %v4399_v53  ;;  %v4403_v55 = vld [vmem:[%s20273_s6 + $0x160] sm:$0xf] }
 0x171   :  { %4402 = vst [vmem:[#allocation3 + $0x16c] sm:$0xf] %v4401_v54  ;;  %v4405_v56 = vld [vmem:[%s20273_s6 + $0x17c] sm:$0xf]  ;;  %v4407_v57 = vld [vmem:[%s20273_s6 + $0x164] sm:$0xf] }
 0x172   :  { %4404 = vst [vmem:[#allocation3 + $0x170] sm:$0xf] %v4403_v55  ;;  %4406 = vst [vmem:[#allocation3 + $0x174] sm:$0xf] %v4405_v56  ;;  %v4409_v58 = vld [vmem:[%s20273_s6 + $0x180] sm:$0xf] }
 0x173   :  { %4408 = vst [vmem:[#allocation3 + $0x178] sm:$0xf] %v4407_v57  ;;  %v4411_v59 = vld [vmem:[%s20273_s6 + $0x168] sm:$0xf]  ;;  %4410 = vst [vmem:[#allocation3 + $0x17c] sm:$0xf] %v4409_v58 }
 0x174   :  { %4412 = vst [vmem:[#allocation3 + $0x180] sm:$0xf] %v4411_v59  ;;  %4414 = vst [vmem:[#allocation3 + $0x184] sm:$0xff] %v4413_v60   ;;  %v4417_v61 = vld [vmem:[%s20273_s6 + $0x1a4] sm:$0xf]  ;;  %v4469_v22 = vld [vmem:[%s20273_s6 + $0x1f4] sm:$0xff]  }
 0x175   :  { %v4419_v62 = vld [vmem:[%s20273_s6 + $0x18c] sm:$0xf]  ;;  %v4421_v63 = vld [vmem:[%s20273_s6 + $0x1a8] sm:$0xf]  ;;  %4418 = vst [vmem:[#allocation3 + $0x18c] sm:$0xf] %v4417_v61 }
 0x176   :  { %4420 = vst [vmem:[#allocation3 + $0x190] sm:$0xf] %v4419_v62  ;;  %4422 = vst [vmem:[#allocation3 + $0x194] sm:$0xf] %v4421_v63  ;;  %v4423_v0 = vld [vmem:[%s20273_s6 + $0x190] sm:$0xf] }
 0x177   :  { %v4425_v1 = vld [vmem:[%s20273_s6 + $0x1ac] sm:$0xf]  ;;  %v4427_v2 = vld [vmem:[%s20273_s6 + $0x194] sm:$0xf]  ;;  %4424 = vst [vmem:[#allocation3 + $0x198] sm:$0xf] %v4423_v0 }
 0x178   :  { %4426 = vst [vmem:[#allocation3 + $0x19c] sm:$0xf] %v4425_v1  ;;  %4428 = vst [vmem:[#allocation3 + $0x1a0] sm:$0xf] %v4427_v2  ;;  %v4429_v3 = vld [vmem:[%s20273_s6 + $0x1b0] sm:$0xf] }
 0x179   :  { %v4431_v4 = vld [vmem:[%s20273_s6 + $0x198] sm:$0xf]  ;;  %v4433_v5 = vld [vmem:[%s20273_s6 + $0x1b4] sm:$0xf]  ;;  %4430 = vst [vmem:[#allocation3 + $0x1a4] sm:$0xf] %v4429_v3 }
 0x17a   :  { %4432 = vst [vmem:[#allocation3 + $0x1a8] sm:$0xf] %v4431_v4  ;;  %4434 = vst [vmem:[#allocation3 + $0x1ac] sm:$0xf] %v4433_v5  ;;  %v4435_v6 = vld [vmem:[%s20273_s6 + $0x19c] sm:$0xf] }
 0x17b   :  { %v4437_v7 = vld [vmem:[%s20273_s6 + $0x1b8] sm:$0xf]  ;;  %v4439_v8 = vld [vmem:[%s20273_s6 + $0x1a0] sm:$0xf]  ;;  %4436 = vst [vmem:[#allocation3 + $0x1b0] sm:$0xf] %v4435_v6 }
 0x17c   :  { %4438 = vst [vmem:[#allocation3 + $0x1b4] sm:$0xf] %v4437_v7  ;;  %4440 = vst [vmem:[#allocation3 + $0x1b8] sm:$0xf] %v4439_v8  ;;  %v4445_v10 = vld [vmem:[%s20273_s6 + $0x1dc] sm:$0xf] }
 0x17d   :  { %v4447_v11 = vld [vmem:[%s20273_s6 + $0x1c4] sm:$0xf]  ;;  %4442 = vst [vmem:[#allocation3 + $0x1bc] sm:$0xff] %v4441_v9   ;;  %4446 = vst [vmem:[#allocation3 + $0x1c4] sm:$0xf] %v4445_v10  ;;  %v4497_v35 = vld [vmem:[%s20273_s6 + $0x22c] sm:$0xff]  }
 0x17e   :  { %4448 = vst [vmem:[#allocation3 + $0x1c8] sm:$0xf] %v4447_v11  ;;  %v4449_v12 = vld [vmem:[%s20273_s6 + $0x1e0] sm:$0xf]  ;;  %v4451_v13 = vld [vmem:[%s20273_s6 + $0x1c8] sm:$0xf] }
 0x17f   :  { %v4453_v14 = vld [vmem:[%s20273_s6 + $0x1e4] sm:$0xf]  ;;  %4450 = vst [vmem:[#allocation3 + $0x1cc] sm:$0xf] %v4449_v12  ;;  %4452 = vst [vmem:[#allocation3 + $0x1d0] sm:$0xf] %v4451_v13 }
 0x180   :  { %4454 = vst [vmem:[#allocation3 + $0x1d4] sm:$0xf] %v4453_v14  ;;  %v4455_v15 = vld [vmem:[%s20273_s6 + $0x1cc] sm:$0xf]  ;;  %v4457_v16 = vld [vmem:[%s20273_s6 + $0x1e8] sm:$0xf] }
 0x181   :  { %v4459_v17 = vld [vmem:[%s20273_s6 + $0x1d0] sm:$0xf]  ;;  %4456 = vst [vmem:[#allocation3 + $0x1d8] sm:$0xf] %v4455_v15  ;;  %4458 = vst [vmem:[#allocation3 + $0x1dc] sm:$0xf] %v4457_v16 }
 0x182   :  { %4460 = vst [vmem:[#allocation3 + $0x1e0] sm:$0xf] %v4459_v17  ;;  %v4461_v18 = vld [vmem:[%s20273_s6 + $0x1ec] sm:$0xf]  ;;  %v4463_v19 = vld [vmem:[%s20273_s6 + $0x1d4] sm:$0xf] }
 0x183   :  { %v4465_v20 = vld [vmem:[%s20273_s6 + $0x1f0] sm:$0xf]  ;;  %4462 = vst [vmem:[#allocation3 + $0x1e4] sm:$0xf] %v4461_v18  ;;  %4464 = vst [vmem:[#allocation3 + $0x1e8] sm:$0xf] %v4463_v19 }
 0x184   :  { %4466 = vst [vmem:[#allocation3 + $0x1ec] sm:$0xf] %v4465_v20  ;;  %v4467_v21 = vld [vmem:[%s20273_s6 + $0x1d8] sm:$0xf]  ;;  %v4473_v23 = vld [vmem:[%s20273_s6 + $0x214] sm:$0xf] }
 0x185   :  { %4468 = vst [vmem:[#allocation3 + $0x1f0] sm:$0xf] %v4467_v21  ;;  %4470 = vst [vmem:[#allocation3 + $0x1f4] sm:$0xff] %v4469_v22   ;;  %v4475_v24 = vld [vmem:[%s20273_s6 + $0x1fc] sm:$0xf]  ;;  %v4525_v48 = vld [vmem:[%s20273_s6 + $0x264] sm:$0xff]  }
 0x186   :  { %4474 = vst [vmem:[#allocation3 + $0x1fc] sm:$0xf] %v4473_v23  ;;  %v4477_v25 = vld [vmem:[%s20273_s6 + $0x218] sm:$0xf]  ;;  %v4479_v26 = vld [vmem:[%s20273_s6 + $0x200] sm:$0xf] }
 0x187   :  { %4476 = vst [vmem:[#allocation3 + $0x200] sm:$0xf] %v4475_v24  ;;  %4478 = vst [vmem:[#allocation3 + $0x204] sm:$0xf] %v4477_v25  ;;  %v4481_v27 = vld [vmem:[%s20273_s6 + $0x21c] sm:$0xf] }
 0x188   :  { %4480 = vst [vmem:[#allocation3 + $0x208] sm:$0xf] %v4479_v26  ;;  %v4483_v28 = vld [vmem:[%s20273_s6 + $0x204] sm:$0xf]  ;;  %v4485_v29 = vld [vmem:[%s20273_s6 + $0x220] sm:$0xf] }
 0x189   :  { %4482 = vst [vmem:[#allocation3 + $0x20c] sm:$0xf] %v4481_v27  ;;  %4484 = vst [vmem:[#allocation3 + $0x210] sm:$0xf] %v4483_v28  ;;  %v4487_v30 = vld [vmem:[%s20273_s6 + $0x208] sm:$0xf] }
 0x18a   :  { %4486 = vst [vmem:[#allocation3 + $0x214] sm:$0xf] %v4485_v29  ;;  %v4489_v31 = vld [vmem:[%s20273_s6 + $0x224] sm:$0xf]  ;;  %v4491_v32 = vld [vmem:[%s20273_s6 + $0x20c] sm:$0xf] }
 0x18b   :  { %4488 = vst [vmem:[#allocation3 + $0x218] sm:$0xf] %v4487_v30  ;;  %4490 = vst [vmem:[#allocation3 + $0x21c] sm:$0xf] %v4489_v31  ;;  %v4493_v33 = vld [vmem:[%s20273_s6 + $0x228] sm:$0xf] }
 0x18c   :  { %4492 = vst [vmem:[#allocation3 + $0x220] sm:$0xf] %v4491_v32  ;;  %v4495_v34 = vld [vmem:[%s20273_s6 + $0x210] sm:$0xf]  ;;  %4494 = vst [vmem:[#allocation3 + $0x224] sm:$0xf] %v4493_v33 }
 0x18d   :  { %4496 = vst [vmem:[#allocation3 + $0x228] sm:$0xf] %v4495_v34  ;;  %4498 = vst [vmem:[#allocation3 + $0x22c] sm:$0xff] %v4497_v35   ;;  %v4501_v36 = vld [vmem:[%s20273_s6 + $0x24c] sm:$0xf]  ;;  %v4553_v61 = vld [vmem:[%s20273_s6 + $0x29c] sm:$0xff]  }
 0x18e   :  { %v4503_v37 = vld [vmem:[%s20273_s6 + $0x234] sm:$0xf]  ;;  %v4505_v38 = vld [vmem:[%s20273_s6 + $0x250] sm:$0xf]  ;;  %4502 = vst [vmem:[#allocation3 + $0x234] sm:$0xf] %v4501_v36 }
 0x18f   :  { %4504 = vst [vmem:[#allocation3 + $0x238] sm:$0xf] %v4503_v37  ;;  %4506 = vst [vmem:[#allocation3 + $0x23c] sm:$0xf] %v4505_v38  ;;  %v4507_v39 = vld [vmem:[%s20273_s6 + $0x238] sm:$0xf] }
 0x190   :  { %v4509_v40 = vld [vmem:[%s20273_s6 + $0x254] sm:$0xf]  ;;  %v4511_v41 = vld [vmem:[%s20273_s6 + $0x23c] sm:$0xf]  ;;  %4508 = vst [vmem:[#allocation3 + $0x240] sm:$0xf] %v4507_v39 }
 0x191   :  { %4510 = vst [vmem:[#allocation3 + $0x244] sm:$0xf] %v4509_v40  ;;  %4512 = vst [vmem:[#allocation3 + $0x248] sm:$0xf] %v4511_v41  ;;  %v4513_v42 = vld [vmem:[%s20273_s6 + $0x258] sm:$0xf] }
 0x192   :  { %v4515_v43 = vld [vmem:[%s20273_s6 + $0x240] sm:$0xf]  ;;  %v4517_v44 = vld [vmem:[%s20273_s6 + $0x25c] sm:$0xf]  ;;  %4514 = vst [vmem:[#allocation3 + $0x24c] sm:$0xf] %v4513_v42 }
 0x193   :  { %4516 = vst [vmem:[#allocation3 + $0x250] sm:$0xf] %v4515_v43  ;;  %4518 = vst [vmem:[#allocation3 + $0x254] sm:$0xf] %v4517_v44  ;;  %v4519_v45 = vld [vmem:[%s20273_s6 + $0x244] sm:$0xf] }
 0x194   :  { %v4521_v46 = vld [vmem:[%s20273_s6 + $0x260] sm:$0xf]  ;;  %v4523_v47 = vld [vmem:[%s20273_s6 + $0x248] sm:$0xf]  ;;  %4520 = vst [vmem:[#allocation3 + $0x258] sm:$0xf] %v4519_v45 }
 0x195   :  { %4522 = vst [vmem:[#allocation3 + $0x25c] sm:$0xf] %v4521_v46  ;;  %4524 = vst [vmem:[#allocation3 + $0x260] sm:$0xf] %v4523_v47  ;;  %v4529_v49 = vld [vmem:[%s20273_s6 + $0x284] sm:$0xf] }
 0x196   :  { %v4531_v50 = vld [vmem:[%s20273_s6 + $0x26c] sm:$0xf]  ;;  %4526 = vst [vmem:[#allocation3 + $0x264] sm:$0xff] %v4525_v48   ;;  %4530 = vst [vmem:[#allocation3 + $0x26c] sm:$0xf] %v4529_v49  ;;  %v4581_v10 = vld [vmem:[%s20273_s6 + $0x2d4] sm:$0xff]  }
 0x197   :  { %4532 = vst [vmem:[#allocation3 + $0x270] sm:$0xf] %v4531_v50  ;;  %v4533_v51 = vld [vmem:[%s20273_s6 + $0x288] sm:$0xf]  ;;  %v4535_v52 = vld [vmem:[%s20273_s6 + $0x270] sm:$0xf] }
 0x198   :  { %v4537_v53 = vld [vmem:[%s20273_s6 + $0x28c] sm:$0xf]  ;;  %4534 = vst [vmem:[#allocation3 + $0x274] sm:$0xf] %v4533_v51  ;;  %4536 = vst [vmem:[#allocation3 + $0x278] sm:$0xf] %v4535_v52 }
 0x199   :  { %4538 = vst [vmem:[#allocation3 + $0x27c] sm:$0xf] %v4537_v53  ;;  %v4539_v54 = vld [vmem:[%s20273_s6 + $0x274] sm:$0xf]  ;;  %v4541_v55 = vld [vmem:[%s20273_s6 + $0x290] sm:$0xf] }
 0x19a   :  { %v4543_v56 = vld [vmem:[%s20273_s6 + $0x278] sm:$0xf]  ;;  %4540 = vst [vmem:[#allocation3 + $0x280] sm:$0xf] %v4539_v54  ;;  %4542 = vst [vmem:[#allocation3 + $0x284] sm:$0xf] %v4541_v55 }
 0x19b   :  { %4544 = vst [vmem:[#allocation3 + $0x288] sm:$0xf] %v4543_v56  ;;  %v4545_v57 = vld [vmem:[%s20273_s6 + $0x294] sm:$0xf]  ;;  %v4547_v58 = vld [vmem:[%s20273_s6 + $0x27c] sm:$0xf] }
 0x19c   :  { %v4549_v59 = vld [vmem:[%s20273_s6 + $0x298] sm:$0xf]  ;;  %4546 = vst [vmem:[#allocation3 + $0x28c] sm:$0xf] %v4545_v57  ;;  %4548 = vst [vmem:[#allocation3 + $0x290] sm:$0xf] %v4547_v58 }
 0x19d   :  { %4550 = vst [vmem:[#allocation3 + $0x294] sm:$0xf] %v4549_v59  ;;  %v4551_v60 = vld [vmem:[%s20273_s6 + $0x280] sm:$0xf]  ;;  %v4557_v62 = vld [vmem:[%s20273_s6 + $0x2bc] sm:$0xf] }
 0x19e   :  { %4552 = vst [vmem:[#allocation3 + $0x298] sm:$0xf] %v4551_v60  ;;  %4554 = vst [vmem:[#allocation3 + $0x29c] sm:$0xff] %v4553_v61   ;;  %v4559_v63 = vld [vmem:[%s20273_s6 + $0x2a4] sm:$0xf]  ;;  %v4609_v23 = vld [vmem:[%s20273_s6 + $0x30c] sm:$0xff]  }
 0x19f   :  { %4558 = vst [vmem:[#allocation3 + $0x2a4] sm:$0xf] %v4557_v62  ;;  %v4561_v0 = vld [vmem:[%s20273_s6 + $0x2c0] sm:$0xf]  ;;  %v4563_v1 = vld [vmem:[%s20273_s6 + $0x2a8] sm:$0xf] }
 0x1a0   :  { %4560 = vst [vmem:[#allocation3 + $0x2a8] sm:$0xf] %v4559_v63  ;;  %4562 = vst [vmem:[#allocation3 + $0x2ac] sm:$0xf] %v4561_v0  ;;  %v4565_v2 = vld [vmem:[%s20273_s6 + $0x2c4] sm:$0xf] }
 0x1a1   :  { %4564 = vst [vmem:[#allocation3 + $0x2b0] sm:$0xf] %v4563_v1  ;;  %v4567_v3 = vld [vmem:[%s20273_s6 + $0x2ac] sm:$0xf]  ;;  %v4569_v4 = vld [vmem:[%s20273_s6 + $0x2c8] sm:$0xf] }
 0x1a2   :  { %4566 = vst [vmem:[#allocation3 + $0x2b4] sm:$0xf] %v4565_v2  ;;  %4568 = vst [vmem:[#allocation3 + $0x2b8] sm:$0xf] %v4567_v3  ;;  %v4571_v5 = vld [vmem:[%s20273_s6 + $0x2b0] sm:$0xf] }
 0x1a3   :  { %4570 = vst [vmem:[#allocation3 + $0x2bc] sm:$0xf] %v4569_v4  ;;  %v4573_v6 = vld [vmem:[%s20273_s6 + $0x2cc] sm:$0xf]  ;;  %v4575_v7 = vld [vmem:[%s20273_s6 + $0x2b4] sm:$0xf] }
 0x1a4   :  { %4572 = vst [vmem:[#allocation3 + $0x2c0] sm:$0xf] %v4571_v5  ;;  %4574 = vst [vmem:[#allocation3 + $0x2c4] sm:$0xf] %v4573_v6  ;;  %v4577_v8 = vld [vmem:[%s20273_s6 + $0x2d0] sm:$0xf] }
 0x1a5   :  { %4576 = vst [vmem:[#allocation3 + $0x2c8] sm:$0xf] %v4575_v7  ;;  %v4579_v9 = vld [vmem:[%s20273_s6 + $0x2b8] sm:$0xf]  ;;  %4578 = vst [vmem:[#allocation3 + $0x2cc] sm:$0xf] %v4577_v8 }
 0x1a6   :  { %4580 = vst [vmem:[#allocation3 + $0x2d0] sm:$0xf] %v4579_v9  ;;  %4582 = vst [vmem:[#allocation3 + $0x2d4] sm:$0xff] %v4581_v10   ;;  %v4585_v11 = vld [vmem:[%s20273_s6 + $0x2f4] sm:$0xf]  ;;  %v4637_v36 = vld [vmem:[%s20273_s6 + $0x344] sm:$0xff]  }
 0x1a7   :  { %v4587_v12 = vld [vmem:[%s20273_s6 + $0x2dc] sm:$0xf]  ;;  %v4589_v13 = vld [vmem:[%s20273_s6 + $0x2f8] sm:$0xf]  ;;  %4586 = vst [vmem:[#allocation3 + $0x2dc] sm:$0xf] %v4585_v11 }
 0x1a8   :  { %4588 = vst [vmem:[#allocation3 + $0x2e0] sm:$0xf] %v4587_v12  ;;  %4590 = vst [vmem:[#allocation3 + $0x2e4] sm:$0xf] %v4589_v13  ;;  %v4591_v14 = vld [vmem:[%s20273_s6 + $0x2e0] sm:$0xf] }
 0x1a9   :  { %v4593_v15 = vld [vmem:[%s20273_s6 + $0x2fc] sm:$0xf]  ;;  %v4595_v16 = vld [vmem:[%s20273_s6 + $0x2e4] sm:$0xf]  ;;  %4592 = vst [vmem:[#allocation3 + $0x2e8] sm:$0xf] %v4591_v14 }
 0x1aa   :  { %4594 = vst [vmem:[#allocation3 + $0x2ec] sm:$0xf] %v4593_v15  ;;  %4596 = vst [vmem:[#allocation3 + $0x2f0] sm:$0xf] %v4595_v16  ;;  %v4597_v17 = vld [vmem:[%s20273_s6 + $0x300] sm:$0xf] }
 0x1ab   :  { %v4599_v18 = vld [vmem:[%s20273_s6 + $0x2e8] sm:$0xf]  ;;  %v4601_v19 = vld [vmem:[%s20273_s6 + $0x304] sm:$0xf]  ;;  %4598 = vst [vmem:[#allocation3 + $0x2f4] sm:$0xf] %v4597_v17 }
 0x1ac   :  { %4600 = vst [vmem:[#allocation3 + $0x2f8] sm:$0xf] %v4599_v18  ;;  %4602 = vst [vmem:[#allocation3 + $0x2fc] sm:$0xf] %v4601_v19  ;;  %v4603_v20 = vld [vmem:[%s20273_s6 + $0x2ec] sm:$0xf] }
 0x1ad   :  { %v4605_v21 = vld [vmem:[%s20273_s6 + $0x308] sm:$0xf]  ;;  %v4607_v22 = vld [vmem:[%s20273_s6 + $0x2f0] sm:$0xf]  ;;  %4604 = vst [vmem:[#allocation3 + $0x300] sm:$0xf] %v4603_v20 }
 0x1ae   :  { %4606 = vst [vmem:[#allocation3 + $0x304] sm:$0xf] %v4605_v21  ;;  %4608 = vst [vmem:[#allocation3 + $0x308] sm:$0xf] %v4607_v22  ;;  %v4613_v24 = vld [vmem:[%s20273_s6 + $0x32c] sm:$0xf] }
 0x1af   :  { %v4615_v25 = vld [vmem:[%s20273_s6 + $0x314] sm:$0xf]  ;;  %4610 = vst [vmem:[#allocation3 + $0x30c] sm:$0xff] %v4609_v23   ;;  %4614 = vst [vmem:[#allocation3 + $0x314] sm:$0xf] %v4613_v24  ;;  %v4665_v49 = vld [vmem:[%s20273_s6 + $0x37c] sm:$0xff]  }
 0x1b0   :  { %4616 = vst [vmem:[#allocation3 + $0x318] sm:$0xf] %v4615_v25  ;;  %v4617_v26 = vld [vmem:[%s20273_s6 + $0x330] sm:$0xf]  ;;  %v4619_v27 = vld [vmem:[%s20273_s6 + $0x318] sm:$0xf] }
 0x1b1   :  { %v4621_v28 = vld [vmem:[%s20273_s6 + $0x334] sm:$0xf]  ;;  %4618 = vst [vmem:[#allocation3 + $0x31c] sm:$0xf] %v4617_v26  ;;  %4620 = vst [vmem:[#allocation3 + $0x320] sm:$0xf] %v4619_v27 }
 0x1b2   :  { %4622 = vst [vmem:[#allocation3 + $0x324] sm:$0xf] %v4621_v28  ;;  %v4623_v29 = vld [vmem:[%s20273_s6 + $0x31c] sm:$0xf]  ;;  %v4625_v30 = vld [vmem:[%s20273_s6 + $0x338] sm:$0xf] }
 0x1b3   :  { %v4627_v31 = vld [vmem:[%s20273_s6 + $0x320] sm:$0xf]  ;;  %4624 = vst [vmem:[#allocation3 + $0x328] sm:$0xf] %v4623_v29  ;;  %4626 = vst [vmem:[#allocation3 + $0x32c] sm:$0xf] %v4625_v30 }
 0x1b4   :  { %4628 = vst [vmem:[#allocation3 + $0x330] sm:$0xf] %v4627_v31  ;;  %v4629_v32 = vld [vmem:[%s20273_s6 + $0x33c] sm:$0xf]  ;;  %v4631_v33 = vld [vmem:[%s20273_s6 + $0x324] sm:$0xf] }
 0x1b5   :  { %v4633_v34 = vld [vmem:[%s20273_s6 + $0x340] sm:$0xf]  ;;  %4630 = vst [vmem:[#allocation3 + $0x334] sm:$0xf] %v4629_v32  ;;  %4632 = vst [vmem:[#allocation3 + $0x338] sm:$0xf] %v4631_v33 }
 0x1b6   :  { %4634 = vst [vmem:[#allocation3 + $0x33c] sm:$0xf] %v4633_v34  ;;  %v4635_v35 = vld [vmem:[%s20273_s6 + $0x328] sm:$0xf]  ;;  %v4641_v37 = vld [vmem:[%s20273_s6 + $0x364] sm:$0xf] }
 0x1b7   :  { %4636 = vst [vmem:[#allocation3 + $0x340] sm:$0xf] %v4635_v35  ;;  %4638 = vst [vmem:[#allocation3 + $0x344] sm:$0xff] %v4637_v36   ;;  %v4643_v38 = vld [vmem:[%s20273_s6 + $0x34c] sm:$0xf]  ;;  %v4693_v62 = vld [vmem:[%s20273_s6 + $0x3b4] sm:$0xff]  }
 0x1b8   :  { %4642 = vst [vmem:[#allocation3 + $0x34c] sm:$0xf] %v4641_v37  ;;  %v4645_v39 = vld [vmem:[%s20273_s6 + $0x368] sm:$0xf]  ;;  %v4647_v40 = vld [vmem:[%s20273_s6 + $0x350] sm:$0xf] }
 0x1b9   :  { %4644 = vst [vmem:[#allocation3 + $0x350] sm:$0xf] %v4643_v38  ;;  %4646 = vst [vmem:[#allocation3 + $0x354] sm:$0xf] %v4645_v39  ;;  %v4649_v41 = vld [vmem:[%s20273_s6 + $0x36c] sm:$0xf] }
 0x1ba   :  { %4648 = vst [vmem:[#allocation3 + $0x358] sm:$0xf] %v4647_v40  ;;  %v4651_v42 = vld [vmem:[%s20273_s6 + $0x354] sm:$0xf]  ;;  %v4653_v43 = vld [vmem:[%s20273_s6 + $0x370] sm:$0xf] }
 0x1bb   :  { %4650 = vst [vmem:[#allocation3 + $0x35c] sm:$0xf] %v4649_v41  ;;  %4652 = vst [vmem:[#allocation3 + $0x360] sm:$0xf] %v4651_v42  ;;  %v4655_v44 = vld [vmem:[%s20273_s6 + $0x358] sm:$0xf] }
 0x1bc   :  { %4654 = vst [vmem:[#allocation3 + $0x364] sm:$0xf] %v4653_v43  ;;  %v4657_v45 = vld [vmem:[%s20273_s6 + $0x374] sm:$0xf]  ;;  %v4659_v46 = vld [vmem:[%s20273_s6 + $0x35c] sm:$0xf] }
 0x1bd   :  { %4656 = vst [vmem:[#allocation3 + $0x368] sm:$0xf] %v4655_v44  ;;  %4658 = vst [vmem:[#allocation3 + $0x36c] sm:$0xf] %v4657_v45  ;;  %v4661_v47 = vld [vmem:[%s20273_s6 + $0x378] sm:$0xf] }
 0x1be   :  { %4660 = vst [vmem:[#allocation3 + $0x370] sm:$0xf] %v4659_v46  ;;  %v4663_v48 = vld [vmem:[%s20273_s6 + $0x360] sm:$0xf]  ;;  %4662 = vst [vmem:[#allocation3 + $0x374] sm:$0xf] %v4661_v47 }
 0x1bf   :  { %4664 = vst [vmem:[#allocation3 + $0x378] sm:$0xf] %v4663_v48  ;;  %4666 = vst [vmem:[#allocation3 + $0x37c] sm:$0xff] %v4665_v49   ;;  %v4669_v50 = vld [vmem:[%s20273_s6 + $0x39c] sm:$0xf]  ;;  %v4721_v11 = vld [vmem:[%s20273_s6 + $0x3ec] sm:$0xff]  }
 0x1c0   :  { %v4671_v51 = vld [vmem:[%s20273_s6 + $0x384] sm:$0xf]  ;;  %v4673_v52 = vld [vmem:[%s20273_s6 + $0x3a0] sm:$0xf]  ;;  %4670 = vst [vmem:[#allocation3 + $0x384] sm:$0xf] %v4669_v50 }
 0x1c1   :  { %4672 = vst [vmem:[#allocation3 + $0x388] sm:$0xf] %v4671_v51  ;;  %4674 = vst [vmem:[#allocation3 + $0x38c] sm:$0xf] %v4673_v52  ;;  %v4675_v53 = vld [vmem:[%s20273_s6 + $0x388] sm:$0xf] }
 0x1c2   :  { %v4677_v54 = vld [vmem:[%s20273_s6 + $0x3a4] sm:$0xf]  ;;  %v4679_v55 = vld [vmem:[%s20273_s6 + $0x38c] sm:$0xf]  ;;  %4676 = vst [vmem:[#allocation3 + $0x390] sm:$0xf] %v4675_v53 }
 0x1c3   :  { %4678 = vst [vmem:[#allocation3 + $0x394] sm:$0xf] %v4677_v54  ;;  %4680 = vst [vmem:[#allocation3 + $0x398] sm:$0xf] %v4679_v55  ;;  %v4681_v56 = vld [vmem:[%s20273_s6 + $0x3a8] sm:$0xf] }
 0x1c4   :  { %v4683_v57 = vld [vmem:[%s20273_s6 + $0x390] sm:$0xf]  ;;  %v4685_v58 = vld [vmem:[%s20273_s6 + $0x3ac] sm:$0xf]  ;;  %4682 = vst [vmem:[#allocation3 + $0x39c] sm:$0xf] %v4681_v56 }
 0x1c5   :  { %4684 = vst [vmem:[#allocation3 + $0x3a0] sm:$0xf] %v4683_v57  ;;  %4686 = vst [vmem:[#allocation3 + $0x3a4] sm:$0xf] %v4685_v58  ;;  %v4687_v59 = vld [vmem:[%s20273_s6 + $0x394] sm:$0xf] }
 0x1c6   :  { %v4689_v60 = vld [vmem:[%s20273_s6 + $0x3b0] sm:$0xf]  ;;  %v4691_v61 = vld [vmem:[%s20273_s6 + $0x398] sm:$0xf]  ;;  %4688 = vst [vmem:[#allocation3 + $0x3a8] sm:$0xf] %v4687_v59 }
 0x1c7   :  { %4690 = vst [vmem:[#allocation3 + $0x3ac] sm:$0xf] %v4689_v60  ;;  %4692 = vst [vmem:[#allocation3 + $0x3b0] sm:$0xf] %v4691_v61  ;;  %v4697_v63 = vld [vmem:[%s20273_s6 + $0x3d4] sm:$0xf] }
 0x1c8   :  { %v4699_v0 = vld [vmem:[%s20273_s6 + $0x3bc] sm:$0xf]  ;;  %4694 = vst [vmem:[#allocation3 + $0x3b4] sm:$0xff] %v4693_v62   ;;  %4698 = vst [vmem:[#allocation3 + $0x3bc] sm:$0xf] %v4697_v63  ;;  %v4749_v24 = vld [vmem:[%s20273_s6 + $0x424] sm:$0xff]  }
 0x1c9   :  { %4700 = vst [vmem:[#allocation3 + $0x3c0] sm:$0xf] %v4699_v0  ;;  %v4701_v1 = vld [vmem:[%s20273_s6 + $0x3d8] sm:$0xf]  ;;  %v4703_v2 = vld [vmem:[%s20273_s6 + $0x3c0] sm:$0xf] }
 0x1ca   :  { %v4705_v3 = vld [vmem:[%s20273_s6 + $0x3dc] sm:$0xf]  ;;  %4702 = vst [vmem:[#allocation3 + $0x3c4] sm:$0xf] %v4701_v1  ;;  %4704 = vst [vmem:[#allocation3 + $0x3c8] sm:$0xf] %v4703_v2 }
 0x1cb   :  { %4706 = vst [vmem:[#allocation3 + $0x3cc] sm:$0xf] %v4705_v3  ;;  %v4707_v4 = vld [vmem:[%s20273_s6 + $0x3c4] sm:$0xf]  ;;  %v4709_v5 = vld [vmem:[%s20273_s6 + $0x3e0] sm:$0xf] }
 0x1cc   :  { %v4711_v6 = vld [vmem:[%s20273_s6 + $0x3c8] sm:$0xf]  ;;  %4708 = vst [vmem:[#allocation3 + $0x3d0] sm:$0xf] %v4707_v4  ;;  %4710 = vst [vmem:[#allocation3 + $0x3d4] sm:$0xf] %v4709_v5 }
 0x1cd   :  { %4712 = vst [vmem:[#allocation3 + $0x3d8] sm:$0xf] %v4711_v6  ;;  %v4713_v7 = vld [vmem:[%s20273_s6 + $0x3e4] sm:$0xf]  ;;  %v4715_v8 = vld [vmem:[%s20273_s6 + $0x3cc] sm:$0xf] }
 0x1ce   :  { %v4717_v9 = vld [vmem:[%s20273_s6 + $0x3e8] sm:$0xf]  ;;  %4714 = vst [vmem:[#allocation3 + $0x3dc] sm:$0xf] %v4713_v7  ;;  %4716 = vst [vmem:[#allocation3 + $0x3e0] sm:$0xf] %v4715_v8 }
 0x1cf   :  { %4718 = vst [vmem:[#allocation3 + $0x3e4] sm:$0xf] %v4717_v9  ;;  %v4719_v10 = vld [vmem:[%s20273_s6 + $0x3d0] sm:$0xf]  ;;  %v4725_v12 = vld [vmem:[%s20273_s6 + $0x40c] sm:$0xf] }
 0x1d0   :  { %4720 = vst [vmem:[#allocation3 + $0x3e8] sm:$0xf] %v4719_v10  ;;  %4722 = vst [vmem:[#allocation3 + $0x3ec] sm:$0xff] %v4721_v11   ;;  %v4727_v13 = vld [vmem:[%s20273_s6 + $0x3f4] sm:$0xf]  ;;  %v4777_v37 = vld [vmem:[%s20273_s6 + $0x45c] sm:$0xff]  }
 0x1d1   :  { %4726 = vst [vmem:[#allocation3 + $0x3f4] sm:$0xf] %v4725_v12  ;;  %v4729_v14 = vld [vmem:[%s20273_s6 + $0x410] sm:$0xf]  ;;  %v4731_v15 = vld [vmem:[%s20273_s6 + $0x3f8] sm:$0xf] }
 0x1d2   :  { %4728 = vst [vmem:[#allocation3 + $0x3f8] sm:$0xf] %v4727_v13  ;;  %4730 = vst [vmem:[#allocation3 + $0x3fc] sm:$0xf] %v4729_v14  ;;  %v4733_v16 = vld [vmem:[%s20273_s6 + $0x414] sm:$0xf] }
 0x1d3   :  { %4732 = vst [vmem:[#allocation3 + $0x400] sm:$0xf] %v4731_v15  ;;  %v4735_v17 = vld [vmem:[%s20273_s6 + $0x3fc] sm:$0xf]  ;;  %v4737_v18 = vld [vmem:[%s20273_s6 + $0x418] sm:$0xf] }
 0x1d4   :  { %4734 = vst [vmem:[#allocation3 + $0x404] sm:$0xf] %v4733_v16  ;;  %4736 = vst [vmem:[#allocation3 + $0x408] sm:$0xf] %v4735_v17  ;;  %v4739_v19 = vld [vmem:[%s20273_s6 + $0x400] sm:$0xf] }
 0x1d5   :  { %4738 = vst [vmem:[#allocation3 + $0x40c] sm:$0xf] %v4737_v18  ;;  %v4741_v20 = vld [vmem:[%s20273_s6 + $0x41c] sm:$0xf]  ;;  %v4743_v21 = vld [vmem:[%s20273_s6 + $0x404] sm:$0xf] }
 0x1d6   :  { %4740 = vst [vmem:[#allocation3 + $0x410] sm:$0xf] %v4739_v19  ;;  %4742 = vst [vmem:[#allocation3 + $0x414] sm:$0xf] %v4741_v20  ;;  %v4745_v22 = vld [vmem:[%s20273_s6 + $0x420] sm:$0xf] }
 0x1d7   :  { %4744 = vst [vmem:[#allocation3 + $0x418] sm:$0xf] %v4743_v21  ;;  %v4747_v23 = vld [vmem:[%s20273_s6 + $0x408] sm:$0xf]  ;;  %4746 = vst [vmem:[#allocation3 + $0x41c] sm:$0xf] %v4745_v22 }
 0x1d8   :  { %4748 = vst [vmem:[#allocation3 + $0x420] sm:$0xf] %v4747_v23  ;;  %4750 = vst [vmem:[#allocation3 + $0x424] sm:$0xff] %v4749_v24   ;;  %v4753_v25 = vld [vmem:[%s20273_s6 + $0x444] sm:$0xf]  ;;  %v4805_v50 = vld [vmem:[%s20273_s6 + $0x494] sm:$0xff]  }
 0x1d9   :  { %v4755_v26 = vld [vmem:[%s20273_s6 + $0x42c] sm:$0xf]  ;;  %v4757_v27 = vld [vmem:[%s20273_s6 + $0x448] sm:$0xf]  ;;  %4754 = vst [vmem:[#allocation3 + $0x42c] sm:$0xf] %v4753_v25 }
 0x1da   :  { %4756 = vst [vmem:[#allocation3 + $0x430] sm:$0xf] %v4755_v26  ;;  %4758 = vst [vmem:[#allocation3 + $0x434] sm:$0xf] %v4757_v27  ;;  %v4759_v28 = vld [vmem:[%s20273_s6 + $0x430] sm:$0xf] }
 0x1db   :  { %v4761_v29 = vld [vmem:[%s20273_s6 + $0x44c] sm:$0xf]  ;;  %v4763_v30 = vld [vmem:[%s20273_s6 + $0x434] sm:$0xf]  ;;  %4760 = vst [vmem:[#allocation3 + $0x438] sm:$0xf] %v4759_v28 }
 0x1dc   :  { %4762 = vst [vmem:[#allocation3 + $0x43c] sm:$0xf] %v4761_v29  ;;  %4764 = vst [vmem:[#allocation3 + $0x440] sm:$0xf] %v4763_v30  ;;  %v4765_v31 = vld [vmem:[%s20273_s6 + $0x450] sm:$0xf] }
 0x1dd   :  { %v4767_v32 = vld [vmem:[%s20273_s6 + $0x438] sm:$0xf]  ;;  %v4769_v33 = vld [vmem:[%s20273_s6 + $0x454] sm:$0xf]  ;;  %4766 = vst [vmem:[#allocation3 + $0x444] sm:$0xf] %v4765_v31 }
 0x1de   :  { %4768 = vst [vmem:[#allocation3 + $0x448] sm:$0xf] %v4767_v32  ;;  %4770 = vst [vmem:[#allocation3 + $0x44c] sm:$0xf] %v4769_v33  ;;  %v4771_v34 = vld [vmem:[%s20273_s6 + $0x43c] sm:$0xf] }
 0x1df   :  { %v4773_v35 = vld [vmem:[%s20273_s6 + $0x458] sm:$0xf]  ;;  %v4775_v36 = vld [vmem:[%s20273_s6 + $0x440] sm:$0xf]  ;;  %4772 = vst [vmem:[#allocation3 + $0x450] sm:$0xf] %v4771_v34 }
 0x1e0   :  { %4774 = vst [vmem:[#allocation3 + $0x454] sm:$0xf] %v4773_v35  ;;  %4776 = vst [vmem:[#allocation3 + $0x458] sm:$0xf] %v4775_v36  ;;  %v4781_v38 = vld [vmem:[%s20273_s6 + $0x47c] sm:$0xf] }
 0x1e1   :  { %v4783_v39 = vld [vmem:[%s20273_s6 + $0x464] sm:$0xf]  ;;  %4778 = vst [vmem:[#allocation3 + $0x45c] sm:$0xff] %v4777_v37   ;;  %4782 = vst [vmem:[#allocation3 + $0x464] sm:$0xf] %v4781_v38  ;;  %v4833_v63 = vld [vmem:[%s20273_s6 + $0x4cc] sm:$0xff]  }
 0x1e2   :  { %4784 = vst [vmem:[#allocation3 + $0x468] sm:$0xf] %v4783_v39  ;;  %v4785_v40 = vld [vmem:[%s20273_s6 + $0x480] sm:$0xf]  ;;  %v4787_v41 = vld [vmem:[%s20273_s6 + $0x468] sm:$0xf] }
 0x1e3   :  { %v4789_v42 = vld [vmem:[%s20273_s6 + $0x484] sm:$0xf]  ;;  %4786 = vst [vmem:[#allocation3 + $0x46c] sm:$0xf] %v4785_v40  ;;  %4788 = vst [vmem:[#allocation3 + $0x470] sm:$0xf] %v4787_v41 }
 0x1e4   :  { %4790 = vst [vmem:[#allocation3 + $0x474] sm:$0xf] %v4789_v42  ;;  %v4791_v43 = vld [vmem:[%s20273_s6 + $0x46c] sm:$0xf]  ;;  %v4793_v44 = vld [vmem:[%s20273_s6 + $0x488] sm:$0xf] }
 0x1e5   :  { %v4795_v45 = vld [vmem:[%s20273_s6 + $0x470] sm:$0xf]  ;;  %4792 = vst [vmem:[#allocation3 + $0x478] sm:$0xf] %v4791_v43  ;;  %4794 = vst [vmem:[#allocation3 + $0x47c] sm:$0xf] %v4793_v44 }
 0x1e6   :  { %4796 = vst [vmem:[#allocation3 + $0x480] sm:$0xf] %v4795_v45  ;;  %v4797_v46 = vld [vmem:[%s20273_s6 + $0x48c] sm:$0xf]  ;;  %v4799_v47 = vld [vmem:[%s20273_s6 + $0x474] sm:$0xf] }
 0x1e7   :  { %v4801_v48 = vld [vmem:[%s20273_s6 + $0x490] sm:$0xf]  ;;  %4798 = vst [vmem:[#allocation3 + $0x484] sm:$0xf] %v4797_v46  ;;  %4800 = vst [vmem:[#allocation3 + $0x488] sm:$0xf] %v4799_v47 }
 0x1e8   :  { %4802 = vst [vmem:[#allocation3 + $0x48c] sm:$0xf] %v4801_v48  ;;  %v4803_v49 = vld [vmem:[%s20273_s6 + $0x478] sm:$0xf]  ;;  %v4809_v51 = vld [vmem:[%s20273_s6 + $0x4b4] sm:$0xf] }
 0x1e9   :  { %4804 = vst [vmem:[#allocation3 + $0x490] sm:$0xf] %v4803_v49  ;;  %4806 = vst [vmem:[#allocation3 + $0x494] sm:$0xff] %v4805_v50   ;;  %v4811_v52 = vld [vmem:[%s20273_s6 + $0x49c] sm:$0xf]  ;;  %v4861_v12 = vld [vmem:[%s20273_s6 + $0x504] sm:$0xff]  }
 0x1ea   :  { %4810 = vst [vmem:[#allocation3 + $0x49c] sm:$0xf] %v4809_v51  ;;  %v4813_v53 = vld [vmem:[%s20273_s6 + $0x4b8] sm:$0xf]  ;;  %v4815_v54 = vld [vmem:[%s20273_s6 + $0x4a0] sm:$0xf] }
 0x1eb   :  { %4812 = vst [vmem:[#allocation3 + $0x4a0] sm:$0xf] %v4811_v52  ;;  %4814 = vst [vmem:[#allocation3 + $0x4a4] sm:$0xf] %v4813_v53  ;;  %v4817_v55 = vld [vmem:[%s20273_s6 + $0x4bc] sm:$0xf] }
 0x1ec   :  { %4816 = vst [vmem:[#allocation3 + $0x4a8] sm:$0xf] %v4815_v54  ;;  %v4819_v56 = vld [vmem:[%s20273_s6 + $0x4a4] sm:$0xf]  ;;  %v4821_v57 = vld [vmem:[%s20273_s6 + $0x4c0] sm:$0xf] }
 0x1ed   :  { %4818 = vst [vmem:[#allocation3 + $0x4ac] sm:$0xf] %v4817_v55  ;;  %4820 = vst [vmem:[#allocation3 + $0x4b0] sm:$0xf] %v4819_v56  ;;  %v4823_v58 = vld [vmem:[%s20273_s6 + $0x4a8] sm:$0xf] }
 0x1ee   :  { %4822 = vst [vmem:[#allocation3 + $0x4b4] sm:$0xf] %v4821_v57  ;;  %v4825_v59 = vld [vmem:[%s20273_s6 + $0x4c4] sm:$0xf]  ;;  %v4827_v60 = vld [vmem:[%s20273_s6 + $0x4ac] sm:$0xf] }
 0x1ef   :  { %4824 = vst [vmem:[#allocation3 + $0x4b8] sm:$0xf] %v4823_v58  ;;  %4826 = vst [vmem:[#allocation3 + $0x4bc] sm:$0xf] %v4825_v59  ;;  %v4829_v61 = vld [vmem:[%s20273_s6 + $0x4c8] sm:$0xf] }
 0x1f0   :  { %4828 = vst [vmem:[#allocation3 + $0x4c0] sm:$0xf] %v4827_v60  ;;  %v4831_v62 = vld [vmem:[%s20273_s6 + $0x4b0] sm:$0xf]  ;;  %4830 = vst [vmem:[#allocation3 + $0x4c4] sm:$0xf] %v4829_v61 }
 0x1f1   :  { %4832 = vst [vmem:[#allocation3 + $0x4c8] sm:$0xf] %v4831_v62  ;;  %4834 = vst [vmem:[#allocation3 + $0x4cc] sm:$0xff] %v4833_v63   ;;  %v4837_v0 = vld [vmem:[%s20273_s6 + $0x4ec] sm:$0xf]  ;;  %v4889_v25 = vld [vmem:[%s20273_s6 + $0x53c] sm:$0xff]  }
 0x1f2   :  { %v4839_v1 = vld [vmem:[%s20273_s6 + $0x4d4] sm:$0xf]  ;;  %v4841_v2 = vld [vmem:[%s20273_s6 + $0x4f0] sm:$0xf]  ;;  %4838 = vst [vmem:[#allocation3 + $0x4d4] sm:$0xf] %v4837_v0 }
 0x1f3   :  { %4840 = vst [vmem:[#allocation3 + $0x4d8] sm:$0xf] %v4839_v1  ;;  %4842 = vst [vmem:[#allocation3 + $0x4dc] sm:$0xf] %v4841_v2  ;;  %v4843_v3 = vld [vmem:[%s20273_s6 + $0x4d8] sm:$0xf] }
 0x1f4   :  { %v4845_v4 = vld [vmem:[%s20273_s6 + $0x4f4] sm:$0xf]  ;;  %v4847_v5 = vld [vmem:[%s20273_s6 + $0x4dc] sm:$0xf]  ;;  %4844 = vst [vmem:[#allocation3 + $0x4e0] sm:$0xf] %v4843_v3 }
 0x1f5   :  { %4846 = vst [vmem:[#allocation3 + $0x4e4] sm:$0xf] %v4845_v4  ;;  %4848 = vst [vmem:[#allocation3 + $0x4e8] sm:$0xf] %v4847_v5  ;;  %v4849_v6 = vld [vmem:[%s20273_s6 + $0x4f8] sm:$0xf] }
 0x1f6   :  { %v4851_v7 = vld [vmem:[%s20273_s6 + $0x4e0] sm:$0xf]  ;;  %v4853_v8 = vld [vmem:[%s20273_s6 + $0x4fc] sm:$0xf]  ;;  %4850 = vst [vmem:[#allocation3 + $0x4ec] sm:$0xf] %v4849_v6 }
 0x1f7   :  { %4852 = vst [vmem:[#allocation3 + $0x4f0] sm:$0xf] %v4851_v7  ;;  %4854 = vst [vmem:[#allocation3 + $0x4f4] sm:$0xf] %v4853_v8  ;;  %v4855_v9 = vld [vmem:[%s20273_s6 + $0x4e4] sm:$0xf] }
 0x1f8   :  { %v4857_v10 = vld [vmem:[%s20273_s6 + $0x500] sm:$0xf]  ;;  %v4859_v11 = vld [vmem:[%s20273_s6 + $0x4e8] sm:$0xf]  ;;  %4856 = vst [vmem:[#allocation3 + $0x4f8] sm:$0xf] %v4855_v9 }
 0x1f9   :  { %4858 = vst [vmem:[#allocation3 + $0x4fc] sm:$0xf] %v4857_v10  ;;  %4860 = vst [vmem:[#allocation3 + $0x500] sm:$0xf] %v4859_v11  ;;  %v4865_v13 = vld [vmem:[%s20273_s6 + $0x524] sm:$0xf] }
 0x1fa   :  { %v4867_v14 = vld [vmem:[%s20273_s6 + $0x50c] sm:$0xf]  ;;  %4862 = vst [vmem:[#allocation3 + $0x504] sm:$0xff] %v4861_v12   ;;  %4866 = vst [vmem:[#allocation3 + $0x50c] sm:$0xf] %v4865_v13  ;;  %v4917_v38 = vld [vmem:[%s20273_s6 + $0x574] sm:$0xff]  }
 0x1fb   :  { %4868 = vst [vmem:[#allocation3 + $0x510] sm:$0xf] %v4867_v14  ;;  %v4869_v15 = vld [vmem:[%s20273_s6 + $0x528] sm:$0xf]  ;;  %v4871_v16 = vld [vmem:[%s20273_s6 + $0x510] sm:$0xf] }
 0x1fc   :  { %v4873_v17 = vld [vmem:[%s20273_s6 + $0x52c] sm:$0xf]  ;;  %4870 = vst [vmem:[#allocation3 + $0x514] sm:$0xf] %v4869_v15  ;;  %4872 = vst [vmem:[#allocation3 + $0x518] sm:$0xf] %v4871_v16 }
 0x1fd   :  { %4874 = vst [vmem:[#allocation3 + $0x51c] sm:$0xf] %v4873_v17  ;;  %v4875_v18 = vld [vmem:[%s20273_s6 + $0x514] sm:$0xf]  ;;  %v4877_v19 = vld [vmem:[%s20273_s6 + $0x530] sm:$0xf] }
 0x1fe   :  { %v4879_v20 = vld [vmem:[%s20273_s6 + $0x518] sm:$0xf]  ;;  %4876 = vst [vmem:[#allocation3 + $0x520] sm:$0xf] %v4875_v18  ;;  %4878 = vst [vmem:[#allocation3 + $0x524] sm:$0xf] %v4877_v19 }
 0x1ff   :  { %4880 = vst [vmem:[#allocation3 + $0x528] sm:$0xf] %v4879_v20  ;;  %v4881_v21 = vld [vmem:[%s20273_s6 + $0x534] sm:$0xf]  ;;  %v4883_v22 = vld [vmem:[%s20273_s6 + $0x51c] sm:$0xf] }
 0x200   :  { %v4885_v23 = vld [vmem:[%s20273_s6 + $0x538] sm:$0xf]  ;;  %4882 = vst [vmem:[#allocation3 + $0x52c] sm:$0xf] %v4881_v21  ;;  %4884 = vst [vmem:[#allocation3 + $0x530] sm:$0xf] %v4883_v22 }
 0x201   :  { %4886 = vst [vmem:[#allocation3 + $0x534] sm:$0xf] %v4885_v23  ;;  %v4887_v24 = vld [vmem:[%s20273_s6 + $0x520] sm:$0xf]  ;;  %v4893_v26 = vld [vmem:[%s20273_s6 + $0x55c] sm:$0xf] }
 0x202   :  { %4888 = vst [vmem:[#allocation3 + $0x538] sm:$0xf] %v4887_v24  ;;  %4890 = vst [vmem:[#allocation3 + $0x53c] sm:$0xff] %v4889_v25   ;;  %v4895_v27 = vld [vmem:[%s20273_s6 + $0x544] sm:$0xf]  ;;  %v4945_v51 = vld [vmem:[%s20273_s6 + $0x5ac] sm:$0xff]  }
 0x203   :  { %4894 = vst [vmem:[#allocation3 + $0x544] sm:$0xf] %v4893_v26  ;;  %v4897_v28 = vld [vmem:[%s20273_s6 + $0x560] sm:$0xf]  ;;  %v4899_v29 = vld [vmem:[%s20273_s6 + $0x548] sm:$0xf] }
 0x204   :  { %4896 = vst [vmem:[#allocation3 + $0x548] sm:$0xf] %v4895_v27  ;;  %4898 = vst [vmem:[#allocation3 + $0x54c] sm:$0xf] %v4897_v28  ;;  %v4901_v30 = vld [vmem:[%s20273_s6 + $0x564] sm:$0xf] }
 0x205   :  { %4900 = vst [vmem:[#allocation3 + $0x550] sm:$0xf] %v4899_v29  ;;  %v4903_v31 = vld [vmem:[%s20273_s6 + $0x54c] sm:$0xf]  ;;  %v4905_v32 = vld [vmem:[%s20273_s6 + $0x568] sm:$0xf] }
 0x206   :  { %4902 = vst [vmem:[#allocation3 + $0x554] sm:$0xf] %v4901_v30  ;;  %4904 = vst [vmem:[#allocation3 + $0x558] sm:$0xf] %v4903_v31  ;;  %v4907_v33 = vld [vmem:[%s20273_s6 + $0x550] sm:$0xf] }
 0x207   :  { %4906 = vst [vmem:[#allocation3 + $0x55c] sm:$0xf] %v4905_v32  ;;  %v4909_v34 = vld [vmem:[%s20273_s6 + $0x56c] sm:$0xf]  ;;  %v4911_v35 = vld [vmem:[%s20273_s6 + $0x554] sm:$0xf] }
 0x208   :  { %4908 = vst [vmem:[#allocation3 + $0x560] sm:$0xf] %v4907_v33  ;;  %4910 = vst [vmem:[#allocation3 + $0x564] sm:$0xf] %v4909_v34  ;;  %v4913_v36 = vld [vmem:[%s20273_s6 + $0x570] sm:$0xf] }
 0x209   :  { %4912 = vst [vmem:[#allocation3 + $0x568] sm:$0xf] %v4911_v35  ;;  %v4915_v37 = vld [vmem:[%s20273_s6 + $0x558] sm:$0xf]  ;;  %4914 = vst [vmem:[#allocation3 + $0x56c] sm:$0xf] %v4913_v36 }
 0x20a   :  { %4916 = vst [vmem:[#allocation3 + $0x570] sm:$0xf] %v4915_v37  ;;  %4918 = vst [vmem:[#allocation3 + $0x574] sm:$0xff] %v4917_v38   ;;  %v4921_v39 = vld [vmem:[%s20273_s6 + $0x594] sm:$0xf]  ;;  %v4973_v0 = vld [vmem:[%s20273_s6 + $0x5e4] sm:$0xff]  }
 0x20b   :  { %v4923_v40 = vld [vmem:[%s20273_s6 + $0x57c] sm:$0xf]  ;;  %v4925_v41 = vld [vmem:[%s20273_s6 + $0x598] sm:$0xf]  ;;  %4922 = vst [vmem:[#allocation3 + $0x57c] sm:$0xf] %v4921_v39 }
 0x20c   :  { %4924 = vst [vmem:[#allocation3 + $0x580] sm:$0xf] %v4923_v40  ;;  %4926 = vst [vmem:[#allocation3 + $0x584] sm:$0xf] %v4925_v41  ;;  %v4927_v42 = vld [vmem:[%s20273_s6 + $0x580] sm:$0xf] }
 0x20d   :  { %v4929_v43 = vld [vmem:[%s20273_s6 + $0x59c] sm:$0xf]  ;;  %v4931_v44 = vld [vmem:[%s20273_s6 + $0x584] sm:$0xf]  ;;  %4928 = vst [vmem:[#allocation3 + $0x588] sm:$0xf] %v4927_v42 }
 0x20e   :  { %4930 = vst [vmem:[#allocation3 + $0x58c] sm:$0xf] %v4929_v43  ;;  %4932 = vst [vmem:[#allocation3 + $0x590] sm:$0xf] %v4931_v44  ;;  %v4933_v45 = vld [vmem:[%s20273_s6 + $0x5a0] sm:$0xf] }
 0x20f   :  { %v4935_v46 = vld [vmem:[%s20273_s6 + $0x588] sm:$0xf]  ;;  %v4937_v47 = vld [vmem:[%s20273_s6 + $0x5a4] sm:$0xf]  ;;  %4934 = vst [vmem:[#allocation3 + $0x594] sm:$0xf] %v4933_v45 }
 0x210   :  { %4936 = vst [vmem:[#allocation3 + $0x598] sm:$0xf] %v4935_v46  ;;  %4938 = vst [vmem:[#allocation3 + $0x59c] sm:$0xf] %v4937_v47  ;;  %v4939_v48 = vld [vmem:[%s20273_s6 + $0x58c] sm:$0xf] }
 0x211   :  { %v4941_v49 = vld [vmem:[%s20273_s6 + $0x5a8] sm:$0xf]  ;;  %v4943_v50 = vld [vmem:[%s20273_s6 + $0x590] sm:$0xf]  ;;  %4940 = vst [vmem:[#allocation3 + $0x5a0] sm:$0xf] %v4939_v48 }
 0x212   :  { %4942 = vst [vmem:[#allocation3 + $0x5a4] sm:$0xf] %v4941_v49  ;;  %4944 = vst [vmem:[#allocation3 + $0x5a8] sm:$0xf] %v4943_v50  ;;  %v4949_v52 = vld [vmem:[%s20273_s6 + $0x5cc] sm:$0xf] }
 0x213   :  { %v4951_v53 = vld [vmem:[%s20273_s6 + $0x5b4] sm:$0xf]  ;;  %4946 = vst [vmem:[#allocation3 + $0x5ac] sm:$0xff] %v4945_v51   ;;  %4950 = vst [vmem:[#allocation3 + $0x5b4] sm:$0xf] %v4949_v52  ;;  %v5001_v13 = vld [vmem:[%s20273_s6 + $0x61c] sm:$0xff]  }
 0x214   :  { %4952 = vst [vmem:[#allocation3 + $0x5b8] sm:$0xf] %v4951_v53  ;;  %v4953_v54 = vld [vmem:[%s20273_s6 + $0x5d0] sm:$0xf]  ;;  %v4955_v55 = vld [vmem:[%s20273_s6 + $0x5b8] sm:$0xf] }
 0x215   :  { %v4957_v56 = vld [vmem:[%s20273_s6 + $0x5d4] sm:$0xf]  ;;  %4954 = vst [vmem:[#allocation3 + $0x5bc] sm:$0xf] %v4953_v54  ;;  %4956 = vst [vmem:[#allocation3 + $0x5c0] sm:$0xf] %v4955_v55 }
 0x216   :  { %4958 = vst [vmem:[#allocation3 + $0x5c4] sm:$0xf] %v4957_v56  ;;  %v4959_v57 = vld [vmem:[%s20273_s6 + $0x5bc] sm:$0xf]  ;;  %v4961_v58 = vld [vmem:[%s20273_s6 + $0x5d8] sm:$0xf] }
 0x217   :  { %v4963_v59 = vld [vmem:[%s20273_s6 + $0x5c0] sm:$0xf]  ;;  %4960 = vst [vmem:[#allocation3 + $0x5c8] sm:$0xf] %v4959_v57  ;;  %4962 = vst [vmem:[#allocation3 + $0x5cc] sm:$0xf] %v4961_v58 }
 0x218   :  { %4964 = vst [vmem:[#allocation3 + $0x5d0] sm:$0xf] %v4963_v59  ;;  %v4965_v60 = vld [vmem:[%s20273_s6 + $0x5dc] sm:$0xf]  ;;  %v4967_v61 = vld [vmem:[%s20273_s6 + $0x5c4] sm:$0xf] }
 0x219   :  { %v4969_v62 = vld [vmem:[%s20273_s6 + $0x5e0] sm:$0xf]  ;;  %4966 = vst [vmem:[#allocation3 + $0x5d4] sm:$0xf] %v4965_v60  ;;  %4968 = vst [vmem:[#allocation3 + $0x5d8] sm:$0xf] %v4967_v61 }
 0x21a   :  { %4970 = vst [vmem:[#allocation3 + $0x5dc] sm:$0xf] %v4969_v62  ;;  %v4971_v63 = vld [vmem:[%s20273_s6 + $0x5c8] sm:$0xf]  ;;  %v4977_v1 = vld [vmem:[%s20273_s6 + $0x604] sm:$0xf] }
 0x21b   :  { %4972 = vst [vmem:[#allocation3 + $0x5e0] sm:$0xf] %v4971_v63  ;;  %4974 = vst [vmem:[#allocation3 + $0x5e4] sm:$0xff] %v4973_v0   ;;  %v4979_v2 = vld [vmem:[%s20273_s6 + $0x5ec] sm:$0xf]  ;;  %v5029_v26 = vld [vmem:[%s20273_s6 + $0x654] sm:$0xff]  }
 0x21c   :  { %4978 = vst [vmem:[#allocation3 + $0x5ec] sm:$0xf] %v4977_v1  ;;  %v4981_v3 = vld [vmem:[%s20273_s6 + $0x608] sm:$0xf]  ;;  %v4983_v4 = vld [vmem:[%s20273_s6 + $0x5f0] sm:$0xf] }
 0x21d   :  { %4980 = vst [vmem:[#allocation3 + $0x5f0] sm:$0xf] %v4979_v2  ;;  %4982 = vst [vmem:[#allocation3 + $0x5f4] sm:$0xf] %v4981_v3  ;;  %v4985_v5 = vld [vmem:[%s20273_s6 + $0x60c] sm:$0xf] }
 0x21e   :  { %4984 = vst [vmem:[#allocation3 + $0x5f8] sm:$0xf] %v4983_v4  ;;  %v4987_v6 = vld [vmem:[%s20273_s6 + $0x5f4] sm:$0xf]  ;;  %v4989_v7 = vld [vmem:[%s20273_s6 + $0x610] sm:$0xf] }
 0x21f   :  { %4986 = vst [vmem:[#allocation3 + $0x5fc] sm:$0xf] %v4985_v5  ;;  %4988 = vst [vmem:[#allocation3 + $0x600] sm:$0xf] %v4987_v6  ;;  %v4991_v8 = vld [vmem:[%s20273_s6 + $0x5f8] sm:$0xf] }
 0x220   :  { %4990 = vst [vmem:[#allocation3 + $0x604] sm:$0xf] %v4989_v7  ;;  %v4993_v9 = vld [vmem:[%s20273_s6 + $0x614] sm:$0xf]  ;;  %v4995_v10 = vld [vmem:[%s20273_s6 + $0x5fc] sm:$0xf] }
 0x221   :  { %4992 = vst [vmem:[#allocation3 + $0x608] sm:$0xf] %v4991_v8  ;;  %4994 = vst [vmem:[#allocation3 + $0x60c] sm:$0xf] %v4993_v9  ;;  %v4997_v11 = vld [vmem:[%s20273_s6 + $0x618] sm:$0xf] }
 0x222   :  { %4996 = vst [vmem:[#allocation3 + $0x610] sm:$0xf] %v4995_v10  ;;  %v4999_v12 = vld [vmem:[%s20273_s6 + $0x600] sm:$0xf]  ;;  %4998 = vst [vmem:[#allocation3 + $0x614] sm:$0xf] %v4997_v11 }
 0x223   :  { %5000 = vst [vmem:[#allocation3 + $0x618] sm:$0xf] %v4999_v12  ;;  %5002 = vst [vmem:[#allocation3 + $0x61c] sm:$0xff] %v5001_v13   ;;  %v5005_v14 = vld [vmem:[%s20273_s6 + $0x63c] sm:$0xf]  ;;  %v5057_v39 = vld [vmem:[%s20273_s6 + $0x68c] sm:$0xff]  }
 0x224   :  { %v5007_v15 = vld [vmem:[%s20273_s6 + $0x624] sm:$0xf]  ;;  %v5009_v16 = vld [vmem:[%s20273_s6 + $0x640] sm:$0xf]  ;;  %5006 = vst [vmem:[#allocation3 + $0x624] sm:$0xf] %v5005_v14 }
 0x225   :  { %5008 = vst [vmem:[#allocation3 + $0x628] sm:$0xf] %v5007_v15  ;;  %5010 = vst [vmem:[#allocation3 + $0x62c] sm:$0xf] %v5009_v16  ;;  %v5011_v17 = vld [vmem:[%s20273_s6 + $0x628] sm:$0xf] }
 0x226   :  { %v5013_v18 = vld [vmem:[%s20273_s6 + $0x644] sm:$0xf]  ;;  %v5015_v19 = vld [vmem:[%s20273_s6 + $0x62c] sm:$0xf]  ;;  %5012 = vst [vmem:[#allocation3 + $0x630] sm:$0xf] %v5011_v17 }
 0x227   :  { %5014 = vst [vmem:[#allocation3 + $0x634] sm:$0xf] %v5013_v18  ;;  %5016 = vst [vmem:[#allocation3 + $0x638] sm:$0xf] %v5015_v19  ;;  %v5017_v20 = vld [vmem:[%s20273_s6 + $0x648] sm:$0xf] }
 0x228   :  { %v5019_v21 = vld [vmem:[%s20273_s6 + $0x630] sm:$0xf]  ;;  %v5021_v22 = vld [vmem:[%s20273_s6 + $0x64c] sm:$0xf]  ;;  %5018 = vst [vmem:[#allocation3 + $0x63c] sm:$0xf] %v5017_v20 }
 0x229   :  { %5020 = vst [vmem:[#allocation3 + $0x640] sm:$0xf] %v5019_v21  ;;  %5022 = vst [vmem:[#allocation3 + $0x644] sm:$0xf] %v5021_v22  ;;  %v5023_v23 = vld [vmem:[%s20273_s6 + $0x634] sm:$0xf] }
 0x22a   :  { %v5025_v24 = vld [vmem:[%s20273_s6 + $0x650] sm:$0xf]  ;;  %v5027_v25 = vld [vmem:[%s20273_s6 + $0x638] sm:$0xf]  ;;  %5024 = vst [vmem:[#allocation3 + $0x648] sm:$0xf] %v5023_v23 }
 0x22b   :  { %5026 = vst [vmem:[#allocation3 + $0x64c] sm:$0xf] %v5025_v24  ;;  %5028 = vst [vmem:[#allocation3 + $0x650] sm:$0xf] %v5027_v25  ;;  %v5033_v27 = vld [vmem:[%s20273_s6 + $0x674] sm:$0xf] }
 0x22c   :  { %v5035_v28 = vld [vmem:[%s20273_s6 + $0x65c] sm:$0xf]  ;;  %5030 = vst [vmem:[#allocation3 + $0x654] sm:$0xff] %v5029_v26   ;;  %5034 = vst [vmem:[#allocation3 + $0x65c] sm:$0xf] %v5033_v27  ;;  %v5085_v52 = vld [vmem:[%s20273_s6 + $0x6c4] sm:$0xff]  }
 0x22d   :  { %5036 = vst [vmem:[#allocation3 + $0x660] sm:$0xf] %v5035_v28  ;;  %v5037_v29 = vld [vmem:[%s20273_s6 + $0x678] sm:$0xf]  ;;  %v5039_v30 = vld [vmem:[%s20273_s6 + $0x660] sm:$0xf] }
 0x22e   :  { %v5041_v31 = vld [vmem:[%s20273_s6 + $0x67c] sm:$0xf]  ;;  %5038 = vst [vmem:[#allocation3 + $0x664] sm:$0xf] %v5037_v29  ;;  %5040 = vst [vmem:[#allocation3 + $0x668] sm:$0xf] %v5039_v30 }
 0x22f   :  { %5042 = vst [vmem:[#allocation3 + $0x66c] sm:$0xf] %v5041_v31  ;;  %v5043_v32 = vld [vmem:[%s20273_s6 + $0x664] sm:$0xf]  ;;  %v5045_v33 = vld [vmem:[%s20273_s6 + $0x680] sm:$0xf] }
 0x230   :  { %v5047_v34 = vld [vmem:[%s20273_s6 + $0x668] sm:$0xf]  ;;  %5044 = vst [vmem:[#allocation3 + $0x670] sm:$0xf] %v5043_v32  ;;  %5046 = vst [vmem:[#allocation3 + $0x674] sm:$0xf] %v5045_v33 }
 0x231   :  { %5048 = vst [vmem:[#allocation3 + $0x678] sm:$0xf] %v5047_v34  ;;  %v5049_v35 = vld [vmem:[%s20273_s6 + $0x684] sm:$0xf]  ;;  %v5051_v36 = vld [vmem:[%s20273_s6 + $0x66c] sm:$0xf] }
 0x232   :  { %v5053_v37 = vld [vmem:[%s20273_s6 + $0x688] sm:$0xf]  ;;  %5050 = vst [vmem:[#allocation3 + $0x67c] sm:$0xf] %v5049_v35  ;;  %5052 = vst [vmem:[#allocation3 + $0x680] sm:$0xf] %v5051_v36 }
 0x233   :  { %5054 = vst [vmem:[#allocation3 + $0x684] sm:$0xf] %v5053_v37  ;;  %v5055_v38 = vld [vmem:[%s20273_s6 + $0x670] sm:$0xf]  ;;  %v5061_v40 = vld [vmem:[%s20273_s6 + $0x6ac] sm:$0xf] }
 0x234   :  { %5056 = vst [vmem:[#allocation3 + $0x688] sm:$0xf] %v5055_v38  ;;  %5058 = vst [vmem:[#allocation3 + $0x68c] sm:$0xff] %v5057_v39   ;;  %v5063_v41 = vld [vmem:[%s20273_s6 + $0x694] sm:$0xf]  ;;  %v5113_v1 = vld [vmem:[%s20273_s6 + $0x6fc] sm:$0xff]  }
 0x235   :  { %5062 = vst [vmem:[#allocation3 + $0x694] sm:$0xf] %v5061_v40  ;;  %v5065_v42 = vld [vmem:[%s20273_s6 + $0x6b0] sm:$0xf]  ;;  %v5067_v43 = vld [vmem:[%s20273_s6 + $0x698] sm:$0xf] }
 0x236   :  { %5064 = vst [vmem:[#allocation3 + $0x698] sm:$0xf] %v5063_v41  ;;  %5066 = vst [vmem:[#allocation3 + $0x69c] sm:$0xf] %v5065_v42  ;;  %v5069_v44 = vld [vmem:[%s20273_s6 + $0x6b4] sm:$0xf] }
 0x237   :  { %5068 = vst [vmem:[#allocation3 + $0x6a0] sm:$0xf] %v5067_v43  ;;  %v5071_v45 = vld [vmem:[%s20273_s6 + $0x69c] sm:$0xf]  ;;  %v5073_v46 = vld [vmem:[%s20273_s6 + $0x6b8] sm:$0xf] }
 0x238   :  { %5070 = vst [vmem:[#allocation3 + $0x6a4] sm:$0xf] %v5069_v44  ;;  %5072 = vst [vmem:[#allocation3 + $0x6a8] sm:$0xf] %v5071_v45  ;;  %v5075_v47 = vld [vmem:[%s20273_s6 + $0x6a0] sm:$0xf] }
 0x239   :  { %5074 = vst [vmem:[#allocation3 + $0x6ac] sm:$0xf] %v5073_v46  ;;  %v5077_v48 = vld [vmem:[%s20273_s6 + $0x6bc] sm:$0xf]  ;;  %v5079_v49 = vld [vmem:[%s20273_s6 + $0x6a4] sm:$0xf] }
 0x23a   :  { %5076 = vst [vmem:[#allocation3 + $0x6b0] sm:$0xf] %v5075_v47  ;;  %5078 = vst [vmem:[#allocation3 + $0x6b4] sm:$0xf] %v5077_v48  ;;  %v5081_v50 = vld [vmem:[%s20273_s6 + $0x6c0] sm:$0xf] }
 0x23b   :  { %5080 = vst [vmem:[#allocation3 + $0x6b8] sm:$0xf] %v5079_v49  ;;  %v5083_v51 = vld [vmem:[%s20273_s6 + $0x6a8] sm:$0xf]  ;;  %5082 = vst [vmem:[#allocation3 + $0x6bc] sm:$0xf] %v5081_v50 }
 0x23c   :  { %5084 = vst [vmem:[#allocation3 + $0x6c0] sm:$0xf] %v5083_v51  ;;  %5086 = vst [vmem:[#allocation3 + $0x6c4] sm:$0xff] %v5085_v52   ;;  %v5089_v53 = vld [vmem:[%s20273_s6 + $0x6e4] sm:$0xf]  ;;  %v5141_v14 = vld [vmem:[%s20273_s6 + $0x734] sm:$0xff]  }
 0x23d   :  { %v5091_v54 = vld [vmem:[%s20273_s6 + $0x6cc] sm:$0xf]  ;;  %v5093_v55 = vld [vmem:[%s20273_s6 + $0x6e8] sm:$0xf]  ;;  %5090 = vst [vmem:[#allocation3 + $0x6cc] sm:$0xf] %v5089_v53 }
 0x23e   :  { %5092 = vst [vmem:[#allocation3 + $0x6d0] sm:$0xf] %v5091_v54  ;;  %5094 = vst [vmem:[#allocation3 + $0x6d4] sm:$0xf] %v5093_v55  ;;  %v5095_v56 = vld [vmem:[%s20273_s6 + $0x6d0] sm:$0xf] }
 0x23f   :  { %v5097_v57 = vld [vmem:[%s20273_s6 + $0x6ec] sm:$0xf]  ;;  %v5099_v58 = vld [vmem:[%s20273_s6 + $0x6d4] sm:$0xf]  ;;  %5096 = vst [vmem:[#allocation3 + $0x6d8] sm:$0xf] %v5095_v56 }
 0x240   :  { %5098 = vst [vmem:[#allocation3 + $0x6dc] sm:$0xf] %v5097_v57  ;;  %5100 = vst [vmem:[#allocation3 + $0x6e0] sm:$0xf] %v5099_v58  ;;  %v5101_v59 = vld [vmem:[%s20273_s6 + $0x6f0] sm:$0xf] }
 0x241   :  { %v5103_v60 = vld [vmem:[%s20273_s6 + $0x6d8] sm:$0xf]  ;;  %v5105_v61 = vld [vmem:[%s20273_s6 + $0x6f4] sm:$0xf]  ;;  %5102 = vst [vmem:[#allocation3 + $0x6e4] sm:$0xf] %v5101_v59 }
 0x242   :  { %5104 = vst [vmem:[#allocation3 + $0x6e8] sm:$0xf] %v5103_v60  ;;  %5106 = vst [vmem:[#allocation3 + $0x6ec] sm:$0xf] %v5105_v61  ;;  %v5107_v62 = vld [vmem:[%s20273_s6 + $0x6dc] sm:$0xf] }
 0x243   :  { %v5109_v63 = vld [vmem:[%s20273_s6 + $0x6f8] sm:$0xf]  ;;  %v5111_v0 = vld [vmem:[%s20273_s6 + $0x6e0] sm:$0xf]  ;;  %5108 = vst [vmem:[#allocation3 + $0x6f0] sm:$0xf] %v5107_v62 }
 0x244   :  { %5110 = vst [vmem:[#allocation3 + $0x6f4] sm:$0xf] %v5109_v63  ;;  %5112 = vst [vmem:[#allocation3 + $0x6f8] sm:$0xf] %v5111_v0  ;;  %v5117_v2 = vld [vmem:[%s20273_s6 + $0x71c] sm:$0xf] }
 0x245   :  { %v5119_v3 = vld [vmem:[%s20273_s6 + $0x704] sm:$0xf]  ;;  %5114 = vst [vmem:[#allocation3 + $0x6fc] sm:$0xff] %v5113_v1   ;;  %5118 = vst [vmem:[#allocation3 + $0x704] sm:$0xf] %v5117_v2  ;;  %v5169_v27 = vld [vmem:[%s20273_s6 + $0x76c] sm:$0xff]  }
 0x246   :  { %5120 = vst [vmem:[#allocation3 + $0x708] sm:$0xf] %v5119_v3  ;;  %v5121_v4 = vld [vmem:[%s20273_s6 + $0x720] sm:$0xf]  ;;  %v5123_v5 = vld [vmem:[%s20273_s6 + $0x708] sm:$0xf] }
 0x247   :  { %v5125_v6 = vld [vmem:[%s20273_s6 + $0x724] sm:$0xf]  ;;  %5122 = vst [vmem:[#allocation3 + $0x70c] sm:$0xf] %v5121_v4  ;;  %5124 = vst [vmem:[#allocation3 + $0x710] sm:$0xf] %v5123_v5 }
 0x248   :  { %5126 = vst [vmem:[#allocation3 + $0x714] sm:$0xf] %v5125_v6  ;;  %v5127_v7 = vld [vmem:[%s20273_s6 + $0x70c] sm:$0xf]  ;;  %v5129_v8 = vld [vmem:[%s20273_s6 + $0x728] sm:$0xf] }
 0x249   :  { %v5131_v9 = vld [vmem:[%s20273_s6 + $0x710] sm:$0xf]  ;;  %5128 = vst [vmem:[#allocation3 + $0x718] sm:$0xf] %v5127_v7  ;;  %5130 = vst [vmem:[#allocation3 + $0x71c] sm:$0xf] %v5129_v8 }
 0x24a   :  { %5132 = vst [vmem:[#allocation3 + $0x720] sm:$0xf] %v5131_v9  ;;  %v5133_v10 = vld [vmem:[%s20273_s6 + $0x72c] sm:$0xf]  ;;  %v5135_v11 = vld [vmem:[%s20273_s6 + $0x714] sm:$0xf] }
 0x24b   :  { %v5137_v12 = vld [vmem:[%s20273_s6 + $0x730] sm:$0xf]  ;;  %5134 = vst [vmem:[#allocation3 + $0x724] sm:$0xf] %v5133_v10  ;;  %5136 = vst [vmem:[#allocation3 + $0x728] sm:$0xf] %v5135_v11 }
 0x24c   :  { %5138 = vst [vmem:[#allocation3 + $0x72c] sm:$0xf] %v5137_v12  ;;  %v5139_v13 = vld [vmem:[%s20273_s6 + $0x718] sm:$0xf]  ;;  %v5145_v15 = vld [vmem:[%s20273_s6 + $0x754] sm:$0xf] }
 0x24d   :  { %5140 = vst [vmem:[#allocation3 + $0x730] sm:$0xf] %v5139_v13  ;;  %5142 = vst [vmem:[#allocation3 + $0x734] sm:$0xff] %v5141_v14   ;;  %v5147_v16 = vld [vmem:[%s20273_s6 + $0x73c] sm:$0xf]  ;;  %v5197_v40 = vld [vmem:[%s20273_s6 + $0x7a4] sm:$0xff]  }
 0x24e   :  { %5146 = vst [vmem:[#allocation3 + $0x73c] sm:$0xf] %v5145_v15  ;;  %v5149_v17 = vld [vmem:[%s20273_s6 + $0x758] sm:$0xf]  ;;  %v5151_v18 = vld [vmem:[%s20273_s6 + $0x740] sm:$0xf] }
 0x24f   :  { %5148 = vst [vmem:[#allocation3 + $0x740] sm:$0xf] %v5147_v16  ;;  %5150 = vst [vmem:[#allocation3 + $0x744] sm:$0xf] %v5149_v17  ;;  %v5153_v19 = vld [vmem:[%s20273_s6 + $0x75c] sm:$0xf] }
 0x250   :  { %5152 = vst [vmem:[#allocation3 + $0x748] sm:$0xf] %v5151_v18  ;;  %v5155_v20 = vld [vmem:[%s20273_s6 + $0x744] sm:$0xf]  ;;  %v5157_v21 = vld [vmem:[%s20273_s6 + $0x760] sm:$0xf] }
 0x251   :  { %5154 = vst [vmem:[#allocation3 + $0x74c] sm:$0xf] %v5153_v19  ;;  %5156 = vst [vmem:[#allocation3 + $0x750] sm:$0xf] %v5155_v20  ;;  %v5159_v22 = vld [vmem:[%s20273_s6 + $0x748] sm:$0xf] }
 0x252   :  { %5158 = vst [vmem:[#allocation3 + $0x754] sm:$0xf] %v5157_v21  ;;  %v5161_v23 = vld [vmem:[%s20273_s6 + $0x764] sm:$0xf]  ;;  %v5163_v24 = vld [vmem:[%s20273_s6 + $0x74c] sm:$0xf] }
 0x253   :  { %5160 = vst [vmem:[#allocation3 + $0x758] sm:$0xf] %v5159_v22  ;;  %5162 = vst [vmem:[#allocation3 + $0x75c] sm:$0xf] %v5161_v23  ;;  %v5165_v25 = vld [vmem:[%s20273_s6 + $0x768] sm:$0xf] }
 0x254   :  { %5164 = vst [vmem:[#allocation3 + $0x760] sm:$0xf] %v5163_v24  ;;  %v5167_v26 = vld [vmem:[%s20273_s6 + $0x750] sm:$0xf]  ;;  %5166 = vst [vmem:[#allocation3 + $0x764] sm:$0xf] %v5165_v25 }
 0x255   :  { %5168 = vst [vmem:[#allocation3 + $0x768] sm:$0xf] %v5167_v26  ;;  %5170 = vst [vmem:[#allocation3 + $0x76c] sm:$0xff] %v5169_v27   ;;  %v5173_v28 = vld [vmem:[%s20273_s6 + $0x78c] sm:$0xf]  ;;  %v5225_v53 = vld [vmem:[%s20273_s6 + $0x7dc] sm:$0xff]  }
 0x256   :  { %v5175_v29 = vld [vmem:[%s20273_s6 + $0x774] sm:$0xf]  ;;  %v5177_v30 = vld [vmem:[%s20273_s6 + $0x790] sm:$0xf]  ;;  %5174 = vst [vmem:[#allocation3 + $0x774] sm:$0xf] %v5173_v28 }
 0x257   :  { %5176 = vst [vmem:[#allocation3 + $0x778] sm:$0xf] %v5175_v29  ;;  %5178 = vst [vmem:[#allocation3 + $0x77c] sm:$0xf] %v5177_v30  ;;  %v5179_v31 = vld [vmem:[%s20273_s6 + $0x778] sm:$0xf] }
 0x258   :  { %v5181_v32 = vld [vmem:[%s20273_s6 + $0x794] sm:$0xf]  ;;  %v5183_v33 = vld [vmem:[%s20273_s6 + $0x77c] sm:$0xf]  ;;  %5180 = vst [vmem:[#allocation3 + $0x780] sm:$0xf] %v5179_v31 }
 0x259   :  { %5182 = vst [vmem:[#allocation3 + $0x784] sm:$0xf] %v5181_v32  ;;  %5184 = vst [vmem:[#allocation3 + $0x788] sm:$0xf] %v5183_v33  ;;  %v5185_v34 = vld [vmem:[%s20273_s6 + $0x798] sm:$0xf] }
 0x25a   :  { %v5187_v35 = vld [vmem:[%s20273_s6 + $0x780] sm:$0xf]  ;;  %v5189_v36 = vld [vmem:[%s20273_s6 + $0x79c] sm:$0xf]  ;;  %5186 = vst [vmem:[#allocation3 + $0x78c] sm:$0xf] %v5185_v34 }
 0x25b   :  { %5188 = vst [vmem:[#allocation3 + $0x790] sm:$0xf] %v5187_v35  ;;  %5190 = vst [vmem:[#allocation3 + $0x794] sm:$0xf] %v5189_v36  ;;  %v5191_v37 = vld [vmem:[%s20273_s6 + $0x784] sm:$0xf] }
 0x25c   :  { %v5193_v38 = vld [vmem:[%s20273_s6 + $0x7a0] sm:$0xf]  ;;  %v5195_v39 = vld [vmem:[%s20273_s6 + $0x788] sm:$0xf]  ;;  %5192 = vst [vmem:[#allocation3 + $0x798] sm:$0xf] %v5191_v37 }
 0x25d   :  { %5194 = vst [vmem:[#allocation3 + $0x79c] sm:$0xf] %v5193_v38  ;;  %5196 = vst [vmem:[#allocation3 + $0x7a0] sm:$0xf] %v5195_v39  ;;  %v5201_v41 = vld [vmem:[%s20273_s6 + $0x7c4] sm:$0xf] }
 0x25e   :  { %v5203_v42 = vld [vmem:[%s20273_s6 + $0x7ac] sm:$0xf]  ;;  %5198 = vst [vmem:[#allocation3 + $0x7a4] sm:$0xff] %v5197_v40   ;;  %5202 = vst [vmem:[#allocation3 + $0x7ac] sm:$0xf] %v5201_v41  ;;  %v5253_v2 = vld [vmem:[%s20273_s6 + $0x814] sm:$0xff]  }
 0x25f   :  { %5204 = vst [vmem:[#allocation3 + $0x7b0] sm:$0xf] %v5203_v42  ;;  %v5205_v43 = vld [vmem:[%s20273_s6 + $0x7c8] sm:$0xf]  ;;  %v5207_v44 = vld [vmem:[%s20273_s6 + $0x7b0] sm:$0xf] }
 0x260   :  { %v5209_v45 = vld [vmem:[%s20273_s6 + $0x7cc] sm:$0xf]  ;;  %5206 = vst [vmem:[#allocation3 + $0x7b4] sm:$0xf] %v5205_v43  ;;  %5208 = vst [vmem:[#allocation3 + $0x7b8] sm:$0xf] %v5207_v44 }
 0x261   :  { %5210 = vst [vmem:[#allocation3 + $0x7bc] sm:$0xf] %v5209_v45  ;;  %v5211_v46 = vld [vmem:[%s20273_s6 + $0x7b4] sm:$0xf]  ;;  %v5213_v47 = vld [vmem:[%s20273_s6 + $0x7d0] sm:$0xf] }
 0x262   :  { %v5215_v48 = vld [vmem:[%s20273_s6 + $0x7b8] sm:$0xf]  ;;  %5212 = vst [vmem:[#allocation3 + $0x7c0] sm:$0xf] %v5211_v46  ;;  %5214 = vst [vmem:[#allocation3 + $0x7c4] sm:$0xf] %v5213_v47 }
 0x263   :  { %5216 = vst [vmem:[#allocation3 + $0x7c8] sm:$0xf] %v5215_v48  ;;  %v5217_v49 = vld [vmem:[%s20273_s6 + $0x7d4] sm:$0xf]  ;;  %v5219_v50 = vld [vmem:[%s20273_s6 + $0x7bc] sm:$0xf] }
 0x264   :  { %v5221_v51 = vld [vmem:[%s20273_s6 + $0x7d8] sm:$0xf]  ;;  %5218 = vst [vmem:[#allocation3 + $0x7cc] sm:$0xf] %v5217_v49  ;;  %5220 = vst [vmem:[#allocation3 + $0x7d0] sm:$0xf] %v5219_v50 }
 0x265   :  { %5222 = vst [vmem:[#allocation3 + $0x7d4] sm:$0xf] %v5221_v51  ;;  %v5223_v52 = vld [vmem:[%s20273_s6 + $0x7c0] sm:$0xf]  ;;  %v5229_v54 = vld [vmem:[%s20273_s6 + $0x7fc] sm:$0xf] }
 0x266   :  { %5224 = vst [vmem:[#allocation3 + $0x7d8] sm:$0xf] %v5223_v52  ;;  %5226 = vst [vmem:[#allocation3 + $0x7dc] sm:$0xff] %v5225_v53   ;;  %v5231_v55 = vld [vmem:[%s20273_s6 + $0x7e4] sm:$0xf]  ;;  %v5281_v15 = vld [vmem:[%s20273_s6 + $0x84c] sm:$0xff]  }
 0x267   :  { %5230 = vst [vmem:[#allocation3 + $0x7e4] sm:$0xf] %v5229_v54  ;;  %v5233_v56 = vld [vmem:[%s20273_s6 + $0x800] sm:$0xf]  ;;  %v5235_v57 = vld [vmem:[%s20273_s6 + $0x7e8] sm:$0xf] }
 0x268   :  { %5232 = vst [vmem:[#allocation3 + $0x7e8] sm:$0xf] %v5231_v55  ;;  %5234 = vst [vmem:[#allocation3 + $0x7ec] sm:$0xf] %v5233_v56  ;;  %v5237_v58 = vld [vmem:[%s20273_s6 + $0x804] sm:$0xf] }
 0x269   :  { %5236 = vst [vmem:[#allocation3 + $0x7f0] sm:$0xf] %v5235_v57  ;;  %v5239_v59 = vld [vmem:[%s20273_s6 + $0x7ec] sm:$0xf]  ;;  %v5241_v60 = vld [vmem:[%s20273_s6 + $0x808] sm:$0xf] }
 0x26a   :  { %5238 = vst [vmem:[#allocation3 + $0x7f4] sm:$0xf] %v5237_v58  ;;  %5240 = vst [vmem:[#allocation3 + $0x7f8] sm:$0xf] %v5239_v59  ;;  %v5243_v61 = vld [vmem:[%s20273_s6 + $0x7f0] sm:$0xf] }
 0x26b   :  { %5242 = vst [vmem:[#allocation3 + $0x7fc] sm:$0xf] %v5241_v60  ;;  %v5245_v62 = vld [vmem:[%s20273_s6 + $0x80c] sm:$0xf]  ;;  %v5247_v63 = vld [vmem:[%s20273_s6 + $0x7f4] sm:$0xf] }
 0x26c   :  { %5244 = vst [vmem:[#allocation3 + $0x800] sm:$0xf] %v5243_v61  ;;  %5246 = vst [vmem:[#allocation3 + $0x804] sm:$0xf] %v5245_v62  ;;  %v5249_v0 = vld [vmem:[%s20273_s6 + $0x810] sm:$0xf] }
 0x26d   :  { %5248 = vst [vmem:[#allocation3 + $0x808] sm:$0xf] %v5247_v63  ;;  %v5251_v1 = vld [vmem:[%s20273_s6 + $0x7f8] sm:$0xf]  ;;  %5250 = vst [vmem:[#allocation3 + $0x80c] sm:$0xf] %v5249_v0 }
 0x26e   :  { %5252 = vst [vmem:[#allocation3 + $0x810] sm:$0xf] %v5251_v1  ;;  %5254 = vst [vmem:[#allocation3 + $0x814] sm:$0xff] %v5253_v2   ;;  %v5257_v3 = vld [vmem:[%s20273_s6 + $0x834] sm:$0xf]  ;;  %v5309_v28 = vld [vmem:[%s20273_s6 + $0x884] sm:$0xff]  }
 0x26f   :  { %v5259_v4 = vld [vmem:[%s20273_s6 + $0x81c] sm:$0xf]  ;;  %v5261_v5 = vld [vmem:[%s20273_s6 + $0x838] sm:$0xf]  ;;  %5258 = vst [vmem:[#allocation3 + $0x81c] sm:$0xf] %v5257_v3 }
 0x270   :  { %5260 = vst [vmem:[#allocation3 + $0x820] sm:$0xf] %v5259_v4  ;;  %5262 = vst [vmem:[#allocation3 + $0x824] sm:$0xf] %v5261_v5  ;;  %v5263_v6 = vld [vmem:[%s20273_s6 + $0x820] sm:$0xf] }
 0x271   :  { %v5265_v7 = vld [vmem:[%s20273_s6 + $0x83c] sm:$0xf]  ;;  %v5267_v8 = vld [vmem:[%s20273_s6 + $0x824] sm:$0xf]  ;;  %5264 = vst [vmem:[#allocation3 + $0x828] sm:$0xf] %v5263_v6 }
 0x272   :  { %5266 = vst [vmem:[#allocation3 + $0x82c] sm:$0xf] %v5265_v7  ;;  %5268 = vst [vmem:[#allocation3 + $0x830] sm:$0xf] %v5267_v8  ;;  %v5269_v9 = vld [vmem:[%s20273_s6 + $0x840] sm:$0xf] }
 0x273   :  { %v5271_v10 = vld [vmem:[%s20273_s6 + $0x828] sm:$0xf]  ;;  %v5273_v11 = vld [vmem:[%s20273_s6 + $0x844] sm:$0xf]  ;;  %5270 = vst [vmem:[#allocation3 + $0x834] sm:$0xf] %v5269_v9 }
 0x274   :  { %5272 = vst [vmem:[#allocation3 + $0x838] sm:$0xf] %v5271_v10  ;;  %5274 = vst [vmem:[#allocation3 + $0x83c] sm:$0xf] %v5273_v11  ;;  %v5275_v12 = vld [vmem:[%s20273_s6 + $0x82c] sm:$0xf] }
 0x275   :  { %v5277_v13 = vld [vmem:[%s20273_s6 + $0x848] sm:$0xf]  ;;  %v5279_v14 = vld [vmem:[%s20273_s6 + $0x830] sm:$0xf]  ;;  %5276 = vst [vmem:[#allocation3 + $0x840] sm:$0xf] %v5275_v12 }
 0x276   :  { %5278 = vst [vmem:[#allocation3 + $0x844] sm:$0xf] %v5277_v13  ;;  %5280 = vst [vmem:[#allocation3 + $0x848] sm:$0xf] %v5279_v14  ;;  %v5285_v16 = vld [vmem:[%s20273_s6 + $0x86c] sm:$0xf] }
 0x277   :  { %v5287_v17 = vld [vmem:[%s20273_s6 + $0x854] sm:$0xf]  ;;  %5282 = vst [vmem:[#allocation3 + $0x84c] sm:$0xff] %v5281_v15   ;;  %5286 = vst [vmem:[#allocation3 + $0x854] sm:$0xf] %v5285_v16  ;;  %v5337_v41 = vld [vmem:[%s20273_s6 + $0x8bc] sm:$0xff]  }
 0x278   :  { %5288 = vst [vmem:[#allocation3 + $0x858] sm:$0xf] %v5287_v17  ;;  %v5289_v18 = vld [vmem:[%s20273_s6 + $0x870] sm:$0xf]  ;;  %v5291_v19 = vld [vmem:[%s20273_s6 + $0x858] sm:$0xf] }
 0x279   :  { %v5293_v20 = vld [vmem:[%s20273_s6 + $0x874] sm:$0xf]  ;;  %5290 = vst [vmem:[#allocation3 + $0x85c] sm:$0xf] %v5289_v18  ;;  %5292 = vst [vmem:[#allocation3 + $0x860] sm:$0xf] %v5291_v19 }
 0x27a   :  { %5294 = vst [vmem:[#allocation3 + $0x864] sm:$0xf] %v5293_v20  ;;  %v5295_v21 = vld [vmem:[%s20273_s6 + $0x85c] sm:$0xf]  ;;  %v5297_v22 = vld [vmem:[%s20273_s6 + $0x878] sm:$0xf] }
 0x27b   :  { %v5299_v23 = vld [vmem:[%s20273_s6 + $0x860] sm:$0xf]  ;;  %5296 = vst [vmem:[#allocation3 + $0x868] sm:$0xf] %v5295_v21  ;;  %5298 = vst [vmem:[#allocation3 + $0x86c] sm:$0xf] %v5297_v22 }
 0x27c   :  { %5300 = vst [vmem:[#allocation3 + $0x870] sm:$0xf] %v5299_v23  ;;  %v5301_v24 = vld [vmem:[%s20273_s6 + $0x87c] sm:$0xf]  ;;  %v5303_v25 = vld [vmem:[%s20273_s6 + $0x864] sm:$0xf] }
 0x27d   :  { %v5305_v26 = vld [vmem:[%s20273_s6 + $0x880] sm:$0xf]  ;;  %5302 = vst [vmem:[#allocation3 + $0x874] sm:$0xf] %v5301_v24  ;;  %5304 = vst [vmem:[#allocation3 + $0x878] sm:$0xf] %v5303_v25 }
 0x27e   :  { %5306 = vst [vmem:[#allocation3 + $0x87c] sm:$0xf] %v5305_v26  ;;  %v5307_v27 = vld [vmem:[%s20273_s6 + $0x868] sm:$0xf]  ;;  %v5313_v29 = vld [vmem:[%s20273_s6 + $0x8a4] sm:$0xf] }
 0x27f   :  { %5308 = vst [vmem:[#allocation3 + $0x880] sm:$0xf] %v5307_v27  ;;  %5310 = vst [vmem:[#allocation3 + $0x884] sm:$0xff] %v5309_v28   ;;  %v5315_v30 = vld [vmem:[%s20273_s6 + $0x88c] sm:$0xf]  ;;  %v5365_v54 = vld [vmem:[%s20273_s6 + $0x8f4] sm:$0xff]  }
 0x280   :  { %5314 = vst [vmem:[#allocation3 + $0x88c] sm:$0xf] %v5313_v29  ;;  %v5317_v31 = vld [vmem:[%s20273_s6 + $0x8a8] sm:$0xf]  ;;  %v5319_v32 = vld [vmem:[%s20273_s6 + $0x890] sm:$0xf] }
 0x281   :  { %5316 = vst [vmem:[#allocation3 + $0x890] sm:$0xf] %v5315_v30  ;;  %5318 = vst [vmem:[#allocation3 + $0x894] sm:$0xf] %v5317_v31  ;;  %v5321_v33 = vld [vmem:[%s20273_s6 + $0x8ac] sm:$0xf] }
 0x282   :  { %5320 = vst [vmem:[#allocation3 + $0x898] sm:$0xf] %v5319_v32  ;;  %v5323_v34 = vld [vmem:[%s20273_s6 + $0x894] sm:$0xf]  ;;  %v5325_v35 = vld [vmem:[%s20273_s6 + $0x8b0] sm:$0xf] }
 0x283   :  { %5322 = vst [vmem:[#allocation3 + $0x89c] sm:$0xf] %v5321_v33  ;;  %5324 = vst [vmem:[#allocation3 + $0x8a0] sm:$0xf] %v5323_v34  ;;  %v5327_v36 = vld [vmem:[%s20273_s6 + $0x898] sm:$0xf] }
 0x284   :  { %5326 = vst [vmem:[#allocation3 + $0x8a4] sm:$0xf] %v5325_v35  ;;  %v5329_v37 = vld [vmem:[%s20273_s6 + $0x8b4] sm:$0xf]  ;;  %v5331_v38 = vld [vmem:[%s20273_s6 + $0x89c] sm:$0xf] }
 0x285   :  { %5328 = vst [vmem:[#allocation3 + $0x8a8] sm:$0xf] %v5327_v36  ;;  %5330 = vst [vmem:[#allocation3 + $0x8ac] sm:$0xf] %v5329_v37  ;;  %v5333_v39 = vld [vmem:[%s20273_s6 + $0x8b8] sm:$0xf] }
 0x286   :  { %5332 = vst [vmem:[#allocation3 + $0x8b0] sm:$0xf] %v5331_v38  ;;  %v5335_v40 = vld [vmem:[%s20273_s6 + $0x8a0] sm:$0xf]  ;;  %5334 = vst [vmem:[#allocation3 + $0x8b4] sm:$0xf] %v5333_v39 }
 0x287   :  { %5336 = vst [vmem:[#allocation3 + $0x8b8] sm:$0xf] %v5335_v40  ;;  %5338 = vst [vmem:[#allocation3 + $0x8bc] sm:$0xff] %v5337_v41   ;;  %v5341_v42 = vld [vmem:[%s20273_s6 + $0x8dc] sm:$0xf]  ;;  %v5393_v3 = vld [vmem:[%s20273_s6 + $0x92c] sm:$0xff]  }
 0x288   :  { %v5343_v43 = vld [vmem:[%s20273_s6 + $0x8c4] sm:$0xf]  ;;  %v5345_v44 = vld [vmem:[%s20273_s6 + $0x8e0] sm:$0xf]  ;;  %5342 = vst [vmem:[#allocation3 + $0x8c4] sm:$0xf] %v5341_v42 }
 0x289   :  { %5344 = vst [vmem:[#allocation3 + $0x8c8] sm:$0xf] %v5343_v43  ;;  %5346 = vst [vmem:[#allocation3 + $0x8cc] sm:$0xf] %v5345_v44  ;;  %v5347_v45 = vld [vmem:[%s20273_s6 + $0x8c8] sm:$0xf] }
 0x28a   :  { %v5349_v46 = vld [vmem:[%s20273_s6 + $0x8e4] sm:$0xf]  ;;  %v5351_v47 = vld [vmem:[%s20273_s6 + $0x8cc] sm:$0xf]  ;;  %5348 = vst [vmem:[#allocation3 + $0x8d0] sm:$0xf] %v5347_v45 }
 0x28b   :  { %5350 = vst [vmem:[#allocation3 + $0x8d4] sm:$0xf] %v5349_v46  ;;  %5352 = vst [vmem:[#allocation3 + $0x8d8] sm:$0xf] %v5351_v47  ;;  %v5353_v48 = vld [vmem:[%s20273_s6 + $0x8e8] sm:$0xf] }
 0x28c   :  { %v5355_v49 = vld [vmem:[%s20273_s6 + $0x8d0] sm:$0xf]  ;;  %v5357_v50 = vld [vmem:[%s20273_s6 + $0x8ec] sm:$0xf]  ;;  %5354 = vst [vmem:[#allocation3 + $0x8dc] sm:$0xf] %v5353_v48 }
 0x28d   :  { %5356 = vst [vmem:[#allocation3 + $0x8e0] sm:$0xf] %v5355_v49  ;;  %5358 = vst [vmem:[#allocation3 + $0x8e4] sm:$0xf] %v5357_v50  ;;  %v5359_v51 = vld [vmem:[%s20273_s6 + $0x8d4] sm:$0xf] }
 0x28e   :  { %v5361_v52 = vld [vmem:[%s20273_s6 + $0x8f0] sm:$0xf]  ;;  %v5363_v53 = vld [vmem:[%s20273_s6 + $0x8d8] sm:$0xf]  ;;  %5360 = vst [vmem:[#allocation3 + $0x8e8] sm:$0xf] %v5359_v51 }
 0x28f   :  { %5362 = vst [vmem:[#allocation3 + $0x8ec] sm:$0xf] %v5361_v52  ;;  %5364 = vst [vmem:[#allocation3 + $0x8f0] sm:$0xf] %v5363_v53  ;;  %v5369_v55 = vld [vmem:[%s20273_s6 + $0x914] sm:$0xf] }
 0x290   :  { %v5371_v56 = vld [vmem:[%s20273_s6 + $0x8fc] sm:$0xf]  ;;  %5366 = vst [vmem:[#allocation3 + $0x8f4] sm:$0xff] %v5365_v54   ;;  %5370 = vst [vmem:[#allocation3 + $0x8fc] sm:$0xf] %v5369_v55  ;;  %v5421_v16 = vld [vmem:[%s20273_s6 + $0x964] sm:$0xff]  }
 0x291   :  { %5372 = vst [vmem:[#allocation3 + $0x900] sm:$0xf] %v5371_v56  ;;  %v5373_v57 = vld [vmem:[%s20273_s6 + $0x918] sm:$0xf]  ;;  %v5375_v58 = vld [vmem:[%s20273_s6 + $0x900] sm:$0xf] }
 0x292   :  { %v5377_v59 = vld [vmem:[%s20273_s6 + $0x91c] sm:$0xf]  ;;  %5374 = vst [vmem:[#allocation3 + $0x904] sm:$0xf] %v5373_v57  ;;  %5376 = vst [vmem:[#allocation3 + $0x908] sm:$0xf] %v5375_v58 }
 0x293   :  { %5378 = vst [vmem:[#allocation3 + $0x90c] sm:$0xf] %v5377_v59  ;;  %v5379_v60 = vld [vmem:[%s20273_s6 + $0x904] sm:$0xf]  ;;  %v5381_v61 = vld [vmem:[%s20273_s6 + $0x920] sm:$0xf] }
 0x294   :  { %v5383_v62 = vld [vmem:[%s20273_s6 + $0x908] sm:$0xf]  ;;  %5380 = vst [vmem:[#allocation3 + $0x910] sm:$0xf] %v5379_v60  ;;  %5382 = vst [vmem:[#allocation3 + $0x914] sm:$0xf] %v5381_v61 }
 0x295   :  { %5384 = vst [vmem:[#allocation3 + $0x918] sm:$0xf] %v5383_v62  ;;  %v5385_v63 = vld [vmem:[%s20273_s6 + $0x924] sm:$0xf]  ;;  %v5387_v0 = vld [vmem:[%s20273_s6 + $0x90c] sm:$0xf] }
 0x296   :  { %v5389_v1 = vld [vmem:[%s20273_s6 + $0x928] sm:$0xf]  ;;  %5386 = vst [vmem:[#allocation3 + $0x91c] sm:$0xf] %v5385_v63  ;;  %5388 = vst [vmem:[#allocation3 + $0x920] sm:$0xf] %v5387_v0 }
 0x297   :  { %5390 = vst [vmem:[#allocation3 + $0x924] sm:$0xf] %v5389_v1  ;;  %v5391_v2 = vld [vmem:[%s20273_s6 + $0x910] sm:$0xf]  ;;  %v5397_v4 = vld [vmem:[%s20273_s6 + $0x94c] sm:$0xf] }
 0x298   :  { %5392 = vst [vmem:[#allocation3 + $0x928] sm:$0xf] %v5391_v2  ;;  %5394 = vst [vmem:[#allocation3 + $0x92c] sm:$0xff] %v5393_v3   ;;  %v5399_v5 = vld [vmem:[%s20273_s6 + $0x934] sm:$0xf]  ;;  %v5449_v29 = vld [vmem:[%s20273_s6 + $0x99c] sm:$0xff]  }
 0x299   :  { %5398 = vst [vmem:[#allocation3 + $0x934] sm:$0xf] %v5397_v4  ;;  %v5401_v6 = vld [vmem:[%s20273_s6 + $0x950] sm:$0xf]  ;;  %v5403_v7 = vld [vmem:[%s20273_s6 + $0x938] sm:$0xf] }
 0x29a   :  { %5400 = vst [vmem:[#allocation3 + $0x938] sm:$0xf] %v5399_v5  ;;  %5402 = vst [vmem:[#allocation3 + $0x93c] sm:$0xf] %v5401_v6  ;;  %v5405_v8 = vld [vmem:[%s20273_s6 + $0x954] sm:$0xf] }
 0x29b   :  { %5404 = vst [vmem:[#allocation3 + $0x940] sm:$0xf] %v5403_v7  ;;  %v5407_v9 = vld [vmem:[%s20273_s6 + $0x93c] sm:$0xf]  ;;  %v5409_v10 = vld [vmem:[%s20273_s6 + $0x958] sm:$0xf] }
 0x29c   :  { %5406 = vst [vmem:[#allocation3 + $0x944] sm:$0xf] %v5405_v8  ;;  %5408 = vst [vmem:[#allocation3 + $0x948] sm:$0xf] %v5407_v9  ;;  %v5411_v11 = vld [vmem:[%s20273_s6 + $0x940] sm:$0xf] }
 0x29d   :  { %5410 = vst [vmem:[#allocation3 + $0x94c] sm:$0xf] %v5409_v10  ;;  %v5413_v12 = vld [vmem:[%s20273_s6 + $0x95c] sm:$0xf]  ;;  %v5415_v13 = vld [vmem:[%s20273_s6 + $0x944] sm:$0xf] }
 0x29e   :  { %5412 = vst [vmem:[#allocation3 + $0x950] sm:$0xf] %v5411_v11  ;;  %5414 = vst [vmem:[#allocation3 + $0x954] sm:$0xf] %v5413_v12  ;;  %v5417_v14 = vld [vmem:[%s20273_s6 + $0x960] sm:$0xf] }
 0x29f   :  { %5416 = vst [vmem:[#allocation3 + $0x958] sm:$0xf] %v5415_v13  ;;  %v5419_v15 = vld [vmem:[%s20273_s6 + $0x948] sm:$0xf]  ;;  %5418 = vst [vmem:[#allocation3 + $0x95c] sm:$0xf] %v5417_v14 }
 0x2a0   :  { %5420 = vst [vmem:[#allocation3 + $0x960] sm:$0xf] %v5419_v15  ;;  %5422 = vst [vmem:[#allocation3 + $0x964] sm:$0xff] %v5421_v16   ;;  %v5425_v17 = vld [vmem:[%s20273_s6 + $0x984] sm:$0xf]  ;;  %v5477_v42 = vld [vmem:[%s20273_s6 + $0x9d4] sm:$0xff]  }
 0x2a1   :  { %v5427_v18 = vld [vmem:[%s20273_s6 + $0x96c] sm:$0xf]  ;;  %v5429_v19 = vld [vmem:[%s20273_s6 + $0x988] sm:$0xf]  ;;  %5426 = vst [vmem:[#allocation3 + $0x96c] sm:$0xf] %v5425_v17 }
 0x2a2   :  { %5428 = vst [vmem:[#allocation3 + $0x970] sm:$0xf] %v5427_v18  ;;  %5430 = vst [vmem:[#allocation3 + $0x974] sm:$0xf] %v5429_v19  ;;  %v5431_v20 = vld [vmem:[%s20273_s6 + $0x970] sm:$0xf] }
 0x2a3   :  { %v5433_v21 = vld [vmem:[%s20273_s6 + $0x98c] sm:$0xf]  ;;  %v5435_v22 = vld [vmem:[%s20273_s6 + $0x974] sm:$0xf]  ;;  %5432 = vst [vmem:[#allocation3 + $0x978] sm:$0xf] %v5431_v20 }
 0x2a4   :  { %5434 = vst [vmem:[#allocation3 + $0x97c] sm:$0xf] %v5433_v21  ;;  %5436 = vst [vmem:[#allocation3 + $0x980] sm:$0xf] %v5435_v22  ;;  %v5437_v23 = vld [vmem:[%s20273_s6 + $0x990] sm:$0xf] }
 0x2a5   :  { %v5439_v24 = vld [vmem:[%s20273_s6 + $0x978] sm:$0xf]  ;;  %v5441_v25 = vld [vmem:[%s20273_s6 + $0x994] sm:$0xf]  ;;  %5438 = vst [vmem:[#allocation3 + $0x984] sm:$0xf] %v5437_v23 }
 0x2a6   :  { %5440 = vst [vmem:[#allocation3 + $0x988] sm:$0xf] %v5439_v24  ;;  %5442 = vst [vmem:[#allocation3 + $0x98c] sm:$0xf] %v5441_v25  ;;  %v5443_v26 = vld [vmem:[%s20273_s6 + $0x97c] sm:$0xf] }
 0x2a7   :  { %v5445_v27 = vld [vmem:[%s20273_s6 + $0x998] sm:$0xf]  ;;  %v5447_v28 = vld [vmem:[%s20273_s6 + $0x980] sm:$0xf]  ;;  %5444 = vst [vmem:[#allocation3 + $0x990] sm:$0xf] %v5443_v26 }
 0x2a8   :  { %5446 = vst [vmem:[#allocation3 + $0x994] sm:$0xf] %v5445_v27  ;;  %5448 = vst [vmem:[#allocation3 + $0x998] sm:$0xf] %v5447_v28  ;;  %v5453_v30 = vld [vmem:[%s20273_s6 + $0x9bc] sm:$0xf] }
 0x2a9   :  { %v5455_v31 = vld [vmem:[%s20273_s6 + $0x9a4] sm:$0xf]  ;;  %5450 = vst [vmem:[#allocation3 + $0x99c] sm:$0xff] %v5449_v29   ;;  %5454 = vst [vmem:[#allocation3 + $0x9a4] sm:$0xf] %v5453_v30  ;;  %v5505_v55 = vld [vmem:[%s20273_s6 + $0xa0c] sm:$0xff]  }
 0x2aa   :  { %5456 = vst [vmem:[#allocation3 + $0x9a8] sm:$0xf] %v5455_v31  ;;  %v5457_v32 = vld [vmem:[%s20273_s6 + $0x9c0] sm:$0xf]  ;;  %v5459_v33 = vld [vmem:[%s20273_s6 + $0x9a8] sm:$0xf] }
 0x2ab   :  { %v5461_v34 = vld [vmem:[%s20273_s6 + $0x9c4] sm:$0xf]  ;;  %5458 = vst [vmem:[#allocation3 + $0x9ac] sm:$0xf] %v5457_v32  ;;  %5460 = vst [vmem:[#allocation3 + $0x9b0] sm:$0xf] %v5459_v33 }
 0x2ac   :  { %5462 = vst [vmem:[#allocation3 + $0x9b4] sm:$0xf] %v5461_v34  ;;  %v5463_v35 = vld [vmem:[%s20273_s6 + $0x9ac] sm:$0xf]  ;;  %v5465_v36 = vld [vmem:[%s20273_s6 + $0x9c8] sm:$0xf] }
 0x2ad   :  { %v5467_v37 = vld [vmem:[%s20273_s6 + $0x9b0] sm:$0xf]  ;;  %5464 = vst [vmem:[#allocation3 + $0x9b8] sm:$0xf] %v5463_v35  ;;  %5466 = vst [vmem:[#allocation3 + $0x9bc] sm:$0xf] %v5465_v36 }
 0x2ae   :  { %5468 = vst [vmem:[#allocation3 + $0x9c0] sm:$0xf] %v5467_v37  ;;  %v5469_v38 = vld [vmem:[%s20273_s6 + $0x9cc] sm:$0xf]  ;;  %v5471_v39 = vld [vmem:[%s20273_s6 + $0x9b4] sm:$0xf] }
 0x2af   :  { %v5473_v40 = vld [vmem:[%s20273_s6 + $0x9d0] sm:$0xf]  ;;  %5470 = vst [vmem:[#allocation3 + $0x9c4] sm:$0xf] %v5469_v38  ;;  %5472 = vst [vmem:[#allocation3 + $0x9c8] sm:$0xf] %v5471_v39 }
 0x2b0   :  { %5474 = vst [vmem:[#allocation3 + $0x9cc] sm:$0xf] %v5473_v40  ;;  %v5475_v41 = vld [vmem:[%s20273_s6 + $0x9b8] sm:$0xf]  ;;  %v5481_v43 = vld [vmem:[%s20273_s6 + $0x9f4] sm:$0xf] }
 0x2b1   :  { %5476 = vst [vmem:[#allocation3 + $0x9d0] sm:$0xf] %v5475_v41  ;;  %5478 = vst [vmem:[#allocation3 + $0x9d4] sm:$0xff] %v5477_v42   ;;  %v5483_v44 = vld [vmem:[%s20273_s6 + $0x9dc] sm:$0xf]  ;;  %v5533_v4 = vld [vmem:[%s20273_s6 + $0xa44] sm:$0xff]  }
 0x2b2   :  { %5482 = vst [vmem:[#allocation3 + $0x9dc] sm:$0xf] %v5481_v43  ;;  %v5485_v45 = vld [vmem:[%s20273_s6 + $0x9f8] sm:$0xf]  ;;  %v5487_v46 = vld [vmem:[%s20273_s6 + $0x9e0] sm:$0xf] }
 0x2b3   :  { %5484 = vst [vmem:[#allocation3 + $0x9e0] sm:$0xf] %v5483_v44  ;;  %5486 = vst [vmem:[#allocation3 + $0x9e4] sm:$0xf] %v5485_v45  ;;  %v5489_v47 = vld [vmem:[%s20273_s6 + $0x9fc] sm:$0xf] }
 0x2b4   :  { %5488 = vst [vmem:[#allocation3 + $0x9e8] sm:$0xf] %v5487_v46  ;;  %v5491_v48 = vld [vmem:[%s20273_s6 + $0x9e4] sm:$0xf]  ;;  %v5493_v49 = vld [vmem:[%s20273_s6 + $0xa00] sm:$0xf] }
 0x2b5   :  { %5490 = vst [vmem:[#allocation3 + $0x9ec] sm:$0xf] %v5489_v47  ;;  %5492 = vst [vmem:[#allocation3 + $0x9f0] sm:$0xf] %v5491_v48  ;;  %v5495_v50 = vld [vmem:[%s20273_s6 + $0x9e8] sm:$0xf] }
 0x2b6   :  { %5494 = vst [vmem:[#allocation3 + $0x9f4] sm:$0xf] %v5493_v49  ;;  %v5497_v51 = vld [vmem:[%s20273_s6 + $0xa04] sm:$0xf]  ;;  %v5499_v52 = vld [vmem:[%s20273_s6 + $0x9ec] sm:$0xf] }
 0x2b7   :  { %5496 = vst [vmem:[#allocation3 + $0x9f8] sm:$0xf] %v5495_v50  ;;  %5498 = vst [vmem:[#allocation3 + $0x9fc] sm:$0xf] %v5497_v51  ;;  %v5501_v53 = vld [vmem:[%s20273_s6 + $0xa08] sm:$0xf] }
 0x2b8   :  { %5500 = vst [vmem:[#allocation3 + $0xa00] sm:$0xf] %v5499_v52  ;;  %v5503_v54 = vld [vmem:[%s20273_s6 + $0x9f0] sm:$0xf]  ;;  %5502 = vst [vmem:[#allocation3 + $0xa04] sm:$0xf] %v5501_v53 }
 0x2b9   :  { %5504 = vst [vmem:[#allocation3 + $0xa08] sm:$0xf] %v5503_v54  ;;  %5506 = vst [vmem:[#allocation3 + $0xa0c] sm:$0xff] %v5505_v55   ;;  %v5509_v56 = vld [vmem:[%s20273_s6 + $0xa2c] sm:$0xf]  ;;  %v5561_v17 = vld [vmem:[%s20273_s6 + $0xa7c] sm:$0xff]  }
 0x2ba   :  { %v5511_v57 = vld [vmem:[%s20273_s6 + $0xa14] sm:$0xf]  ;;  %v5513_v58 = vld [vmem:[%s20273_s6 + $0xa30] sm:$0xf]  ;;  %5510 = vst [vmem:[#allocation3 + $0xa14] sm:$0xf] %v5509_v56 }
 0x2bb   :  { %5512 = vst [vmem:[#allocation3 + $0xa18] sm:$0xf] %v5511_v57  ;;  %5514 = vst [vmem:[#allocation3 + $0xa1c] sm:$0xf] %v5513_v58  ;;  %v5515_v59 = vld [vmem:[%s20273_s6 + $0xa18] sm:$0xf] }
 0x2bc   :  { %v5517_v60 = vld [vmem:[%s20273_s6 + $0xa34] sm:$0xf]  ;;  %v5519_v61 = vld [vmem:[%s20273_s6 + $0xa1c] sm:$0xf]  ;;  %5516 = vst [vmem:[#allocation3 + $0xa20] sm:$0xf] %v5515_v59 }
 0x2bd   :  { %5518 = vst [vmem:[#allocation3 + $0xa24] sm:$0xf] %v5517_v60  ;;  %5520 = vst [vmem:[#allocation3 + $0xa28] sm:$0xf] %v5519_v61  ;;  %v5521_v62 = vld [vmem:[%s20273_s6 + $0xa38] sm:$0xf] }
 0x2be   :  { %v5523_v63 = vld [vmem:[%s20273_s6 + $0xa20] sm:$0xf]  ;;  %v5525_v0 = vld [vmem:[%s20273_s6 + $0xa3c] sm:$0xf]  ;;  %5522 = vst [vmem:[#allocation3 + $0xa2c] sm:$0xf] %v5521_v62 }
 0x2bf   :  { %5524 = vst [vmem:[#allocation3 + $0xa30] sm:$0xf] %v5523_v63  ;;  %5526 = vst [vmem:[#allocation3 + $0xa34] sm:$0xf] %v5525_v0  ;;  %v5527_v1 = vld [vmem:[%s20273_s6 + $0xa24] sm:$0xf] }
 0x2c0   :  { %v5529_v2 = vld [vmem:[%s20273_s6 + $0xa40] sm:$0xf]  ;;  %v5531_v3 = vld [vmem:[%s20273_s6 + $0xa28] sm:$0xf]  ;;  %5528 = vst [vmem:[#allocation3 + $0xa38] sm:$0xf] %v5527_v1 }
 0x2c1   :  { %5530 = vst [vmem:[#allocation3 + $0xa3c] sm:$0xf] %v5529_v2  ;;  %5532 = vst [vmem:[#allocation3 + $0xa40] sm:$0xf] %v5531_v3  ;;  %v5537_v5 = vld [vmem:[%s20273_s6 + $0xa64] sm:$0xf] }
 0x2c2   :  { %v5539_v6 = vld [vmem:[%s20273_s6 + $0xa4c] sm:$0xf]  ;;  %5534 = vst [vmem:[#allocation3 + $0xa44] sm:$0xff] %v5533_v4   ;;  %5538 = vst [vmem:[#allocation3 + $0xa4c] sm:$0xf] %v5537_v5  ;;  %v5589_v30 = vld [vmem:[%s20273_s6 + $0xab4] sm:$0xff]  }
 0x2c3   :  { %5540 = vst [vmem:[#allocation3 + $0xa50] sm:$0xf] %v5539_v6  ;;  %v5541_v7 = vld [vmem:[%s20273_s6 + $0xa68] sm:$0xf]  ;;  %v5543_v8 = vld [vmem:[%s20273_s6 + $0xa50] sm:$0xf] }
 0x2c4   :  { %v5545_v9 = vld [vmem:[%s20273_s6 + $0xa6c] sm:$0xf]  ;;  %5542 = vst [vmem:[#allocation3 + $0xa54] sm:$0xf] %v5541_v7  ;;  %5544 = vst [vmem:[#allocation3 + $0xa58] sm:$0xf] %v5543_v8 }
 0x2c5   :  { %5546 = vst [vmem:[#allocation3 + $0xa5c] sm:$0xf] %v5545_v9  ;;  %v5547_v10 = vld [vmem:[%s20273_s6 + $0xa54] sm:$0xf]  ;;  %v5549_v11 = vld [vmem:[%s20273_s6 + $0xa70] sm:$0xf] }
 0x2c6   :  { %v5551_v12 = vld [vmem:[%s20273_s6 + $0xa58] sm:$0xf]  ;;  %5548 = vst [vmem:[#allocation3 + $0xa60] sm:$0xf] %v5547_v10  ;;  %5550 = vst [vmem:[#allocation3 + $0xa64] sm:$0xf] %v5549_v11 }
 0x2c7   :  { %5552 = vst [vmem:[#allocation3 + $0xa68] sm:$0xf] %v5551_v12  ;;  %v5553_v13 = vld [vmem:[%s20273_s6 + $0xa74] sm:$0xf]  ;;  %v5555_v14 = vld [vmem:[%s20273_s6 + $0xa5c] sm:$0xf] }
 0x2c8   :  { %v5557_v15 = vld [vmem:[%s20273_s6 + $0xa78] sm:$0xf]  ;;  %5554 = vst [vmem:[#allocation3 + $0xa6c] sm:$0xf] %v5553_v13  ;;  %5556 = vst [vmem:[#allocation3 + $0xa70] sm:$0xf] %v5555_v14 }
 0x2c9   :  { %5558 = vst [vmem:[#allocation3 + $0xa74] sm:$0xf] %v5557_v15  ;;  %v5559_v16 = vld [vmem:[%s20273_s6 + $0xa60] sm:$0xf]  ;;  %v5565_v18 = vld [vmem:[%s20273_s6 + $0xa9c] sm:$0xf] }
 0x2ca   :  { %5560 = vst [vmem:[#allocation3 + $0xa78] sm:$0xf] %v5559_v16  ;;  %5562 = vst [vmem:[#allocation3 + $0xa7c] sm:$0xff] %v5561_v17   ;;  %v5567_v19 = vld [vmem:[%s20273_s6 + $0xa84] sm:$0xf]  ;;  %v5617_v43 = vld [vmem:[%s20273_s6 + $0xaec] sm:$0xff]  }
 0x2cb   :  { %5566 = vst [vmem:[#allocation3 + $0xa84] sm:$0xf] %v5565_v18  ;;  %v5569_v20 = vld [vmem:[%s20273_s6 + $0xaa0] sm:$0xf]  ;;  %v5571_v21 = vld [vmem:[%s20273_s6 + $0xa88] sm:$0xf] }
 0x2cc   :  { %5568 = vst [vmem:[#allocation3 + $0xa88] sm:$0xf] %v5567_v19  ;;  %5570 = vst [vmem:[#allocation3 + $0xa8c] sm:$0xf] %v5569_v20  ;;  %v5573_v22 = vld [vmem:[%s20273_s6 + $0xaa4] sm:$0xf] }
 0x2cd   :  { %5572 = vst [vmem:[#allocation3 + $0xa90] sm:$0xf] %v5571_v21  ;;  %v5575_v23 = vld [vmem:[%s20273_s6 + $0xa8c] sm:$0xf]  ;;  %v5577_v24 = vld [vmem:[%s20273_s6 + $0xaa8] sm:$0xf] }
 0x2ce   :  { %5574 = vst [vmem:[#allocation3 + $0xa94] sm:$0xf] %v5573_v22  ;;  %5576 = vst [vmem:[#allocation3 + $0xa98] sm:$0xf] %v5575_v23  ;;  %v5579_v25 = vld [vmem:[%s20273_s6 + $0xa90] sm:$0xf] }
 0x2cf   :  { %5578 = vst [vmem:[#allocation3 + $0xa9c] sm:$0xf] %v5577_v24  ;;  %v5581_v26 = vld [vmem:[%s20273_s6 + $0xaac] sm:$0xf]  ;;  %v5583_v27 = vld [vmem:[%s20273_s6 + $0xa94] sm:$0xf] }
 0x2d0   :  { %5580 = vst [vmem:[#allocation3 + $0xaa0] sm:$0xf] %v5579_v25  ;;  %5582 = vst [vmem:[#allocation3 + $0xaa4] sm:$0xf] %v5581_v26  ;;  %v5585_v28 = vld [vmem:[%s20273_s6 + $0xab0] sm:$0xf] }
 0x2d1   :  { %5584 = vst [vmem:[#allocation3 + $0xaa8] sm:$0xf] %v5583_v27  ;;  %v5587_v29 = vld [vmem:[%s20273_s6 + $0xa98] sm:$0xf]  ;;  %5586 = vst [vmem:[#allocation3 + $0xaac] sm:$0xf] %v5585_v28 }
 0x2d2   :  { %5588 = vst [vmem:[#allocation3 + $0xab0] sm:$0xf] %v5587_v29  ;;  %5590 = vst [vmem:[#allocation3 + $0xab4] sm:$0xff] %v5589_v30   ;;  %v5593_v31 = vld [vmem:[%s20273_s6 + $0xad4] sm:$0xf]  ;;  %v5645_v56 = vld [vmem:[%s20273_s6 + $0xb24] sm:$0xff]  }
 0x2d3   :  { %v5595_v32 = vld [vmem:[%s20273_s6 + $0xabc] sm:$0xf]  ;;  %v5597_v33 = vld [vmem:[%s20273_s6 + $0xad8] sm:$0xf]  ;;  %5594 = vst [vmem:[#allocation3 + $0xabc] sm:$0xf] %v5593_v31 }
 0x2d4   :  { %5596 = vst [vmem:[#allocation3 + $0xac0] sm:$0xf] %v5595_v32  ;;  %5598 = vst [vmem:[#allocation3 + $0xac4] sm:$0xf] %v5597_v33  ;;  %v5599_v34 = vld [vmem:[%s20273_s6 + $0xac0] sm:$0xf] }
 0x2d5   :  { %v5601_v35 = vld [vmem:[%s20273_s6 + $0xadc] sm:$0xf]  ;;  %v5603_v36 = vld [vmem:[%s20273_s6 + $0xac4] sm:$0xf]  ;;  %5600 = vst [vmem:[#allocation3 + $0xac8] sm:$0xf] %v5599_v34 }
 0x2d6   :  { %5602 = vst [vmem:[#allocation3 + $0xacc] sm:$0xf] %v5601_v35  ;;  %5604 = vst [vmem:[#allocation3 + $0xad0] sm:$0xf] %v5603_v36  ;;  %v5605_v37 = vld [vmem:[%s20273_s6 + $0xae0] sm:$0xf] }
 0x2d7   :  { %v5607_v38 = vld [vmem:[%s20273_s6 + $0xac8] sm:$0xf]  ;;  %v5609_v39 = vld [vmem:[%s20273_s6 + $0xae4] sm:$0xf]  ;;  %5606 = vst [vmem:[#allocation3 + $0xad4] sm:$0xf] %v5605_v37 }
 0x2d8   :  { %5608 = vst [vmem:[#allocation3 + $0xad8] sm:$0xf] %v5607_v38  ;;  %5610 = vst [vmem:[#allocation3 + $0xadc] sm:$0xf] %v5609_v39  ;;  %v5611_v40 = vld [vmem:[%s20273_s6 + $0xacc] sm:$0xf] }
 0x2d9   :  { %v5613_v41 = vld [vmem:[%s20273_s6 + $0xae8] sm:$0xf]  ;;  %v5615_v42 = vld [vmem:[%s20273_s6 + $0xad0] sm:$0xf]  ;;  %5612 = vst [vmem:[#allocation3 + $0xae0] sm:$0xf] %v5611_v40 }
 0x2da   :  { %5614 = vst [vmem:[#allocation3 + $0xae4] sm:$0xf] %v5613_v41  ;;  %5616 = vst [vmem:[#allocation3 + $0xae8] sm:$0xf] %v5615_v42  ;;  %v5621_v44 = vld [vmem:[%s20273_s6 + $0xb0c] sm:$0xf] }
 0x2db   :  { %v5623_v45 = vld [vmem:[%s20273_s6 + $0xaf4] sm:$0xf]  ;;  %5618 = vst [vmem:[#allocation3 + $0xaec] sm:$0xff] %v5617_v43   ;;  %5622 = vst [vmem:[#allocation3 + $0xaf4] sm:$0xf] %v5621_v44  ;;  %v5673_v5 = vld [vmem:[%s20273_s6 + $0xb5c] sm:$0xff]  }
 0x2dc   :  { %5624 = vst [vmem:[#allocation3 + $0xaf8] sm:$0xf] %v5623_v45  ;;  %v5625_v46 = vld [vmem:[%s20273_s6 + $0xb10] sm:$0xf]  ;;  %v5627_v47 = vld [vmem:[%s20273_s6 + $0xaf8] sm:$0xf] }
 0x2dd   :  { %v5629_v48 = vld [vmem:[%s20273_s6 + $0xb14] sm:$0xf]  ;;  %5626 = vst [vmem:[#allocation3 + $0xafc] sm:$0xf] %v5625_v46  ;;  %5628 = vst [vmem:[#allocation3 + $0xb00] sm:$0xf] %v5627_v47 }
 0x2de   :  { %5630 = vst [vmem:[#allocation3 + $0xb04] sm:$0xf] %v5629_v48  ;;  %v5631_v49 = vld [vmem:[%s20273_s6 + $0xafc] sm:$0xf]  ;;  %v5633_v50 = vld [vmem:[%s20273_s6 + $0xb18] sm:$0xf] }
 0x2df   :  { %v5635_v51 = vld [vmem:[%s20273_s6 + $0xb00] sm:$0xf]  ;;  %5632 = vst [vmem:[#allocation3 + $0xb08] sm:$0xf] %v5631_v49  ;;  %5634 = vst [vmem:[#allocation3 + $0xb0c] sm:$0xf] %v5633_v50 }
 0x2e0   :  { %5636 = vst [vmem:[#allocation3 + $0xb10] sm:$0xf] %v5635_v51  ;;  %v5637_v52 = vld [vmem:[%s20273_s6 + $0xb1c] sm:$0xf]  ;;  %v5639_v53 = vld [vmem:[%s20273_s6 + $0xb04] sm:$0xf] }
 0x2e1   :  { %v5641_v54 = vld [vmem:[%s20273_s6 + $0xb20] sm:$0xf]  ;;  %5638 = vst [vmem:[#allocation3 + $0xb14] sm:$0xf] %v5637_v52  ;;  %5640 = vst [vmem:[#allocation3 + $0xb18] sm:$0xf] %v5639_v53 }
 0x2e2   :  { %5642 = vst [vmem:[#allocation3 + $0xb1c] sm:$0xf] %v5641_v54  ;;  %v5643_v55 = vld [vmem:[%s20273_s6 + $0xb08] sm:$0xf]  ;;  %v5649_v57 = vld [vmem:[%s20273_s6 + $0xb44] sm:$0xf] }
 0x2e3   :  { %5644 = vst [vmem:[#allocation3 + $0xb20] sm:$0xf] %v5643_v55  ;;  %5646 = vst [vmem:[#allocation3 + $0xb24] sm:$0xff] %v5645_v56   ;;  %v5651_v58 = vld [vmem:[%s20273_s6 + $0xb2c] sm:$0xf]  ;;  %v5701_v18 = vld [vmem:[%s20273_s6 + $0xb94] sm:$0xff]  }
 0x2e4   :  { %5650 = vst [vmem:[#allocation3 + $0xb2c] sm:$0xf] %v5649_v57  ;;  %v5653_v59 = vld [vmem:[%s20273_s6 + $0xb48] sm:$0xf]  ;;  %v5655_v60 = vld [vmem:[%s20273_s6 + $0xb30] sm:$0xf] }
 0x2e5   :  { %5652 = vst [vmem:[#allocation3 + $0xb30] sm:$0xf] %v5651_v58  ;;  %5654 = vst [vmem:[#allocation3 + $0xb34] sm:$0xf] %v5653_v59  ;;  %v5657_v61 = vld [vmem:[%s20273_s6 + $0xb4c] sm:$0xf] }
 0x2e6   :  { %5656 = vst [vmem:[#allocation3 + $0xb38] sm:$0xf] %v5655_v60  ;;  %v5659_v62 = vld [vmem:[%s20273_s6 + $0xb34] sm:$0xf]  ;;  %v5661_v63 = vld [vmem:[%s20273_s6 + $0xb50] sm:$0xf] }
 0x2e7   :  { %5658 = vst [vmem:[#allocation3 + $0xb3c] sm:$0xf] %v5657_v61  ;;  %5660 = vst [vmem:[#allocation3 + $0xb40] sm:$0xf] %v5659_v62  ;;  %v5663_v0 = vld [vmem:[%s20273_s6 + $0xb38] sm:$0xf] }
 0x2e8   :  { %5662 = vst [vmem:[#allocation3 + $0xb44] sm:$0xf] %v5661_v63  ;;  %v5665_v1 = vld [vmem:[%s20273_s6 + $0xb54] sm:$0xf]  ;;  %v5667_v2 = vld [vmem:[%s20273_s6 + $0xb3c] sm:$0xf] }
 0x2e9   :  { %5664 = vst [vmem:[#allocation3 + $0xb48] sm:$0xf] %v5663_v0  ;;  %5666 = vst [vmem:[#allocation3 + $0xb4c] sm:$0xf] %v5665_v1  ;;  %v5669_v3 = vld [vmem:[%s20273_s6 + $0xb58] sm:$0xf] }
 0x2ea   :  { %5668 = vst [vmem:[#allocation3 + $0xb50] sm:$0xf] %v5667_v2  ;;  %v5671_v4 = vld [vmem:[%s20273_s6 + $0xb40] sm:$0xf]  ;;  %5670 = vst [vmem:[#allocation3 + $0xb54] sm:$0xf] %v5669_v3 }
 0x2eb   :  { %5672 = vst [vmem:[#allocation3 + $0xb58] sm:$0xf] %v5671_v4  ;;  %5674 = vst [vmem:[#allocation3 + $0xb5c] sm:$0xff] %v5673_v5   ;;  %v5677_v6 = vld [vmem:[%s20273_s6 + $0xb7c] sm:$0xf]  ;;  %v5729_v31 = vld [vmem:[%s20273_s6 + $0xbcc] sm:$0xff]  }
 0x2ec   :  { %v5679_v7 = vld [vmem:[%s20273_s6 + $0xb64] sm:$0xf]  ;;  %v5681_v8 = vld [vmem:[%s20273_s6 + $0xb80] sm:$0xf]  ;;  %5678 = vst [vmem:[#allocation3 + $0xb64] sm:$0xf] %v5677_v6 }
 0x2ed   :  { %5680 = vst [vmem:[#allocation3 + $0xb68] sm:$0xf] %v5679_v7  ;;  %5682 = vst [vmem:[#allocation3 + $0xb6c] sm:$0xf] %v5681_v8  ;;  %v5683_v9 = vld [vmem:[%s20273_s6 + $0xb68] sm:$0xf] }
 0x2ee   :  { %v5685_v10 = vld [vmem:[%s20273_s6 + $0xb84] sm:$0xf]  ;;  %v5687_v11 = vld [vmem:[%s20273_s6 + $0xb6c] sm:$0xf]  ;;  %5684 = vst [vmem:[#allocation3 + $0xb70] sm:$0xf] %v5683_v9 }
 0x2ef   :  { %5686 = vst [vmem:[#allocation3 + $0xb74] sm:$0xf] %v5685_v10  ;;  %5688 = vst [vmem:[#allocation3 + $0xb78] sm:$0xf] %v5687_v11  ;;  %v5689_v12 = vld [vmem:[%s20273_s6 + $0xb88] sm:$0xf] }
 0x2f0   :  { %v5691_v13 = vld [vmem:[%s20273_s6 + $0xb70] sm:$0xf]  ;;  %v5693_v14 = vld [vmem:[%s20273_s6 + $0xb8c] sm:$0xf]  ;;  %5690 = vst [vmem:[#allocation3 + $0xb7c] sm:$0xf] %v5689_v12 }
 0x2f1   :  { %5692 = vst [vmem:[#allocation3 + $0xb80] sm:$0xf] %v5691_v13  ;;  %5694 = vst [vmem:[#allocation3 + $0xb84] sm:$0xf] %v5693_v14  ;;  %v5695_v15 = vld [vmem:[%s20273_s6 + $0xb74] sm:$0xf] }
 0x2f2   :  { %v5697_v16 = vld [vmem:[%s20273_s6 + $0xb90] sm:$0xf]  ;;  %v5699_v17 = vld [vmem:[%s20273_s6 + $0xb78] sm:$0xf]  ;;  %5696 = vst [vmem:[#allocation3 + $0xb88] sm:$0xf] %v5695_v15 }
 0x2f3   :  { %5698 = vst [vmem:[#allocation3 + $0xb8c] sm:$0xf] %v5697_v16  ;;  %5700 = vst [vmem:[#allocation3 + $0xb90] sm:$0xf] %v5699_v17  ;;  %v5705_v19 = vld [vmem:[%s20273_s6 + $0xbb4] sm:$0xf] }
 0x2f4   :  { %v5707_v20 = vld [vmem:[%s20273_s6 + $0xb9c] sm:$0xf]  ;;  %5702 = vst [vmem:[#allocation3 + $0xb94] sm:$0xff] %v5701_v18   ;;  %5706 = vst [vmem:[#allocation3 + $0xb9c] sm:$0xf] %v5705_v19  ;;  %v5757_v44 = vld [vmem:[%s20273_s6 + $0xc04] sm:$0xff]  }
 0x2f5   :  { %5708 = vst [vmem:[#allocation3 + $0xba0] sm:$0xf] %v5707_v20  ;;  %v5709_v21 = vld [vmem:[%s20273_s6 + $0xbb8] sm:$0xf]  ;;  %v5711_v22 = vld [vmem:[%s20273_s6 + $0xba0] sm:$0xf] }
 0x2f6   :  { %v5713_v23 = vld [vmem:[%s20273_s6 + $0xbbc] sm:$0xf]  ;;  %5710 = vst [vmem:[#allocation3 + $0xba4] sm:$0xf] %v5709_v21  ;;  %5712 = vst [vmem:[#allocation3 + $0xba8] sm:$0xf] %v5711_v22 }
 0x2f7   :  { %5714 = vst [vmem:[#allocation3 + $0xbac] sm:$0xf] %v5713_v23  ;;  %v5715_v24 = vld [vmem:[%s20273_s6 + $0xba4] sm:$0xf]  ;;  %v5717_v25 = vld [vmem:[%s20273_s6 + $0xbc0] sm:$0xf] }
 0x2f8   :  { %v5719_v26 = vld [vmem:[%s20273_s6 + $0xba8] sm:$0xf]  ;;  %5716 = vst [vmem:[#allocation3 + $0xbb0] sm:$0xf] %v5715_v24  ;;  %5718 = vst [vmem:[#allocation3 + $0xbb4] sm:$0xf] %v5717_v25 }
 0x2f9   :  { %5720 = vst [vmem:[#allocation3 + $0xbb8] sm:$0xf] %v5719_v26  ;;  %v5721_v27 = vld [vmem:[%s20273_s6 + $0xbc4] sm:$0xf]  ;;  %v5723_v28 = vld [vmem:[%s20273_s6 + $0xbac] sm:$0xf] }
 0x2fa   :  { %v5725_v29 = vld [vmem:[%s20273_s6 + $0xbc8] sm:$0xf]  ;;  %5722 = vst [vmem:[#allocation3 + $0xbbc] sm:$0xf] %v5721_v27  ;;  %5724 = vst [vmem:[#allocation3 + $0xbc0] sm:$0xf] %v5723_v28 }
 0x2fb   :  { %5726 = vst [vmem:[#allocation3 + $0xbc4] sm:$0xf] %v5725_v29  ;;  %v5727_v30 = vld [vmem:[%s20273_s6 + $0xbb0] sm:$0xf]  ;;  %v5733_v32 = vld [vmem:[%s20273_s6 + $0xbec] sm:$0xf] }
 0x2fc   :  { %5728 = vst [vmem:[#allocation3 + $0xbc8] sm:$0xf] %v5727_v30  ;;  %5730 = vst [vmem:[#allocation3 + $0xbcc] sm:$0xff] %v5729_v31   ;;  %v5735_v33 = vld [vmem:[%s20273_s6 + $0xbd4] sm:$0xf]  ;;  %v5785_v57 = vld [vmem:[%s20273_s6 + $0xc3c] sm:$0xff]  }
 0x2fd   :  { %5734 = vst [vmem:[#allocation3 + $0xbd4] sm:$0xf] %v5733_v32  ;;  %v5737_v34 = vld [vmem:[%s20273_s6 + $0xbf0] sm:$0xf]  ;;  %v5739_v35 = vld [vmem:[%s20273_s6 + $0xbd8] sm:$0xf] }
 0x2fe   :  { %5736 = vst [vmem:[#allocation3 + $0xbd8] sm:$0xf] %v5735_v33  ;;  %5738 = vst [vmem:[#allocation3 + $0xbdc] sm:$0xf] %v5737_v34  ;;  %v5741_v36 = vld [vmem:[%s20273_s6 + $0xbf4] sm:$0xf] }
 0x2ff   :  { %5740 = vst [vmem:[#allocation3 + $0xbe0] sm:$0xf] %v5739_v35  ;;  %v5743_v37 = vld [vmem:[%s20273_s6 + $0xbdc] sm:$0xf]  ;;  %v5745_v38 = vld [vmem:[%s20273_s6 + $0xbf8] sm:$0xf] }
 0x300   :  { %5742 = vst [vmem:[#allocation3 + $0xbe4] sm:$0xf] %v5741_v36  ;;  %5744 = vst [vmem:[#allocation3 + $0xbe8] sm:$0xf] %v5743_v37  ;;  %v5747_v39 = vld [vmem:[%s20273_s6 + $0xbe0] sm:$0xf] }
 0x301   :  { %5746 = vst [vmem:[#allocation3 + $0xbec] sm:$0xf] %v5745_v38  ;;  %v5749_v40 = vld [vmem:[%s20273_s6 + $0xbfc] sm:$0xf]  ;;  %v5751_v41 = vld [vmem:[%s20273_s6 + $0xbe4] sm:$0xf] }
 0x302   :  { %5748 = vst [vmem:[#allocation3 + $0xbf0] sm:$0xf] %v5747_v39  ;;  %5750 = vst [vmem:[#allocation3 + $0xbf4] sm:$0xf] %v5749_v40  ;;  %v5753_v42 = vld [vmem:[%s20273_s6 + $0xc00] sm:$0xf] }
 0x303   :  { %5752 = vst [vmem:[#allocation3 + $0xbf8] sm:$0xf] %v5751_v41  ;;  %v5755_v43 = vld [vmem:[%s20273_s6 + $0xbe8] sm:$0xf]  ;;  %5754 = vst [vmem:[#allocation3 + $0xbfc] sm:$0xf] %v5753_v42 }
 0x304   :  { %5756 = vst [vmem:[#allocation3 + $0xc00] sm:$0xf] %v5755_v43  ;;  %5758 = vst [vmem:[#allocation3 + $0xc04] sm:$0xff] %v5757_v44   ;;  %v5761_v45 = vld [vmem:[%s20273_s6 + $0xc24] sm:$0xf]  ;;  %v5813_v6 = vld [vmem:[%s20273_s6 + $0xc74] sm:$0xff]  }
 0x305   :  { %v5763_v46 = vld [vmem:[%s20273_s6 + $0xc0c] sm:$0xf]  ;;  %v5765_v47 = vld [vmem:[%s20273_s6 + $0xc28] sm:$0xf]  ;;  %5762 = vst [vmem:[#allocation3 + $0xc0c] sm:$0xf] %v5761_v45 }
 0x306   :  { %5764 = vst [vmem:[#allocation3 + $0xc10] sm:$0xf] %v5763_v46  ;;  %5766 = vst [vmem:[#allocation3 + $0xc14] sm:$0xf] %v5765_v47  ;;  %v5767_v48 = vld [vmem:[%s20273_s6 + $0xc10] sm:$0xf] }
 0x307   :  { %v5769_v49 = vld [vmem:[%s20273_s6 + $0xc2c] sm:$0xf]  ;;  %v5771_v50 = vld [vmem:[%s20273_s6 + $0xc14] sm:$0xf]  ;;  %5768 = vst [vmem:[#allocation3 + $0xc18] sm:$0xf] %v5767_v48 }
 0x308   :  { %5770 = vst [vmem:[#allocation3 + $0xc1c] sm:$0xf] %v5769_v49  ;;  %5772 = vst [vmem:[#allocation3 + $0xc20] sm:$0xf] %v5771_v50  ;;  %v5773_v51 = vld [vmem:[%s20273_s6 + $0xc30] sm:$0xf] }
 0x309   :  { %v5775_v52 = vld [vmem:[%s20273_s6 + $0xc18] sm:$0xf]  ;;  %v5777_v53 = vld [vmem:[%s20273_s6 + $0xc34] sm:$0xf]  ;;  %5774 = vst [vmem:[#allocation3 + $0xc24] sm:$0xf] %v5773_v51 }
 0x30a   :  { %5776 = vst [vmem:[#allocation3 + $0xc28] sm:$0xf] %v5775_v52  ;;  %5778 = vst [vmem:[#allocation3 + $0xc2c] sm:$0xf] %v5777_v53  ;;  %v5779_v54 = vld [vmem:[%s20273_s6 + $0xc1c] sm:$0xf] }
 0x30b   :  { %v5781_v55 = vld [vmem:[%s20273_s6 + $0xc38] sm:$0xf]  ;;  %v5783_v56 = vld [vmem:[%s20273_s6 + $0xc20] sm:$0xf]  ;;  %5780 = vst [vmem:[#allocation3 + $0xc30] sm:$0xf] %v5779_v54 }
 0x30c   :  { %5782 = vst [vmem:[#allocation3 + $0xc34] sm:$0xf] %v5781_v55  ;;  %5784 = vst [vmem:[#allocation3 + $0xc38] sm:$0xf] %v5783_v56  ;;  %v5789_v58 = vld [vmem:[%s20273_s6 + $0xc5c] sm:$0xf] }
 0x30d   :  { %v5791_v59 = vld [vmem:[%s20273_s6 + $0xc44] sm:$0xf]  ;;  %5786 = vst [vmem:[#allocation3 + $0xc3c] sm:$0xff] %v5785_v57   ;;  %5790 = vst [vmem:[#allocation3 + $0xc44] sm:$0xf] %v5789_v58  ;;  %v5841_v19 = vld [vmem:[%s20273_s6 + $0xcac] sm:$0xff]  }
 0x30e   :  { %5792 = vst [vmem:[#allocation3 + $0xc48] sm:$0xf] %v5791_v59  ;;  %v5793_v60 = vld [vmem:[%s20273_s6 + $0xc60] sm:$0xf]  ;;  %v5795_v61 = vld [vmem:[%s20273_s6 + $0xc48] sm:$0xf] }
 0x30f   :  { %v5797_v62 = vld [vmem:[%s20273_s6 + $0xc64] sm:$0xf]  ;;  %5794 = vst [vmem:[#allocation3 + $0xc4c] sm:$0xf] %v5793_v60  ;;  %5796 = vst [vmem:[#allocation3 + $0xc50] sm:$0xf] %v5795_v61 }
 0x310   :  { %5798 = vst [vmem:[#allocation3 + $0xc54] sm:$0xf] %v5797_v62  ;;  %v5799_v63 = vld [vmem:[%s20273_s6 + $0xc4c] sm:$0xf]  ;;  %v5801_v0 = vld [vmem:[%s20273_s6 + $0xc68] sm:$0xf] }
 0x311   :  { %v5803_v1 = vld [vmem:[%s20273_s6 + $0xc50] sm:$0xf]  ;;  %5800 = vst [vmem:[#allocation3 + $0xc58] sm:$0xf] %v5799_v63  ;;  %5802 = vst [vmem:[#allocation3 + $0xc5c] sm:$0xf] %v5801_v0 }
 0x312   :  { %5804 = vst [vmem:[#allocation3 + $0xc60] sm:$0xf] %v5803_v1  ;;  %v5805_v2 = vld [vmem:[%s20273_s6 + $0xc6c] sm:$0xf]  ;;  %v5807_v3 = vld [vmem:[%s20273_s6 + $0xc54] sm:$0xf] }
 0x313   :  { %v5809_v4 = vld [vmem:[%s20273_s6 + $0xc70] sm:$0xf]  ;;  %5806 = vst [vmem:[#allocation3 + $0xc64] sm:$0xf] %v5805_v2  ;;  %5808 = vst [vmem:[#allocation3 + $0xc68] sm:$0xf] %v5807_v3 }
 0x314   :  { %5810 = vst [vmem:[#allocation3 + $0xc6c] sm:$0xf] %v5809_v4  ;;  %v5811_v5 = vld [vmem:[%s20273_s6 + $0xc58] sm:$0xf]  ;;  %v5817_v7 = vld [vmem:[%s20273_s6 + $0xc94] sm:$0xf] }
 0x315   :  { %5812 = vst [vmem:[#allocation3 + $0xc70] sm:$0xf] %v5811_v5  ;;  %5814 = vst [vmem:[#allocation3 + $0xc74] sm:$0xff] %v5813_v6   ;;  %v5819_v8 = vld [vmem:[%s20273_s6 + $0xc7c] sm:$0xf]  ;;  %v5869_v32 = vld [vmem:[%s20273_s6 + $0xce4] sm:$0xff]  }
 0x316   :  { %5818 = vst [vmem:[#allocation3 + $0xc7c] sm:$0xf] %v5817_v7  ;;  %v5821_v9 = vld [vmem:[%s20273_s6 + $0xc98] sm:$0xf]  ;;  %v5823_v10 = vld [vmem:[%s20273_s6 + $0xc80] sm:$0xf] }
 0x317   :  { %5820 = vst [vmem:[#allocation3 + $0xc80] sm:$0xf] %v5819_v8  ;;  %5822 = vst [vmem:[#allocation3 + $0xc84] sm:$0xf] %v5821_v9  ;;  %v5825_v11 = vld [vmem:[%s20273_s6 + $0xc9c] sm:$0xf] }
 0x318   :  { %5824 = vst [vmem:[#allocation3 + $0xc88] sm:$0xf] %v5823_v10  ;;  %v5827_v12 = vld [vmem:[%s20273_s6 + $0xc84] sm:$0xf]  ;;  %v5829_v13 = vld [vmem:[%s20273_s6 + $0xca0] sm:$0xf] }
 0x319   :  { %5826 = vst [vmem:[#allocation3 + $0xc8c] sm:$0xf] %v5825_v11  ;;  %5828 = vst [vmem:[#allocation3 + $0xc90] sm:$0xf] %v5827_v12  ;;  %v5831_v14 = vld [vmem:[%s20273_s6 + $0xc88] sm:$0xf] }
 0x31a   :  { %5830 = vst [vmem:[#allocation3 + $0xc94] sm:$0xf] %v5829_v13  ;;  %v5833_v15 = vld [vmem:[%s20273_s6 + $0xca4] sm:$0xf]  ;;  %v5835_v16 = vld [vmem:[%s20273_s6 + $0xc8c] sm:$0xf] }
 0x31b   :  { %5832 = vst [vmem:[#allocation3 + $0xc98] sm:$0xf] %v5831_v14  ;;  %5834 = vst [vmem:[#allocation3 + $0xc9c] sm:$0xf] %v5833_v15  ;;  %v5837_v17 = vld [vmem:[%s20273_s6 + $0xca8] sm:$0xf] }
 0x31c   :  { %5836 = vst [vmem:[#allocation3 + $0xca0] sm:$0xf] %v5835_v16  ;;  %v5839_v18 = vld [vmem:[%s20273_s6 + $0xc90] sm:$0xf]  ;;  %5838 = vst [vmem:[#allocation3 + $0xca4] sm:$0xf] %v5837_v17 }
 0x31d   :  { %5840 = vst [vmem:[#allocation3 + $0xca8] sm:$0xf] %v5839_v18  ;;  %5842 = vst [vmem:[#allocation3 + $0xcac] sm:$0xff] %v5841_v19   ;;  %v5845_v20 = vld [vmem:[%s20273_s6 + $0xccc] sm:$0xf]  ;;  %v5897_v45 = vld [vmem:[%s20273_s6 + $0xd1c] sm:$0xff]  }
 0x31e   :  { %v5847_v21 = vld [vmem:[%s20273_s6 + $0xcb4] sm:$0xf]  ;;  %v5849_v22 = vld [vmem:[%s20273_s6 + $0xcd0] sm:$0xf]  ;;  %5846 = vst [vmem:[#allocation3 + $0xcb4] sm:$0xf] %v5845_v20 }
 0x31f   :  { %5848 = vst [vmem:[#allocation3 + $0xcb8] sm:$0xf] %v5847_v21  ;;  %5850 = vst [vmem:[#allocation3 + $0xcbc] sm:$0xf] %v5849_v22  ;;  %v5851_v23 = vld [vmem:[%s20273_s6 + $0xcb8] sm:$0xf] }
 0x320   :  { %v5853_v24 = vld [vmem:[%s20273_s6 + $0xcd4] sm:$0xf]  ;;  %v5855_v25 = vld [vmem:[%s20273_s6 + $0xcbc] sm:$0xf]  ;;  %5852 = vst [vmem:[#allocation3 + $0xcc0] sm:$0xf] %v5851_v23 }
 0x321   :  { %5854 = vst [vmem:[#allocation3 + $0xcc4] sm:$0xf] %v5853_v24  ;;  %5856 = vst [vmem:[#allocation3 + $0xcc8] sm:$0xf] %v5855_v25  ;;  %v5857_v26 = vld [vmem:[%s20273_s6 + $0xcd8] sm:$0xf] }
 0x322   :  { %v5859_v27 = vld [vmem:[%s20273_s6 + $0xcc0] sm:$0xf]  ;;  %v5861_v28 = vld [vmem:[%s20273_s6 + $0xcdc] sm:$0xf]  ;;  %5858 = vst [vmem:[#allocation3 + $0xccc] sm:$0xf] %v5857_v26 }
 0x323   :  { %5860 = vst [vmem:[#allocation3 + $0xcd0] sm:$0xf] %v5859_v27  ;;  %5862 = vst [vmem:[#allocation3 + $0xcd4] sm:$0xf] %v5861_v28  ;;  %v5863_v29 = vld [vmem:[%s20273_s6 + $0xcc4] sm:$0xf] }
 0x324   :  { %v5865_v30 = vld [vmem:[%s20273_s6 + $0xce0] sm:$0xf]  ;;  %v5867_v31 = vld [vmem:[%s20273_s6 + $0xcc8] sm:$0xf]  ;;  %5864 = vst [vmem:[#allocation3 + $0xcd8] sm:$0xf] %v5863_v29 }
 0x325   :  { %5866 = vst [vmem:[#allocation3 + $0xcdc] sm:$0xf] %v5865_v30  ;;  %5868 = vst [vmem:[#allocation3 + $0xce0] sm:$0xf] %v5867_v31  ;;  %v5873_v33 = vld [vmem:[%s20273_s6 + $0xd04] sm:$0xf] }
 0x326   :  { %v5875_v34 = vld [vmem:[%s20273_s6 + $0xcec] sm:$0xf]  ;;  %5870 = vst [vmem:[#allocation3 + $0xce4] sm:$0xff] %v5869_v32   ;;  %5874 = vst [vmem:[#allocation3 + $0xcec] sm:$0xf] %v5873_v33  ;;  %v5925_v58 = vld [vmem:[%s20273_s6 + $0xd54] sm:$0xff]  }
 0x327   :  { %5876 = vst [vmem:[#allocation3 + $0xcf0] sm:$0xf] %v5875_v34  ;;  %v5877_v35 = vld [vmem:[%s20273_s6 + $0xd08] sm:$0xf]  ;;  %v5879_v36 = vld [vmem:[%s20273_s6 + $0xcf0] sm:$0xf] }
 0x328   :  { %v5881_v37 = vld [vmem:[%s20273_s6 + $0xd0c] sm:$0xf]  ;;  %5878 = vst [vmem:[#allocation3 + $0xcf4] sm:$0xf] %v5877_v35  ;;  %5880 = vst [vmem:[#allocation3 + $0xcf8] sm:$0xf] %v5879_v36 }
 0x329   :  { %5882 = vst [vmem:[#allocation3 + $0xcfc] sm:$0xf] %v5881_v37  ;;  %v5883_v38 = vld [vmem:[%s20273_s6 + $0xcf4] sm:$0xf]  ;;  %v5885_v39 = vld [vmem:[%s20273_s6 + $0xd10] sm:$0xf] }
 0x32a   :  { %v5887_v40 = vld [vmem:[%s20273_s6 + $0xcf8] sm:$0xf]  ;;  %5884 = vst [vmem:[#allocation3 + $0xd00] sm:$0xf] %v5883_v38  ;;  %5886 = vst [vmem:[#allocation3 + $0xd04] sm:$0xf] %v5885_v39 }
 0x32b   :  { %5888 = vst [vmem:[#allocation3 + $0xd08] sm:$0xf] %v5887_v40  ;;  %v5889_v41 = vld [vmem:[%s20273_s6 + $0xd14] sm:$0xf]  ;;  %v5891_v42 = vld [vmem:[%s20273_s6 + $0xcfc] sm:$0xf] }
 0x32c   :  { %v5893_v43 = vld [vmem:[%s20273_s6 + $0xd18] sm:$0xf]  ;;  %5890 = vst [vmem:[#allocation3 + $0xd0c] sm:$0xf] %v5889_v41  ;;  %5892 = vst [vmem:[#allocation3 + $0xd10] sm:$0xf] %v5891_v42 }
 0x32d   :  { %5894 = vst [vmem:[#allocation3 + $0xd14] sm:$0xf] %v5893_v43  ;;  %v5895_v44 = vld [vmem:[%s20273_s6 + $0xd00] sm:$0xf]  ;;  %v5901_v46 = vld [vmem:[%s20273_s6 + $0xd3c] sm:$0xf] }
 0x32e   :  { %5896 = vst [vmem:[#allocation3 + $0xd18] sm:$0xf] %v5895_v44  ;;  %5898 = vst [vmem:[#allocation3 + $0xd1c] sm:$0xff] %v5897_v45   ;;  %v5903_v47 = vld [vmem:[%s20273_s6 + $0xd24] sm:$0xf]  ;;  %v5953_v7 = vld [vmem:[%s20273_s6 + $0xd8c] sm:$0xff]  }
 0x32f   :  { %5902 = vst [vmem:[#allocation3 + $0xd24] sm:$0xf] %v5901_v46  ;;  %v5905_v48 = vld [vmem:[%s20273_s6 + $0xd40] sm:$0xf]  ;;  %v5907_v49 = vld [vmem:[%s20273_s6 + $0xd28] sm:$0xf] }
 0x330   :  { %5904 = vst [vmem:[#allocation3 + $0xd28] sm:$0xf] %v5903_v47  ;;  %5906 = vst [vmem:[#allocation3 + $0xd2c] sm:$0xf] %v5905_v48  ;;  %v5909_v50 = vld [vmem:[%s20273_s6 + $0xd44] sm:$0xf] }
 0x331   :  { %5908 = vst [vmem:[#allocation3 + $0xd30] sm:$0xf] %v5907_v49  ;;  %v5911_v51 = vld [vmem:[%s20273_s6 + $0xd2c] sm:$0xf]  ;;  %v5913_v52 = vld [vmem:[%s20273_s6 + $0xd48] sm:$0xf] }
 0x332   :  { %5910 = vst [vmem:[#allocation3 + $0xd34] sm:$0xf] %v5909_v50  ;;  %5912 = vst [vmem:[#allocation3 + $0xd38] sm:$0xf] %v5911_v51  ;;  %v5915_v53 = vld [vmem:[%s20273_s6 + $0xd30] sm:$0xf] }
 0x333   :  { %5914 = vst [vmem:[#allocation3 + $0xd3c] sm:$0xf] %v5913_v52  ;;  %v5917_v54 = vld [vmem:[%s20273_s6 + $0xd4c] sm:$0xf]  ;;  %v5919_v55 = vld [vmem:[%s20273_s6 + $0xd34] sm:$0xf] }
 0x334   :  { %5916 = vst [vmem:[#allocation3 + $0xd40] sm:$0xf] %v5915_v53  ;;  %5918 = vst [vmem:[#allocation3 + $0xd44] sm:$0xf] %v5917_v54  ;;  %v5921_v56 = vld [vmem:[%s20273_s6 + $0xd50] sm:$0xf] }
 0x335   :  { %5920 = vst [vmem:[#allocation3 + $0xd48] sm:$0xf] %v5919_v55  ;;  %v5923_v57 = vld [vmem:[%s20273_s6 + $0xd38] sm:$0xf]  ;;  %5922 = vst [vmem:[#allocation3 + $0xd4c] sm:$0xf] %v5921_v56 }
 0x336   :  { %5924 = vst [vmem:[#allocation3 + $0xd50] sm:$0xf] %v5923_v57  ;;  %5926 = vst [vmem:[#allocation3 + $0xd54] sm:$0xff] %v5925_v58   ;;  %v5929_v59 = vld [vmem:[%s20273_s6 + $0xd74] sm:$0xf]  ;;  %v5981_v20 = vld [vmem:[%s20273_s6 + $0xdc4] sm:$0xff]  }
 0x337   :  { %v5931_v60 = vld [vmem:[%s20273_s6 + $0xd5c] sm:$0xf]  ;;  %v5933_v61 = vld [vmem:[%s20273_s6 + $0xd78] sm:$0xf]  ;;  %5930 = vst [vmem:[#allocation3 + $0xd5c] sm:$0xf] %v5929_v59 }
 0x338   :  { %5932 = vst [vmem:[#allocation3 + $0xd60] sm:$0xf] %v5931_v60  ;;  %5934 = vst [vmem:[#allocation3 + $0xd64] sm:$0xf] %v5933_v61  ;;  %v5935_v62 = vld [vmem:[%s20273_s6 + $0xd60] sm:$0xf] }
 0x339   :  { %v5937_v63 = vld [vmem:[%s20273_s6 + $0xd7c] sm:$0xf]  ;;  %v5939_v0 = vld [vmem:[%s20273_s6 + $0xd64] sm:$0xf]  ;;  %5936 = vst [vmem:[#allocation3 + $0xd68] sm:$0xf] %v5935_v62 }
 0x33a   :  { %5938 = vst [vmem:[#allocation3 + $0xd6c] sm:$0xf] %v5937_v63  ;;  %5940 = vst [vmem:[#allocation3 + $0xd70] sm:$0xf] %v5939_v0  ;;  %v5941_v1 = vld [vmem:[%s20273_s6 + $0xd80] sm:$0xf] }
 0x33b   :  { %v5943_v2 = vld [vmem:[%s20273_s6 + $0xd68] sm:$0xf]  ;;  %v5945_v3 = vld [vmem:[%s20273_s6 + $0xd84] sm:$0xf]  ;;  %5942 = vst [vmem:[#allocation3 + $0xd74] sm:$0xf] %v5941_v1 }
 0x33c   :  { %5944 = vst [vmem:[#allocation3 + $0xd78] sm:$0xf] %v5943_v2  ;;  %5946 = vst [vmem:[#allocation3 + $0xd7c] sm:$0xf] %v5945_v3  ;;  %v5947_v4 = vld [vmem:[%s20273_s6 + $0xd6c] sm:$0xf] }
 0x33d   :  { %v5949_v5 = vld [vmem:[%s20273_s6 + $0xd88] sm:$0xf]  ;;  %v5951_v6 = vld [vmem:[%s20273_s6 + $0xd70] sm:$0xf]  ;;  %5948 = vst [vmem:[#allocation3 + $0xd80] sm:$0xf] %v5947_v4 }
 0x33e   :  { %5950 = vst [vmem:[#allocation3 + $0xd84] sm:$0xf] %v5949_v5  ;;  %5952 = vst [vmem:[#allocation3 + $0xd88] sm:$0xf] %v5951_v6  ;;  %v5957_v8 = vld [vmem:[%s20273_s6 + $0xdac] sm:$0xf] }
 0x33f   :  { %v5959_v9 = vld [vmem:[%s20273_s6 + $0xd94] sm:$0xf]  ;;  %5954 = vst [vmem:[#allocation3 + $0xd8c] sm:$0xff] %v5953_v7   ;;  %5958 = vst [vmem:[#allocation3 + $0xd94] sm:$0xf] %v5957_v8 }
 0x340   :  { %5960 = vst [vmem:[#allocation3 + $0xd98] sm:$0xf] %v5959_v9  ;;  %v5961_v10 = vld [vmem:[%s20273_s6 + $0xdb0] sm:$0xf]  ;;  %v5963_v11 = vld [vmem:[%s20273_s6 + $0xd98] sm:$0xf] }
 0x341   :  { %v5965_v12 = vld [vmem:[%s20273_s6 + $0xdb4] sm:$0xf]  ;;  %5962 = vst [vmem:[#allocation3 + $0xd9c] sm:$0xf] %v5961_v10  ;;  %5964 = vst [vmem:[#allocation3 + $0xda0] sm:$0xf] %v5963_v11 }
 0x342   :  { %5966 = vst [vmem:[#allocation3 + $0xda4] sm:$0xf] %v5965_v12  ;;  %v5967_v13 = vld [vmem:[%s20273_s6 + $0xd9c] sm:$0xf]  ;;  %v5969_v14 = vld [vmem:[%s20273_s6 + $0xdb8] sm:$0xf] }
 0x343   :  { %v5971_v15 = vld [vmem:[%s20273_s6 + $0xda0] sm:$0xf]  ;;  %5968 = vst [vmem:[#allocation3 + $0xda8] sm:$0xf] %v5967_v13  ;;  %5970 = vst [vmem:[#allocation3 + $0xdac] sm:$0xf] %v5969_v14 }
 0x344   :  { %5972 = vst [vmem:[#allocation3 + $0xdb0] sm:$0xf] %v5971_v15  ;;  %v5973_v16 = vld [vmem:[%s20273_s6 + $0xdbc] sm:$0xf]  ;;  %v5975_v17 = vld [vmem:[%s20273_s6 + $0xda4] sm:$0xf] }
 0x345   :  { %v5977_v18 = vld [vmem:[%s20273_s6 + $0xdc0] sm:$0xf]  ;;  %5974 = vst [vmem:[#allocation3 + $0xdb4] sm:$0xf] %v5973_v16  ;;  %5976 = vst [vmem:[#allocation3 + $0xdb8] sm:$0xf] %v5975_v17 }
 0x346   :  { %5978 = vst [vmem:[#allocation3 + $0xdbc] sm:$0xf] %v5977_v18  ;;  %v5979_v19 = vld [vmem:[%s20273_s6 + $0xda8] sm:$0xf]  ;;  %v5985_v21 = vld [vmem:[%s20273_s6 + $0xde4] sm:$0xf] }
 0x347   :  { %5980 = vst [vmem:[#allocation3 + $0xdc0] sm:$0xf] %v5979_v19  ;;  %5982 = vst [vmem:[#allocation3 + $0xdc4] sm:$0xff] %v5981_v20   ;;  %v5987_v22 = vld [vmem:[%s20273_s6 + $0xdcc] sm:$0xf] }
 0x348   :  { %5986 = vst [vmem:[#allocation3 + $0xdcc] sm:$0xf] %v5985_v21  ;;  %v5989_v23 = vld [vmem:[%s20273_s6 + $0xde8] sm:$0xf]  ;;  %v5991_v24 = vld [vmem:[%s20273_s6 + $0xdd0] sm:$0xf] }
 0x349   :  { %5988 = vst [vmem:[#allocation3 + $0xdd0] sm:$0xf] %v5987_v22  ;;  %5990 = vst [vmem:[#allocation3 + $0xdd4] sm:$0xf] %v5989_v23  ;;  %v5993_v25 = vld [vmem:[%s20273_s6 + $0xdec] sm:$0xf] }
 0x34a   :  { %5992 = vst [vmem:[#allocation3 + $0xdd8] sm:$0xf] %v5991_v24  ;;  %v5995_v26 = vld [vmem:[%s20273_s6 + $0xdd4] sm:$0xf]  ;;  %v5997_v27 = vld [vmem:[%s20273_s6 + $0xdf0] sm:$0xf] }
 0x34b   :  { %5994 = vst [vmem:[#allocation3 + $0xddc] sm:$0xf] %v5993_v25  ;;  %5996 = vst [vmem:[#allocation3 + $0xde0] sm:$0xf] %v5995_v26  ;;  %v5999_v28 = vld [vmem:[%s20273_s6 + $0xdd8] sm:$0xf] }
 0x34c   :  { %5998 = vst [vmem:[#allocation3 + $0xde4] sm:$0xf] %v5997_v27  ;;  %v6001_v29 = vld [vmem:[%s20273_s6 + $0xdf4] sm:$0xf]  ;;  %v6003_v30 = vld [vmem:[%s20273_s6 + $0xddc] sm:$0xf] }
 0x34d   :  { %6000 = vst [vmem:[#allocation3 + $0xde8] sm:$0xf] %v5999_v28  ;;  %6002 = vst [vmem:[#allocation3 + $0xdec] sm:$0xf] %v6001_v29  ;;  %v6005_v31 = vld [vmem:[%s20273_s6 + $0xdf8] sm:$0xf] }
 0x34e   :  { %6004 = vst [vmem:[#allocation3 + $0xdf0] sm:$0xf] %v6003_v30  ;;  %v6007_v32 = vld [vmem:[%s20273_s6 + $0xde0] sm:$0xf]  ;;  %v6009_v33 = vld [vmem:[%s20273_s6 + $0xdfc] sm:$0xf] }
 0x34f   :  { %6006 = vst [vmem:[#allocation3 + $0xdf4] sm:$0xf] %v6005_v31  ;;  %6008 = vst [vmem:[#allocation3 + $0xdf8] sm:$0xf] %v6007_v32 }
 0x350   :  { %6010 = vst [vmem:[#allocation3 + $0xdfc] sm:$0xf] %v6009_v33 }
 0x351   :  { %11450 = vsyncadd [#allocation4 + $0x1], 57344  ;;  %v15316_v34 = vld [vmem:[%s20269_s2] sm:$0xff]   ;;  %v15522_v35 = vmov 0.0   ;;  %v15317_v36 = vld [vmem:[%s20269_s2 + $0x8] sm:$0xff]   ;;  %vm15523_vm0 = vmmov 0  }
 0x352   :  { %15221 = vmatprep.subr.bf16.mxu0 %v15522_v35  ;;  %v11451_v37 = vld [vmem:[%s20267_s0] sm:$0xff]  ;;  %v11452_v38 = vld [vmem:[%s20267_s0 + $0x8] sm:$0xff]  ;;  %15225 = vmatprep.mubr.msk.bf16.mxu0 %vm15523_vm0, %v15522_v35  ;;  %v15321_v42 = vld [vmem:[%s20270_s3 + $0x14] ss:$8 sps:$4 sm:$0xff]   ;;  %vm11477_vm1 = vcmask 261120   ;;  %v15524_v56 = vmov 0  }
 0x353   :  { %15222 = vmatpush3.bf16.msra.mxu0 %v15316_v34  ;;  %v15318_v39 = vld [vmem:[%s20270_s3 + $0x4] ss:$8 sps:$4 sm:$0xff]   ;;  %v15320_v40 = vld [vmem:[%s20270_s3] ss:$8 sps:$4 sm:$0xff]   ;;  %v11458_v41 = vpack.c.bf16 %v11452_v38, %v11451_v37  ;;  %v15323_v43 = vld [vmem:[%s20270_s3 + $0x10] ss:$8 sps:$4 sm:$0xff]   ;;  %11669 = vmatprep.mubr.bf16.mxu1 %v15524_v56  ;;  %v11547_v38 = vlaneseq }
 0x354   :  { %15223 = vmatprep.subr.bf16.mxu0 %v15522_v35  ;;  %11637 = vmatprep.subr.bf16.mxu1 %v15318_v39  ;;  %v15324_v44 = vld [vmem:[%s20270_s3 + $0x24] ss:$8 sps:$4 sm:$0xff]   ;;  %v15326_v45 = vld [vmem:[%s20270_s3 + $0x20] ss:$8 sps:$4 sm:$0xff]   ;;  %v15327_v46 = vld [vmem:[%s20270_s3 + $0x34] ss:$8 sps:$4 sm:$0xff]  }
 0x355   :  { %11638 = vmatpush1.bf16.msra.mxu1 %v15320_v40  ;;  %v15329_v47 = vld [vmem:[%s20270_s3 + $0x30] ss:$8 sps:$4 sm:$0xff]   ;;  %v15330_v48 = vld [vmem:[%s20270_s3 + $0x44] ss:$8 sps:$4 sm:$0xff]   ;;  %v15332_v49 = vld [vmem:[%s20270_s3 + $0x40] ss:$8 sps:$4 sm:$0xff]  }
 0x356   :  { %11639 = vmatprep.subr.bf16.mxu1 %v15321_v42  ;;  %v15333_v50 = vld [vmem:[%s20270_s3 + $0x54] ss:$8 sps:$4 sm:$0xff]   ;;  %v15335_v51 = vld [vmem:[%s20270_s3 + $0x50] ss:$8 sps:$4 sm:$0xff]   ;;  %v15336_v52 = vld [vmem:[%s20270_s3 + $0x64] ss:$8 sps:$4 sm:$0xff]  }
 0x357   :  { %15224 = vmatpush3.bf16.msra.mxu0 %v15317_v36  ;;  %v15338_v53 = vld [vmem:[%s20270_s3 + $0x60] ss:$8 sps:$4 sm:$0xff]   ;;  %v15339_v54 = vld [vmem:[%s20270_s3 + $0x74] ss:$8 sps:$4 sm:$0xff]   ;;  %v15341_v55 = vld [vmem:[%s20270_s3 + $0x70] ss:$8 sps:$4 sm:$0xff]  }
 0x358   :  { %v15028_v57 = vld [vmem:[%s20268_s1] ss:$0 sm:$0xff]  ;;  %v15344_v5 = vld [vmem:[%s20271_s4 + $0x4] ss:$16 sps:$4 sm:$0xff]   ;;  %v15392_v37 = vld [vmem:[%s20271_s4 + $0xc] ss:$16 sps:$4 sm:$0xff]  }
 0x359   :  { %11640 = vmatpush1.bf16.msra.mxu1 %v15323_v43  ;;  %v15342_v6 = vld [vmem:[%s20271_s4] ss:$16 sps:$4 sm:$0xff]   ;;  %v15347_v7 = vld [vmem:[%s20271_s4 + $0x24] ss:$16 sps:$4 sm:$0xff]   ;;  %v19673_v39 = vshrl.u32 %v11547_v38, 7 }
 0x35a   :  { %15226 = vmatmul.mubr.msk.bf16.vlgmr.msra.gmra.mrb[0].mxu0 %vm11477_vm1, %v11458_v41  ;;  %11641 = vmatprep.subr.bf16.mxu1 %v15324_v44  ;;  %v15345_v8 = vld [vmem:[%s20271_s4 + $0x20] ss:$16 sps:$4 sm:$0xff]   ;;  %v15350_v9 = vld [vmem:[%s20271_s4 + $0x44] ss:$16 sps:$4 sm:$0xff]  }
 0x35b   :  { %v15348_v10 = vld [vmem:[%s20271_s4 + $0x40] ss:$16 sps:$4 sm:$0xff]   ;;  %v15353_v11 = vld [vmem:[%s20271_s4 + $0x64] ss:$16 sps:$4 sm:$0xff]   ;;  %v19676_v40 = vsub.s32 0, %v19673_v39  ;;  %v19682_v42 = vsub.s32 1, %v19673_v39 }
 0x35c   :  { %v15351_v12 = vld [vmem:[%s20271_s4 + $0x60] ss:$16 sps:$4 sm:$0xff]   ;;  %v15356_v13 = vld [vmem:[%s20271_s4 + $0x84] ss:$16 sps:$4 sm:$0xff]  }
 0x35d   :  { %11642 = vmatpush1.bf16.msra.mxu1 %v15326_v45  ;;  %v15354_v14 = vld [vmem:[%s20271_s4 + $0x80] ss:$16 sps:$4 sm:$0xff]   ;;  %v15359_v15 = vld [vmem:[%s20271_s4 + $0xa4] ss:$16 sps:$4 sm:$0xff]  }
 0x35e   :  { %11643 = vmatprep.subr.bf16.mxu1 %v15327_v46  ;;  %v15357_v16 = vld [vmem:[%s20271_s4 + $0xa0] ss:$16 sps:$4 sm:$0xff]   ;;  %v15362_v17 = vld [vmem:[%s20271_s4 + $0xc4] ss:$16 sps:$4 sm:$0xff]  }
 0x35f   :  { %v15360_v18 = vld [vmem:[%s20271_s4 + $0xc0] ss:$16 sps:$4 sm:$0xff]   ;;  %v15365_v19 = vld [vmem:[%s20271_s4 + $0xe4] ss:$16 sps:$4 sm:$0xff]  }
 0x360   :  { %v15363_v20 = vld [vmem:[%s20271_s4 + $0xe0] ss:$16 sps:$4 sm:$0xff]   ;;  %v15368_v21 = vld [vmem:[%s20271_s4 + $0x104] ss:$16 sps:$4 sm:$0xff]  }
 0x361   :  { %11644 = vmatpush1.bf16.msra.mxu1 %v15329_v47  ;;  %v15366_v22 = vld [vmem:[%s20271_s4 + $0x100] ss:$16 sps:$4 sm:$0xff]   ;;  %v15371_v23 = vld [vmem:[%s20271_s4 + $0x124] ss:$16 sps:$4 sm:$0xff]  }
 0x362   :  { %11645 = vmatprep.subr.bf16.mxu1 %v15330_v48  ;;  %v15369_v24 = vld [vmem:[%s20271_s4 + $0x120] ss:$16 sps:$4 sm:$0xff]   ;;  %v15374_v25 = vld [vmem:[%s20271_s4 + $0x144] ss:$16 sps:$4 sm:$0xff]  }
 0x363   :  { %v15372_v26 = vld [vmem:[%s20271_s4 + $0x140] ss:$16 sps:$4 sm:$0xff]   ;;  %v15377_v27 = vld [vmem:[%s20271_s4 + $0x164] ss:$16 sps:$4 sm:$0xff]  }
 0x364   :  { %v15375_v28 = vld [vmem:[%s20271_s4 + $0x160] ss:$16 sps:$4 sm:$0xff]   ;;  %v15380_v29 = vld [vmem:[%s20271_s4 + $0x184] ss:$16 sps:$4 sm:$0xff]  }
 0x365   :  { %11646 = vmatpush1.bf16.msra.mxu1 %v15332_v49  ;;  %v15378_v30 = vld [vmem:[%s20271_s4 + $0x180] ss:$16 sps:$4 sm:$0xff]   ;;  %v15383_v31 = vld [vmem:[%s20271_s4 + $0x1a4] ss:$16 sps:$4 sm:$0xff]  }
 0x366   :  { %11647 = vmatprep.subr.bf16.mxu1 %v15333_v50  ;;  %v15381_v32 = vld [vmem:[%s20271_s4 + $0x1a0] ss:$16 sps:$4 sm:$0xff]   ;;  %v15386_v33 = vld [vmem:[%s20271_s4 + $0x1c4] ss:$16 sps:$4 sm:$0xff]  }
 0x367   :  { %v15384_v34 = vld [vmem:[%s20271_s4 + $0x1c0] ss:$16 sps:$4 sm:$0xff]   ;;  %v15389_v36 = vld [vmem:[%s20271_s4 + $0x1e4] ss:$16 sps:$4 sm:$0xff]  }
 0x368   :  { %v15387_v35 = vld [vmem:[%s20271_s4 + $0x1e0] ss:$16 sps:$4 sm:$0xff]  }
 0x369   :  { %11648 = vmatpush1.bf16.msra.mxu1 %v15335_v51  ;;  %v11544_v41 = vld [vmem:[%s20268_s1 + $0x1] sm:$0x3] }
 0x36a   :  { %11649 = vmatprep.subr.bf16.mxu1 %v15336_v52  ;;  %v11550_v43 = vrot.slane %v11544_v41, %v19676_v40  ;;  %v11554_v45 = vrot.slane %v11544_v41, %v19682_v42  ;;  %v11680_v41 = vld [vmem:[%s20268_s1 + $0x3] sm:$0x3] }
 0x36d   :  { %11650 = vmatpush1.bf16.msra.mxu1 %v15338_v53 }
 0x36e   :  { %11651 = vmatprep.subr.bf16.mxu1 %v15339_v54 }
 0x371   :  { %11652 = vmatpush1.bf16.msra.mxu1 %v15341_v55 }
 0x372   :  { %12217 = vmatprep.subr.bf16.mxu1 %v15344_v5 }
 0x42d   :  { %v11515_v58 = vpop.f32.mrb[0].mxu0 }
 0x42e   :  { %v11516_v59 = vadd.f32 %v15028_v57, %v11515_v58  ;;  %v15227_v60 = vpop.f32.mrb[1].mxu0 }
 0x42f   :  { %v11518_v61 = vpop.f32.mrb[2].mxu0 }
 0x430   :  { %v11524_v62 = vmul.f32 0.2, %v11516_v59  ;;  %v11519_v63 = vadd.f32 %v15028_v57, %v11518_v61  ;;  %v15228_v0 = vpop.f32.mrb[3].mxu0  ;;  %vm11522_vm2 = vcmp.ge.f32.partialorder %v11516_v59, 0.0 }
 0x432   :  { %vm11523_vm3 = vcmp.ge.f32.partialorder %v11519_v63, 0.0  ;;  %v11525_v1 = vmul.f32 0.2, %v11519_v63  ;;  %v11526_v2 = vsel %vm11522_vm2, %v11516_v59, %v11524_v62 }
 0x434   :  { %v11527_v3 = vsel %vm11523_vm3, %v11519_v63, %v11525_v1 }
 0x435   :  { %v11545_v4 = vpack.c.bf16 %v11527_v3, %v11526_v2 }
 0x437   :  { %11670 = vmatmul.mubr.bf16.vlgmr.msra.gmra.mrb[0].mxu1 %v11545_v4 }
 0x438   :  { %12218 = vmatpush1.bf16.msra.mxu1 %v15342_v6 }
 0x439   :  { %12219 = vmatprep.subr.bf16.mxu1 %v15347_v7 }
 0x43c   :  { %12220 = vmatpush1.bf16.msra.mxu1 %v15345_v8 }
 0x43d   :  { %12221 = vmatprep.subr.bf16.mxu1 %v15350_v9 }
 0x440   :  { %12222 = vmatpush1.bf16.msra.mxu1 %v15348_v10 }
 0x441   :  { %12223 = vmatprep.subr.bf16.mxu1 %v15353_v11 }
 0x444   :  { %12224 = vmatpush1.bf16.msra.mxu1 %v15351_v12 }
 0x445   :  { %12225 = vmatprep.subr.bf16.mxu1 %v15356_v13 }
 0x448   :  { %12226 = vmatpush1.bf16.msra.mxu1 %v15354_v14 }
 0x449   :  { %12227 = vmatprep.subr.bf16.mxu1 %v15359_v15 }
 0x44c   :  { %12228 = vmatpush1.bf16.msra.mxu1 %v15357_v16 }
 0x44d   :  { %12229 = vmatprep.subr.bf16.mxu1 %v15362_v17 }
 0x450   :  { %12230 = vmatpush1.bf16.msra.mxu1 %v15360_v18 }
 0x451   :  { %12231 = vmatprep.subr.bf16.mxu1 %v15365_v19 }
 0x454   :  { %12232 = vmatpush1.bf16.msra.mxu1 %v15363_v20 }
 0x455   :  { %12233 = vmatprep.subr.bf16.mxu1 %v15368_v21 }
 0x458   :  { %12234 = vmatpush1.bf16.msra.mxu1 %v15366_v22 }
 0x459   :  { %12235 = vmatprep.subr.bf16.mxu1 %v15371_v23 }
 0x45c   :  { %12236 = vmatpush1.bf16.msra.mxu1 %v15369_v24 }
 0x45d   :  { %12237 = vmatprep.subr.bf16.mxu1 %v15374_v25 }
 0x460   :  { %12238 = vmatpush1.bf16.msra.mxu1 %v15372_v26 }
 0x461   :  { %12239 = vmatprep.subr.bf16.mxu1 %v15377_v27 }
 0x464   :  { %12240 = vmatpush1.bf16.msra.mxu1 %v15375_v28 }
 0x465   :  { %12241 = vmatprep.subr.bf16.mxu1 %v15380_v29 }
 0x468   :  { %12242 = vmatpush1.bf16.msra.mxu1 %v15378_v30 }
 0x469   :  { %12243 = vmatprep.subr.bf16.mxu1 %v15383_v31  ;;  %v15525_v31 = vmov 1966171168  }
 0x46c   :  { %12244 = vmatpush1.bf16.msra.mxu1 %v15381_v32  ;;  %v11731_v32 = vunpack.c.l.s4 %v15525_v31  ;;  %v15425_v31 = vld [vmem:[%s20271_s4 + $0x16c] ss:$16 sps:$4 sm:$0xff]  }
 0x46d   :  { %12245 = vmatprep.subr.bf16.mxu1 %v15386_v33 }
 0x46e   :  { %v11732_v33 = vunpack.c.0.s8 %v11731_v32  ;;  %v15423_v32 = vld [vmem:[%s20271_s4 + $0x168] ss:$16 sps:$4 sm:$0xff]  }
 0x470   :  { %12246 = vmatpush1.bf16.msra.mxu1 %v15384_v34 }
 0x471   :  { %12247 = vmatprep.subr.bf16.mxu1 %v15389_v36 }
 0x474   :  { %12248 = vmatpush1.bf16.msra.mxu1 %v15387_v35  ;;  %v19695_v35 = vsub.s32 %v11732_v33, %v19673_v39  ;;  %v15428_v33 = vld [vmem:[%s20271_s4 + $0x18c] ss:$16 sps:$4 sm:$0xff]  }
 0x475   :  { %12260 = vmatprep.subr.bf16.mxu1 %v15392_v37 }
 0x50a   :  { %v11671_v44 = vpop.f32.mrb[0].mxu1 }
 0x50b   :  { %v11673_v46 = vpop.f32.mrb[1].mxu1  ;;  %v19686_v48 = vadd.f32 %v11671_v44, %v11550_v43 }
 0x50c   :  { %v11675_v47 = vpop.f32.mrb[2].mxu1  ;;  %v11674_v51 = vadd.f32 %v11673_v46, %v11554_v45 }
 0x50d   :  { %v19688_v49 = vadd.f32 %v11675_v47, %v11550_v43  ;;  %v11677_v50 = vpop.f32.mrb[3].mxu1 }
 0x50e   :  { %v11678_v52 = vadd.f32 %v11677_v50, %v11554_v45 }
 0x50f   :  { %v11682_v53 = vadd.f32 %v19688_v49, %v19686_v48 }
 0x510   :  { %v11689_v54 = vadd.f32 %v11678_v52, %v11674_v51 }
 0x511   :  { %v11683_v55 = vrot.slane %v11682_v53, 4 }
 0x512   :  { %v11690_v56 = vrot.slane %v11689_v54, 4 }
 0x513   :  { %v11684_v57 = vadd.f32 %v11683_v55, %v11682_v53 }
 0x514   :  { %v11691_v58 = vadd.f32 %v11690_v56, %v11689_v54 }
 0x515   :  { %v11685_v59 = vrot.slane %v11684_v57, 2 }
 0x516   :  { %v11692_v60 = vrot.slane %v11691_v58, 2 }
 0x517   :  { %v11686_v61 = vadd.f32 %v11685_v59, %v11684_v57  ;;  %v11681_v59 = vld [vmem:[%s20268_s1 + $0x5] sm:$0x3] }
 0x518   :  { %v11693_v62 = vadd.f32 %v11692_v60, %v11691_v58 }
 0x519   :  { %v11687_v63 = vrot.slane %v11686_v61, 1 }
 0x51a   :  { %v11694_v0 = vrot.slane %v11693_v62, 1 }
 0x51b   :  { %v11688_v1 = vadd.f32 %v11687_v63, %v11686_v61 }
 0x51c   :  { %v11695_v2 = vadd.f32 %v11694_v0, %v11693_v62 }
 0x51d   :  { %v11697_v3 = vmul.f32 0.0625, %v11688_v1 }
 0x51e   :  { %v11698_v4 = vmul.f32 0.0625, %v11695_v2 }
 0x51f   :  { %v11699_v5 = vsub.f32 %v19686_v48, %v11697_v3  ;;  %v11701_v6 = vsub.f32 %v19688_v49, %v11697_v3 }
 0x520   :  { %v11700_v7 = vsub.f32 %v11674_v51, %v11698_v4  ;;  %v11702_v8 = vsub.f32 %v11678_v52, %v11698_v4 }
 0x521   :  { %v11703_v9 = vmul.f32 %v11699_v5, %v11699_v5  ;;  %v11705_v10 = vmul.f32 %v11701_v6, %v11701_v6 }
 0x522   :  { %v11704_v11 = vmul.f32 %v11700_v7, %v11700_v7  ;;  %v11706_v12 = vmul.f32 %v11702_v8, %v11702_v8  ;;  %v15390_v7 = vld [vmem:[%s20271_s4 + $0x8] ss:$16 sps:$4 sm:$0xff]  }
 0x523   :  { %v11707_v13 = vadd.f32 %v11705_v10, %v11703_v9 }
 0x524   :  { %v11714_v14 = vadd.f32 %v11706_v12, %v11704_v11  ;;  %v15395_v11 = vld [vmem:[%s20271_s4 + $0x2c] ss:$16 sps:$4 sm:$0xff]   ;;  %v15393_v12 = vld [vmem:[%s20271_s4 + $0x28] ss:$16 sps:$4 sm:$0xff]  }
 0x525   :  { %v11708_v15 = vrot.slane %v11707_v13, 4 }
 0x526   :  { %v11715_v16 = vrot.slane %v11714_v14, 4 }
 0x527   :  { %v11709_v17 = vadd.f32 %v11708_v15, %v11707_v13  ;;  %v15398_v13 = vld [vmem:[%s20271_s4 + $0x4c] ss:$16 sps:$4 sm:$0xff]  }
 0x528   :  { %v11716_v18 = vadd.f32 %v11715_v16, %v11714_v14  ;;  %v15396_v14 = vld [vmem:[%s20271_s4 + $0x48] ss:$16 sps:$4 sm:$0xff]   ;;  %v15401_v15 = vld [vmem:[%s20271_s4 + $0x6c] ss:$16 sps:$4 sm:$0xff]  }
 0x529   :  { %v11710_v19 = vrot.slane %v11709_v17, 2  ;;  %v15399_v16 = vld [vmem:[%s20271_s4 + $0x68] ss:$16 sps:$4 sm:$0xff]  }
 0x52a   :  { %v11717_v20 = vrot.slane %v11716_v18, 2 }
 0x52b   :  { %v11711_v21 = vadd.f32 %v11710_v19, %v11709_v17  ;;  %v15404_v17 = vld [vmem:[%s20271_s4 + $0x8c] ss:$16 sps:$4 sm:$0xff]  }
 0x52c   :  { %v11718_v22 = vadd.f32 %v11717_v20, %v11716_v18  ;;  %v15402_v18 = vld [vmem:[%s20271_s4 + $0x88] ss:$16 sps:$4 sm:$0xff]   ;;  %v15407_v19 = vld [vmem:[%s20271_s4 + $0xac] ss:$16 sps:$4 sm:$0xff]  }
 0x52d   :  { %v11712_v23 = vrot.slane %v11711_v21, 1  ;;  %v15405_v20 = vld [vmem:[%s20271_s4 + $0xa8] ss:$16 sps:$4 sm:$0xff]  }
 0x52e   :  { %v11719_v24 = vrot.slane %v11718_v22, 1 }
 0x52f   :  { %v11713_v25 = vadd.f32 %v11712_v23, %v11711_v21  ;;  %v15410_v21 = vld [vmem:[%s20271_s4 + $0xcc] ss:$16 sps:$4 sm:$0xff]  }
 0x530   :  { %v11720_v26 = vadd.f32 %v11719_v24, %v11718_v22  ;;  %v15408_v22 = vld [vmem:[%s20271_s4 + $0xc8] ss:$16 sps:$4 sm:$0xff]   ;;  %v15413_v23 = vld [vmem:[%s20271_s4 + $0xec] ss:$16 sps:$4 sm:$0xff]  }
 0x531   :  { %v11721_v27 = vmul.f32 0.0625, %v11713_v25  ;;  %v15411_v24 = vld [vmem:[%s20271_s4 + $0xe8] ss:$16 sps:$4 sm:$0xff]   ;;  %v15416_v25 = vld [vmem:[%s20271_s4 + $0x10c] ss:$16 sps:$4 sm:$0xff]  }
 0x532   :  { %v11722_v28 = vmul.f32 0.0625, %v11720_v26  ;;  %v15414_v26 = vld [vmem:[%s20271_s4 + $0x108] ss:$16 sps:$4 sm:$0xff]  }
 0x533   :  { %v11723_v29 = vadd.f32 1e-05, %v11721_v27  ;;  %v15419_v27 = vld [vmem:[%s20271_s4 + $0x12c] ss:$16 sps:$4 sm:$0xff]  }
 0x534   :  { %v11724_v30 = vadd.f32 1e-05, %v11722_v28  ;;  %v15417_v28 = vld [vmem:[%s20271_s4 + $0x128] ss:$16 sps:$4 sm:$0xff]  }
 0x535   :  { %15438 = vrsqrt.f32 %v11723_v29  ;;  %v15422_v29 = vld [vmem:[%s20271_s4 + $0x14c] ss:$16 sps:$4 sm:$0xff]  }
 0x536   :  { %15440 = vrsqrt.f32 %v11724_v30  ;;  %v15420_v30 = vld [vmem:[%s20271_s4 + $0x148] ss:$16 sps:$4 sm:$0xff]  }
 0x53f   :  { %v15439_v34 = vpop.eup %15438 }
 0x540   :  { %v15441_v36 = vpop.eup %15440 }
 0x541   :  { %v11729_v37 = vcombine.low %v15439_v34, %v15441_v36  ;;  %v15426_v34 = vld [vmem:[%s20271_s4 + $0x188] ss:$16 sps:$4 sm:$0xff]   ;;  %v15431_v36 = vld [vmem:[%s20271_s4 + $0x1ac] ss:$16 sps:$4 sm:$0xff]  }
 0x543   :  { %v11736_v38 = vrot.slane %v11729_v37, %v19695_v35  ;;  %v15429_v37 = vld [vmem:[%s20271_s4 + $0x1a8] ss:$16 sps:$4 sm:$0xff]  }
 0x545   :  { %v11743_v43 = vrot.slane %v11736_v38, %v19695_v35  ;;  %v15434_v38 = vld [vmem:[%s20271_s4 + $0x1cc] ss:$16 sps:$4 sm:$0xff]  }
 0x547   :  { %v11745_v44 = vmul.f32 %v11743_v43, %v11680_v41  ;;  %v15432_v41 = vld [vmem:[%s20271_s4 + $0x1c8] ss:$16 sps:$4 sm:$0xff]   ;;  %v15437_v43 = vld [vmem:[%s20271_s4 + $0x1ec] ss:$16 sps:$4 sm:$0xff]  }
 0x549   :  { %v11750_v45 = vrot.slane %v11745_v44, %v19676_v40  ;;  %v11754_v46 = vrot.slane %v11745_v44, %v19682_v42  ;;  %v15435_v44 = vld [vmem:[%s20271_s4 + $0x1e8] ss:$16 sps:$4 sm:$0xff]  }
 0x54b   :  { %v11757_v47 = vmul.f32 %v11750_v45, %v11697_v3  ;;  %v11758_v50 = vmul.f32 %v11754_v46, %v11698_v4  ;;  %v11781_v53 = vmul.f32 %v11754_v46, %v11678_v52  ;;  %v11779_v54 = vmul.f32 %v11754_v46, %v11674_v51 }
 0x54c   :  { %v11778_v55 = vmul.f32 %v11750_v45, %v19686_v48  ;;  %v11780_v56 = vmul.f32 %v11750_v45, %v19688_v49 }
 0x54d   :  { %v11761_v57 = vcombine.low %v11757_v47, %v11758_v50 }
 0x54f   :  { %v11768_v58 = vrot.slane %v11761_v57, %v19695_v35 }
 0x551   :  { %v11775_v60 = vrot.slane %v11768_v58, %v19695_v35 }
 0x553   :  { %v11777_v61 = vsub.f32 %v11681_v59, %v11775_v60 }
 0x555   :  { %v11786_v62 = vrot.slane %v11777_v61, %v19676_v40  ;;  %v11790_v63 = vrot.slane %v11777_v61, %v19682_v42 }
 0x557   :  { %v11796_v52 = vadd.f32 %v11790_v63, %v11781_v53  ;;  %v11794_v51 = vadd.f32 %v11790_v63, %v11779_v54  ;;  %v11793_v0 = vadd.f32 %v11786_v62, %v11778_v55  ;;  %v11795_v48 = vadd.f32 %v11786_v62, %v11780_v56  ;;  %v11873_v53 = vld [vmem:[%s20268_s1 + $0x7] sm:$0xf] }
 0x558   :  { %v11880_v54 = vrot.slane %v11873_v53, %v19676_v40  ;;  %v11884_v55 = vrot.slane %v11873_v53, %v19682_v42 }
 0x559   :  { %vm11798_vm4 = vcmp.ge.f32.partialorder %v11794_v51, 0.0  ;;  %vm11800_vm5 = vcmp.ge.f32.partialorder %v11796_v52, 0.0  ;;  %v11802_v49 = vmul.f32 0.2, %v11794_v51  ;;  %v11804_v1 = vmul.f32 0.2, %v11796_v52 }
 0x55a   :  { %vm11797_vm6 = vcmp.ge.f32.partialorder %v11793_v0, 0.0  ;;  %vm11799_vm7 = vcmp.ge.f32.partialorder %v11795_v48, 0.0  ;;  %v11801_v2 = vmul.f32 0.2, %v11793_v0  ;;  %v11803_v3 = vmul.f32 0.2, %v11795_v48 }
 0x55b   :  { %v11806_v4 = vsel %vm11798_vm4, %v11794_v51, %v11802_v49  ;;  %v11808_v5 = vsel %vm11800_vm5, %v11796_v52, %v11804_v1 }
 0x55c   :  { %v11875_v6 = vpack.c.bf16 %v11808_v5, %v11806_v4  ;;  %v11805_v8 = vsel %vm11797_vm6, %v11793_v0, %v11801_v2  ;;  %v11807_v9 = vsel %vm11799_vm7, %v11795_v48, %v11803_v3 }
 0x55d   :  { %v19716_v10 = vpack.c.bf16 %v11807_v9, %v11805_v8 }
 0x55e   :  { %12249 = vmatprep.mubr.bf16.mxu1 %v11875_v6 }
 0x55f   :  { %12250 = vmatmul.mubr.bf16.vlgmr.msra.gmra.mrb[4].mxu1 %v19716_v10 }
 0x560   :  { %12261 = vmatpush1.bf16.msra.mxu1 %v15390_v7  ;;  %12292 = vmatprep.mubr.bf16.mxu1 %v11875_v6 }
 0x561   :  { %12262 = vmatprep.subr.bf16.mxu1 %v15395_v11 }
 0x564   :  { %12263 = vmatpush1.bf16.msra.mxu1 %v15393_v12 }
 0x565   :  { %12264 = vmatprep.subr.bf16.mxu1 %v15398_v13  ;;  %v19843_v13 = vsub.s32 3, %v19673_v39 }
 0x568   :  { %12265 = vmatpush1.bf16.msra.mxu1 %v15396_v14 }
 0x569   :  { %12266 = vmatprep.subr.bf16.mxu1 %v15401_v15 }
 0x56c   :  { %12267 = vmatpush1.bf16.msra.mxu1 %v15399_v16 }
 0x56d   :  { %12268 = vmatprep.subr.bf16.mxu1 %v15404_v17 }
 0x570   :  { %12269 = vmatpush1.bf16.msra.mxu1 %v15402_v18 }
 0x571   :  { %12270 = vmatprep.subr.bf16.mxu1 %v15407_v19 }
 0x574   :  { %12271 = vmatpush1.bf16.msra.mxu1 %v15405_v20  ;;  %v11892_v20 = vrot.slane %v11873_v53, %v19843_v13 }
 0x575   :  { %12272 = vmatprep.subr.bf16.mxu1 %v15410_v21 }
 0x578   :  { %12273 = vmatpush1.bf16.msra.mxu1 %v15408_v22 }
 0x579   :  { %12274 = vmatprep.subr.bf16.mxu1 %v15413_v23 }
 0x57c   :  { %12275 = vmatpush1.bf16.msra.mxu1 %v15411_v24 }
 0x57d   :  { %12276 = vmatprep.subr.bf16.mxu1 %v15416_v25 }
 0x580   :  { %12277 = vmatpush1.bf16.msra.mxu1 %v15414_v26 }
 0x581   :  { %12278 = vmatprep.subr.bf16.mxu1 %v15419_v27 }
 0x584   :  { %12279 = vmatpush1.bf16.msra.mxu1 %v15417_v28 }
 0x585   :  { %12280 = vmatprep.subr.bf16.mxu1 %v15422_v29 }
 0x588   :  { %12281 = vmatpush1.bf16.msra.mxu1 %v15420_v30 }
 0x589   :  { %12282 = vmatprep.subr.bf16.mxu1 %v15425_v31 }
 0x58c   :  { %12283 = vmatpush1.bf16.msra.mxu1 %v15423_v32 }
 0x58d   :  { %12284 = vmatprep.subr.bf16.mxu1 %v15428_v33 }
 0x590   :  { %12285 = vmatpush1.bf16.msra.mxu1 %v15426_v34 }
 0x591   :  { %12286 = vmatprep.subr.bf16.mxu1 %v15431_v36 }
 0x594   :  { %12287 = vmatpush1.bf16.msra.mxu1 %v15429_v37 }
 0x595   :  { %12288 = vmatprep.subr.bf16.mxu1 %v15434_v38 }
 0x598   :  { %12289 = vmatpush1.bf16.msra.mxu1 %v15432_v41 }
 0x599   :  { %12290 = vmatprep.subr.bf16.mxu1 %v15437_v43 }
 0x59c   :  { %12291 = vmatpush1.bf16.msra.mxu1 %v15435_v44 }
 0x59f   :  { %12293 = vmatmul.mubr.bf16.vlgmr.msra.gmra.mrb[8].mxu1 %v19716_v10  ;;  %v19836_v10 = vsub.s32 2, %v19673_v39 }
 0x5a1   :  { %v11888_v16 = vrot.slane %v11873_v53, %v19836_v10 }
 0x632   :  { %v12251_v45 = vpop.f32.mrb[4].mxu1 }
 0x633   :  { %v12253_v46 = vpop.f32.mrb[5].mxu1  ;;  %v19819_v58 = vadd.f32 %v12251_v45, %v11880_v54 }
 0x634   :  { %v12255_v47 = vpop.f32.mrb[6].mxu1  ;;  %v19821_v59 = vadd.f32 %v12253_v46, %v11884_v55 }
 0x635   :  { %v12257_v50 = vpop.f32.mrb[7].mxu1  ;;  %v19815_v56 = vadd.f32 %v12255_v47, %v11880_v54 }
 0x636   :  { %v19817_v57 = vadd.f32 %v12257_v50, %v11884_v55 }
 0x637   :  { %v12305_v60 = vadd.f32 %v19815_v56, %v19819_v58 }
 0x638   :  { %v12312_v61 = vadd.f32 %v19817_v57, %v19821_v59 }
 0x639   :  { %v12306_v62 = vrot.slane %v12305_v60, 4 }
 0x63a   :  { %v12313_v63 = vrot.slane %v12312_v61, 4 }
 0x63b   :  { %v12307_v52 = vadd.f32 %v12306_v62, %v12305_v60 }
 0x63c   :  { %v12314_v51 = vadd.f32 %v12313_v63, %v12312_v61 }
 0x63d   :  { %v12308_v0 = vrot.slane %v12307_v52, 2 }
 0x63e   :  { %v12315_v48 = vrot.slane %v12314_v51, 2 }
 0x63f   :  { %v12309_v49 = vadd.f32 %v12308_v0, %v12307_v52 }
 0x640   :  { %v12316_v1 = vadd.f32 %v12315_v48, %v12314_v51 }
 0x641   :  { %v12310_v2 = vrot.slane %v12309_v49, 1 }
 0x642   :  { %v12317_v3 = vrot.slane %v12316_v1, 1 }
 0x643   :  { %v12311_v4 = vadd.f32 %v12310_v2, %v12309_v49 }
 0x644   :  { %v12318_v5 = vadd.f32 %v12317_v3, %v12316_v1 }
 0x645   :  { %v19827_v6 = vmul.f32 0.0625, %v12311_v4 }
 0x646   :  { %v19829_v7 = vmul.f32 0.0625, %v12318_v5 }
 0x647   :  { %v12337_v8 = vsub.f32 %v19819_v58, %v19827_v6  ;;  %v12341_v9 = vsub.f32 %v19815_v56, %v19827_v6 }
 0x648   :  { %v12338_v11 = vsub.f32 %v19821_v59, %v19829_v7  ;;  %v12342_v12 = vsub.f32 %v19817_v57, %v19829_v7 }
 0x649   :  { %v12345_v14 = vmul.f32 %v12337_v8, %v12337_v8  ;;  %v12349_v15 = vmul.f32 %v12341_v9, %v12341_v9 }
 0x64a   :  { %v12346_v17 = vmul.f32 %v12338_v11, %v12338_v11  ;;  %v12350_v18 = vmul.f32 %v12342_v12, %v12342_v12 }
 0x64b   :  { %v12353_v23 = vadd.f32 %v12349_v15, %v12345_v14 }
 0x64c   :  { %v12360_v27 = vadd.f32 %v12350_v18, %v12346_v17 }
 0x64d   :  { %v12354_v32 = vrot.slane %v12353_v23, 4 }
 0x64e   :  { %v12361_v34 = vrot.slane %v12360_v27, 4 }
 0x64f   :  { %v12355_v41 = vadd.f32 %v12354_v32, %v12353_v23 }
 0x650   :  { %v12362_v44 = vadd.f32 %v12361_v34, %v12360_v27 }
 0x651   :  { %v12356_v50 = vrot.slane %v12355_v41, 2 }
 0x652   :  { %v12363_v54 = vrot.slane %v12362_v44, 2 }
 0x653   :  { %v12357_v62 = vadd.f32 %v12356_v50, %v12355_v41 }
 0x654   :  { %v12364_v52 = vadd.f32 %v12363_v54, %v12362_v44 }
 0x655   :  { %v12358_v2 = vrot.slane %v12357_v62, 1 }
 0x656   :  { %v12365_v5 = vrot.slane %v12364_v52, 1 }
 0x657   :  { %v12359_v14 = vadd.f32 %v12358_v2, %v12357_v62 }
 0x672   :  { %v12294_v19 = vpop.f32.mrb[8].mxu1 }
 0x673   :  { %v12296_v21 = vpop.f32.mrb[9].mxu1  ;;  %v19847_v24 = vadd.f32 %v12294_v19, %v11888_v16 }
 0x674   :  { %v12298_v22 = vpop.f32.mrb[10].mxu1  ;;  %v19851_v28 = vadd.f32 %v12296_v21, %v11892_v20 }
 0x675   :  { %v19849_v25 = vadd.f32 %v12298_v22, %v11888_v16  ;;  %v12300_v26 = vpop.f32.mrb[11].mxu1  ;;  %v12366_v16 = vadd.f32 %v12365_v5, %v12364_v52 }
 0x676   :  { %v19853_v29 = vadd.f32 %v12300_v26, %v11892_v20  ;;  %v12381_v20 = vmul.f32 0.0625, %v12359_v14 }
 0x677   :  { %v12319_v30 = vadd.f32 %v19849_v25, %v19847_v24  ;;  %v12382_v22 = vmul.f32 0.0625, %v12366_v16 }
 0x678   :  { %v12326_v31 = vadd.f32 %v19853_v29, %v19851_v28 }
 0x679   :  { %v12320_v33 = vrot.slane %v12319_v30, 4  ;;  %v12386_v32 = vadd.f32 1e-05, %v12382_v22 }
 0x67a   :  { %v12327_v36 = vrot.slane %v12326_v31, 4 }
 0x67b   :  { %v12321_v37 = vadd.f32 %v12320_v33, %v12319_v30  ;;  %v12385_v30 = vadd.f32 1e-05, %v12381_v20 }
 0x67c   :  { %v12328_v38 = vadd.f32 %v12327_v36, %v12326_v31 }
 0x67d   :  { %v12322_v43 = vrot.slane %v12321_v37, 2  ;;  %15442 = vrsqrt.f32 %v12385_v30 }
 0x67e   :  { %v12329_v45 = vrot.slane %v12328_v38, 2  ;;  %15444 = vrsqrt.f32 %v12386_v32 }
 0x67f   :  { %v12323_v46 = vadd.f32 %v12322_v43, %v12321_v37 }
 0x680   :  { %v12330_v47 = vadd.f32 %v12329_v45, %v12328_v38 }
 0x681   :  { %v12324_v53 = vrot.slane %v12323_v46, 1 }
 0x682   :  { %v12331_v55 = vrot.slane %v12330_v47, 1 }
 0x683   :  { %v12325_v60 = vadd.f32 %v12324_v53, %v12323_v46 }
 0x684   :  { %v12332_v61 = vadd.f32 %v12331_v55, %v12330_v47 }
 0x685   :  { %v12335_v63 = vmul.f32 0.0625, %v12325_v60 }
 0x686   :  { %v12336_v51 = vmul.f32 0.0625, %v12332_v61  ;;  %v12303_v61 = vld [vmem:[%s20268_s1 + $0xb] sm:$0xf] }
 0x687   :  { %v12339_v0 = vsub.f32 %v19847_v24, %v12335_v63  ;;  %v12343_v48 = vsub.f32 %v19849_v25, %v12335_v63  ;;  %v15443_v44 = vpop.eup %15442 }
 0x688   :  { %v12340_v49 = vsub.f32 %v19851_v28, %v12336_v51  ;;  %v12344_v1 = vsub.f32 %v19853_v29, %v12336_v51  ;;  %v15445_v45 = vpop.eup %15444 }
 0x689   :  { %v12347_v3 = vmul.f32 %v12339_v0, %v12339_v0  ;;  %v12351_v4 = vmul.f32 %v12343_v48, %v12343_v48  ;;  %v12397_v47 = vcombine.low %v15443_v44, %v15445_v45 }
 0x68a   :  { %v12348_v8 = vmul.f32 %v12340_v49, %v12340_v49  ;;  %v12352_v9 = vmul.f32 %v12344_v1, %v12344_v1 }
 0x68b   :  { %v12367_v11 = vadd.f32 %v12351_v4, %v12347_v3  ;;  %v12405_v54 = vrot.slane %v12397_v47, %v19695_v35 }
 0x68c   :  { %v12374_v12 = vadd.f32 %v12352_v9, %v12348_v8 }
 0x68d   :  { %v12368_v15 = vrot.slane %v12367_v11, 4 }
 0x68e   :  { %v12375_v17 = vrot.slane %v12374_v12, 4 }
 0x68f   :  { %v12369_v18 = vadd.f32 %v12368_v15, %v12367_v11 }
 0x690   :  { %v12376_v19 = vadd.f32 %v12375_v17, %v12374_v12 }
 0x691   :  { %v12370_v21 = vrot.slane %v12369_v18, 2 }
 0x692   :  { %v12377_v23 = vrot.slane %v12376_v19, 2 }
 0x693   :  { %v12371_v26 = vadd.f32 %v12370_v21, %v12369_v18 }
 0x694   :  { %v12378_v27 = vadd.f32 %v12377_v23, %v12376_v19 }
 0x695   :  { %v12372_v31 = vrot.slane %v12371_v26, 1 }
 0x696   :  { %v12379_v33 = vrot.slane %v12378_v27, 1 }
 0x697   :  { %v12373_v34 = vadd.f32 %v12372_v31, %v12371_v26 }
 0x698   :  { %v12380_v36 = vadd.f32 %v12379_v33, %v12378_v27 }
 0x699   :  { %v12383_v37 = vmul.f32 0.0625, %v12373_v34 }
 0x69a   :  { %v12384_v38 = vmul.f32 0.0625, %v12380_v36 }
 0x69b   :  { %v12387_v41 = vadd.f32 1e-05, %v12383_v37 }
 0x69c   :  { %v12388_v43 = vadd.f32 1e-05, %v12384_v38 }
 0x69d   :  { %15446 = vrsqrt.f32 %v12387_v41 }
 0x69e   :  { %15448 = vrsqrt.f32 %v12388_v43 }
 0x6a7   :  { %v15447_v46 = vpop.eup %15446 }
 0x6a8   :  { %v15449_v50 = vpop.eup %15448 }
 0x6a9   :  { %v12398_v53 = vcombine.low %v15447_v46, %v15449_v50 }
 0x6ab   :  { %v12412_v55 = vrot.slane %v12398_v53, %v19695_v35 }
 0x6ad   :  { %v12413_v60 = vcombine.low %v12405_v54, %v12412_v55 }
 0x6af   :  { %v12420_v62 = vrot.slane %v12413_v60, %v19695_v35 }
 0x6b1   :  { %v12422_v52 = vmul.f32 %v12420_v62, %v12303_v61 }
 0x6b3   :  { %v12427_v0 = vrot.slane %v12422_v52, %v19676_v40  ;;  %v12431_v48 = vrot.slane %v12422_v52, %v19682_v42  ;;  %v12435_v49 = vrot.slane %v12422_v52, %v19836_v10  ;;  %v12439_v1 = vrot.slane %v12422_v52, %v19843_v13 }
 0x6b5   :  { %v12444_v2 = vmul.f32 %v12427_v0, %v19827_v6  ;;  %v12445_v3 = vmul.f32 %v12431_v48, %v19829_v7  ;;  %v12446_v4 = vmul.f32 %v12435_v49, %v12335_v63  ;;  %v12447_v5 = vmul.f32 %v12439_v1, %v12336_v51  ;;  %v12304_v6 = vld [vmem:[%s20268_s1 + $0xf] sm:$0xf] }
 0x6b6   :  { %v12480_v8 = vmul.f32 %v12435_v49, %v19847_v24  ;;  %v12481_v9 = vmul.f32 %v12439_v1, %v19851_v28  ;;  %v12485_v14 = vmul.f32 %v12439_v1, %v19853_v29  ;;  %v12478_v24 = vmul.f32 %v12427_v0, %v19819_v58 }
 0x6b7   :  { %v12452_v11 = vcombine.low %v12444_v2, %v12445_v3  ;;  %v12453_v12 = vcombine.low %v12446_v4, %v12447_v5  ;;  %v12479_v28 = vmul.f32 %v12431_v48, %v19821_v59  ;;  %v12482_v20 = vmul.f32 %v12427_v0, %v19815_v56 }
 0x6b8   :  { %v12483_v21 = vmul.f32 %v12431_v48, %v19817_v57  ;;  %v12484_v22 = vmul.f32 %v12435_v49, %v19849_v25 }
 0x6b9   :  { %v12460_v15 = vrot.slane %v12452_v11, %v19695_v35  ;;  %v12467_v16 = vrot.slane %v12453_v12, %v19695_v35 }
 0x6bb   :  { %v12468_v17 = vcombine.low %v12460_v15, %v12467_v16 }
 0x6bd   :  { %v12475_v7 = vrot.slane %v12468_v17, %v19695_v35 }
 0x6bf   :  { %v12477_v63 = vsub.f32 %v12304_v6, %v12475_v7 }
 0x6c1   :  { %v12490_v51 = vrot.slane %v12477_v63, %v19676_v40  ;;  %v12494_v29 = vrot.slane %v12477_v63, %v19682_v42  ;;  %v12498_v18 = vrot.slane %v12477_v63, %v19836_v10  ;;  %v12502_v19 = vrot.slane %v12477_v63, %v19843_v13 }
 0x6c3   :  { %v12507_v23 = vadd.f32 %v12490_v51, %v12478_v24  ;;  %v12508_v26 = vadd.f32 %v12494_v29, %v12479_v28  ;;  %v12509_v27 = vadd.f32 %v12498_v18, %v12480_v8  ;;  %v12510_v58 = vadd.f32 %v12502_v19, %v12481_v9 }
 0x6c4   :  { %v12511_v30 = vadd.f32 %v12490_v51, %v12482_v20  ;;  %v12512_v59 = vadd.f32 %v12494_v29, %v12483_v21  ;;  %v12513_v31 = vadd.f32 %v12498_v18, %v12484_v22  ;;  %v12514_v32 = vadd.f32 %v12502_v19, %v12485_v14 }
 0x6c5   :  { %vm12515_vm8 = vcmp.ge.f32.partialorder %v12507_v23, 0.0  ;;  %vm12516_vm9 = vcmp.ge.f32.partialorder %v12508_v26, 0.0  ;;  %vm12517_vm10 = vcmp.ge.f32.partialorder %v12509_v27, 0.0  ;;  %vm12518_vm11 = vcmp.ge.f32.partialorder %v12510_v58, 0.0 }
 0x6c6   :  { %vm12519_vm12 = vcmp.ge.f32.partialorder %v12511_v30, 0.0  ;;  %vm12520_vm13 = vcmp.ge.f32.partialorder %v12512_v59, 0.0  ;;  %vm12521_vm14 = vcmp.ge.f32.partialorder %v12513_v31, 0.0  ;;  %vm12522_vm15 = vcmp.ge.f32.partialorder %v12514_v32, 0.0 }
 0x6c7   :  { %v12523_v56 = vmul.f32 0.2, %v12507_v23  ;;  %v12524_v57 = vmul.f32 0.2, %v12508_v26  ;;  %v12525_v33 = vmul.f32 0.2, %v12509_v27 }
 0x6c8   :  { %v12526_v25 = vmul.f32 0.2, %v12510_v58  ;;  %v12527_v34 = vmul.f32 0.2, %v12511_v30  ;;  %v12528_v36 = vmul.f32 0.2, %v12512_v59 }
 0x6c9   :  { %v12529_v37 = vmul.f32 0.2, %v12513_v31  ;;  %v12530_v38 = vmul.f32 0.2, %v12514_v32  ;;  %v19894_v41 = vsel %vm12515_vm8, %v12507_v23, %v12523_v56  ;;  %v12532_v43 = vsel %vm12516_vm9, %v12508_v26, %v12524_v57 }
 0x6ca   :  { %v19898_v44 = vsel %vm12517_vm10, %v12509_v27, %v12525_v33  ;;  %v19901_v45 = vsel %vm12518_vm11, %v12510_v58, %v12526_v25  ;;  %v19904_v46 = vsel %vm12519_vm12, %v12511_v30, %v12527_v34  ;;  %v12536_v47 = vsel %vm12520_vm13, %v12512_v59, %v12528_v36 }
 0x6cb   :  { %v19908_v50 = vsel %vm12521_vm14, %v12513_v31, %v12529_v37  ;;  %v19911_v53 = vsel %vm12522_vm15, %v12514_v32, %v12530_v38 }
 0x6cc   :  { %15516 = dma.done.wait [#allocation4], 32768 }
 0x6cd   :  { %15517 = vsyncadd [#allocation4], 4294934528  ;;  %v19913_v54 = vpack.c.bf16 %v12536_v47, %v12532_v43  ;;  %v12544_v55 = vld [vmem:[#allocation2 + $0x8] sm:$0xff]  ;;  %v12546_v60 = vld [vmem:[#allocation2 + $0x18] sm:$0xff] }
 0x6ce   :  { %v12543_v61 = vld [vmem:[#allocation2] sm:$0xff]  ;;  %12845 = vmatprep.subr.bf16.mxu0 %v12544_v55  ;;  %12931 = vmatprep.subr.bf16.mxu1 %v12546_v60  ;;  %v12545_v62 = vld [vmem:[#allocation2 + $0x10] sm:$0xff]  ;;  %v12552_v52 = vld [vmem:[#allocation2 + $0x48] sm:$0xff] }
 0x6cf   :  { %12877 = vmatprep.mubr.bf16.mxu0 %v19913_v54  ;;  %12963 = vmatprep.mubr.bf16.mxu1 %v19913_v54  ;;  %v12554_v0 = vld [vmem:[#allocation2 + $0x58] sm:$0xff]  ;;  %v12551_v48 = vld [vmem:[#allocation2 + $0x40] sm:$0xff]  ;;  %v12553_v49 = vld [vmem:[#allocation2 + $0x50] sm:$0xff] }
 0x6d0   :  { %12846 = vmatpush1.bf16.msra.mxu0 %v12543_v61  ;;  %12932 = vmatpush1.bf16.msra.mxu1 %v12545_v62  ;;  %v12560_v1 = vld [vmem:[#allocation2 + $0x88] sm:$0xff]  ;;  %v12562_v2 = vld [vmem:[#allocation2 + $0x98] sm:$0xff]  ;;  %v12559_v3 = vld [vmem:[#allocation2 + $0x80] sm:$0xff] }
 0x6d1   :  { %12847 = vmatprep.subr.bf16.mxu0 %v12552_v52  ;;  %12933 = vmatprep.subr.bf16.mxu1 %v12554_v0  ;;  %v12561_v4 = vld [vmem:[#allocation2 + $0x90] sm:$0xff]  ;;  %v12568_v5 = vld [vmem:[#allocation2 + $0xc8] sm:$0xff]  ;;  %v12570_v8 = vld [vmem:[#allocation2 + $0xd8] sm:$0xff] }
 0x6d2   :  { %v12567_v9 = vld [vmem:[#allocation2 + $0xc0] sm:$0xff]  ;;  %v12569_v11 = vld [vmem:[#allocation2 + $0xd0] sm:$0xff]  ;;  %v12576_v12 = vld [vmem:[#allocation2 + $0x108] sm:$0xff] }
 0x6d3   :  { %v12578_v14 = vld [vmem:[#allocation2 + $0x118] sm:$0xff]  ;;  %v12575_v15 = vld [vmem:[#allocation2 + $0x100] sm:$0xff]  ;;  %v12577_v16 = vld [vmem:[#allocation2 + $0x110] sm:$0xff] }
 0x6d4   :  { %12848 = vmatpush1.bf16.msra.mxu0 %v12551_v48  ;;  %12934 = vmatpush1.bf16.msra.mxu1 %v12553_v49  ;;  %v12584_v17 = vld [vmem:[#allocation2 + $0x148] sm:$0xff]  ;;  %v12586_v6 = vld [vmem:[#allocation2 + $0x158] sm:$0xff]  ;;  %v12583_v7 = vld [vmem:[#allocation2 + $0x140] sm:$0xff] }
 0x6d5   :  { %12849 = vmatprep.subr.bf16.mxu0 %v12560_v1  ;;  %12935 = vmatprep.subr.bf16.mxu1 %v12562_v2  ;;  %v12585_v63 = vld [vmem:[#allocation2 + $0x150] sm:$0xff]  ;;  %v12592_v24 = vld [vmem:[#allocation2 + $0x188] sm:$0xff]  ;;  %v12594_v28 = vld [vmem:[#allocation2 + $0x198] sm:$0xff] }
 0x6d6   :  { %v12591_v51 = vld [vmem:[#allocation2 + $0x180] sm:$0xff]  ;;  %v12593_v29 = vld [vmem:[#allocation2 + $0x190] sm:$0xff]  ;;  %v12600_v18 = vld [vmem:[#allocation2 + $0x1c8] sm:$0xff] }
 0x6d7   :  { %v12602_v19 = vld [vmem:[#allocation2 + $0x1d8] sm:$0xff]  ;;  %v12599_v20 = vld [vmem:[#allocation2 + $0x1c0] sm:$0xff]  ;;  %v12601_v21 = vld [vmem:[#allocation2 + $0x1d0] sm:$0xff] }
 0x6d8   :  { %12850 = vmatpush1.bf16.msra.mxu0 %v12559_v3  ;;  %12936 = vmatpush1.bf16.msra.mxu1 %v12561_v4  ;;  %v12608_v22 = vld [vmem:[#allocation2 + $0x208] sm:$0xff]  ;;  %v12610_v23 = vld [vmem:[#allocation2 + $0x218] sm:$0xff]  ;;  %v12607_v26 = vld [vmem:[#allocation2 + $0x200] sm:$0xff] }
 0x6d9   :  { %12851 = vmatprep.subr.bf16.mxu0 %v12568_v5  ;;  %12937 = vmatprep.subr.bf16.mxu1 %v12570_v8  ;;  %v12609_v27 = vld [vmem:[#allocation2 + $0x210] sm:$0xff]  ;;  %v12616_v58 = vld [vmem:[#allocation2 + $0x248] sm:$0xff]  ;;  %v12618_v30 = vld [vmem:[#allocation2 + $0x258] sm:$0xff] }
 0x6da   :  { %v12615_v59 = vld [vmem:[#allocation2 + $0x240] sm:$0xff]  ;;  %v12617_v31 = vld [vmem:[#allocation2 + $0x250] sm:$0xff]  ;;  %v12624_v32 = vld [vmem:[#allocation2 + $0x288] sm:$0xff] }
 0x6db   :  { %v12626_v56 = vld [vmem:[#allocation2 + $0x298] sm:$0xff]  ;;  %v12623_v57 = vld [vmem:[#allocation2 + $0x280] sm:$0xff]  ;;  %v12625_v33 = vld [vmem:[#allocation2 + $0x290] sm:$0xff] }
 0x6dc   :  { %12852 = vmatpush1.bf16.msra.mxu0 %v12567_v9  ;;  %12938 = vmatpush1.bf16.msra.mxu1 %v12569_v11  ;;  %v12632_v25 = vld [vmem:[#allocation2 + $0x2c8] sm:$0xff]  ;;  %v12634_v34 = vld [vmem:[#allocation2 + $0x2d8] sm:$0xff]  ;;  %v12631_v36 = vld [vmem:[#allocation2 + $0x2c0] sm:$0xff]  ;;  %v19919_v11 = vpack.c.bf16 %v19904_v46, %v19894_v41 }
 0x6dd   :  { %12853 = vmatprep.subr.bf16.mxu0 %v12576_v12  ;;  %12939 = vmatprep.subr.bf16.mxu1 %v12578_v14  ;;  %v12633_v37 = vld [vmem:[#allocation2 + $0x2d0] sm:$0xff]  ;;  %v12640_v38 = vld [vmem:[#allocation2 + $0x308] sm:$0xff]  ;;  %v12642_v43 = vld [vmem:[#allocation2 + $0x318] sm:$0xff] }
 0x6de   :  { %v12639_v47 = vld [vmem:[#allocation2 + $0x300] sm:$0xff]  ;;  %v12641_v55 = vld [vmem:[#allocation2 + $0x310] sm:$0xff]  ;;  %v12648_v60 = vld [vmem:[#allocation2 + $0x348] sm:$0xff] }
 0x6df   :  { %v12650_v61 = vld [vmem:[#allocation2 + $0x358] sm:$0xff]  ;;  %v12647_v62 = vld [vmem:[#allocation2 + $0x340] sm:$0xff]  ;;  %v12649_v52 = vld [vmem:[#allocation2 + $0x350] sm:$0xff] }
 0x6e0   :  { %12854 = vmatpush1.bf16.msra.mxu0 %v12575_v15  ;;  %12940 = vmatpush1.bf16.msra.mxu1 %v12577_v16  ;;  %v12656_v0 = vld [vmem:[#allocation2 + $0x388] sm:$0xff]  ;;  %v12658_v48 = vld [vmem:[#allocation2 + $0x398] sm:$0xff]  ;;  %v12655_v49 = vld [vmem:[#allocation2 + $0x380] sm:$0xff] }
 0x6e1   :  { %12855 = vmatprep.subr.bf16.mxu0 %v12584_v17  ;;  %12941 = vmatprep.subr.bf16.mxu1 %v12586_v6  ;;  %v12657_v1 = vld [vmem:[#allocation2 + $0x390] sm:$0xff]  ;;  %v12664_v2 = vld [vmem:[#allocation2 + $0x3c8] sm:$0xff]  ;;  %v12666_v3 = vld [vmem:[#allocation2 + $0x3d8] sm:$0xff]  ;;  %v19923_v17 = vpack.c.bf16 %v19911_v53, %v19901_v45 }
 0x6e2   :  { %v12663_v4 = vld [vmem:[#allocation2 + $0x3c0] sm:$0xff]  ;;  %v12665_v5 = vld [vmem:[#allocation2 + $0x3d0] sm:$0xff]  ;;  %v12672_v8 = vld [vmem:[#allocation2 + $0x408] sm:$0xff] }
 0x6e3   :  { %v12674_v9 = vld [vmem:[#allocation2 + $0x418] sm:$0xff]  ;;  %v12671_v12 = vld [vmem:[#allocation2 + $0x400] sm:$0xff]  ;;  %v12673_v14 = vld [vmem:[#allocation2 + $0x410] sm:$0xff] }
 0x6e4   :  { %12856 = vmatpush1.bf16.msra.mxu0 %v12583_v7  ;;  %12942 = vmatpush1.bf16.msra.mxu1 %v12585_v63  ;;  %v12680_v15 = vld [vmem:[#allocation2 + $0x448] sm:$0xff]  ;;  %v12682_v16 = vld [vmem:[#allocation2 + $0x458] sm:$0xff]  ;;  %v12679_v41 = vld [vmem:[#allocation2 + $0x440] sm:$0xff] }
 0x6e5   :  { %12857 = vmatprep.subr.bf16.mxu0 %v12592_v24  ;;  %12943 = vmatprep.subr.bf16.mxu1 %v12594_v28  ;;  %v12681_v46 = vld [vmem:[#allocation2 + $0x450] sm:$0xff]  ;;  %v12688_v6 = vld [vmem:[#allocation2 + $0x488] sm:$0xff]  ;;  %v12690_v7 = vld [vmem:[#allocation2 + $0x498] sm:$0xff] }
 0x6e6   :  { %v12687_v45 = vld [vmem:[#allocation2 + $0x480] sm:$0xff]  ;;  %v12689_v53 = vld [vmem:[#allocation2 + $0x490] sm:$0xff]  ;;  %v12696_v63 = vld [vmem:[#allocation2 + $0x4c8] sm:$0xff] }
 0x6e7   :  { %v12698_v24 = vld [vmem:[#allocation2 + $0x4d8] sm:$0xff]  ;;  %v12695_v28 = vld [vmem:[#allocation2 + $0x4c0] sm:$0xff] }
 0x6e8   :  { %12858 = vmatpush1.bf16.msra.mxu0 %v12591_v51  ;;  %12944 = vmatpush1.bf16.msra.mxu1 %v12593_v29  ;;  %v12697_v51 = vld [vmem:[#allocation2 + $0x4d0] sm:$0xff]  ;;  %v12704_v29 = vld [vmem:[#allocation2 + $0x508] sm:$0xff] }
 0x6e9   :  { %12859 = vmatprep.subr.bf16.mxu0 %v12600_v18  ;;  %12945 = vmatprep.subr.bf16.mxu1 %v12602_v19  ;;  %v12706_v18 = vld [vmem:[#allocation2 + $0x518] sm:$0xff]  ;;  %v12703_v19 = vld [vmem:[#allocation2 + $0x500] sm:$0xff] }
 0x6ec   :  { %12860 = vmatpush1.bf16.msra.mxu0 %v12599_v20  ;;  %12946 = vmatpush1.bf16.msra.mxu1 %v12601_v21  ;;  %v12705_v20 = vld [vmem:[#allocation2 + $0x510] sm:$0xff]  ;;  %v12712_v21 = vld [vmem:[#allocation2 + $0x548] sm:$0xff] }
 0x6ed   :  { %12861 = vmatprep.subr.bf16.mxu0 %v12608_v22  ;;  %12947 = vmatprep.subr.bf16.mxu1 %v12610_v23  ;;  %v12714_v22 = vld [vmem:[#allocation2 + $0x558] sm:$0xff]  ;;  %v12711_v23 = vld [vmem:[#allocation2 + $0x540] sm:$0xff] }
 0x6f0   :  { %12862 = vmatpush1.bf16.msra.mxu0 %v12607_v26  ;;  %12948 = vmatpush1.bf16.msra.mxu1 %v12609_v27  ;;  %v12713_v26 = vld [vmem:[#allocation2 + $0x550] sm:$0xff]  ;;  %v12720_v27 = vld [vmem:[#allocation2 + $0x588] sm:$0xff] }
 0x6f1   :  { %12863 = vmatprep.subr.bf16.mxu0 %v12616_v58  ;;  %12949 = vmatprep.subr.bf16.mxu1 %v12618_v30  ;;  %v12722_v58 = vld [vmem:[#allocation2 + $0x598] sm:$0xff]  ;;  %v12719_v30 = vld [vmem:[#allocation2 + $0x580] sm:$0xff] }
 0x6f4   :  { %12864 = vmatpush1.bf16.msra.mxu0 %v12615_v59  ;;  %12950 = vmatpush1.bf16.msra.mxu1 %v12617_v31  ;;  %v12721_v59 = vld [vmem:[#allocation2 + $0x590] sm:$0xff]  ;;  %v12728_v31 = vld [vmem:[#allocation2 + $0x5c8] sm:$0xff] }
 0x6f5   :  { %12865 = vmatprep.subr.bf16.mxu0 %v12624_v32  ;;  %12951 = vmatprep.subr.bf16.mxu1 %v12626_v56  ;;  %v12730_v32 = vld [vmem:[#allocation2 + $0x5d8] sm:$0xff]  ;;  %v12727_v56 = vld [vmem:[#allocation2 + $0x5c0] sm:$0xff] }
 0x6f8   :  { %12866 = vmatpush1.bf16.msra.mxu0 %v12623_v57  ;;  %12952 = vmatpush1.bf16.msra.mxu1 %v12625_v33  ;;  %v12729_v57 = vld [vmem:[#allocation2 + $0x5d0] sm:$0xff]  ;;  %v12736_v33 = vld [vmem:[#allocation2 + $0x608] sm:$0xff] }
 0x6f9   :  { %12867 = vmatprep.subr.bf16.mxu0 %v12632_v25  ;;  %12953 = vmatprep.subr.bf16.mxu1 %v12634_v34  ;;  %v12738_v25 = vld [vmem:[#allocation2 + $0x618] sm:$0xff]  ;;  %v12735_v34 = vld [vmem:[#allocation2 + $0x600] sm:$0xff] }
 0x6fc   :  { %12868 = vmatpush1.bf16.msra.mxu0 %v12631_v36  ;;  %12954 = vmatpush1.bf16.msra.mxu1 %v12633_v37  ;;  %v12737_v36 = vld [vmem:[#allocation2 + $0x610] sm:$0xff]  ;;  %v12744_v37 = vld [vmem:[#allocation2 + $0x648] sm:$0xff] }
 0x6fd   :  { %12869 = vmatprep.subr.bf16.mxu0 %v12640_v38  ;;  %12955 = vmatprep.subr.bf16.mxu1 %v12642_v43  ;;  %v12746_v38 = vld [vmem:[#allocation2 + $0x658] sm:$0xff]  ;;  %v12743_v43 = vld [vmem:[#allocation2 + $0x640] sm:$0xff] }
 0x700   :  { %12870 = vmatpush1.bf16.msra.mxu0 %v12639_v47  ;;  %12956 = vmatpush1.bf16.msra.mxu1 %v12641_v55  ;;  %v12745_v47 = vld [vmem:[#allocation2 + $0x650] sm:$0xff]  ;;  %v12752_v55 = vld [vmem:[#allocation2 + $0x688] sm:$0xff] }
 0x701   :  { %12871 = vmatprep.subr.bf16.mxu0 %v12648_v60  ;;  %12957 = vmatprep.subr.bf16.mxu1 %v12650_v61  ;;  %v12754_v60 = vld [vmem:[#allocation2 + $0x698] sm:$0xff]  ;;  %v12751_v61 = vld [vmem:[#allocation2 + $0x680] sm:$0xff] }
 0x704   :  { %12872 = vmatpush1.bf16.msra.mxu0 %v12647_v62  ;;  %12958 = vmatpush1.bf16.msra.mxu1 %v12649_v52  ;;  %v12753_v62 = vld [vmem:[#allocation2 + $0x690] sm:$0xff]  ;;  %v12760_v52 = vld [vmem:[#allocation2 + $0x6c8] sm:$0xff] }
 0x705   :  { %12873 = vmatprep.subr.bf16.mxu0 %v12656_v0  ;;  %12959 = vmatprep.subr.bf16.mxu1 %v12658_v48  ;;  %v12762_v0 = vld [vmem:[#allocation2 + $0x6d8] sm:$0xff]  ;;  %v12759_v48 = vld [vmem:[#allocation2 + $0x6c0] sm:$0xff] }
 0x708   :  { %12874 = vmatpush1.bf16.msra.mxu0 %v12655_v49  ;;  %12960 = vmatpush1.bf16.msra.mxu1 %v12657_v1  ;;  %v12761_v49 = vld [vmem:[#allocation2 + $0x6d0] sm:$0xff]  ;;  %v12768_v1 = vld [vmem:[#allocation2 + $0x708] sm:$0xff] }
 0x709   :  { %12875 = vmatprep.subr.bf16.mxu0 %v12664_v2  ;;  %12961 = vmatprep.subr.bf16.mxu1 %v12666_v3  ;;  %v12770_v2 = vld [vmem:[#allocation2 + $0x718] sm:$0xff]  ;;  %v12767_v3 = vld [vmem:[#allocation2 + $0x700] sm:$0xff] }
 0x70c   :  { %12876 = vmatpush1.bf16.msra.mxu0 %v12663_v4  ;;  %12962 = vmatpush1.bf16.msra.mxu1 %v12665_v5  ;;  %v12769_v4 = vld [vmem:[#allocation2 + $0x710] sm:$0xff]  ;;  %v12776_v5 = vld [vmem:[#allocation2 + $0x748] sm:$0xff] }
 0x70d   :  { %12888 = vmatprep.subr.bf16.mxu0 %v12672_v8  ;;  %12974 = vmatprep.subr.bf16.mxu1 %v12674_v9  ;;  %v12778_v8 = vld [vmem:[#allocation2 + $0x758] sm:$0xff]  ;;  %v12775_v9 = vld [vmem:[#allocation2 + $0x740] sm:$0xff] }
 0x70f   :  { %12878 = vmatmul.mubr.bf16.vlgmr.msra.gmra.mrb[4].mxu0 %v19919_v11  ;;  %12964 = vmatmul.mubr.bf16.vlgmr.msra.gmra.mrb[12].mxu1 %v19919_v11 }
 0x710   :  { %12889 = vmatpush1.bf16.msra.mxu0 %v12671_v12  ;;  %12975 = vmatpush1.bf16.msra.mxu1 %v12673_v14  ;;  %v12777_v12 = vld [vmem:[#allocation2 + $0x750] sm:$0xff]  ;;  %v12784_v14 = vld [vmem:[#allocation2 + $0x788] sm:$0xff] }
 0x711   :  { %12890 = vmatprep.subr.bf16.mxu0 %v12680_v15  ;;  %12976 = vmatprep.subr.bf16.mxu1 %v12682_v16  ;;  %v12786_v15 = vld [vmem:[#allocation2 + $0x798] sm:$0xff]  ;;  %v12783_v16 = vld [vmem:[#allocation2 + $0x780] sm:$0xff] }
 0x712   :  { %12920 = vmatprep.mubr.bf16.mxu0 %v19923_v17  ;;  %13006 = vmatprep.mubr.bf16.mxu1 %v19923_v17 }
 0x714   :  { %12891 = vmatpush1.bf16.msra.mxu0 %v12679_v41  ;;  %12977 = vmatpush1.bf16.msra.mxu1 %v12681_v46  ;;  %v12785_v41 = vld [vmem:[#allocation2 + $0x790] sm:$0xff]  ;;  %v12792_v46 = vld [vmem:[#allocation2 + $0x7c8] sm:$0xff] }
 0x715   :  { %12892 = vmatprep.subr.bf16.mxu0 %v12688_v6  ;;  %12978 = vmatprep.subr.bf16.mxu1 %v12690_v7  ;;  %v12794_v6 = vld [vmem:[#allocation2 + $0x7d8] sm:$0xff]  ;;  %v12791_v7 = vld [vmem:[#allocation2 + $0x7c0] sm:$0xff] }
 0x718   :  { %12893 = vmatpush1.bf16.msra.mxu0 %v12687_v45  ;;  %12979 = vmatpush1.bf16.msra.mxu1 %v12689_v53  ;;  %v12793_v45 = vld [vmem:[#allocation2 + $0x7d0] sm:$0xff]  ;;  %v12548_v53 = vld [vmem:[#allocation2 + $0x28] sm:$0xff] }
 0x719   :  { %12894 = vmatprep.subr.bf16.mxu0 %v12696_v63  ;;  %12980 = vmatprep.subr.bf16.mxu1 %v12698_v24  ;;  %v12550_v63 = vld [vmem:[#allocation2 + $0x38] sm:$0xff]  ;;  %v19931_v24 = vpack.c.bf16 %v19908_v50, %v19898_v44  ;;  %v12564_v44 = vld [vmem:[#allocation2 + $0xa8] sm:$0xff] }
 0x71a   :  { %v12566_v50 = vld [vmem:[#allocation2 + $0xb8] sm:$0xff] }
 0x71c   :  { %12895 = vmatpush1.bf16.msra.mxu0 %v12695_v28  ;;  %12981 = vmatpush1.bf16.msra.mxu1 %v12697_v51  ;;  %v12547_v28 = vld [vmem:[#allocation2 + $0x20] sm:$0xff]  ;;  %v12549_v51 = vld [vmem:[#allocation2 + $0x30] sm:$0xff] }
 0x71d   :  { %12896 = vmatprep.subr.bf16.mxu0 %v12704_v29  ;;  %12982 = vmatprep.subr.bf16.mxu1 %v12706_v18  ;;  %v12556_v29 = vld [vmem:[#allocation2 + $0x68] sm:$0xff]  ;;  %v12558_v18 = vld [vmem:[#allocation2 + $0x78] sm:$0xff] }
 0x720   :  { %12897 = vmatpush1.bf16.msra.mxu0 %v12703_v19  ;;  %12983 = vmatpush1.bf16.msra.mxu1 %v12705_v20  ;;  %v12555_v19 = vld [vmem:[#allocation2 + $0x60] sm:$0xff]  ;;  %v12557_v20 = vld [vmem:[#allocation2 + $0x70] sm:$0xff] }
 0x721   :  { %12898 = vmatprep.subr.bf16.mxu0 %v12712_v21  ;;  %12984 = vmatprep.subr.bf16.mxu1 %v12714_v22  ;;  %v12563_v21 = vld [vmem:[#allocation2 + $0xa0] sm:$0xff]  ;;  %v12565_v22 = vld [vmem:[#allocation2 + $0xb0] sm:$0xff] }
 0x724   :  { %12899 = vmatpush1.bf16.msra.mxu0 %v12711_v23  ;;  %12985 = vmatpush1.bf16.msra.mxu1 %v12713_v26  ;;  %v12572_v23 = vld [vmem:[#allocation2 + $0xe8] sm:$0xff]  ;;  %v12574_v26 = vld [vmem:[#allocation2 + $0xf8] sm:$0xff] }
 0x725   :  { %12900 = vmatprep.subr.bf16.mxu0 %v12720_v27  ;;  %12986 = vmatprep.subr.bf16.mxu1 %v12722_v58  ;;  %v12571_v27 = vld [vmem:[#allocation2 + $0xe0] sm:$0xff]  ;;  %v12573_v58 = vld [vmem:[#allocation2 + $0xf0] sm:$0xff] }
 0x728   :  { %12901 = vmatpush1.bf16.msra.mxu0 %v12719_v30  ;;  %12987 = vmatpush1.bf16.msra.mxu1 %v12721_v59  ;;  %v12580_v30 = vld [vmem:[#allocation2 + $0x128] sm:$0xff]  ;;  %v12582_v59 = vld [vmem:[#allocation2 + $0x138] sm:$0xff] }
 0x729   :  { %12902 = vmatprep.subr.bf16.mxu0 %v12728_v31  ;;  %12988 = vmatprep.subr.bf16.mxu1 %v12730_v32  ;;  %v12581_v31 = vld [vmem:[#allocation2 + $0x130] sm:$0xff]  ;;  %v12588_v32 = vld [vmem:[#allocation2 + $0x168] sm:$0xff] }
 0x72c   :  { %12903 = vmatpush1.bf16.msra.mxu0 %v12727_v56  ;;  %12989 = vmatpush1.bf16.msra.mxu1 %v12729_v57  ;;  %v12590_v56 = vld [vmem:[#allocation2 + $0x178] sm:$0xff]  ;;  %v12587_v57 = vld [vmem:[#allocation2 + $0x160] sm:$0xff] }
 0x72d   :  { %12904 = vmatprep.subr.bf16.mxu0 %v12736_v33  ;;  %12990 = vmatprep.subr.bf16.mxu1 %v12738_v25  ;;  %v12589_v33 = vld [vmem:[#allocation2 + $0x170] sm:$0xff]  ;;  %v12596_v25 = vld [vmem:[#allocation2 + $0x1a8] sm:$0xff] }
 0x730   :  { %12905 = vmatpush1.bf16.msra.mxu0 %v12735_v34  ;;  %12991 = vmatpush1.bf16.msra.mxu1 %v12737_v36  ;;  %v12598_v34 = vld [vmem:[#allocation2 + $0x1b8] sm:$0xff]  ;;  %v12595_v36 = vld [vmem:[#allocation2 + $0x1a0] sm:$0xff] }
 0x731   :  { %12906 = vmatprep.subr.bf16.mxu0 %v12744_v37  ;;  %12992 = vmatprep.subr.bf16.mxu1 %v12746_v38  ;;  %v12597_v37 = vld [vmem:[#allocation2 + $0x1b0] sm:$0xff]  ;;  %v12604_v38 = vld [vmem:[#allocation2 + $0x1e8] sm:$0xff] }
 0x734   :  { %12907 = vmatpush1.bf16.msra.mxu0 %v12743_v43  ;;  %12993 = vmatpush1.bf16.msra.mxu1 %v12745_v47  ;;  %v12606_v43 = vld [vmem:[#allocation2 + $0x1f8] sm:$0xff]  ;;  %v12603_v47 = vld [vmem:[#allocation2 + $0x1e0] sm:$0xff] }
 0x735   :  { %12908 = vmatprep.subr.bf16.mxu0 %v12752_v55  ;;  %12994 = vmatprep.subr.bf16.mxu1 %v12754_v60  ;;  %v12605_v55 = vld [vmem:[#allocation2 + $0x1f0] sm:$0xff]  ;;  %v12612_v60 = vld [vmem:[#allocation2 + $0x228] sm:$0xff] }
 0x738   :  { %12909 = vmatpush1.bf16.msra.mxu0 %v12751_v61  ;;  %12995 = vmatpush1.bf16.msra.mxu1 %v12753_v62  ;;  %v12614_v61 = vld [vmem:[#allocation2 + $0x238] sm:$0xff]  ;;  %v12611_v62 = vld [vmem:[#allocation2 + $0x220] sm:$0xff] }
 0x739   :  { %12910 = vmatprep.subr.bf16.mxu0 %v12760_v52  ;;  %12996 = vmatprep.subr.bf16.mxu1 %v12762_v0  ;;  %v12613_v52 = vld [vmem:[#allocation2 + $0x230] sm:$0xff]  ;;  %v12620_v0 = vld [vmem:[#allocation2 + $0x268] sm:$0xff] }
 0x73c   :  { %12911 = vmatpush1.bf16.msra.mxu0 %v12759_v48  ;;  %12997 = vmatpush1.bf16.msra.mxu1 %v12761_v49  ;;  %v12622_v48 = vld [vmem:[#allocation2 + $0x278] sm:$0xff]  ;;  %v12619_v49 = vld [vmem:[#allocation2 + $0x260] sm:$0xff] }
 0x73d   :  { %12912 = vmatprep.subr.bf16.mxu0 %v12768_v1  ;;  %12998 = vmatprep.subr.bf16.mxu1 %v12770_v2  ;;  %v12621_v1 = vld [vmem:[#allocation2 + $0x270] sm:$0xff]  ;;  %v12628_v2 = vld [vmem:[#allocation2 + $0x2a8] sm:$0xff] }
 0x740   :  { %12913 = vmatpush1.bf16.msra.mxu0 %v12767_v3  ;;  %12999 = vmatpush1.bf16.msra.mxu1 %v12769_v4  ;;  %v12630_v3 = vld [vmem:[#allocation2 + $0x2b8] sm:$0xff]  ;;  %v12627_v4 = vld [vmem:[#allocation2 + $0x2a0] sm:$0xff] }
 0x741   :  { %12914 = vmatprep.subr.bf16.mxu0 %v12776_v5  ;;  %13000 = vmatprep.subr.bf16.mxu1 %v12778_v8  ;;  %v12629_v5 = vld [vmem:[#allocation2 + $0x2b0] sm:$0xff]  ;;  %v12636_v8 = vld [vmem:[#allocation2 + $0x2e8] sm:$0xff] }
 0x744   :  { %12915 = vmatpush1.bf16.msra.mxu0 %v12775_v9  ;;  %13001 = vmatpush1.bf16.msra.mxu1 %v12777_v12  ;;  %v12638_v9 = vld [vmem:[#allocation2 + $0x2f8] sm:$0xff]  ;;  %v12635_v12 = vld [vmem:[#allocation2 + $0x2e0] sm:$0xff] }
 0x745   :  { %12916 = vmatprep.subr.bf16.mxu0 %v12784_v14  ;;  %13002 = vmatprep.subr.bf16.mxu1 %v12786_v15  ;;  %v12637_v14 = vld [vmem:[#allocation2 + $0x2f0] sm:$0xff]  ;;  %v12644_v15 = vld [vmem:[#allocation2 + $0x328] sm:$0xff] }
 0x748   :  { %12917 = vmatpush1.bf16.msra.mxu0 %v12783_v16  ;;  %13003 = vmatpush1.bf16.msra.mxu1 %v12785_v41  ;;  %v12646_v16 = vld [vmem:[#allocation2 + $0x338] sm:$0xff]  ;;  %v12643_v41 = vld [vmem:[#allocation2 + $0x320] sm:$0xff] }
 0x749   :  { %12918 = vmatprep.subr.bf16.mxu0 %v12792_v46  ;;  %13004 = vmatprep.subr.bf16.mxu1 %v12794_v6  ;;  %v12645_v46 = vld [vmem:[#allocation2 + $0x330] sm:$0xff]  ;;  %v12652_v6 = vld [vmem:[#allocation2 + $0x368] sm:$0xff] }
 0x74c   :  { %12919 = vmatpush1.bf16.msra.mxu0 %v12791_v7  ;;  %13005 = vmatpush1.bf16.msra.mxu1 %v12793_v45  ;;  %v12654_v7 = vld [vmem:[#allocation2 + $0x378] sm:$0xff]  ;;  %v12651_v45 = vld [vmem:[#allocation2 + $0x360] sm:$0xff] }
 0x74d   :  { %13017 = vmatprep.subr.bf16.mxu0 %v12548_v53  ;;  %13103 = vmatprep.subr.bf16.mxu1 %v12550_v63  ;;  %v12653_v53 = vld [vmem:[#allocation2 + $0x370] sm:$0xff]  ;;  %v12660_v63 = vld [vmem:[#allocation2 + $0x3a8] sm:$0xff] }
 0x74f   :  { %12921 = vmatmul.mubr.bf16.vlgmr.msra.gmra.mrb[4].mxu0 %v19931_v24  ;;  %13007 = vmatmul.mubr.bf16.vlgmr.msra.gmra.mrb[12].mxu1 %v19931_v24 }
 0x750   :  { %13018 = vmatpush1.bf16.msra.mxu0 %v12547_v28  ;;  %13104 = vmatpush1.bf16.msra.mxu1 %v12549_v51  ;;  %v12662_v28 = vld [vmem:[#allocation2 + $0x3b8] sm:$0xff]  ;;  %v12659_v51 = vld [vmem:[#allocation2 + $0x3a0] sm:$0xff] }
 0x751   :  { %13019 = vmatprep.subr.bf16.mxu0 %v12556_v29  ;;  %13105 = vmatprep.subr.bf16.mxu1 %v12558_v18  ;;  %v12661_v29 = vld [vmem:[#allocation2 + $0x3b0] sm:$0xff]  ;;  %v12668_v18 = vld [vmem:[#allocation2 + $0x3e8] sm:$0xff] }
 0x752   :  { %13049 = vmatprep.mubr.bf16.mxu0 %v19913_v54  ;;  %13135 = vmatprep.mubr.bf16.mxu1 %v19913_v54  ;;  %v12579_v54 = vld [vmem:[#allocation2 + $0x120] sm:$0xff] }
 0x754   :  { %13020 = vmatpush1.bf16.msra.mxu0 %v12555_v19  ;;  %13106 = vmatpush1.bf16.msra.mxu1 %v12557_v20  ;;  %v12670_v19 = vld [vmem:[#allocation2 + $0x3f8] sm:$0xff]  ;;  %v12667_v20 = vld [vmem:[#allocation2 + $0x3e0] sm:$0xff] }
 0x755   :  { %13021 = vmatprep.subr.bf16.mxu0 %v12564_v44  ;;  %13107 = vmatprep.subr.bf16.mxu1 %v12566_v50  ;;  %v12669_v44 = vld [vmem:[#allocation2 + $0x3f0] sm:$0xff]  ;;  %v12676_v50 = vld [vmem:[#allocation2 + $0x428] sm:$0xff] }
 0x758   :  { %13022 = vmatpush1.bf16.msra.mxu0 %v12563_v21  ;;  %13108 = vmatpush1.bf16.msra.mxu1 %v12565_v22  ;;  %v12678_v21 = vld [vmem:[#allocation2 + $0x438] sm:$0xff]  ;;  %v12675_v22 = vld [vmem:[#allocation2 + $0x420] sm:$0xff] }
 0x759   :  { %13023 = vmatprep.subr.bf16.mxu0 %v12572_v23  ;;  %13109 = vmatprep.subr.bf16.mxu1 %v12574_v26  ;;  %v12677_v23 = vld [vmem:[#allocation2 + $0x430] sm:$0xff]  ;;  %v12684_v26 = vld [vmem:[#allocation2 + $0x468] sm:$0xff] }
 0x75c   :  { %13024 = vmatpush1.bf16.msra.mxu0 %v12571_v27  ;;  %13110 = vmatpush1.bf16.msra.mxu1 %v12573_v58  ;;  %v12686_v27 = vld [vmem:[#allocation2 + $0x478] sm:$0xff]  ;;  %v12683_v58 = vld [vmem:[#allocation2 + $0x460] sm:$0xff] }
 0x75d   :  { %13025 = vmatprep.subr.bf16.mxu0 %v12580_v30  ;;  %13111 = vmatprep.subr.bf16.mxu1 %v12582_v59  ;;  %v12685_v30 = vld [vmem:[#allocation2 + $0x470] sm:$0xff]  ;;  %v12692_v59 = vld [vmem:[#allocation2 + $0x4a8] sm:$0xff] }
 0x760   :  { %13026 = vmatpush1.bf16.msra.mxu0 %v12579_v54  ;;  %13112 = vmatpush1.bf16.msra.mxu1 %v12581_v31  ;;  %v12694_v54 = vld [vmem:[#allocation2 + $0x4b8] sm:$0xff]  ;;  %v12691_v31 = vld [vmem:[#allocation2 + $0x4a0] sm:$0xff] }
 0x761   :  { %13027 = vmatprep.subr.bf16.mxu0 %v12588_v32  ;;  %13113 = vmatprep.subr.bf16.mxu1 %v12590_v56  ;;  %v12693_v32 = vld [vmem:[#allocation2 + $0x4b0] sm:$0xff]  ;;  %v12700_v56 = vld [vmem:[#allocation2 + $0x4e8] sm:$0xff] }
 0x764   :  { %13028 = vmatpush1.bf16.msra.mxu0 %v12587_v57  ;;  %13114 = vmatpush1.bf16.msra.mxu1 %v12589_v33  ;;  %v12699_v57 = vld [vmem:[#allocation2 + $0x4e0] sm:$0xff]  ;;  %v12701_v33 = vld [vmem:[#allocation2 + $0x4f0] sm:$0xff] }
 0x765   :  { %13029 = vmatprep.subr.bf16.mxu0 %v12596_v25  ;;  %13115 = vmatprep.subr.bf16.mxu1 %v12598_v34  ;;  %v12708_v25 = vld [vmem:[#allocation2 + $0x528] sm:$0xff]  ;;  %v12710_v34 = vld [vmem:[#allocation2 + $0x538] sm:$0xff] }
 0x768   :  { %13030 = vmatpush1.bf16.msra.mxu0 %v12595_v36  ;;  %13116 = vmatpush1.bf16.msra.mxu1 %v12597_v37  ;;  %v12709_v36 = vld [vmem:[#allocation2 + $0x530] sm:$0xff]  ;;  %v12716_v37 = vld [vmem:[#allocation2 + $0x568] sm:$0xff] }
 0x769   :  { %13031 = vmatprep.subr.bf16.mxu0 %v12604_v38  ;;  %13117 = vmatprep.subr.bf16.mxu1 %v12606_v43  ;;  %v12718_v38 = vld [vmem:[#allocation2 + $0x578] sm:$0xff]  ;;  %v12715_v43 = vld [vmem:[#allocation2 + $0x560] sm:$0xff] }
 0x76c   :  { %13032 = vmatpush1.bf16.msra.mxu0 %v12603_v47  ;;  %13118 = vmatpush1.bf16.msra.mxu1 %v12605_v55  ;;  %v12717_v47 = vld [vmem:[#allocation2 + $0x570] sm:$0xff]  ;;  %v12724_v55 = vld [vmem:[#allocation2 + $0x5a8] sm:$0xff] }
 0x76d   :  { %13033 = vmatprep.subr.bf16.mxu0 %v12612_v60  ;;  %13119 = vmatprep.subr.bf16.mxu1 %v12614_v61  ;;  %v12726_v60 = vld [vmem:[#allocation2 + $0x5b8] sm:$0xff]  ;;  %v12723_v61 = vld [vmem:[#allocation2 + $0x5a0] sm:$0xff] }
 0x770   :  { %13034 = vmatpush1.bf16.msra.mxu0 %v12611_v62  ;;  %13120 = vmatpush1.bf16.msra.mxu1 %v12613_v52  ;;  %v12725_v62 = vld [vmem:[#allocation2 + $0x5b0] sm:$0xff]  ;;  %v12732_v52 = vld [vmem:[#allocation2 + $0x5e8] sm:$0xff] }
 0x771   :  { %13035 = vmatprep.subr.bf16.mxu0 %v12620_v0  ;;  %13121 = vmatprep.subr.bf16.mxu1 %v12622_v48  ;;  %v12734_v0 = vld [vmem:[#allocation2 + $0x5f8] sm:$0xff]  ;;  %v12731_v48 = vld [vmem:[#allocation2 + $0x5e0] sm:$0xff] }
 0x774   :  { %13036 = vmatpush1.bf16.msra.mxu0 %v12619_v49  ;;  %13122 = vmatpush1.bf16.msra.mxu1 %v12621_v1  ;;  %v12733_v49 = vld [vmem:[#allocation2 + $0x5f0] sm:$0xff]  ;;  %v12740_v1 = vld [vmem:[#allocation2 + $0x628] sm:$0xff] }
 0x775   :  { %13037 = vmatprep.subr.bf16.mxu0 %v12628_v2  ;;  %13123 = vmatprep.subr.bf16.mxu1 %v12630_v3  ;;  %v12742_v2 = vld [vmem:[#allocation2 + $0x638] sm:$0xff]  ;;  %v12739_v3 = vld [vmem:[#allocation2 + $0x620] sm:$0xff] }
 0x778   :  { %13038 = vmatpush1.bf16.msra.mxu0 %v12627_v4  ;;  %13124 = vmatpush1.bf16.msra.mxu1 %v12629_v5  ;;  %v12741_v4 = vld [vmem:[#allocation2 + $0x630] sm:$0xff]  ;;  %v12748_v5 = vld [vmem:[#allocation2 + $0x668] sm:$0xff] }
 0x779   :  { %13039 = vmatprep.subr.bf16.mxu0 %v12636_v8  ;;  %13125 = vmatprep.subr.bf16.mxu1 %v12638_v9  ;;  %v12750_v8 = vld [vmem:[#allocation2 + $0x678] sm:$0xff]  ;;  %v12747_v9 = vld [vmem:[#allocation2 + $0x660] sm:$0xff] }
 0x77c   :  { %13040 = vmatpush1.bf16.msra.mxu0 %v12635_v12  ;;  %13126 = vmatpush1.bf16.msra.mxu1 %v12637_v14  ;;  %v12749_v12 = vld [vmem:[#allocation2 + $0x670] sm:$0xff]  ;;  %v12756_v14 = vld [vmem:[#allocation2 + $0x6a8] sm:$0xff] }
 0x77d   :  { %13041 = vmatprep.subr.bf16.mxu0 %v12644_v15  ;;  %13127 = vmatprep.subr.bf16.mxu1 %v12646_v16  ;;  %v12758_v15 = vld [vmem:[#allocation2 + $0x6b8] sm:$0xff]  ;;  %v12755_v16 = vld [vmem:[#allocation2 + $0x6a0] sm:$0xff] }
 0x780   :  { %13042 = vmatpush1.bf16.msra.mxu0 %v12643_v41  ;;  %13128 = vmatpush1.bf16.msra.mxu1 %v12645_v46  ;;  %v12757_v41 = vld [vmem:[#allocation2 + $0x6b0] sm:$0xff]  ;;  %v12764_v46 = vld [vmem:[#allocation2 + $0x6e8] sm:$0xff] }
 0x781   :  { %13043 = vmatprep.subr.bf16.mxu0 %v12652_v6  ;;  %13129 = vmatprep.subr.bf16.mxu1 %v12654_v7  ;;  %v12766_v6 = vld [vmem:[#allocation2 + $0x6f8] sm:$0xff]  ;;  %v12763_v7 = vld [vmem:[#allocation2 + $0x6e0] sm:$0xff] }
 0x784   :  { %13044 = vmatpush1.bf16.msra.mxu0 %v12651_v45  ;;  %13130 = vmatpush1.bf16.msra.mxu1 %v12653_v53  ;;  %v12765_v45 = vld [vmem:[#allocation2 + $0x6f0] sm:$0xff]  ;;  %v12772_v53 = vld [vmem:[#allocation2 + $0x728] sm:$0xff] }
 0x785   :  { %13045 = vmatprep.subr.bf16.mxu0 %v12660_v63  ;;  %13131 = vmatprep.subr.bf16.mxu1 %v12662_v28  ;;  %v12774_v63 = vld [vmem:[#allocation2 + $0x738] sm:$0xff]  ;;  %v12771_v28 = vld [vmem:[#allocation2 + $0x720] sm:$0xff] }
 0x788   :  { %13046 = vmatpush1.bf16.msra.mxu0 %v12659_v51  ;;  %13132 = vmatpush1.bf16.msra.mxu1 %v12661_v29  ;;  %v12773_v51 = vld [vmem:[#allocation2 + $0x730] sm:$0xff]  ;;  %v12780_v29 = vld [vmem:[#allocation2 + $0x768] sm:$0xff] }
 0x789   :  { %13047 = vmatprep.subr.bf16.mxu0 %v12668_v18  ;;  %13133 = vmatprep.subr.bf16.mxu1 %v12670_v19  ;;  %v12782_v18 = vld [vmem:[#allocation2 + $0x778] sm:$0xff]  ;;  %v12779_v19 = vld [vmem:[#allocation2 + $0x760] sm:$0xff] }
 0x78c   :  { %13048 = vmatpush1.bf16.msra.mxu0 %v12667_v20  ;;  %13134 = vmatpush1.bf16.msra.mxu1 %v12669_v44  ;;  %v12781_v20 = vld [vmem:[#allocation2 + $0x770] sm:$0xff]  ;;  %v12788_v44 = vld [vmem:[#allocation2 + $0x7a8] sm:$0xff] }
 0x78d   :  { %13060 = vmatprep.subr.bf16.mxu0 %v12676_v50  ;;  %13146 = vmatprep.subr.bf16.mxu1 %v12678_v21  ;;  %v12790_v50 = vld [vmem:[#allocation2 + $0x7b8] sm:$0xff]  ;;  %v12787_v21 = vld [vmem:[#allocation2 + $0x7a0] sm:$0xff] }
 0x78f   :  { %13050 = vmatmul.mubr.bf16.vlgmr.msra.gmra.mrb[8].mxu0 %v19919_v11  ;;  %13136 = vmatmul.mubr.bf16.vlgmr.msra.gmra.mrb[16].mxu1 %v19919_v11  ;;  %v12702_v11 = vld [vmem:[#allocation2 + $0x4f8] sm:$0xff] }
 0x790   :  { %13061 = vmatpush1.bf16.msra.mxu0 %v12675_v22  ;;  %13147 = vmatpush1.bf16.msra.mxu1 %v12677_v23  ;;  %v12789_v22 = vld [vmem:[#allocation2 + $0x7b0] sm:$0xff]  ;;  %v12796_v23 = vld [vmem:[#allocation2 + $0x7e8] sm:$0xff] }
 0x791   :  { %13062 = vmatprep.subr.bf16.mxu0 %v12684_v26  ;;  %13148 = vmatprep.subr.bf16.mxu1 %v12686_v27  ;;  %v12798_v26 = vld [vmem:[#allocation2 + $0x7f8] sm:$0xff]  ;;  %v12795_v27 = vld [vmem:[#allocation2 + $0x7e0] sm:$0xff] }
 0x792   :  { %13092 = vmatprep.mubr.bf16.mxu0 %v19923_v17  ;;  %13178 = vmatprep.mubr.bf16.mxu1 %v19923_v17  ;;  %v12707_v17 = vld [vmem:[#allocation2 + $0x520] sm:$0xff] }
 0x794   :  { %13063 = vmatpush1.bf16.msra.mxu0 %v12683_v58  ;;  %13149 = vmatpush1.bf16.msra.mxu1 %v12685_v30  ;;  %v12797_v58 = vld [vmem:[#allocation2 + $0x7f0] sm:$0xff] }
 0x795   :  { %13064 = vmatprep.subr.bf16.mxu0 %v12692_v59  ;;  %13150 = vmatprep.subr.bf16.mxu1 %v12694_v54 }
 0x798   :  { %13065 = vmatpush1.bf16.msra.mxu0 %v12691_v31  ;;  %13151 = vmatpush1.bf16.msra.mxu1 %v12693_v32 }
 0x799   :  { %13066 = vmatprep.subr.bf16.mxu0 %v12700_v56  ;;  %13152 = vmatprep.subr.bf16.mxu1 %v12702_v11 }
 0x79c   :  { %13067 = vmatpush1.bf16.msra.mxu0 %v12699_v57  ;;  %13153 = vmatpush1.bf16.msra.mxu1 %v12701_v33  ;;  %v19946_v33 = vld [vmem:[%s20268_s1 + $0x13] sm:$0xff] }
 0x79d   :  { %13068 = vmatprep.subr.bf16.mxu0 %v12708_v25  ;;  %13154 = vmatprep.subr.bf16.mxu1 %v12710_v34  ;;  %v12808_v25 = vrot.slane %v19946_v33, %v19676_v40  ;;  %v12816_v34 = vrot.slane %v19946_v33, %v19836_v10 }
 0x7a0   :  { %13069 = vmatpush1.bf16.msra.mxu0 %v12707_v17  ;;  %13155 = vmatpush1.bf16.msra.mxu1 %v12709_v36  ;;  %v12812_v36 = vrot.slane %v19946_v33, %v19682_v42 }
 0x7a1   :  { %13070 = vmatprep.subr.bf16.mxu0 %v12716_v37  ;;  %13156 = vmatprep.subr.bf16.mxu1 %v12718_v38  ;;  %v12820_v37 = vrot.slane %v19946_v33, %v19843_v13 }
 0x7a4   :  { %13071 = vmatpush1.bf16.msra.mxu0 %v12715_v43  ;;  %13157 = vmatpush1.bf16.msra.mxu1 %v12717_v47 }
 0x7a5   :  { %13072 = vmatprep.subr.bf16.mxu0 %v12724_v55  ;;  %13158 = vmatprep.subr.bf16.mxu1 %v12726_v60 }
 0x7a8   :  { %13073 = vmatpush1.bf16.msra.mxu0 %v12723_v61  ;;  %13159 = vmatpush1.bf16.msra.mxu1 %v12725_v62 }
 0x7a9   :  { %13074 = vmatprep.subr.bf16.mxu0 %v12732_v52  ;;  %13160 = vmatprep.subr.bf16.mxu1 %v12734_v0 }
 0x7ac   :  { %13075 = vmatpush1.bf16.msra.mxu0 %v12731_v48  ;;  %13161 = vmatpush1.bf16.msra.mxu1 %v12733_v49 }
 0x7ad   :  { %13076 = vmatprep.subr.bf16.mxu0 %v12740_v1  ;;  %13162 = vmatprep.subr.bf16.mxu1 %v12742_v2 }
 0x7b0   :  { %13077 = vmatpush1.bf16.msra.mxu0 %v12739_v3  ;;  %13163 = vmatpush1.bf16.msra.mxu1 %v12741_v4 }
 0x7b1   :  { %13078 = vmatprep.subr.bf16.mxu0 %v12748_v5  ;;  %13164 = vmatprep.subr.bf16.mxu1 %v12750_v8 }
 0x7b4   :  { %13079 = vmatpush1.bf16.msra.mxu0 %v12747_v9  ;;  %13165 = vmatpush1.bf16.msra.mxu1 %v12749_v12 }
 0x7b5   :  { %13080 = vmatprep.subr.bf16.mxu0 %v12756_v14  ;;  %13166 = vmatprep.subr.bf16.mxu1 %v12758_v15 }
 0x7b8   :  { %13081 = vmatpush1.bf16.msra.mxu0 %v12755_v16  ;;  %13167 = vmatpush1.bf16.msra.mxu1 %v12757_v41 }
 0x7b9   :  { %13082 = vmatprep.subr.bf16.mxu0 %v12764_v46  ;;  %13168 = vmatprep.subr.bf16.mxu1 %v12766_v6 }
 0x7bc   :  { %13083 = vmatpush1.bf16.msra.mxu0 %v12763_v7  ;;  %13169 = vmatpush1.bf16.msra.mxu1 %v12765_v45 }
 0x7bd   :  { %13084 = vmatprep.subr.bf16.mxu0 %v12772_v53  ;;  %13170 = vmatprep.subr.bf16.mxu1 %v12774_v63 }
 0x7c0   :  { %13085 = vmatpush1.bf16.msra.mxu0 %v12771_v28  ;;  %13171 = vmatpush1.bf16.msra.mxu1 %v12773_v51 }
 0x7c1   :  { %13086 = vmatprep.subr.bf16.mxu0 %v12780_v29  ;;  %13172 = vmatprep.subr.bf16.mxu1 %v12782_v18 }
 0x7c4   :  { %13087 = vmatpush1.bf16.msra.mxu0 %v12779_v19  ;;  %13173 = vmatpush1.bf16.msra.mxu1 %v12781_v20 }
 0x7c5   :  { %13088 = vmatprep.subr.bf16.mxu0 %v12788_v44  ;;  %13174 = vmatprep.subr.bf16.mxu1 %v12790_v50 }
 0x7c8   :  { %13089 = vmatpush1.bf16.msra.mxu0 %v12787_v21  ;;  %13175 = vmatpush1.bf16.msra.mxu1 %v12789_v22 }
 0x7c9   :  { %13090 = vmatprep.subr.bf16.mxu0 %v12796_v23  ;;  %13176 = vmatprep.subr.bf16.mxu1 %v12798_v26 }
 0x7cc   :  { %13091 = vmatpush1.bf16.msra.mxu0 %v12795_v27  ;;  %13177 = vmatpush1.bf16.msra.mxu1 %v12797_v58 }
 0x7cf   :  { %13093 = vmatmul.mubr.bf16.vlgmr.msra.gmra.mrb[8].mxu0 %v19931_v24  ;;  %13179 = vmatmul.mubr.bf16.vlgmr.msra.gmra.mrb[16].mxu1 %v19931_v24 }
 0x822   :  { %v12922_v30 = vpop.f32.mrb[4].mxu0  ;;  %v13008_v59 = vpop.f32.mrb[12].mxu1 }
 0x823   :  { %v12924_v54 = vpop.f32.mrb[5].mxu0  ;;  %v13010_v31 = vpop.f32.mrb[13].mxu1  ;;  %v19960_v38 = vadd.f32 %v12922_v30, %v12808_v25  ;;  %v19962_v43 = vadd.f32 %v13008_v59, %v12816_v34 }
 0x824   :  { %v12926_v32 = vpop.f32.mrb[6].mxu0  ;;  %v13012_v56 = vpop.f32.mrb[14].mxu1  ;;  %v19972_v62 = vadd.f32 %v12924_v54, %v12812_v36  ;;  %v19974_v52 = vadd.f32 %v13010_v31, %v12820_v37 }
 0x825   :  { %v12928_v11 = vpop.f32.mrb[7].mxu0  ;;  %v13014_v57 = vpop.f32.mrb[15].mxu1  ;;  %v19952_v24 = vadd.f32 %v12926_v32, %v12808_v25  ;;  %v19954_v17 = vadd.f32 %v13012_v56, %v12816_v34 }
 0x826   :  { %v19964_v47 = vadd.f32 %v12928_v11, %v12812_v36  ;;  %v19966_v55 = vadd.f32 %v13014_v57, %v12820_v37 }
 0x827   :  { %v13191_v60 = vadd.f32 %v19952_v24, %v19960_v38  ;;  %v13205_v61 = vadd.f32 %v19954_v17, %v19962_v43 }
 0x828   :  { %v13198_v0 = vadd.f32 %v19964_v47, %v19972_v62  ;;  %v13212_v48 = vadd.f32 %v19966_v55, %v19974_v52 }
 0x829   :  { %v13192_v49 = vrot.slane %v13191_v60, 4  ;;  %v13206_v1 = vrot.slane %v13205_v61, 4 }
 0x82a   :  { %v13199_v2 = vrot.slane %v13198_v0, 4  ;;  %v13213_v3 = vrot.slane %v13212_v48, 4 }
 0x82b   :  { %v13193_v4 = vadd.f32 %v13192_v49, %v13191_v60  ;;  %v13207_v5 = vadd.f32 %v13206_v1, %v13205_v61  ;;  %v20005_v61 = vsub.s32 4, %v19673_v39  ;;  %v20014_v49 = vsub.s32 7, %v19673_v39 }
 0x82c   :  { %v13200_v8 = vadd.f32 %v13199_v2, %v13198_v0  ;;  %v13214_v9 = vadd.f32 %v13213_v3, %v13212_v48  ;;  %v20008_v0 = vsub.s32 6, %v19673_v39  ;;  %v20011_v48 = vsub.s32 5, %v19673_v39 }
 0x82d   :  { %v13194_v12 = vrot.slane %v13193_v4, 2  ;;  %v13208_v14 = vrot.slane %v13207_v5, 2 }
 0x82e   :  { %v13201_v15 = vrot.slane %v13200_v8, 2  ;;  %v13215_v16 = vrot.slane %v13214_v9, 2 }
 0x82f   :  { %v13195_v41 = vadd.f32 %v13194_v12, %v13193_v4  ;;  %v13209_v46 = vadd.f32 %v13208_v14, %v13207_v5  ;;  %v12824_v5 = vrot.slane %v19946_v33, %v20005_v61  ;;  %v12828_v14 = vrot.slane %v19946_v33, %v20011_v48 }
 0x830   :  { %v13202_v6 = vadd.f32 %v13201_v15, %v13200_v8  ;;  %v13216_v7 = vadd.f32 %v13215_v16, %v13214_v9  ;;  %v12832_v8 = vrot.slane %v19946_v33, %v20008_v0  ;;  %v12836_v15 = vrot.slane %v19946_v33, %v20014_v49 }
 0x831   :  { %v13196_v45 = vrot.slane %v13195_v41, 1  ;;  %v13210_v53 = vrot.slane %v13209_v46, 1 }
 0x832   :  { %v13203_v63 = vrot.slane %v13202_v6, 1  ;;  %v13217_v28 = vrot.slane %v13216_v7, 1 }
 0x833   :  { %v13197_v51 = vadd.f32 %v13196_v45, %v13195_v41  ;;  %v13211_v29 = vadd.f32 %v13210_v53, %v13209_v46 }
 0x834   :  { %v13204_v18 = vadd.f32 %v13203_v63, %v13202_v6  ;;  %v13218_v19 = vadd.f32 %v13217_v28, %v13216_v7 }
 0x835   :  { %v19980_v20 = vmul.f32 0.0625, %v13197_v51  ;;  %v19982_v44 = vmul.f32 0.0625, %v13211_v29 }
 0x836   :  { %v19984_v50 = vmul.f32 0.0625, %v13204_v18  ;;  %v19986_v21 = vmul.f32 0.0625, %v13218_v19 }
 0x837   :  { %v13255_v22 = vsub.f32 %v19960_v38, %v19980_v20  ;;  %v13263_v23 = vsub.f32 %v19952_v24, %v19980_v20  ;;  %v13257_v26 = vsub.f32 %v19962_v43, %v19982_v44  ;;  %v13265_v27 = vsub.f32 %v19954_v17, %v19982_v44 }
 0x838   :  { %v13256_v58 = vsub.f32 %v19972_v62, %v19984_v50  ;;  %v13264_v30 = vsub.f32 %v19964_v47, %v19984_v50  ;;  %v13258_v59 = vsub.f32 %v19974_v52, %v19986_v21  ;;  %v13266_v54 = vsub.f32 %v19966_v55, %v19986_v21 }
 0x839   :  { %v13271_v31 = vmul.f32 %v13255_v22, %v13255_v22  ;;  %v13279_v32 = vmul.f32 %v13263_v23, %v13263_v23  ;;  %v13273_v56 = vmul.f32 %v13257_v26, %v13257_v26  ;;  %v13281_v11 = vmul.f32 %v13265_v27, %v13265_v27 }
 0x83a   :  { %v13272_v57 = vmul.f32 %v13256_v58, %v13256_v58  ;;  %v13280_v25 = vmul.f32 %v13264_v30, %v13264_v30  ;;  %v13274_v37 = vmul.f32 %v13258_v59, %v13258_v59  ;;  %v13282_v60 = vmul.f32 %v13266_v54, %v13266_v54 }
 0x83b   :  { %v13287_v34 = vadd.f32 %v13279_v32, %v13271_v31  ;;  %v13301_v36 = vadd.f32 %v13281_v11, %v13273_v56 }
 0x83c   :  { %v13294_v3 = vadd.f32 %v13280_v25, %v13272_v57  ;;  %v13308_v4 = vadd.f32 %v13282_v60, %v13274_v37 }
 0x83d   :  { %v13288_v1 = vrot.slane %v13287_v34, 4  ;;  %v13302_v2 = vrot.slane %v13301_v36, 4 }
 0x83e   :  { %v13295_v6 = vrot.slane %v13294_v3, 4  ;;  %v13309_v7 = vrot.slane %v13308_v4, 4 }
 0x83f   :  { %v13289_v41 = vadd.f32 %v13288_v1, %v13287_v34  ;;  %v13303_v46 = vadd.f32 %v13302_v2, %v13301_v36 }
 0x840   :  { %v13296_v54 = vadd.f32 %v13295_v6, %v13294_v3  ;;  %v13310_v31 = vadd.f32 %v13309_v7, %v13308_v4 }
 0x841   :  { %v13290_v11 = vrot.slane %v13289_v41, 2  ;;  %v13304_v57 = vrot.slane %v13303_v46, 2 }
 0x842   :  { %v13297_v2 = vrot.slane %v13296_v54, 2 }
 0x844   :  { %v13298_v7 = vadd.f32 %v13297_v2, %v13296_v54 }
 0x8a2   :  { %v13094_v9 = vpop.f32.mrb[8].mxu0  ;;  %v13180_v12 = vpop.f32.mrb[16].mxu1 }
 0x8a3   :  { %v13096_v39 = vpop.f32.mrb[9].mxu0  ;;  %v13182_v16 = vpop.f32.mrb[17].mxu1  ;;  %v20024_v63 = vadd.f32 %v13094_v9, %v12824_v5  ;;  %v20026_v28 = vadd.f32 %v13180_v12, %v12832_v8  ;;  %v13291_v12 = vadd.f32 %v13290_v11, %v13289_v41  ;;  %v13299_v41 = vrot.slane %v13298_v7, 1 }
 0x8a4   :  { %v13098_v45 = vpop.f32.mrb[10].mxu0  ;;  %v13184_v53 = vpop.f32.mrb[18].mxu1  ;;  %v20032_v22 = vadd.f32 %v13096_v39, %v12828_v14  ;;  %v20034_v33 = vadd.f32 %v13182_v16, %v12836_v15 }
 0x8a5   :  { %v20028_v51 = vadd.f32 %v13098_v45, %v12824_v5  ;;  %v20030_v29 = vadd.f32 %v13184_v53, %v12832_v8  ;;  %v13100_v18 = vpop.f32.mrb[11].mxu0  ;;  %v13186_v19 = vpop.f32.mrb[19].mxu1  ;;  %v13311_v5 = vrot.slane %v13310_v31, 2 }
 0x8a6   :  { %v20036_v23 = vadd.f32 %v13100_v18, %v12828_v14  ;;  %v20038_v26 = vadd.f32 %v13186_v19, %v12836_v15  ;;  %v13305_v14 = vadd.f32 %v13304_v57, %v13303_v46  ;;  %v13292_v19 = vrot.slane %v13291_v12, 1 }
 0x8a7   :  { %20278 = vst [vmem:[#allocation12_spill] sm:$0xff] %v20030_v29  ;;  %v13219_v27 = vadd.f32 %v20028_v51, %v20024_v63  ;;  %v13233_v58 = vadd.f32 %v20030_v29, %v20026_v28  ;;  %v13312_v45 = vadd.f32 %v13311_v5, %v13310_v31 }
 0x8a8   :  { %20279 = vst [vmem:[#allocation13_spill] sm:$0xff] %v20036_v23  ;;  %20280 = vst [vmem:[#allocation14_spill] sm:$0xff] %v20038_v26  ;;  %v13226_v30 = vadd.f32 %v20036_v23, %v20032_v22  ;;  %v13240_v59 = vadd.f32 %v20038_v26, %v20034_v33 }
 0x8a9   :  { %v13220_v32 = vrot.slane %v13219_v27, 4  ;;  %v13234_v56 = vrot.slane %v13233_v58, 4  ;;  %v13313_v46 = vrot.slane %v13312_v45, 1 }
 0x8aa   :  { %v13227_v25 = vrot.slane %v13226_v30, 4  ;;  %v13241_v34 = vrot.slane %v13240_v59, 4 }
 0x8ab   :  { %v13221_v36 = vadd.f32 %v13220_v32, %v13219_v27  ;;  %v13235_v37 = vadd.f32 %v13234_v56, %v13233_v58  ;;  %v13306_v27 = vrot.slane %v13305_v14, 1 }
 0x8ac   :  { %v13228_v60 = vadd.f32 %v13227_v25, %v13226_v30  ;;  %v13242_v1 = vadd.f32 %v13241_v34, %v13240_v59  ;;  %v13293_v34 = vadd.f32 %v13292_v19, %v13291_v12 }
 0x8ad   :  { %v13222_v8 = vrot.slane %v13221_v36, 2  ;;  %v13236_v9 = vrot.slane %v13235_v37, 2 }
 0x8ae   :  { %v13229_v15 = vrot.slane %v13228_v60, 2  ;;  %v13243_v39 = vrot.slane %v13242_v1, 2 }
 0x8af   :  { %v13223_v3 = vadd.f32 %v13222_v8, %v13221_v36  ;;  %v13237_v4 = vadd.f32 %v13236_v9, %v13235_v37  ;;  %v13307_v36 = vadd.f32 %v13306_v27, %v13305_v14 }
 0x8b0   :  { %v13230_v16 = vadd.f32 %v13229_v15, %v13228_v60  ;;  %v13244_v6 = vadd.f32 %v13243_v39, %v13242_v1 }
 0x8b1   :  { %v13224_v53 = vrot.slane %v13223_v3, 1  ;;  %v13238_v18 = vrot.slane %v13237_v4, 1 }
 0x8b2   :  { %v13231_v58 = vrot.slane %v13230_v16, 1  ;;  %v13245_v30 = vrot.slane %v13244_v6, 1 }
 0x8b3   :  { %v13225_v59 = vadd.f32 %v13224_v53, %v13223_v3  ;;  %v13239_v32 = vadd.f32 %v13238_v18, %v13237_v4  ;;  %v13300_v18 = vadd.f32 %v13299_v41, %v13298_v7 }
 0x8b4   :  { %v13232_v56 = vadd.f32 %v13231_v58, %v13230_v16  ;;  %v13246_v25 = vadd.f32 %v13245_v30, %v13244_v6  ;;  %v13314_v58 = vadd.f32 %v13313_v46, %v13312_v45 }
 0x8b5   :  { %v20048_v11 = vmul.f32 0.0625, %v13225_v59  ;;  %v20050_v57 = vmul.f32 0.0625, %v13239_v32  ;;  %v13343_v32 = vmul.f32 0.0625, %v13293_v34 }
 0x8b6   :  { %v20052_v54 = vmul.f32 0.0625, %v13232_v56  ;;  %v20054_v31 = vmul.f32 0.0625, %v13246_v25 }
 0x8b7   :  { %v13259_v37 = vsub.f32 %v20024_v63, %v20048_v11  ;;  %v13267_v60 = vsub.f32 %v20028_v51, %v20048_v11  ;;  %v13261_v1 = vsub.f32 %v20026_v28, %v20050_v57  ;;  %v13269_v2 = vsub.f32 %v20030_v29, %v20050_v57 }
 0x8b8   :  { %v13260_v5 = vsub.f32 %v20032_v22, %v20052_v54  ;;  %v13268_v8 = vsub.f32 %v20036_v23, %v20052_v54  ;;  %v13262_v9 = vsub.f32 %v20034_v33, %v20054_v31  ;;  %v13270_v12 = vsub.f32 %v20038_v26, %v20054_v31 }
 0x8b9   :  { %v13275_v14 = vmul.f32 %v13259_v37, %v13259_v37  ;;  %v13283_v15 = vmul.f32 %v13267_v60, %v13267_v60  ;;  %v13277_v39 = vmul.f32 %v13261_v1, %v13261_v1  ;;  %v13285_v3 = vmul.f32 %v13269_v2, %v13269_v2 }
 0x8ba   :  { %v13276_v4 = vmul.f32 %v13260_v5, %v13260_v5  ;;  %v13284_v16 = vmul.f32 %v13268_v8, %v13268_v8  ;;  %v13278_v6 = vmul.f32 %v13262_v9, %v13262_v9  ;;  %v13286_v53 = vmul.f32 %v13270_v12, %v13270_v12 }
 0x8bb   :  { %v13315_v19 = vadd.f32 %v13283_v15, %v13275_v14  ;;  %v13329_v27 = vadd.f32 %v13285_v3, %v13277_v39  ;;  %v13345_v29 = vmul.f32 0.0625, %v13307_v36  ;;  %v13344_v37 = vmul.f32 0.0625, %v13300_v18 }
 0x8bc   :  { %v13322_v30 = vadd.f32 %v13284_v16, %v13276_v4  ;;  %v13336_v59 = vadd.f32 %v13286_v53, %v13278_v6  ;;  %v13346_v2 = vmul.f32 0.0625, %v13314_v58  ;;  %v13351_v9 = vadd.f32 1e-05, %v13343_v32 }
 0x8bd   :  { %v13316_v56 = vrot.slane %v13315_v19, 4  ;;  %v13330_v25 = vrot.slane %v13329_v27, 4  ;;  %v13353_v41 = vadd.f32 1e-05, %v13345_v29  ;;  %v13352_v46 = vadd.f32 1e-05, %v13344_v37 }
 0x8be   :  { %v13323_v23 = vrot.slane %v13322_v30, 4  ;;  %v13337_v26 = vrot.slane %v13336_v59, 4  ;;  %v13354_v39 = vadd.f32 1e-05, %v13346_v2  ;;  %15450 = vrsqrt.f32 %v13351_v9 }
 0x8bf   :  { %v13317_v60 = vadd.f32 %v13316_v56, %v13315_v19  ;;  %v13331_v1 = vadd.f32 %v13330_v25, %v13329_v27  ;;  %15452 = vrsqrt.f32 %v13353_v41 }
 0x8c0   :  { %v13324_v5 = vadd.f32 %v13323_v23, %v13322_v30  ;;  %v13338_v8 = vadd.f32 %v13337_v26, %v13336_v59  ;;  %15454 = vrsqrt.f32 %v13352_v46 }
 0x8c1   :  { %v13318_v12 = vrot.slane %v13317_v60, 2  ;;  %v13332_v7 = vrot.slane %v13331_v1, 2  ;;  %15456 = vrsqrt.f32 %v13354_v39 }
 0x8c2   :  { %v13325_v14 = vrot.slane %v13324_v5, 2  ;;  %v13339_v45 = vrot.slane %v13338_v8, 2 }
 0x8c3   :  { %v13319_v15 = vadd.f32 %v13318_v12, %v13317_v60  ;;  %v13333_v34 = vadd.f32 %v13332_v7, %v13331_v1 }
 0x8c4   :  { %v13326_v3 = vadd.f32 %v13325_v14, %v13324_v5  ;;  %v13340_v36 = vadd.f32 %v13339_v45, %v13338_v8 }
 0x8c5   :  { %v13320_v4 = vrot.slane %v13319_v15, 1  ;;  %v13334_v16 = vrot.slane %v13333_v34, 1 }
 0x8c6   :  { %v13327_v6 = vrot.slane %v13326_v3, 1  ;;  %v13341_v53 = vrot.slane %v13340_v36, 1 }
 0x8c7   :  { %v13321_v23 = vadd.f32 %v13320_v4, %v13319_v15  ;;  %v13335_v26 = vadd.f32 %v13334_v16, %v13333_v34 }
 0x8c8   :  { %v13328_v18 = vadd.f32 %v13327_v6, %v13326_v3  ;;  %v13342_v29 = vadd.f32 %v13341_v53, %v13340_v36  ;;  %v15451_v37 = vpop.eup %15450  ;;  %v13189_v6 = vld [vmem:[%s20268_s1 + $0x1b] sm:$0xff] }
 0x8c9   :  { %v13347_v19 = vmul.f32 0.0625, %v13321_v23  ;;  %v13349_v27 = vmul.f32 0.0625, %v13335_v26  ;;  %v15453_v60 = vpop.eup %15452 }
 0x8ca   :  { %v13348_v58 = vmul.f32 0.0625, %v13328_v18  ;;  %v13350_v30 = vmul.f32 0.0625, %v13342_v29  ;;  %v15455_v1 = vpop.eup %15454 }
 0x8cb   :  { %v13355_v59 = vadd.f32 1e-05, %v13347_v19  ;;  %v13357_v32 = vadd.f32 1e-05, %v13349_v27  ;;  %v15457_v2 = vpop.eup %15456  ;;  %v13375_v5 = vcombine.low %v15451_v37, %v15455_v1 }
 0x8cc   :  { %v13356_v56 = vadd.f32 1e-05, %v13348_v58  ;;  %v13358_v25 = vadd.f32 1e-05, %v13350_v30  ;;  %v13376_v8 = vcombine.low %v15453_v60, %v15457_v2 }
 0x8cd   :  { %15458 = vrsqrt.f32 %v13355_v59  ;;  %v13385_v41 = vrot.slane %v13375_v5, %v19695_v35 }
 0x8ce   :  { %15460 = vrsqrt.f32 %v13357_v32  ;;  %v13392_v14 = vrot.slane %v13376_v8, %v19695_v35 }
 0x8cf   :  { %15462 = vrsqrt.f32 %v13356_v56 }
 0x8d0   :  { %15464 = vrsqrt.f32 %v13358_v25  ;;  %v13407_v39 = vcombine.low %v13385_v41, %v13392_v14 }
 0x8d2   :  { %v13415_v4 = vrot.slane %v13407_v39, %v19695_v35 }
 0x8d7   :  { %v15459_v9 = vpop.eup %15458 }
 0x8d8   :  { %v15461_v12 = vpop.eup %15460 }
 0x8d9   :  { %v15463_v7 = vpop.eup %15462 }
 0x8da   :  { %v15465_v45 = vpop.eup %15464  ;;  %v13377_v46 = vcombine.low %v15459_v9, %v15463_v7 }
 0x8db   :  { %v13378_v15 = vcombine.low %v15461_v12, %v15465_v45 }
 0x8dc   :  { %v13399_v34 = vrot.slane %v13377_v46, %v19695_v35 }
 0x8dd   :  { %v13406_v3 = vrot.slane %v13378_v15, %v19695_v35 }
 0x8df   :  { %v13408_v36 = vcombine.low %v13399_v34, %v13406_v3 }
 0x8e1   :  { %v13422_v16 = vrot.slane %v13408_v36, %v19695_v35 }
 0x8e3   :  { %v13423_v53 = vcombine.low %v13415_v4, %v13422_v16 }
 0x8e5   :  { %v13425_v23 = vmul.f32 %v13423_v53, %v13189_v6 }
 0x8e7   :  { %v13430_v26 = vrot.slane %v13425_v23, %v19676_v40  ;;  %v13434_v18 = vrot.slane %v13425_v23, %v19682_v42  ;;  %v13438_v29 = vrot.slane %v13425_v23, %v19836_v10  ;;  %v13442_v19 = vrot.slane %v13425_v23, %v19843_v13 }
 0x8e8   :  { %v13446_v27 = vrot.slane %v13425_v23, %v20005_v61  ;;  %v13450_v58 = vrot.slane %v13425_v23, %v20011_v48  ;;  %v13454_v30 = vrot.slane %v13425_v23, %v20008_v0  ;;  %v13458_v59 = vrot.slane %v13425_v23, %v20014_v49 }
 0x8e9   :  { %v13467_v32 = vmul.f32 %v13430_v26, %v19980_v20  ;;  %v13468_v56 = vmul.f32 %v13434_v18, %v19984_v50  ;;  %v13469_v25 = vmul.f32 %v13438_v29, %v19982_v44  ;;  %v13470_v37 = vmul.f32 %v13442_v19, %v19986_v21 }
 0x8ea   :  { %v13471_v60 = vmul.f32 %v13446_v27, %v20048_v11  ;;  %v13472_v1 = vmul.f32 %v13450_v58, %v20052_v54  ;;  %v13473_v2 = vmul.f32 %v13454_v30, %v20050_v57  ;;  %v13474_v5 = vmul.f32 %v13458_v59, %v20054_v31  ;;  %v13190_v31 = vld [vmem:[%s20268_s1 + $0x23] sm:$0xff] }
 0x8eb   :  { %v13483_v8 = vcombine.low %v13467_v32, %v13468_v56  ;;  %v13484_v9 = vcombine.low %v13469_v25, %v13470_v37  ;;  %v13534_v14 = vmul.f32 %v19960_v38, %v13430_v26  ;;  %v13535_v45 = vmul.f32 %v19972_v62, %v13434_v18 }
 0x8ec   :  { %v13485_v12 = vcombine.low %v13471_v60, %v13472_v1  ;;  %v13486_v7 = vcombine.low %v13473_v2, %v13474_v5  ;;  %v13536_v15 = vmul.f32 %v19962_v43, %v13438_v29  ;;  %v13537_v34 = vmul.f32 %v19974_v52, %v13442_v19  ;;  %v20281_v52 = vld [vmem:[#allocation13_spill] sm:$0xff] }
 0x8ed   :  { %v13493_v20 = vrot.slane %v13483_v8, %v19695_v35  ;;  %v13500_v50 = vrot.slane %v13484_v9, %v19695_v35  ;;  %v13538_v39 = vmul.f32 %v20024_v63, %v13446_v27  ;;  %v13539_v3 = vmul.f32 %v20032_v22, %v13450_v58  ;;  %v20282_v63 = vld [vmem:[#allocation12_spill] sm:$0xff]  ;;  %v20283_v22 = vld [vmem:[#allocation14_spill] sm:$0xff] }
 0x8ee   :  { %v13507_v44 = vrot.slane %v13485_v12, %v19695_v35  ;;  %v13514_v21 = vrot.slane %v13486_v7, %v19695_v35  ;;  %v13540_v36 = vmul.f32 %v20026_v28, %v13454_v30  ;;  %v13542_v4 = vmul.f32 %v19952_v24, %v13430_v26 }
 0x8ef   :  { %v13515_v41 = vcombine.low %v13493_v20, %v13500_v50  ;;  %v13543_v38 = vmul.f32 %v19964_v47, %v13434_v18  ;;  %v13544_v62 = vmul.f32 %v19954_v17, %v13438_v29  ;;  %v13545_v6 = vmul.f32 %v19966_v55, %v13442_v19 }
 0x8f0   :  { %v13516_v11 = vcombine.low %v13507_v44, %v13514_v21  ;;  %v13546_v43 = vmul.f32 %v20028_v51, %v13446_v27  ;;  %v13547_v53 = vmul.f32 %v20281_v52, %v13450_v58  ;;  %v13548_v23 = vmul.f32 %v20282_v63, %v13454_v30 }
 0x8f1   :  { %v13523_v54 = vrot.slane %v13515_v41, %v19695_v35  ;;  %v13549_v32 = vmul.f32 %v20283_v22, %v13458_v59 }
 0x8f2   :  { %v13530_v57 = vrot.slane %v13516_v11, %v19695_v35  ;;  %v13541_v35 = vmul.f32 %v20034_v33, %v13458_v59 }
 0x8f4   :  { %v13531_v46 = vcombine.low %v13523_v54, %v13530_v57 }
 0x8f6   :  { %v13533_v16 = vsub.f32 %v13190_v31, %v13531_v46 }
 0x8f8   :  { %v13554_v28 = vrot.slane %v13533_v16, %v19676_v40  ;;  %v13558_v33 = vrot.slane %v13533_v16, %v19682_v42  ;;  %v13562_v24 = vrot.slane %v13533_v16, %v19836_v10  ;;  %v13566_v47 = vrot.slane %v13533_v16, %v19843_v13 }
 0x8f9   :  { %v13570_v17 = vrot.slane %v13533_v16, %v20005_v61  ;;  %v13574_v55 = vrot.slane %v13533_v16, %v20011_v48  ;;  %v13578_v51 = vrot.slane %v13533_v16, %v20008_v0  ;;  %v13582_v26 = vrot.slane %v13533_v16, %v20014_v49 }
 0x8fa   :  { %v13591_v18 = vadd.f32 %v13554_v28, %v13534_v14  ;;  %v13592_v29 = vadd.f32 %v13558_v33, %v13535_v45  ;;  %v13593_v19 = vadd.f32 %v13562_v24, %v13536_v15  ;;  %v13594_v27 = vadd.f32 %v13566_v47, %v13537_v34 }
 0x8fb   :  { %v13595_v58 = vadd.f32 %v13570_v17, %v13538_v39  ;;  %v13596_v30 = vadd.f32 %v13574_v55, %v13539_v3  ;;  %v13597_v59 = vadd.f32 %v13578_v51, %v13540_v36  ;;  %v13598_v56 = vadd.f32 %v13582_v26, %v13541_v35 }
 0x8fc   :  { %v13599_v25 = vadd.f32 %v13554_v28, %v13542_v4  ;;  %v13600_v37 = vadd.f32 %v13558_v33, %v13543_v38  ;;  %v13601_v60 = vadd.f32 %v13562_v24, %v13544_v62  ;;  %v13602_v1 = vadd.f32 %v13566_v47, %v13545_v6 }
 0x8fd   :  { %v13603_v2 = vadd.f32 %v13570_v17, %v13546_v43  ;;  %v13604_v5 = vadd.f32 %v13574_v55, %v13547_v53  ;;  %v13605_v8 = vadd.f32 %v13578_v51, %v13548_v23  ;;  %v13606_v9 = vadd.f32 %v13582_v26, %v13549_v32 }
 0x8fe   :  { %vm13607_vm0 = vcmp.ge.f32.partialorder %v13591_v18, 0.0  ;;  %vm13608_vm1 = vcmp.ge.f32.partialorder %v13592_v29, 0.0  ;;  %vm13609_vm2 = vcmp.ge.f32.partialorder %v13593_v19, 0.0  ;;  %vm13610_vm3 = vcmp.ge.f32.partialorder %v13594_v27, 0.0 }
 0x8ff   :  { %vm13611_vm4 = vcmp.ge.f32.partialorder %v13595_v58, 0.0  ;;  %vm13612_vm5 = vcmp.ge.f32.partialorder %v13596_v30, 0.0  ;;  %vm13613_vm6 = vcmp.ge.f32.partialorder %v13597_v59, 0.0  ;;  %vm13614_vm7 = vcmp.ge.f32.partialorder %v13598_v56, 0.0 }
 0x900   :  { %vm13615_vm8 = vcmp.ge.f32.partialorder %v13599_v25, 0.0  ;;  %vm13616_vm9 = vcmp.ge.f32.partialorder %v13600_v37, 0.0  ;;  %vm13617_vm10 = vcmp.ge.f32.partialorder %v13601_v60, 0.0  ;;  %vm13618_vm11 = vcmp.ge.f32.partialorder %v13602_v1, 0.0 }
 0x901   :  { %vm13619_vm12 = vcmp.ge.f32.partialorder %v13603_v2, 0.0  ;;  %vm13620_vm13 = vcmp.ge.f32.partialorder %v13604_v5, 0.0  ;;  %vm13621_vm14 = vcmp.ge.f32.partialorder %v13605_v8, 0.0  ;;  %vm13622_vm15 = vcmp.ge.f32.partialorder %v13606_v9, 0.0 }
 0x902   :  { %v13623_v49 = vmul.f32 0.2, %v13591_v18  ;;  %v13624_v12 = vmul.f32 0.2, %v13592_v29  ;;  %v13625_v7 = vmul.f32 0.2, %v13593_v19 }
 0x903   :  { %v13626_v20 = vmul.f32 0.2, %v13594_v27  ;;  %v13627_v50 = vmul.f32 0.2, %v13595_v58  ;;  %v13628_v44 = vmul.f32 0.2, %v13596_v30 }
 0x904   :  { %v13629_v21 = vmul.f32 0.2, %v13597_v59  ;;  %v13630_v41 = vmul.f32 0.2, %v13598_v56  ;;  %v13631_v11 = vmul.f32 0.2, %v13599_v25  ;;  %v20131_v54 = vsel %vm13607_vm0, %v13591_v18, %v13623_v49 }
 0x905   :  { %v13632_v57 = vmul.f32 0.2, %v13600_v37  ;;  %v13633_v31 = vmul.f32 0.2, %v13601_v60  ;;  %v13634_v14 = vmul.f32 0.2, %v13602_v1  ;;  %v13640_v45 = vsel %vm13608_vm1, %v13592_v29, %v13624_v12 }
 0x906   :  { %v13635_v46 = vmul.f32 0.2, %v13603_v2  ;;  %v13636_v15 = vmul.f32 0.2, %v13604_v5  ;;  %v13637_v34 = vmul.f32 0.2, %v13605_v8  ;;  %v20135_v39 = vsel %vm13609_vm2, %v13593_v19, %v13625_v7 }
 0x907   :  { %v13638_v3 = vmul.f32 0.2, %v13606_v9  ;;  %v20138_v36 = vsel %vm13610_vm3, %v13594_v27, %v13626_v20  ;;  %v20141_v35 = vsel %vm13611_vm4, %v13595_v58, %v13627_v50  ;;  %v20144_v4 = vsel %vm13612_vm5, %v13596_v30, %v13628_v44 }
 0x908   :  { %v20147_v16 = vsel %vm13613_vm6, %v13597_v59, %v13629_v21  ;;  %v20150_v38 = vsel %vm13614_vm7, %v13598_v56, %v13630_v41  ;;  %v20153_v62 = vsel %vm13615_vm8, %v13599_v25, %v13631_v11  ;;  %v13648_v6 = vsel %vm13616_vm9, %v13600_v37, %v13632_v57 }
 0x909   :  { %v20157_v43 = vsel %vm13617_vm10, %v13601_v60, %v13633_v31  ;;  %v20160_v52 = vsel %vm13618_vm11, %v13602_v1, %v13634_v14  ;;  %v20163_v53 = vsel %vm13619_vm12, %v13603_v2, %v13635_v46  ;;  %v20166_v63 = vsel %vm13620_vm13, %v13604_v5, %v13636_v15 }
 0x90a   :  { %v20169_v23 = vsel %vm13621_vm14, %v13605_v8, %v13637_v34  ;;  %v20172_v22 = vsel %vm13622_vm15, %v13606_v9, %v13638_v3 }
 0x90b   :  { %15518 = dma.done.wait [#allocation4 + $0x1], 57344 }
 0x90c   :  { %15519 = vsyncadd [#allocation4 + $0x1], 4294909952  ;;  %v20174_v32 = vpack.c.bf16 %v13648_v6, %v13640_v45  ;;  %v13660_v28 = vld [vmem:[#allocation3 + $0x8] sm:$0xff]  ;;  %v13662_v33 = vld [vmem:[#allocation3 + $0x18] sm:$0xff]  ;;  %vm14893_vm0 = vcmask 125952  }
 0x90d   :  { %v13659_v24 = vld [vmem:[#allocation3] sm:$0xff]  ;;  %14152 = vmatprep.subr.bf16.mxu0 %v13660_v28  ;;  %14324 = vmatprep.subr.bf16.mxu1 %v13662_v33  ;;  %v13661_v47 = vld [vmem:[#allocation3 + $0x10] sm:$0xff]  ;;  %v13666_v51 = vld [vmem:[#allocation3 + $0x38] sm:$0xff] }
 0x90e   :  { %14184 = vmatprep.mubr.bf16.mxu0 %v20174_v32  ;;  %14356 = vmatprep.mubr.bf16.mxu1 %v20174_v32  ;;  %v13667_v17 = vld [vmem:[#allocation3 + $0x40] sm:$0xff]  ;;  %v13669_v55 = vld [vmem:[#allocation3 + $0x50] sm:$0xff]  ;;  %v13668_v26 = vld [vmem:[#allocation3 + $0x48] sm:$0xff] }
 0x90f   :  { %14153 = vmatpush1.bf16.msra.mxu0 %v13659_v24  ;;  %14325 = vmatpush1.bf16.msra.mxu1 %v13661_v47  ;;  %v13674_v18 = vld [vmem:[#allocation3 + $0x78] sm:$0xff]  ;;  %v13676_v29 = vld [vmem:[#allocation3 + $0x88] sm:$0xff]  ;;  %v13673_v19 = vld [vmem:[#allocation3 + $0x70] sm:$0xff] }
 0x910   :  { %14154 = vmatprep.subr.bf16.mxu0 %v13667_v17  ;;  %14326 = vmatprep.subr.bf16.mxu1 %v13669_v55  ;;  %v13675_v27 = vld [vmem:[#allocation3 + $0x80] sm:$0xff]  ;;  %v13681_v58 = vld [vmem:[#allocation3 + $0xb0] sm:$0xff]  ;;  %v13680_v59 = vld [vmem:[#allocation3 + $0xa8] sm:$0xff] }
 0x911   :  { %v13683_v30 = vld [vmem:[#allocation3 + $0xc0] sm:$0xff]  ;;  %v13682_v56 = vld [vmem:[#allocation3 + $0xb8] sm:$0xff]  ;;  %v13688_v25 = vld [vmem:[#allocation3 + $0xe8] sm:$0xff] }
 0x912   :  { %v13690_v37 = vld [vmem:[#allocation3 + $0xf8] sm:$0xff]  ;;  %v13687_v60 = vld [vmem:[#allocation3 + $0xe0] sm:$0xff]  ;;  %v13689_v1 = vld [vmem:[#allocation3 + $0xf0] sm:$0xff] }
 0x913   :  { %14155 = vmatpush1.bf16.msra.mxu0 %v13666_v51  ;;  %14327 = vmatpush1.bf16.msra.mxu1 %v13668_v26  ;;  %v13695_v2 = vld [vmem:[#allocation3 + $0x120] sm:$0xff]  ;;  %v13697_v5 = vld [vmem:[#allocation3 + $0x130] sm:$0xff]  ;;  %v13694_v8 = vld [vmem:[#allocation3 + $0x118] sm:$0xff] }
 0x914   :  { %14156 = vmatprep.subr.bf16.mxu0 %v13674_v18  ;;  %14328 = vmatprep.subr.bf16.mxu1 %v13676_v29  ;;  %v13696_v9 = vld [vmem:[#allocation3 + $0x128] sm:$0xff]  ;;  %v13702_v49 = vld [vmem:[#allocation3 + $0x158] sm:$0xff]  ;;  %v13701_v7 = vld [vmem:[#allocation3 + $0x150] sm:$0xff] }
 0x915   :  { %v13704_v12 = vld [vmem:[#allocation3 + $0x168] sm:$0xff]  ;;  %v13703_v20 = vld [vmem:[#allocation3 + $0x160] sm:$0xff]  ;;  %v13709_v50 = vld [vmem:[#allocation3 + $0x190] sm:$0xff] }
 0x916   :  { %v13711_v44 = vld [vmem:[#allocation3 + $0x1a0] sm:$0xff]  ;;  %v13708_v21 = vld [vmem:[#allocation3 + $0x188] sm:$0xff]  ;;  %v13710_v41 = vld [vmem:[#allocation3 + $0x198] sm:$0xff] }
 0x917   :  { %14157 = vmatpush1.bf16.msra.mxu0 %v13673_v19  ;;  %14329 = vmatpush1.bf16.msra.mxu1 %v13675_v27  ;;  %v13716_v11 = vld [vmem:[#allocation3 + $0x1c8] sm:$0xff]  ;;  %v13718_v57 = vld [vmem:[#allocation3 + $0x1d8] sm:$0xff]  ;;  %v13715_v31 = vld [vmem:[#allocation3 + $0x1c0] sm:$0xff] }
 0x918   :  { %14158 = vmatprep.subr.bf16.mxu0 %v13681_v58  ;;  %14330 = vmatprep.subr.bf16.mxu1 %v13683_v30  ;;  %v13717_v14 = vld [vmem:[#allocation3 + $0x1d0] sm:$0xff]  ;;  %v13723_v45 = vld [vmem:[#allocation3 + $0x200] sm:$0xff]  ;;  %v13722_v15 = vld [vmem:[#allocation3 + $0x1f8] sm:$0xff] }
 0x919   :  { %v13725_v46 = vld [vmem:[#allocation3 + $0x210] sm:$0xff]  ;;  %v13724_v34 = vld [vmem:[#allocation3 + $0x208] sm:$0xff]  ;;  %v13730_v3 = vld [vmem:[#allocation3 + $0x238] sm:$0xff] }
 0x91a   :  { %v13732_v6 = vld [vmem:[#allocation3 + $0x248] sm:$0xff]  ;;  %v13729_v28 = vld [vmem:[#allocation3 + $0x230] sm:$0xff]  ;;  %v13731_v33 = vld [vmem:[#allocation3 + $0x240] sm:$0xff] }
 0x91b   :  { %14159 = vmatpush1.bf16.msra.mxu0 %v13680_v59  ;;  %14331 = vmatpush1.bf16.msra.mxu1 %v13682_v56  ;;  %v13737_v24 = vld [vmem:[#allocation3 + $0x270] sm:$0xff]  ;;  %v13739_v47 = vld [vmem:[#allocation3 + $0x280] sm:$0xff]  ;;  %v13736_v17 = vld [vmem:[#allocation3 + $0x268] sm:$0xff] }
 0x91c   :  { %14160 = vmatprep.subr.bf16.mxu0 %v13688_v25  ;;  %14332 = vmatprep.subr.bf16.mxu1 %v13690_v37  ;;  %v13738_v55 = vld [vmem:[#allocation3 + $0x278] sm:$0xff]  ;;  %v13744_v51 = vld [vmem:[#allocation3 + $0x2a8] sm:$0xff]  ;;  %v13743_v18 = vld [vmem:[#allocation3 + $0x2a0] sm:$0xff] }
 0x91d   :  { %v13746_v26 = vld [vmem:[#allocation3 + $0x2b8] sm:$0xff]  ;;  %v13745_v29 = vld [vmem:[#allocation3 + $0x2b0] sm:$0xff]  ;;  %v13751_v19 = vld [vmem:[#allocation3 + $0x2e0] sm:$0xff] }
 0x91e   :  { %v13753_v27 = vld [vmem:[#allocation3 + $0x2f0] sm:$0xff]  ;;  %v13750_v58 = vld [vmem:[#allocation3 + $0x2d8] sm:$0xff]  ;;  %v13752_v30 = vld [vmem:[#allocation3 + $0x2e8] sm:$0xff] }
 0x91f   :  { %14161 = vmatpush1.bf16.msra.mxu0 %v13687_v60  ;;  %14333 = vmatpush1.bf16.msra.mxu1 %v13689_v1  ;;  %v13758_v59 = vld [vmem:[#allocation3 + $0x318] sm:$0xff]  ;;  %v13760_v56 = vld [vmem:[#allocation3 + $0x328] sm:$0xff]  ;;  %v13757_v25 = vld [vmem:[#allocation3 + $0x310] sm:$0xff] }
 0x920   :  { %14162 = vmatprep.subr.bf16.mxu0 %v13695_v2  ;;  %14334 = vmatprep.subr.bf16.mxu1 %v13697_v5  ;;  %v13759_v37 = vld [vmem:[#allocation3 + $0x320] sm:$0xff]  ;;  %v13765_v60 = vld [vmem:[#allocation3 + $0x350] sm:$0xff]  ;;  %v13764_v2 = vld [vmem:[#allocation3 + $0x348] sm:$0xff] }
 0x921   :  { %v13767_v1 = vld [vmem:[#allocation3 + $0x360] sm:$0xff]  ;;  %v13766_v5 = vld [vmem:[#allocation3 + $0x358] sm:$0xff] }
 0x923   :  { %14163 = vmatpush1.bf16.msra.mxu0 %v13694_v8  ;;  %14335 = vmatpush1.bf16.msra.mxu1 %v13696_v9  ;;  %v13772_v8 = vld [vmem:[#allocation3 + $0x388] sm:$0xff]  ;;  %v13774_v9 = vld [vmem:[#allocation3 + $0x398] sm:$0xff] }
 0x924   :  { %14164 = vmatprep.subr.bf16.mxu0 %v13702_v49  ;;  %14336 = vmatprep.subr.bf16.mxu1 %v13704_v12  ;;  %v20180_v49 = vpack.c.bf16 %v20153_v62, %v20131_v54  ;;  %v13771_v12 = vld [vmem:[#allocation3 + $0x380] sm:$0xff]  ;;  %v13778_v54 = vld [vmem:[#allocation3 + $0x3b8] sm:$0xff]  ;;  %v13780_v62 = vld [vmem:[#allocation3 + $0x3c8] sm:$0xff] }
 0x927   :  { %14165 = vmatpush1.bf16.msra.mxu0 %v13701_v7  ;;  %14337 = vmatpush1.bf16.msra.mxu1 %v13703_v20  ;;  %v13773_v7 = vld [vmem:[#allocation3 + $0x390] sm:$0xff]  ;;  %v13779_v20 = vld [vmem:[#allocation3 + $0x3c0] sm:$0xff] }
 0x928   :  { %14166 = vmatprep.subr.bf16.mxu0 %v13709_v50  ;;  %14338 = vmatprep.subr.bf16.mxu1 %v13711_v44  ;;  %v13781_v50 = vld [vmem:[#allocation3 + $0x3d0] sm:$0xff]  ;;  %v20184_v44 = vpack.c.bf16 %v20160_v52, %v20138_v36  ;;  %v13787_v52 = vld [vmem:[#allocation3 + $0x400] sm:$0xff] }
 0x929   :  { %v13785_v36 = vld [vmem:[#allocation3 + $0x3f0] sm:$0xff] }
 0x92b   :  { %14167 = vmatpush1.bf16.msra.mxu0 %v13708_v21  ;;  %14339 = vmatpush1.bf16.msra.mxu1 %v13710_v41  ;;  %v13786_v21 = vld [vmem:[#allocation3 + $0x3f8] sm:$0xff]  ;;  %v13788_v41 = vld [vmem:[#allocation3 + $0x408] sm:$0xff] }
 0x92c   :  { %14168 = vmatprep.subr.bf16.mxu0 %v13716_v11  ;;  %14340 = vmatprep.subr.bf16.mxu1 %v13718_v57  ;;  %v13793_v11 = vld [vmem:[#allocation3 + $0x430] sm:$0xff]  ;;  %v13795_v57 = vld [vmem:[#allocation3 + $0x440] sm:$0xff] }
 0x92f   :  { %14169 = vmatpush1.bf16.msra.mxu0 %v13715_v31  ;;  %14341 = vmatpush1.bf16.msra.mxu1 %v13717_v14  ;;  %v13792_v31 = vld [vmem:[#allocation3 + $0x428] sm:$0xff]  ;;  %v13794_v14 = vld [vmem:[#allocation3 + $0x438] sm:$0xff] }
 0x930   :  { %14170 = vmatprep.subr.bf16.mxu0 %v13723_v45  ;;  %14342 = vmatprep.subr.bf16.mxu1 %v13725_v46  ;;  %v13800_v45 = vld [vmem:[#allocation3 + $0x468] sm:$0xff]  ;;  %v13802_v46 = vld [vmem:[#allocation3 + $0x478] sm:$0xff] }
 0x933   :  { %14171 = vmatpush1.bf16.msra.mxu0 %v13722_v15  ;;  %14343 = vmatpush1.bf16.msra.mxu1 %v13724_v34  ;;  %v13799_v15 = vld [vmem:[#allocation3 + $0x460] sm:$0xff]  ;;  %v13801_v34 = vld [vmem:[#allocation3 + $0x470] sm:$0xff] }
 0x934   :  { %14172 = vmatprep.subr.bf16.mxu0 %v13730_v3  ;;  %14344 = vmatprep.subr.bf16.mxu1 %v13732_v6  ;;  %v13807_v3 = vld [vmem:[#allocation3 + $0x4a0] sm:$0xff]  ;;  %v13809_v6 = vld [vmem:[#allocation3 + $0x4b0] sm:$0xff] }
 0x937   :  { %14173 = vmatpush1.bf16.msra.mxu0 %v13729_v28  ;;  %14345 = vmatpush1.bf16.msra.mxu1 %v13731_v33  ;;  %v13806_v28 = vld [vmem:[#allocation3 + $0x498] sm:$0xff]  ;;  %v13808_v33 = vld [vmem:[#allocation3 + $0x4a8] sm:$0xff] }
 0x938   :  { %14174 = vmatprep.subr.bf16.mxu0 %v13737_v24  ;;  %14346 = vmatprep.subr.bf16.mxu1 %v13739_v47  ;;  %v13814_v24 = vld [vmem:[#allocation3 + $0x4d8] sm:$0xff]  ;;  %v13816_v47 = vld [vmem:[#allocation3 + $0x4e8] sm:$0xff] }
 0x93b   :  { %14175 = vmatpush1.bf16.msra.mxu0 %v13736_v17  ;;  %14347 = vmatpush1.bf16.msra.mxu1 %v13738_v55  ;;  %v13813_v17 = vld [vmem:[#allocation3 + $0x4d0] sm:$0xff]  ;;  %v13815_v55 = vld [vmem:[#allocation3 + $0x4e0] sm:$0xff] }
 0x93c   :  { %14176 = vmatprep.subr.bf16.mxu0 %v13744_v51  ;;  %14348 = vmatprep.subr.bf16.mxu1 %v13746_v26  ;;  %v13821_v51 = vld [vmem:[#allocation3 + $0x510] sm:$0xff]  ;;  %v13823_v26 = vld [vmem:[#allocation3 + $0x520] sm:$0xff] }
 0x93f   :  { %14177 = vmatpush1.bf16.msra.mxu0 %v13743_v18  ;;  %14349 = vmatpush1.bf16.msra.mxu1 %v13745_v29  ;;  %v13820_v18 = vld [vmem:[#allocation3 + $0x508] sm:$0xff]  ;;  %v13822_v29 = vld [vmem:[#allocation3 + $0x518] sm:$0xff] }
 0x940   :  { %14178 = vmatprep.subr.bf16.mxu0 %v13751_v19  ;;  %14350 = vmatprep.subr.bf16.mxu1 %v13753_v27  ;;  %v13828_v19 = vld [vmem:[#allocation3 + $0x548] sm:$0xff]  ;;  %v13830_v27 = vld [vmem:[#allocation3 + $0x558] sm:$0xff] }
 0x943   :  { %14179 = vmatpush1.bf16.msra.mxu0 %v13750_v58  ;;  %14351 = vmatpush1.bf16.msra.mxu1 %v13752_v30  ;;  %v13827_v58 = vld [vmem:[#allocation3 + $0x540] sm:$0xff]  ;;  %v13829_v30 = vld [vmem:[#allocation3 + $0x550] sm:$0xff] }
 0x944   :  { %14180 = vmatprep.subr.bf16.mxu0 %v13758_v59  ;;  %14352 = vmatprep.subr.bf16.mxu1 %v13760_v56  ;;  %v13835_v59 = vld [vmem:[#allocation3 + $0x580] sm:$0xff]  ;;  %v13837_v56 = vld [vmem:[#allocation3 + $0x590] sm:$0xff] }
 0x947   :  { %14181 = vmatpush1.bf16.msra.mxu0 %v13757_v25  ;;  %14353 = vmatpush1.bf16.msra.mxu1 %v13759_v37  ;;  %v13834_v25 = vld [vmem:[#allocation3 + $0x578] sm:$0xff]  ;;  %v13836_v37 = vld [vmem:[#allocation3 + $0x588] sm:$0xff] }
 0x948   :  { %14182 = vmatprep.subr.bf16.mxu0 %v13765_v60  ;;  %14354 = vmatprep.subr.bf16.mxu1 %v13767_v1  ;;  %v13842_v60 = vld [vmem:[#allocation3 + $0x5b8] sm:$0xff]  ;;  %v13844_v1 = vld [vmem:[#allocation3 + $0x5c8] sm:$0xff] }
 0x94b   :  { %14183 = vmatpush1.bf16.msra.mxu0 %v13764_v2  ;;  %14355 = vmatpush1.bf16.msra.mxu1 %v13766_v5  ;;  %v13841_v2 = vld [vmem:[#allocation3 + $0x5b0] sm:$0xff]  ;;  %v13843_v5 = vld [vmem:[#allocation3 + $0x5c0] sm:$0xff] }
 0x94c   :  { %14195 = vmatprep.subr.bf16.mxu0 %v13772_v8  ;;  %14367 = vmatprep.subr.bf16.mxu1 %v13774_v9  ;;  %v13849_v8 = vld [vmem:[#allocation3 + $0x5f0] sm:$0xff]  ;;  %v13851_v9 = vld [vmem:[#allocation3 + $0x600] sm:$0xff] }
 0x94e   :  { %14185 = vmatmul.mubr.bf16.vlgmr.msra.gmra.mrb[12].mxu0 %v20180_v49  ;;  %14357 = vmatmul.mubr.bf16.vlgmr.msra.gmra.mrb[20].mxu1 %v20180_v49 }
 0x94f   :  { %14196 = vmatpush1.bf16.msra.mxu0 %v13771_v12  ;;  %14368 = vmatpush1.bf16.msra.mxu1 %v13773_v7  ;;  %v13848_v12 = vld [vmem:[#allocation3 + $0x5e8] sm:$0xff]  ;;  %v13850_v7 = vld [vmem:[#allocation3 + $0x5f8] sm:$0xff] }
 0x950   :  { %14197 = vmatprep.subr.bf16.mxu0 %v13779_v20  ;;  %14369 = vmatprep.subr.bf16.mxu1 %v13781_v50  ;;  %v13856_v20 = vld [vmem:[#allocation3 + $0x628] sm:$0xff]  ;;  %v13858_v50 = vld [vmem:[#allocation3 + $0x638] sm:$0xff] }
 0x951   :  { %14227 = vmatprep.mubr.bf16.mxu0 %v20184_v44  ;;  %14399 = vmatprep.mubr.bf16.mxu1 %v20184_v44 }
 0x953   :  { %14198 = vmatpush1.bf16.msra.mxu0 %v13778_v54  ;;  %14370 = vmatpush1.bf16.msra.mxu1 %v13780_v62  ;;  %v13855_v54 = vld [vmem:[#allocation3 + $0x620] sm:$0xff]  ;;  %v13857_v62 = vld [vmem:[#allocation3 + $0x630] sm:$0xff] }
 0x954   :  { %14199 = vmatprep.subr.bf16.mxu0 %v13786_v21  ;;  %14371 = vmatprep.subr.bf16.mxu1 %v13788_v41  ;;  %v13863_v21 = vld [vmem:[#allocation3 + $0x660] sm:$0xff]  ;;  %v13865_v41 = vld [vmem:[#allocation3 + $0x670] sm:$0xff] }
 0x957   :  { %14200 = vmatpush1.bf16.msra.mxu0 %v13785_v36  ;;  %14372 = vmatpush1.bf16.msra.mxu1 %v13787_v52  ;;  %v13862_v36 = vld [vmem:[#allocation3 + $0x658] sm:$0xff]  ;;  %v13864_v52 = vld [vmem:[#allocation3 + $0x668] sm:$0xff] }
 0x958   :  { %14201 = vmatprep.subr.bf16.mxu0 %v13793_v11  ;;  %14373 = vmatprep.subr.bf16.mxu1 %v13795_v57  ;;  %v13870_v11 = vld [vmem:[#allocation3 + $0x698] sm:$0xff]  ;;  %v13872_v57 = vld [vmem:[#allocation3 + $0x6a8] sm:$0xff] }
 0x95b   :  { %14202 = vmatpush1.bf16.msra.mxu0 %v13792_v31  ;;  %14374 = vmatpush1.bf16.msra.mxu1 %v13794_v14  ;;  %v13869_v31 = vld [vmem:[#allocation3 + $0x690] sm:$0xff]  ;;  %v13871_v14 = vld [vmem:[#allocation3 + $0x6a0] sm:$0xff] }
 0x95c   :  { %14203 = vmatprep.subr.bf16.mxu0 %v13800_v45  ;;  %14375 = vmatprep.subr.bf16.mxu1 %v13802_v46  ;;  %v13877_v45 = vld [vmem:[#allocation3 + $0x6d0] sm:$0xff]  ;;  %v13879_v46 = vld [vmem:[#allocation3 + $0x6e0] sm:$0xff] }
 0x95f   :  { %14204 = vmatpush1.bf16.msra.mxu0 %v13799_v15  ;;  %14376 = vmatpush1.bf16.msra.mxu1 %v13801_v34  ;;  %v13876_v15 = vld [vmem:[#allocation3 + $0x6c8] sm:$0xff]  ;;  %v13878_v34 = vld [vmem:[#allocation3 + $0x6d8] sm:$0xff] }
 0x960   :  { %14205 = vmatprep.subr.bf16.mxu0 %v13807_v3  ;;  %14377 = vmatprep.subr.bf16.mxu1 %v13809_v6  ;;  %v13884_v3 = vld [vmem:[#allocation3 + $0x708] sm:$0xff]  ;;  %v13886_v6 = vld [vmem:[#allocation3 + $0x718] sm:$0xff] }
 0x963   :  { %14206 = vmatpush1.bf16.msra.mxu0 %v13806_v28  ;;  %14378 = vmatpush1.bf16.msra.mxu1 %v13808_v33  ;;  %v20192_v28 = vpack.c.bf16 %v20157_v43, %v20135_v39  ;;  %v13883_v33 = vld [vmem:[#allocation3 + $0x700] sm:$0xff]  ;;  %v13890_v39 = vld [vmem:[#allocation3 + $0x738] sm:$0xff]  ;;  %v13892_v43 = vld [vmem:[#allocation3 + $0x748] sm:$0xff] }
 0x964   :  { %14207 = vmatprep.subr.bf16.mxu0 %v13814_v24  ;;  %14379 = vmatprep.subr.bf16.mxu1 %v13816_v47  ;;  %v13885_v24 = vld [vmem:[#allocation3 + $0x710] sm:$0xff]  ;;  %v13891_v47 = vld [vmem:[#allocation3 + $0x740] sm:$0xff] }
 0x967   :  { %14208 = vmatpush1.bf16.msra.mxu0 %v13813_v17  ;;  %14380 = vmatpush1.bf16.msra.mxu1 %v13815_v55  ;;  %v13893_v17 = vld [vmem:[#allocation3 + $0x750] sm:$0xff]  ;;  %v20196_v55 = vpack.c.bf16 %v20166_v63, %v20144_v4  ;;  %v13899_v63 = vld [vmem:[#allocation3 + $0x780] sm:$0xff] }
 0x968   :  { %14209 = vmatprep.subr.bf16.mxu0 %v13821_v51  ;;  %14381 = vmatprep.subr.bf16.mxu1 %v13823_v26  ;;  %v13898_v51 = vld [vmem:[#allocation3 + $0x778] sm:$0xff]  ;;  %v13900_v26 = vld [vmem:[#allocation3 + $0x788] sm:$0xff]  ;;  %v13897_v4 = vld [vmem:[#allocation3 + $0x770] sm:$0xff] }
 0x96b   :  { %14210 = vmatpush1.bf16.msra.mxu0 %v13820_v18  ;;  %14382 = vmatpush1.bf16.msra.mxu1 %v13822_v29  ;;  %v13905_v18 = vld [vmem:[#allocation3 + $0x7b0] sm:$0xff]  ;;  %v13907_v29 = vld [vmem:[#allocation3 + $0x7c0] sm:$0xff] }
 0x96c   :  { %14211 = vmatprep.subr.bf16.mxu0 %v13828_v19  ;;  %14383 = vmatprep.subr.bf16.mxu1 %v13830_v27  ;;  %v13904_v19 = vld [vmem:[#allocation3 + $0x7a8] sm:$0xff]  ;;  %v13906_v27 = vld [vmem:[#allocation3 + $0x7b8] sm:$0xff] }
 0x96f   :  { %14212 = vmatpush1.bf16.msra.mxu0 %v13827_v58  ;;  %14384 = vmatpush1.bf16.msra.mxu1 %v13829_v30  ;;  %v13912_v58 = vld [vmem:[#allocation3 + $0x7e8] sm:$0xff]  ;;  %v13914_v30 = vld [vmem:[#allocation3 + $0x7f8] sm:$0xff] }
 0x970   :  { %14213 = vmatprep.subr.bf16.mxu0 %v13835_v59  ;;  %14385 = vmatprep.subr.bf16.mxu1 %v13837_v56  ;;  %v13911_v59 = vld [vmem:[#allocation3 + $0x7e0] sm:$0xff]  ;;  %v13913_v56 = vld [vmem:[#allocation3 + $0x7f0] sm:$0xff] }
 0x973   :  { %14214 = vmatpush1.bf16.msra.mxu0 %v13834_v25  ;;  %14386 = vmatpush1.bf16.msra.mxu1 %v13836_v37  ;;  %v13919_v25 = vld [vmem:[#allocation3 + $0x820] sm:$0xff]  ;;  %v13921_v37 = vld [vmem:[#allocation3 + $0x830] sm:$0xff] }
 0x974   :  { %14215 = vmatprep.subr.bf16.mxu0 %v13842_v60  ;;  %14387 = vmatprep.subr.bf16.mxu1 %v13844_v1  ;;  %v13918_v60 = vld [vmem:[#allocation3 + $0x818] sm:$0xff]  ;;  %v13920_v1 = vld [vmem:[#allocation3 + $0x828] sm:$0xff] }
 0x977   :  { %14216 = vmatpush1.bf16.msra.mxu0 %v13841_v2  ;;  %14388 = vmatpush1.bf16.msra.mxu1 %v13843_v5  ;;  %v13926_v2 = vld [vmem:[#allocation3 + $0x858] sm:$0xff]  ;;  %v13928_v5 = vld [vmem:[#allocation3 + $0x868] sm:$0xff] }
 0x978   :  { %14217 = vmatprep.subr.bf16.mxu0 %v13849_v8  ;;  %14389 = vmatprep.subr.bf16.mxu1 %v13851_v9  ;;  %v13925_v8 = vld [vmem:[#allocation3 + $0x850] sm:$0xff]  ;;  %v13927_v9 = vld [vmem:[#allocation3 + $0x860] sm:$0xff] }
 0x97b   :  { %14218 = vmatpush1.bf16.msra.mxu0 %v13848_v12  ;;  %14390 = vmatpush1.bf16.msra.mxu1 %v13850_v7  ;;  %v13933_v12 = vld [vmem:[#allocation3 + $0x890] sm:$0xff]  ;;  %v13935_v7 = vld [vmem:[#allocation3 + $0x8a0] sm:$0xff] }
 0x97c   :  { %14219 = vmatprep.subr.bf16.mxu0 %v13856_v20  ;;  %14391 = vmatprep.subr.bf16.mxu1 %v13858_v50  ;;  %v13932_v20 = vld [vmem:[#allocation3 + $0x888] sm:$0xff]  ;;  %v13934_v50 = vld [vmem:[#allocation3 + $0x898] sm:$0xff] }
 0x97f   :  { %14220 = vmatpush1.bf16.msra.mxu0 %v13855_v54  ;;  %14392 = vmatpush1.bf16.msra.mxu1 %v13857_v62  ;;  %v13940_v54 = vld [vmem:[#allocation3 + $0x8c8] sm:$0xff]  ;;  %v13942_v62 = vld [vmem:[#allocation3 + $0x8d8] sm:$0xff] }
 0x980   :  { %14221 = vmatprep.subr.bf16.mxu0 %v13863_v21  ;;  %14393 = vmatprep.subr.bf16.mxu1 %v13865_v41  ;;  %v13939_v21 = vld [vmem:[#allocation3 + $0x8c0] sm:$0xff]  ;;  %v13941_v41 = vld [vmem:[#allocation3 + $0x8d0] sm:$0xff] }
 0x983   :  { %14222 = vmatpush1.bf16.msra.mxu0 %v13862_v36  ;;  %14394 = vmatpush1.bf16.msra.mxu1 %v13864_v52  ;;  %v13947_v36 = vld [vmem:[#allocation3 + $0x900] sm:$0xff]  ;;  %v13949_v52 = vld [vmem:[#allocation3 + $0x910] sm:$0xff] }
 0x984   :  { %14223 = vmatprep.subr.bf16.mxu0 %v13870_v11  ;;  %14395 = vmatprep.subr.bf16.mxu1 %v13872_v57  ;;  %v13946_v11 = vld [vmem:[#allocation3 + $0x8f8] sm:$0xff]  ;;  %v13948_v57 = vld [vmem:[#allocation3 + $0x908] sm:$0xff] }
 0x987   :  { %14224 = vmatpush1.bf16.msra.mxu0 %v13869_v31  ;;  %14396 = vmatpush1.bf16.msra.mxu1 %v13871_v14  ;;  %v13954_v31 = vld [vmem:[#allocation3 + $0x938] sm:$0xff]  ;;  %v13956_v14 = vld [vmem:[#allocation3 + $0x948] sm:$0xff] }
 0x988   :  { %14225 = vmatprep.subr.bf16.mxu0 %v13877_v45  ;;  %14397 = vmatprep.subr.bf16.mxu1 %v13879_v46  ;;  %v13953_v45 = vld [vmem:[#allocation3 + $0x930] sm:$0xff]  ;;  %v13955_v46 = vld [vmem:[#allocation3 + $0x940] sm:$0xff] }
 0x98b   :  { %14226 = vmatpush1.bf16.msra.mxu0 %v13876_v15  ;;  %14398 = vmatpush1.bf16.msra.mxu1 %v13878_v34  ;;  %v13961_v15 = vld [vmem:[#allocation3 + $0x970] sm:$0xff]  ;;  %v13963_v34 = vld [vmem:[#allocation3 + $0x980] sm:$0xff] }
 0x98c   :  { %14238 = vmatprep.subr.bf16.mxu0 %v13884_v3  ;;  %14410 = vmatprep.subr.bf16.mxu1 %v13886_v6  ;;  %v13960_v3 = vld [vmem:[#allocation3 + $0x968] sm:$0xff]  ;;  %v13962_v6 = vld [vmem:[#allocation3 + $0x978] sm:$0xff] }
 0x98e   :  { %14228 = vmatmul.mubr.bf16.vlgmr.msra.gmra.mrb[12].mxu0 %v20192_v28  ;;  %14400 = vmatmul.mubr.bf16.vlgmr.msra.gmra.mrb[20].mxu1 %v20192_v28 }
 0x98f   :  { %14239 = vmatpush1.bf16.msra.mxu0 %v13883_v33  ;;  %14411 = vmatpush1.bf16.msra.mxu1 %v13885_v24  ;;  %v13968_v33 = vld [vmem:[#allocation3 + $0x9a8] sm:$0xff]  ;;  %v13970_v24 = vld [vmem:[#allocation3 + $0x9b8] sm:$0xff] }
 0x990   :  { %14240 = vmatprep.subr.bf16.mxu0 %v13891_v47  ;;  %14412 = vmatprep.subr.bf16.mxu1 %v13893_v17  ;;  %v13967_v47 = vld [vmem:[#allocation3 + $0x9a0] sm:$0xff]  ;;  %v13969_v17 = vld [vmem:[#allocation3 + $0x9b0] sm:$0xff] }
 0x991   :  { %14270 = vmatprep.mubr.bf16.mxu0 %v20196_v55  ;;  %14442 = vmatprep.mubr.bf16.mxu1 %v20196_v55 }
 0x993   :  { %14241 = vmatpush1.bf16.msra.mxu0 %v13890_v39  ;;  %14413 = vmatpush1.bf16.msra.mxu1 %v13892_v43  ;;  %v13975_v39 = vld [vmem:[#allocation3 + $0x9e0] sm:$0xff]  ;;  %v13977_v43 = vld [vmem:[#allocation3 + $0x9f0] sm:$0xff] }
 0x994   :  { %14242 = vmatprep.subr.bf16.mxu0 %v13898_v51  ;;  %14414 = vmatprep.subr.bf16.mxu1 %v13900_v26  ;;  %v13974_v51 = vld [vmem:[#allocation3 + $0x9d8] sm:$0xff]  ;;  %v13976_v26 = vld [vmem:[#allocation3 + $0x9e8] sm:$0xff] }
 0x997   :  { %14243 = vmatpush1.bf16.msra.mxu0 %v13897_v4  ;;  %14415 = vmatpush1.bf16.msra.mxu1 %v13899_v63  ;;  %v13982_v4 = vld [vmem:[#allocation3 + $0xa18] sm:$0xff]  ;;  %v13984_v63 = vld [vmem:[#allocation3 + $0xa28] sm:$0xff] }
 0x998   :  { %14244 = vmatprep.subr.bf16.mxu0 %v13905_v18  ;;  %14416 = vmatprep.subr.bf16.mxu1 %v13907_v29  ;;  %v13981_v18 = vld [vmem:[#allocation3 + $0xa10] sm:$0xff]  ;;  %v13983_v29 = vld [vmem:[#allocation3 + $0xa20] sm:$0xff] }
 0x99b   :  { %14245 = vmatpush1.bf16.msra.mxu0 %v13904_v19  ;;  %14417 = vmatpush1.bf16.msra.mxu1 %v13906_v27  ;;  %v13989_v19 = vld [vmem:[#allocation3 + $0xa50] sm:$0xff]  ;;  %v13991_v27 = vld [vmem:[#allocation3 + $0xa60] sm:$0xff] }
 0x99c   :  { %14246 = vmatprep.subr.bf16.mxu0 %v13912_v58  ;;  %14418 = vmatprep.subr.bf16.mxu1 %v13914_v30  ;;  %v13988_v58 = vld [vmem:[#allocation3 + $0xa48] sm:$0xff]  ;;  %v13990_v30 = vld [vmem:[#allocation3 + $0xa58] sm:$0xff] }
 0x99f   :  { %14247 = vmatpush1.bf16.msra.mxu0 %v13911_v59  ;;  %14419 = vmatpush1.bf16.msra.mxu1 %v13913_v56  ;;  %v13996_v59 = vld [vmem:[#allocation3 + $0xa88] sm:$0xff]  ;;  %v13998_v56 = vld [vmem:[#allocation3 + $0xa98] sm:$0xff] }
 0x9a0   :  { %14248 = vmatprep.subr.bf16.mxu0 %v13919_v25  ;;  %14420 = vmatprep.subr.bf16.mxu1 %v13921_v37  ;;  %v20204_v25 = vpack.c.bf16 %v20163_v53, %v20141_v35  ;;  %v13995_v37 = vld [vmem:[#allocation3 + $0xa80] sm:$0xff]  ;;  %v14002_v35 = vld [vmem:[#allocation3 + $0xab8] sm:$0xff]  ;;  %v14004_v53 = vld [vmem:[#allocation3 + $0xac8] sm:$0xff] }
 0x9a3   :  { %14249 = vmatpush1.bf16.msra.mxu0 %v13918_v60  ;;  %14421 = vmatpush1.bf16.msra.mxu1 %v13920_v1  ;;  %v13997_v60 = vld [vmem:[#allocation3 + $0xa90] sm:$0xff]  ;;  %v14003_v1 = vld [vmem:[#allocation3 + $0xac0] sm:$0xff] }
 0x9a4   :  { %14250 = vmatprep.subr.bf16.mxu0 %v13926_v2  ;;  %14422 = vmatprep.subr.bf16.mxu1 %v13928_v5  ;;  %v14005_v2 = vld [vmem:[#allocation3 + $0xad0] sm:$0xff]  ;;  %v20208_v5 = vpack.c.bf16 %v20172_v22, %v20150_v38  ;;  %v14011_v22 = vld [vmem:[#allocation3 + $0xb00] sm:$0xff] }
 0x9a5   :  { %v14009_v38 = vld [vmem:[#allocation3 + $0xaf0] sm:$0xff] }
 0x9a7   :  { %14251 = vmatpush1.bf16.msra.mxu0 %v13925_v8  ;;  %14423 = vmatpush1.bf16.msra.mxu1 %v13927_v9  ;;  %v14010_v8 = vld [vmem:[#allocation3 + $0xaf8] sm:$0xff]  ;;  %v14012_v9 = vld [vmem:[#allocation3 + $0xb08] sm:$0xff] }
 0x9a8   :  { %14252 = vmatprep.subr.bf16.mxu0 %v13933_v12  ;;  %14424 = vmatprep.subr.bf16.mxu1 %v13935_v7  ;;  %v14017_v12 = vld [vmem:[#allocation3 + $0xb30] sm:$0xff]  ;;  %v14019_v7 = vld [vmem:[#allocation3 + $0xb40] sm:$0xff] }
 0x9ab   :  { %14253 = vmatpush1.bf16.msra.mxu0 %v13932_v20  ;;  %14425 = vmatpush1.bf16.msra.mxu1 %v13934_v50  ;;  %v14016_v20 = vld [vmem:[#allocation3 + $0xb28] sm:$0xff]  ;;  %v14018_v50 = vld [vmem:[#allocation3 + $0xb38] sm:$0xff] }
 0x9ac   :  { %14254 = vmatprep.subr.bf16.mxu0 %v13940_v54  ;;  %14426 = vmatprep.subr.bf16.mxu1 %v13942_v62  ;;  %v14024_v54 = vld [vmem:[#allocation3 + $0xb68] sm:$0xff]  ;;  %v14026_v62 = vld [vmem:[#allocation3 + $0xb78] sm:$0xff] }
 0x9af   :  { %14255 = vmatpush1.bf16.msra.mxu0 %v13939_v21  ;;  %14427 = vmatpush1.bf16.msra.mxu1 %v13941_v41  ;;  %v14023_v21 = vld [vmem:[#allocation3 + $0xb60] sm:$0xff]  ;;  %v14025_v41 = vld [vmem:[#allocation3 + $0xb70] sm:$0xff] }
 0x9b0   :  { %14256 = vmatprep.subr.bf16.mxu0 %v13947_v36  ;;  %14428 = vmatprep.subr.bf16.mxu1 %v13949_v52  ;;  %v14031_v36 = vld [vmem:[#allocation3 + $0xba0] sm:$0xff]  ;;  %v14033_v52 = vld [vmem:[#allocation3 + $0xbb0] sm:$0xff] }
 0x9b3   :  { %14257 = vmatpush1.bf16.msra.mxu0 %v13946_v11  ;;  %14429 = vmatpush1.bf16.msra.mxu1 %v13948_v57  ;;  %v14030_v11 = vld [vmem:[#allocation3 + $0xb98] sm:$0xff]  ;;  %v14032_v57 = vld [vmem:[#allocation3 + $0xba8] sm:$0xff] }
 0x9b4   :  { %14258 = vmatprep.subr.bf16.mxu0 %v13954_v31  ;;  %14430 = vmatprep.subr.bf16.mxu1 %v13956_v14  ;;  %v14038_v31 = vld [vmem:[#allocation3 + $0xbd8] sm:$0xff]  ;;  %v14040_v14 = vld [vmem:[#allocation3 + $0xbe8] sm:$0xff] }
 0x9b7   :  { %14259 = vmatpush1.bf16.msra.mxu0 %v13953_v45  ;;  %14431 = vmatpush1.bf16.msra.mxu1 %v13955_v46  ;;  %v14037_v45 = vld [vmem:[#allocation3 + $0xbd0] sm:$0xff]  ;;  %v14039_v46 = vld [vmem:[#allocation3 + $0xbe0] sm:$0xff] }
 0x9b8   :  { %14260 = vmatprep.subr.bf16.mxu0 %v13961_v15  ;;  %14432 = vmatprep.subr.bf16.mxu1 %v13963_v34  ;;  %v14045_v15 = vld [vmem:[#allocation3 + $0xc10] sm:$0xff]  ;;  %v14047_v34 = vld [vmem:[#allocation3 + $0xc20] sm:$0xff] }
 0x9bb   :  { %14261 = vmatpush1.bf16.msra.mxu0 %v13960_v3  ;;  %14433 = vmatpush1.bf16.msra.mxu1 %v13962_v6  ;;  %v14044_v3 = vld [vmem:[#allocation3 + $0xc08] sm:$0xff]  ;;  %v14046_v6 = vld [vmem:[#allocation3 + $0xc18] sm:$0xff] }
 0x9bc   :  { %14262 = vmatprep.subr.bf16.mxu0 %v13968_v33  ;;  %14434 = vmatprep.subr.bf16.mxu1 %v13970_v24  ;;  %v14052_v33 = vld [vmem:[#allocation3 + $0xc48] sm:$0xff]  ;;  %v14054_v24 = vld [vmem:[#allocation3 + $0xc58] sm:$0xff] }
 0x9bf   :  { %14263 = vmatpush1.bf16.msra.mxu0 %v13967_v47  ;;  %14435 = vmatpush1.bf16.msra.mxu1 %v13969_v17  ;;  %v14051_v47 = vld [vmem:[#allocation3 + $0xc40] sm:$0xff]  ;;  %v14053_v17 = vld [vmem:[#allocation3 + $0xc50] sm:$0xff] }
 0x9c0   :  { %14264 = vmatprep.subr.bf16.mxu0 %v13975_v39  ;;  %14436 = vmatprep.subr.bf16.mxu1 %v13977_v43  ;;  %v14059_v39 = vld [vmem:[#allocation3 + $0xc80] sm:$0xff]  ;;  %v14061_v43 = vld [vmem:[#allocation3 + $0xc90] sm:$0xff] }
 0x9c3   :  { %14265 = vmatpush1.bf16.msra.mxu0 %v13974_v51  ;;  %14437 = vmatpush1.bf16.msra.mxu1 %v13976_v26  ;;  %v14058_v51 = vld [vmem:[#allocation3 + $0xc78] sm:$0xff]  ;;  %v14060_v26 = vld [vmem:[#allocation3 + $0xc88] sm:$0xff] }
 0x9c4   :  { %14266 = vmatprep.subr.bf16.mxu0 %v13982_v4  ;;  %14438 = vmatprep.subr.bf16.mxu1 %v13984_v63  ;;  %v14066_v4 = vld [vmem:[#allocation3 + $0xcb8] sm:$0xff]  ;;  %v14068_v63 = vld [vmem:[#allocation3 + $0xcc8] sm:$0xff] }
 0x9c7   :  { %14267 = vmatpush1.bf16.msra.mxu0 %v13981_v18  ;;  %14439 = vmatpush1.bf16.msra.mxu1 %v13983_v29  ;;  %v14065_v18 = vld [vmem:[#allocation3 + $0xcb0] sm:$0xff]  ;;  %v14067_v29 = vld [vmem:[#allocation3 + $0xcc0] sm:$0xff] }
 0x9c8   :  { %14268 = vmatprep.subr.bf16.mxu0 %v13989_v19  ;;  %14440 = vmatprep.subr.bf16.mxu1 %v13991_v27  ;;  %v14073_v19 = vld [vmem:[#allocation3 + $0xcf0] sm:$0xff]  ;;  %v14075_v27 = vld [vmem:[#allocation3 + $0xd00] sm:$0xff] }
 0x9cb   :  { %14269 = vmatpush1.bf16.msra.mxu0 %v13988_v58  ;;  %14441 = vmatpush1.bf16.msra.mxu1 %v13990_v30  ;;  %v14072_v58 = vld [vmem:[#allocation3 + $0xce8] sm:$0xff]  ;;  %v14074_v30 = vld [vmem:[#allocation3 + $0xcf8] sm:$0xff] }
 0x9cc   :  { %14281 = vmatprep.subr.bf16.mxu0 %v13996_v59  ;;  %14453 = vmatprep.subr.bf16.mxu1 %v13998_v56  ;;  %v14080_v59 = vld [vmem:[#allocation3 + $0xd28] sm:$0xff]  ;;  %v14082_v56 = vld [vmem:[#allocation3 + $0xd38] sm:$0xff] }
 0x9ce   :  { %14271 = vmatmul.mubr.bf16.vlgmr.msra.gmra.mrb[12].mxu0 %v20204_v25  ;;  %14443 = vmatmul.mubr.bf16.vlgmr.msra.gmra.mrb[20].mxu1 %v20204_v25 }
 0x9cf   :  { %14282 = vmatpush1.bf16.msra.mxu0 %v13995_v37  ;;  %14454 = vmatpush1.bf16.msra.mxu1 %v13997_v60  ;;  %v14079_v37 = vld [vmem:[#allocation3 + $0xd20] sm:$0xff]  ;;  %v14081_v60 = vld [vmem:[#allocation3 + $0xd30] sm:$0xff] }
 0x9d0   :  { %14283 = vmatprep.subr.bf16.mxu0 %v14003_v1  ;;  %14455 = vmatprep.subr.bf16.mxu1 %v14005_v2  ;;  %v14087_v1 = vld [vmem:[#allocation3 + $0xd60] sm:$0xff]  ;;  %v14089_v2 = vld [vmem:[#allocation3 + $0xd70] sm:$0xff] }
 0x9d1   :  { %14313 = vmatprep.mubr.bf16.mxu0 %v20208_v5  ;;  %14485 = vmatprep.mubr.bf16.mxu1 %v20208_v5 }
 0x9d3   :  { %14284 = vmatpush1.bf16.msra.mxu0 %v14002_v35  ;;  %14456 = vmatpush1.bf16.msra.mxu1 %v14004_v53  ;;  %v14086_v35 = vld [vmem:[#allocation3 + $0xd58] sm:$0xff]  ;;  %v14088_v53 = vld [vmem:[#allocation3 + $0xd68] sm:$0xff] }
 0x9d4   :  { %14285 = vmatprep.subr.bf16.mxu0 %v14010_v8  ;;  %14457 = vmatprep.subr.bf16.mxu1 %v14012_v9  ;;  %v14094_v8 = vld [vmem:[#allocation3 + $0xd98] sm:$0xff]  ;;  %v14096_v9 = vld [vmem:[#allocation3 + $0xda8] sm:$0xff] }
 0x9d7   :  { %14286 = vmatpush1.bf16.msra.mxu0 %v14009_v38  ;;  %14458 = vmatpush1.bf16.msra.mxu1 %v14011_v22  ;;  %v14093_v38 = vld [vmem:[#allocation3 + $0xd90] sm:$0xff]  ;;  %v14095_v22 = vld [vmem:[#allocation3 + $0xda0] sm:$0xff] }
 0x9d8   :  { %14287 = vmatprep.subr.bf16.mxu0 %v14017_v12  ;;  %14459 = vmatprep.subr.bf16.mxu1 %v14019_v7  ;;  %v14101_v12 = vld [vmem:[#allocation3 + $0xdd0] sm:$0xff]  ;;  %v14103_v7 = vld [vmem:[#allocation3 + $0xde0] sm:$0xff] }
 0x9db   :  { %14288 = vmatpush1.bf16.msra.mxu0 %v14016_v20  ;;  %14460 = vmatpush1.bf16.msra.mxu1 %v14018_v50  ;;  %v14100_v20 = vld [vmem:[#allocation3 + $0xdc8] sm:$0xff]  ;;  %v14102_v50 = vld [vmem:[#allocation3 + $0xdd8] sm:$0xff] }
 0x9dc   :  { %14289 = vmatprep.subr.bf16.mxu0 %v14024_v54  ;;  %14461 = vmatprep.subr.bf16.mxu1 %v14026_v62  ;;  %v13664_v54 = vld [vmem:[#allocation3 + $0x28] sm:$0xff]  ;;  %v13721_v62 = vld [vmem:[#allocation3 + $0x1f0] sm:$0xff] }
 0x9df   :  { %14290 = vmatpush1.bf16.msra.mxu0 %v14023_v21  ;;  %14462 = vmatpush1.bf16.msra.mxu1 %v14025_v41  ;;  %v20216_v21 = vpack.c.bf16 %v20169_v23, %v20147_v16  ;;  %v13663_v41 = vld [vmem:[#allocation3 + $0x20] sm:$0xff]  ;;  %v13678_v16 = vld [vmem:[#allocation3 + $0x98] sm:$0xff] }
 0x9e0   :  { %14291 = vmatprep.subr.bf16.mxu0 %v14031_v36  ;;  %14463 = vmatprep.subr.bf16.mxu1 %v14033_v52  ;;  %v13665_v36 = vld [vmem:[#allocation3 + $0x30] sm:$0xff]  ;;  %v13671_v52 = vld [vmem:[#allocation3 + $0x60] sm:$0xff] }
 0x9e1   :  { %v13735_v23 = vld [vmem:[#allocation3 + $0x260] sm:$0xff] }
 0x9e3   :  { %14292 = vmatpush1.bf16.msra.mxu0 %v14030_v11  ;;  %14464 = vmatpush1.bf16.msra.mxu1 %v14032_v57  ;;  %v13728_v11 = vld [vmem:[#allocation3 + $0x228] sm:$0xff]  ;;  %v13670_v57 = vld [vmem:[#allocation3 + $0x58] sm:$0xff] }
 0x9e4   :  { %14293 = vmatprep.subr.bf16.mxu0 %v14038_v31  ;;  %14465 = vmatprep.subr.bf16.mxu1 %v14040_v14  ;;  %v13672_v31 = vld [vmem:[#allocation3 + $0x68] sm:$0xff]  ;;  %v13677_v14 = vld [vmem:[#allocation3 + $0x90] sm:$0xff] }
 0x9e7   :  { %14294 = vmatpush1.bf16.msra.mxu0 %v14037_v45  ;;  %14466 = vmatpush1.bf16.msra.mxu1 %v14039_v46  ;;  %v13679_v45 = vld [vmem:[#allocation3 + $0xa0] sm:$0xff]  ;;  %v13685_v46 = vld [vmem:[#allocation3 + $0xd0] sm:$0xff] }
 0x9e8   :  { %14295 = vmatprep.subr.bf16.mxu0 %v14045_v15  ;;  %14467 = vmatprep.subr.bf16.mxu1 %v14047_v34  ;;  %v13742_v15 = vld [vmem:[#allocation3 + $0x298] sm:$0xff]  ;;  %v13684_v34 = vld [vmem:[#allocation3 + $0xc8] sm:$0xff] }
 0x9eb   :  { %14296 = vmatpush1.bf16.msra.mxu0 %v14044_v3  ;;  %14468 = vmatpush1.bf16.msra.mxu1 %v14046_v6  ;;  %v13686_v3 = vld [vmem:[#allocation3 + $0xd8] sm:$0xff]  ;;  %v13692_v6 = vld [vmem:[#allocation3 + $0x108] sm:$0xff] }
 0x9ec   :  { %14297 = vmatprep.subr.bf16.mxu0 %v14052_v33  ;;  %14469 = vmatprep.subr.bf16.mxu1 %v14054_v24  ;;  %v13749_v33 = vld [vmem:[#allocation3 + $0x2d0] sm:$0xff] }
 0x9ed   :  { %v13693_v24 = vld [vmem:[#allocation3 + $0x110] sm:$0xff] }
 0x9ef   :  { %14298 = vmatpush1.bf16.msra.mxu0 %v14051_v47  ;;  %14470 = vmatpush1.bf16.msra.mxu1 %v14053_v17  ;;  %v13699_v47 = vld [vmem:[#allocation3 + $0x140] sm:$0xff]  ;;  %v13756_v17 = vld [vmem:[#allocation3 + $0x308] sm:$0xff] }
 0x9f0   :  { %14299 = vmatprep.subr.bf16.mxu0 %v14059_v39  ;;  %14471 = vmatprep.subr.bf16.mxu1 %v14061_v43  ;;  %v13698_v39 = vld [vmem:[#allocation3 + $0x138] sm:$0xff]  ;;  %v13700_v43 = vld [vmem:[#allocation3 + $0x148] sm:$0xff] }
 0x9f3   :  { %14300 = vmatpush1.bf16.msra.mxu0 %v14058_v51  ;;  %14472 = vmatpush1.bf16.msra.mxu1 %v14060_v26  ;;  %v13706_v51 = vld [vmem:[#allocation3 + $0x178] sm:$0xff]  ;;  %v13763_v26 = vld [vmem:[#allocation3 + $0x340] sm:$0xff] }
 0x9f4   :  { %14301 = vmatprep.subr.bf16.mxu0 %v14066_v4  ;;  %14473 = vmatprep.subr.bf16.mxu1 %v14068_v63  ;;  %v13705_v4 = vld [vmem:[#allocation3 + $0x170] sm:$0xff]  ;;  %v13707_v63 = vld [vmem:[#allocation3 + $0x180] sm:$0xff] }
 0x9f7   :  { %14302 = vmatpush1.bf16.msra.mxu0 %v14065_v18  ;;  %14474 = vmatpush1.bf16.msra.mxu1 %v14067_v29  ;;  %v13713_v18 = vld [vmem:[#allocation3 + $0x1b0] sm:$0xff]  ;;  %v13770_v29 = vld [vmem:[#allocation3 + $0x378] sm:$0xff] }
 0x9f8   :  { %14303 = vmatprep.subr.bf16.mxu0 %v14073_v19  ;;  %14475 = vmatprep.subr.bf16.mxu1 %v14075_v27  ;;  %v13712_v19 = vld [vmem:[#allocation3 + $0x1a8] sm:$0xff]  ;;  %v13714_v27 = vld [vmem:[#allocation3 + $0x1b8] sm:$0xff] }
 0x9fb   :  { %14304 = vmatpush1.bf16.msra.mxu0 %v14072_v58  ;;  %14476 = vmatpush1.bf16.msra.mxu1 %v14074_v30  ;;  %v13720_v58 = vld [vmem:[#allocation3 + $0x1e8] sm:$0xff]  ;;  %v13833_v30 = vld [vmem:[#allocation3 + $0x570] sm:$0xff] }
 0x9fc   :  { %14305 = vmatprep.subr.bf16.mxu0 %v14080_v59  ;;  %14477 = vmatprep.subr.bf16.mxu1 %v14082_v56  ;;  %v13719_v59 = vld [vmem:[#allocation3 + $0x1e0] sm:$0xff]  ;;  %v13777_v56 = vld [vmem:[#allocation3 + $0x3b0] sm:$0xff] }
 0x9ff   :  { %14306 = vmatpush1.bf16.msra.mxu0 %v14079_v37  ;;  %14478 = vmatpush1.bf16.msra.mxu1 %v14081_v60  ;;  %v13727_v37 = vld [vmem:[#allocation3 + $0x220] sm:$0xff]  ;;  %v13840_v60 = vld [vmem:[#allocation3 + $0x5a8] sm:$0xff] }
 0xa00   :  { %14307 = vmatprep.subr.bf16.mxu0 %v14087_v1  ;;  %14479 = vmatprep.subr.bf16.mxu1 %v14089_v2  ;;  %v13726_v1 = vld [vmem:[#allocation3 + $0x218] sm:$0xff]  ;;  %v13784_v2 = vld [vmem:[#allocation3 + $0x3e8] sm:$0xff] }
 0xa03   :  { %14308 = vmatpush1.bf16.msra.mxu0 %v14086_v35  ;;  %14480 = vmatpush1.bf16.msra.mxu1 %v14088_v53  ;;  %v13734_v35 = vld [vmem:[#allocation3 + $0x258] sm:$0xff]  ;;  %v13847_v53 = vld [vmem:[#allocation3 + $0x5e0] sm:$0xff] }
 0xa04   :  { %14309 = vmatprep.subr.bf16.mxu0 %v14094_v8  ;;  %14481 = vmatprep.subr.bf16.mxu1 %v14096_v9  ;;  %v13733_v8 = vld [vmem:[#allocation3 + $0x250] sm:$0xff]  ;;  %v13791_v9 = vld [vmem:[#allocation3 + $0x420] sm:$0xff] }
 0xa07   :  { %14310 = vmatpush1.bf16.msra.mxu0 %v14093_v38  ;;  %14482 = vmatpush1.bf16.msra.mxu1 %v14095_v22  ;;  %v13741_v38 = vld [vmem:[#allocation3 + $0x290] sm:$0xff]  ;;  %v13854_v22 = vld [vmem:[#allocation3 + $0x618] sm:$0xff] }
 0xa08   :  { %14311 = vmatprep.subr.bf16.mxu0 %v14101_v12  ;;  %14483 = vmatprep.subr.bf16.mxu1 %v14103_v7  ;;  %v13740_v12 = vld [vmem:[#allocation3 + $0x288] sm:$0xff]  ;;  %v13798_v7 = vld [vmem:[#allocation3 + $0x458] sm:$0xff] }
 0xa0b   :  { %14312 = vmatpush1.bf16.msra.mxu0 %v14100_v20  ;;  %14484 = vmatpush1.bf16.msra.mxu1 %v14102_v50  ;;  %v13748_v20 = vld [vmem:[#allocation3 + $0x2c8] sm:$0xff]  ;;  %v13861_v50 = vld [vmem:[#allocation3 + $0x650] sm:$0xff] }
 0xa0c   :  { %14496 = vmatprep.subr.bf16.mxu0 %v13664_v54  ;;  %15133 = vmatprep.subr.bf16.mxu1 %v13721_v62  ;;  %v13747_v54 = vld [vmem:[#allocation3 + $0x2c0] sm:$0xff]  ;;  %v13805_v62 = vld [vmem:[#allocation3 + $0x490] sm:$0xff] }
 0xa0e   :  { %14314 = vmatmul.mubr.bf16.vlgmr.msra.gmra.mrb[12].mxu0 %v20216_v21  ;;  %14486 = vmatmul.mubr.bf16.vlgmr.msra.gmra.mrb[20].mxu1 %v20216_v21 }
 0xa0f   :  { %14497 = vmatpush1.bf16.msra.mxu0 %v13663_v41  ;;  %15134 = vmatpush3.bf16.msra.mxu1 %v13665_v36  ;;  %v13755_v41 = vld [vmem:[#allocation3 + $0x300] sm:$0xff]  ;;  %v13868_v36 = vld [vmem:[#allocation3 + $0x688] sm:$0xff] }
 0xa10   :  { %14498 = vmatprep.subr.bf16.mxu0 %v13671_v52  ;;  %15135 = vmatprep.subr.bf16.mxu1 %v13728_v11  ;;  %v13754_v52 = vld [vmem:[#allocation3 + $0x2f8] sm:$0xff]  ;;  %v13812_v11 = vld [vmem:[#allocation3 + $0x4c8] sm:$0xff] }
 0xa11   :  { %14528 = vmatprep.mubr.bf16.mxu0 %v20174_v32  ;;  %14700 = vmatprep.mubr.bf16.mxu1 %v20174_v32  ;;  %v13691_v32 = vld [vmem:[#allocation3 + $0x100] sm:$0xff] }
 0xa13   :  { %14499 = vmatpush1.bf16.msra.mxu0 %v13670_v57  ;;  %15136 = vmatpush3.bf16.msra.mxu1 %v13672_v31  ;;  %v13762_v57 = vld [vmem:[#allocation3 + $0x338] sm:$0xff]  ;;  %v13875_v31 = vld [vmem:[#allocation3 + $0x6c0] sm:$0xff] }
 0xa14   :  { %14500 = vmatprep.subr.bf16.mxu0 %v13678_v16  ;;  %15137 = vmatprep.subr.bf16.mxu1 %v13735_v23  ;;  %v13761_v16 = vld [vmem:[#allocation3 + $0x330] sm:$0xff]  ;;  %v13819_v23 = vld [vmem:[#allocation3 + $0x500] sm:$0xff] }
 0xa17   :  { %14501 = vmatpush1.bf16.msra.mxu0 %v13677_v14  ;;  %15138 = vmatpush3.bf16.msra.mxu1 %v13679_v45  ;;  %v13769_v14 = vld [vmem:[#allocation3 + $0x370] sm:$0xff]  ;;  %v13882_v45 = vld [vmem:[#allocation3 + $0x6f8] sm:$0xff] }
 0xa18   :  { %14502 = vmatprep.subr.bf16.mxu0 %v13685_v46  ;;  %15139 = vmatprep.subr.bf16.mxu1 %v13742_v15  ;;  %v13768_v46 = vld [vmem:[#allocation3 + $0x368] sm:$0xff]  ;;  %v13826_v15 = vld [vmem:[#allocation3 + $0x538] sm:$0xff] }
 0xa1b   :  { %14503 = vmatpush1.bf16.msra.mxu0 %v13684_v34  ;;  %15140 = vmatpush3.bf16.msra.mxu1 %v13686_v3  ;;  %v13776_v34 = vld [vmem:[#allocation3 + $0x3a8] sm:$0xff]  ;;  %v13945_v3 = vld [vmem:[#allocation3 + $0x8f0] sm:$0xff] }
 0xa1c   :  { %14504 = vmatprep.subr.bf16.mxu0 %v13692_v6  ;;  %15141 = vmatprep.subr.bf16.mxu1 %v13749_v33  ;;  %v13775_v6 = vld [vmem:[#allocation3 + $0x3a0] sm:$0xff]  ;;  %v13889_v33 = vld [vmem:[#allocation3 + $0x730] sm:$0xff] }
 0xa1f   :  { %14505 = vmatpush1.bf16.msra.mxu0 %v13691_v32  ;;  %15142 = vmatpush3.bf16.msra.mxu1 %v13693_v24  ;;  %v13783_v32 = vld [vmem:[#allocation3 + $0x3e0] sm:$0xff]  ;;  %v13952_v24 = vld [vmem:[#allocation3 + $0x928] sm:$0xff] }
 0xa20   :  { %14506 = vmatprep.subr.bf16.mxu0 %v13699_v47  ;;  %15143 = vmatprep.subr.bf16.mxu1 %v13756_v17  ;;  %v13782_v47 = vld [vmem:[#allocation3 + $0x3d8] sm:$0xff]  ;;  %v13896_v17 = vld [vmem:[#allocation3 + $0x768] sm:$0xff] }
 0xa23   :  { %14507 = vmatpush1.bf16.msra.mxu0 %v13698_v39  ;;  %15144 = vmatpush3.bf16.msra.mxu1 %v13700_v43  ;;  %v13790_v39 = vld [vmem:[#allocation3 + $0x418] sm:$0xff]  ;;  %v13959_v43 = vld [vmem:[#allocation3 + $0x960] sm:$0xff] }
 0xa24   :  { %14508 = vmatprep.subr.bf16.mxu0 %v13706_v51  ;;  %15145 = vmatprep.subr.bf16.mxu1 %v13763_v26  ;;  %v13789_v51 = vld [vmem:[#allocation3 + $0x410] sm:$0xff] }
 0xa25   :  { %v13797_v26 = vld [vmem:[#allocation3 + $0x450] sm:$0xff] }
 0xa27   :  { %14509 = vmatpush1.bf16.msra.mxu0 %v13705_v4  ;;  %15146 = vmatpush3.bf16.msra.mxu1 %v13707_v63  ;;  %v13966_v4 = vld [vmem:[#allocation3 + $0x998] sm:$0xff]  ;;  %v13796_v63 = vld [vmem:[#allocation3 + $0x448] sm:$0xff] }
 0xa28   :  { %14510 = vmatprep.subr.bf16.mxu0 %v13713_v18  ;;  %15147 = vmatprep.subr.bf16.mxu1 %v13770_v29  ;;  %v13910_v18 = vld [vmem:[#allocation3 + $0x7d8] sm:$0xff]  ;;  %v13804_v29 = vld [vmem:[#allocation3 + $0x488] sm:$0xff] }
 0xa2b   :  { %14511 = vmatpush1.bf16.msra.mxu0 %v13712_v19  ;;  %15148 = vmatpush3.bf16.msra.mxu1 %v13714_v27  ;;  %v13973_v19 = vld [vmem:[#allocation3 + $0x9d0] sm:$0xff] }
 0xa2c   :  { %14512 = vmatprep.subr.bf16.mxu0 %v13720_v58  ;;  %15155 = vmatprep.subr.bf16.mxu1 %v13833_v30  ;;  %v13917_v27 = vld [vmem:[#allocation3 + $0x810] sm:$0xff]  ;;  %v13811_v58 = vld [vmem:[#allocation3 + $0x4c0] sm:$0xff]  ;;  %v13980_v30 = vld [vmem:[#allocation3 + $0xa08] sm:$0xff] }
 0xa2e   :  { %14701 = vmatmul.mubr.bf16.vlgmr.msra.gmra.mrb[24].mxu1 %v20180_v49 }
 0xa2f   :  { %14513 = vmatpush1.bf16.msra.mxu0 %v13719_v59  ;;  %15156 = vmatpush3.bf16.msra.mxu1 %v13777_v56  ;;  %v13810_v59 = vld [vmem:[#allocation3 + $0x4b8] sm:$0xff]  ;;  %v13924_v56 = vld [vmem:[#allocation3 + $0x848] sm:$0xff] }
 0xa30   :  { %14514 = vmatprep.subr.bf16.mxu0 %v13727_v37  ;;  %15157 = vmatprep.subr.bf16.mxu1 %v13840_v60  ;;  %v13818_v37 = vld [vmem:[#allocation3 + $0x4f8] sm:$0xff]  ;;  %v13987_v60 = vld [vmem:[#allocation3 + $0xa40] sm:$0xff] }
 0xa31   :  { %14741 = vmatprep.mubr.bf16.mxu1 %v20184_v44 }
 0xa33   :  { %14515 = vmatpush1.bf16.msra.mxu0 %v13726_v1  ;;  %15158 = vmatpush3.bf16.msra.mxu1 %v13784_v2  ;;  %v13817_v1 = vld [vmem:[#allocation3 + $0x4f0] sm:$0xff]  ;;  %v13931_v2 = vld [vmem:[#allocation3 + $0x880] sm:$0xff] }
 0xa34   :  { %14516 = vmatprep.subr.bf16.mxu0 %v13734_v35  ;;  %15159 = vmatprep.subr.bf16.mxu1 %v13847_v53  ;;  %v13825_v35 = vld [vmem:[#allocation3 + $0x530] sm:$0xff]  ;;  %v13994_v53 = vld [vmem:[#allocation3 + $0xa78] sm:$0xff] }
 0xa37   :  { %14517 = vmatpush1.bf16.msra.mxu0 %v13733_v8  ;;  %15160 = vmatpush3.bf16.msra.mxu1 %v13791_v9  ;;  %v13824_v8 = vld [vmem:[#allocation3 + $0x528] sm:$0xff]  ;;  %v13938_v9 = vld [vmem:[#allocation3 + $0x8b8] sm:$0xff] }
 0xa38   :  { %14518 = vmatprep.subr.bf16.mxu0 %v13741_v38  ;;  %15161 = vmatprep.subr.bf16.mxu1 %v13854_v22  ;;  %v13832_v38 = vld [vmem:[#allocation3 + $0x568] sm:$0xff]  ;;  %v14057_v22 = vld [vmem:[#allocation3 + $0xc70] sm:$0xff] }
 0xa3b   :  { %14519 = vmatpush1.bf16.msra.mxu0 %v13740_v12  ;;  %15162 = vmatpush3.bf16.msra.mxu1 %v13798_v7  ;;  %v13831_v12 = vld [vmem:[#allocation3 + $0x560] sm:$0xff]  ;;  %v14001_v7 = vld [vmem:[#allocation3 + $0xab0] sm:$0xff] }
 0xa3c   :  { %14520 = vmatprep.subr.bf16.mxu0 %v13748_v20  ;;  %15163 = vmatprep.subr.bf16.mxu1 %v13861_v50  ;;  %v13839_v20 = vld [vmem:[#allocation3 + $0x5a0] sm:$0xff]  ;;  %v14064_v50 = vld [vmem:[#allocation3 + $0xca8] sm:$0xff] }
 0xa3f   :  { %14521 = vmatpush1.bf16.msra.mxu0 %v13747_v54  ;;  %15164 = vmatpush3.bf16.msra.mxu1 %v13805_v62  ;;  %v13838_v54 = vld [vmem:[#allocation3 + $0x598] sm:$0xff]  ;;  %v14008_v62 = vld [vmem:[#allocation3 + $0xae8] sm:$0xff] }
 0xa40   :  { %14522 = vmatprep.subr.bf16.mxu0 %v13755_v41  ;;  %15165 = vmatprep.subr.bf16.mxu1 %v13868_v36  ;;  %v13846_v41 = vld [vmem:[#allocation3 + $0x5d8] sm:$0xff]  ;;  %v14071_v36 = vld [vmem:[#allocation3 + $0xce0] sm:$0xff] }
 0xa43   :  { %14523 = vmatpush1.bf16.msra.mxu0 %v13754_v52  ;;  %15166 = vmatpush3.bf16.msra.mxu1 %v13812_v11  ;;  %v13845_v52 = vld [vmem:[#allocation3 + $0x5d0] sm:$0xff]  ;;  %v14015_v11 = vld [vmem:[#allocation3 + $0xb20] sm:$0xff] }
 0xa44   :  { %14524 = vmatprep.subr.bf16.mxu0 %v13762_v57  ;;  %15167 = vmatprep.subr.bf16.mxu1 %v13875_v31  ;;  %v13853_v57 = vld [vmem:[#allocation3 + $0x610] sm:$0xff]  ;;  %v14078_v31 = vld [vmem:[#allocation3 + $0xd18] sm:$0xff] }
 0xa47   :  { %14525 = vmatpush1.bf16.msra.mxu0 %v13761_v16  ;;  %15168 = vmatpush3.bf16.msra.mxu1 %v13819_v23  ;;  %v13852_v16 = vld [vmem:[#allocation3 + $0x608] sm:$0xff]  ;;  %v14022_v23 = vld [vmem:[#allocation3 + $0xb58] sm:$0xff] }
 0xa48   :  { %14526 = vmatprep.subr.bf16.mxu0 %v13769_v14  ;;  %15169 = vmatprep.subr.bf16.mxu1 %v13882_v45  ;;  %v13860_v14 = vld [vmem:[#allocation3 + $0x648] sm:$0xff]  ;;  %v14085_v45 = vld [vmem:[#allocation3 + $0xd50] sm:$0xff] }
 0xa4b   :  { %14527 = vmatpush1.bf16.msra.mxu0 %v13768_v46  ;;  %15170 = vmatpush3.bf16.msra.mxu1 %v13826_v15  ;;  %v13859_v46 = vld [vmem:[#allocation3 + $0x640] sm:$0xff]  ;;  %v14029_v15 = vld [vmem:[#allocation3 + $0xb90] sm:$0xff] }
 0xa4c   :  { %14539 = vmatprep.subr.bf16.mxu0 %v13776_v34  ;;  %15177 = vmatprep.subr.bf16.mxu1 %v13945_v3  ;;  %v13867_v34 = vld [vmem:[#allocation3 + $0x680] sm:$0xff]  ;;  %v14092_v3 = vld [vmem:[#allocation3 + $0xd88] sm:$0xff] }
 0xa4e   :  { %14529 = vmatmul.mubr.bf16.vlgmr.msra.gmra.mrb[16].mxu0 %v20180_v49  ;;  %14742 = vmatmul.mubr.bf16.vlgmr.msra.gmra.mrb[28].mxu1 %v20192_v28  ;;  %v13903_v49 = vld [vmem:[#allocation3 + $0x7a0] sm:$0xff] }
 0xa4f   :  { %14540 = vmatpush1.bf16.msra.mxu0 %v13775_v6  ;;  %15178 = vmatpush3.bf16.msra.mxu1 %v13889_v33  ;;  %v13866_v6 = vld [vmem:[#allocation3 + $0x678] sm:$0xff]  ;;  %v14036_v33 = vld [vmem:[#allocation3 + $0xbc8] sm:$0xff] }
 0xa50   :  { %14541 = vmatprep.subr.bf16.mxu0 %v13783_v32  ;;  %15179 = vmatprep.subr.bf16.mxu1 %v13952_v24  ;;  %v13874_v32 = vld [vmem:[#allocation3 + $0x6b8] sm:$0xff]  ;;  %v14099_v24 = vld [vmem:[#allocation3 + $0xdc0] sm:$0xff] }
 0xa51   :  { %14571 = vmatprep.mubr.bf16.mxu0 %v20184_v44  ;;  %14782 = vmatprep.mubr.bf16.mxu1 %v20196_v55  ;;  %v13803_v44 = vld [vmem:[#allocation3 + $0x480] sm:$0xff] }
 0xa53   :  { %14542 = vmatpush1.bf16.msra.mxu0 %v13782_v47  ;;  %15180 = vmatpush3.bf16.msra.mxu1 %v13896_v17  ;;  %v13873_v47 = vld [vmem:[#allocation3 + $0x6b0] sm:$0xff]  ;;  %v14043_v17 = vld [vmem:[#allocation3 + $0xc00] sm:$0xff] }
 0xa54   :  { %14543 = vmatprep.subr.bf16.mxu0 %v13790_v39  ;;  %15181 = vmatprep.subr.bf16.mxu1 %v13959_v43  ;;  %v13881_v39 = vld [vmem:[#allocation3 + $0x6f0] sm:$0xff]  ;;  %v14106_v43 = vld [vmem:[#allocation3 + $0xdf8] sm:$0xff] }
 0xa57   :  { %14544 = vmatpush1.bf16.msra.mxu0 %v13789_v51  ;;  %15182 = vmatpush3.bf16.msra.mxu1 %v13903_v49  ;;  %v13880_v51 = vld [vmem:[#allocation3 + $0x6e8] sm:$0xff]  ;;  %v14050_v49 = vld [vmem:[#allocation3 + $0xc38] sm:$0xff] }
 0xa58   :  { %14545 = vmatprep.subr.bf16.mxu0 %v13797_v26  ;;  %15183 = vmatprep.subr.bf16.mxu1 %v13966_v4  ;;  %v13888_v26 = vld [vmem:[#allocation3 + $0x728] sm:$0xff]  ;;  %v13887_v4 = vld [vmem:[#allocation3 + $0x720] sm:$0xff] }
 0xa5b   :  { %14546 = vmatpush1.bf16.msra.mxu0 %v13796_v63  ;;  %15184 = vmatpush3.bf16.msra.mxu1 %v13910_v18  ;;  %v13895_v63 = vld [vmem:[#allocation3 + $0x760] sm:$0xff]  ;;  %v13894_v18 = vld [vmem:[#allocation3 + $0x758] sm:$0xff] }
 0xa5c   :  { %14547 = vmatprep.subr.bf16.mxu0 %v13804_v29  ;;  %15185 = vmatprep.subr.bf16.mxu1 %v13973_v19  ;;  %v13902_v29 = vld [vmem:[#allocation3 + $0x798] sm:$0xff]  ;;  %v13901_v19 = vld [vmem:[#allocation3 + $0x790] sm:$0xff] }
 0xa5f   :  { %14548 = vmatpush1.bf16.msra.mxu0 %v13803_v44  ;;  %15186 = vmatpush3.bf16.msra.mxu1 %v13917_v27  ;;  %v13909_v44 = vld [vmem:[#allocation3 + $0x7d0] sm:$0xff]  ;;  %v13908_v27 = vld [vmem:[#allocation3 + $0x7c8] sm:$0xff] }
 0xa60   :  { %14549 = vmatprep.subr.bf16.mxu0 %v13811_v58  ;;  %15187 = vmatprep.subr.bf16.mxu1 %v13980_v30  ;;  %v13916_v58 = vld [vmem:[#allocation3 + $0x808] sm:$0xff]  ;;  %v13915_v30 = vld [vmem:[#allocation3 + $0x800] sm:$0xff] }
 0xa63   :  { %14550 = vmatpush1.bf16.msra.mxu0 %v13810_v59  ;;  %15188 = vmatpush3.bf16.msra.mxu1 %v13924_v56  ;;  %v13922_v59 = vld [vmem:[#allocation3 + $0x838] sm:$0xff] }
 0xa64   :  { %14551 = vmatprep.subr.bf16.mxu0 %v13818_v37  ;;  %15189 = vmatprep.subr.bf16.mxu1 %v13987_v60  ;;  %v13930_v56 = vld [vmem:[#allocation3 + $0x878] sm:$0xff]  ;;  %v13937_v37 = vld [vmem:[#allocation3 + $0x8b0] sm:$0xff]  ;;  %v13936_v60 = vld [vmem:[#allocation3 + $0x8a8] sm:$0xff] }
 0xa67   :  { %14552 = vmatpush1.bf16.msra.mxu0 %v13817_v1  ;;  %15190 = vmatpush3.bf16.msra.mxu1 %v13931_v2  ;;  %v13944_v1 = vld [vmem:[#allocation3 + $0x8e8] sm:$0xff]  ;;  %v13943_v2 = vld [vmem:[#allocation3 + $0x8e0] sm:$0xff] }
 0xa68   :  { %14553 = vmatprep.subr.bf16.mxu0 %v13825_v35  ;;  %15191 = vmatprep.subr.bf16.mxu1 %v13994_v53  ;;  %v13951_v35 = vld [vmem:[#allocation3 + $0x920] sm:$0xff]  ;;  %v13950_v53 = vld [vmem:[#allocation3 + $0x918] sm:$0xff] }
 0xa6b   :  { %14554 = vmatpush1.bf16.msra.mxu0 %v13824_v8  ;;  %15192 = vmatpush3.bf16.msra.mxu1 %v13938_v9  ;;  %v13958_v8 = vld [vmem:[#allocation3 + $0x958] sm:$0xff]  ;;  %v13957_v9 = vld [vmem:[#allocation3 + $0x950] sm:$0xff] }
 0xa6c   :  { %14555 = vmatprep.subr.bf16.mxu0 %v13832_v38  ;;  %15199 = vmatprep.subr.bf16.mxu1 %v14057_v22  ;;  %v13965_v38 = vld [vmem:[#allocation3 + $0x990] sm:$0xff]  ;;  %v13964_v22 = vld [vmem:[#allocation3 + $0x988] sm:$0xff] }
 0xa6e   :  { %14783 = vmatmul.mubr.bf16.vlgmr.msra.gmra.mrb[32].mxu1 %v20204_v25 }
 0xa6f   :  { %14556 = vmatpush1.bf16.msra.mxu0 %v13831_v12  ;;  %15200 = vmatpush3.bf16.msra.mxu1 %v14001_v7  ;;  %v13972_v12 = vld [vmem:[#allocation3 + $0x9c8] sm:$0xff]  ;;  %v13971_v7 = vld [vmem:[#allocation3 + $0x9c0] sm:$0xff] }
 0xa70   :  { %14557 = vmatprep.subr.bf16.mxu0 %v13839_v20  ;;  %15201 = vmatprep.subr.bf16.mxu1 %v14064_v50  ;;  %v13979_v20 = vld [vmem:[#allocation3 + $0xa00] sm:$0xff]  ;;  %v13978_v50 = vld [vmem:[#allocation3 + $0x9f8] sm:$0xff] }
 0xa71   :  { %14823 = vmatprep.mubr.bf16.mxu1 %v20208_v5 }
 0xa73   :  { %14558 = vmatpush1.bf16.msra.mxu0 %v13838_v54  ;;  %15202 = vmatpush3.bf16.msra.mxu1 %v14008_v62  ;;  %v13986_v54 = vld [vmem:[#allocation3 + $0xa38] sm:$0xff]  ;;  %v13985_v62 = vld [vmem:[#allocation3 + $0xa30] sm:$0xff] }
 0xa74   :  { %14559 = vmatprep.subr.bf16.mxu0 %v13846_v41  ;;  %15203 = vmatprep.subr.bf16.mxu1 %v14071_v36  ;;  %v13993_v41 = vld [vmem:[#allocation3 + $0xa70] sm:$0xff]  ;;  %v13992_v36 = vld [vmem:[#allocation3 + $0xa68] sm:$0xff] }
 0xa77   :  { %14560 = vmatpush1.bf16.msra.mxu0 %v13845_v52  ;;  %15204 = vmatpush3.bf16.msra.mxu1 %v14015_v11  ;;  %v14000_v52 = vld [vmem:[#allocation3 + $0xaa8] sm:$0xff]  ;;  %v13999_v11 = vld [vmem:[#allocation3 + $0xaa0] sm:$0xff] }
 0xa78   :  { %14561 = vmatprep.subr.bf16.mxu0 %v13853_v57  ;;  %15205 = vmatprep.subr.bf16.mxu1 %v14078_v31  ;;  %v14007_v57 = vld [vmem:[#allocation3 + $0xae0] sm:$0xff]  ;;  %v14006_v31 = vld [vmem:[#allocation3 + $0xad8] sm:$0xff] }
 0xa7b   :  { %14562 = vmatpush1.bf16.msra.mxu0 %v13852_v16  ;;  %15206 = vmatpush3.bf16.msra.mxu1 %v14022_v23  ;;  %v14014_v16 = vld [vmem:[#allocation3 + $0xb18] sm:$0xff]  ;;  %v14013_v23 = vld [vmem:[#allocation3 + $0xb10] sm:$0xff] }
 0xa7c   :  { %14563 = vmatprep.subr.bf16.mxu0 %v13860_v14  ;;  %15207 = vmatprep.subr.bf16.mxu1 %v14085_v45  ;;  %v14021_v14 = vld [vmem:[#allocation3 + $0xb50] sm:$0xff]  ;;  %v14020_v45 = vld [vmem:[#allocation3 + $0xb48] sm:$0xff] }
 0xa7f   :  { %14564 = vmatpush1.bf16.msra.mxu0 %v13859_v46  ;;  %15208 = vmatpush3.bf16.msra.mxu1 %v14029_v15  ;;  %v14028_v46 = vld [vmem:[#allocation3 + $0xb88] sm:$0xff] }
 0xa80   :  { %14565 = vmatprep.subr.bf16.mxu0 %v13867_v34  ;;  %15209 = vmatprep.subr.bf16.mxu1 %v14092_v3  ;;  %v20238_v15 = vld [vmem:[%s20268_s1 + $0x2b] sm:$0x7f]  ;;  %s15526_s1 = smov [#allocation5]  }
 0xa81   :  { %v14120_v34 = vrot.slane %v20238_v15, %v19676_v40  ;;  %v14128_v3 = vrot.slane %v20238_v15, %v19836_v10  ;;  %s14904_s24 = sshll.u32 %s15526_s1, 4  ;;  %s14905_s24 = int_to_ptr.vmem [resolvable:$true] %s14904_s24 }
 0xa82   :  { %s15494_s25 = scalar_lea.vmem %s14905_s24, 896  ;;  %p15499_p1 = scmp.lt.s32.totalorder %s14905_s24, %s14905_s24 }
 0xa83   :  { %14566 = vmatpush1.bf16.msra.mxu0 %v13866_v6  ;;  %15210 = vmatpush3.bf16.msra.mxu1 %v14036_v33  ;;  %v14124_v6 = vrot.slane %v20238_v15, %v19682_v42  ;;  %v14132_v33 = vrot.slane %v20238_v15, %v19843_v13  ;;  %v14041_v13 = vld [vmem:[#allocation3 + $0xbf0] sm:$0xff]  ;;  %p15495_p0 = scmp.ne.s32.totalorder %s14905_s24, %s15494_s25  ;;  %p15500_p2 = scmp.lt.s32.totalorder %s15494_s25, %s15494_s25 }
 0xa84   :  { %14567 = vmatprep.subr.bf16.mxu0 %v13874_v32  ;;  %15211 = vmatprep.subr.bf16.mxu1 %v14099_v24  ;;  %v14034_v32 = vld [vmem:[#allocation3 + $0xbb8] sm:$0xff] }
 0xa85   :  { %p15501_p3 = por %p15500_p2, %p15499_p1 }
 0xa87   :  { %14568 = vmatpush1.bf16.msra.mxu0 %v13873_v47  ;;  %15212 = vmatpush3.bf16.msra.mxu1 %v14043_v17  ;;  %v14042_v17 = vld [vmem:[#allocation3 + $0xbf8] sm:$0xff]  ;;  %p15502_p4 = pnand %p15501_p3, %p15495_p0 }
 0xa88   :  { %14569 = vmatprep.subr.bf16.mxu0 %v13881_v39  ;;  %15213 = vmatprep.subr.bf16.mxu1 %v14106_v43 }
 0xa8b   :  { %14570 = vmatpush1.bf16.msra.mxu0 %v13880_v51  ;;  %15214 = vmatpush3.bf16.msra.mxu1 %v14050_v49 }
 0xa8c   :  { %14582 = vmatprep.subr.bf16.mxu0 %v13888_v26 }
 0xa8e   :  { %14572 = vmatmul.mubr.bf16.vlgmr.msra.gmra.mrb[16].mxu0 %v20192_v28  ;;  %14824 = vmatmul.mubr.bf16.vlgmr.msra.gmra.mrb[36].mxu1 %v20216_v21  ;;  %v13923_v28 = vld [vmem:[#allocation3 + $0x840] sm:$0xff] }
 0xa8f   :  { %14583 = vmatpush1.bf16.msra.mxu0 %v13887_v4  ;;  %14614 = vmatprep.mubr.bf16.mxu0 %v20196_v55  ;;  %v13929_v55 = vld [vmem:[#allocation3 + $0x870] sm:$0xff] }
 0xa90   :  { %14584 = vmatprep.subr.bf16.mxu0 %v13895_v63 }
 0xa93   :  { %14585 = vmatpush1.bf16.msra.mxu0 %v13894_v18 }
 0xa94   :  { %14586 = vmatprep.subr.bf16.mxu0 %v13902_v29 }
 0xa97   :  { %14587 = vmatpush1.bf16.msra.mxu0 %v13901_v19  ;;  %v14049_v19 = vld [vmem:[#allocation3 + $0xc30] sm:$0xff] }
 0xa98   :  { %14588 = vmatprep.subr.bf16.mxu0 %v13909_v44 }
 0xa9b   :  { %14589 = vmatpush1.bf16.msra.mxu0 %v13908_v27 }
 0xa9c   :  { %14590 = vmatprep.subr.bf16.mxu0 %v13916_v58  ;;  %v14048_v58 = vld [vmem:[#allocation3 + $0xc28] sm:$0xff] }
 0xa9f   :  { %14591 = vmatpush1.bf16.msra.mxu0 %v13915_v30  ;;  %v14056_v30 = vld [vmem:[#allocation3 + $0xc68] sm:$0xff] }
 0xaa0   :  { %14592 = vmatprep.subr.bf16.mxu0 %v13923_v28  ;;  %v14055_v28 = vld [vmem:[#allocation3 + $0xc60] sm:$0xff] }
 0xaa3   :  { %14593 = vmatpush1.bf16.msra.mxu0 %v13922_v59  ;;  %v14063_v59 = vld [vmem:[#allocation3 + $0xca0] sm:$0xff] }
 0xaa4   :  { %14594 = vmatprep.subr.bf16.mxu0 %v13930_v56 }
 0xaa7   :  { %14595 = vmatpush1.bf16.msra.mxu0 %v13929_v55 }
 0xaa8   :  { %14596 = vmatprep.subr.bf16.mxu0 %v13937_v37 }
 0xaab   :  { %14597 = vmatpush1.bf16.msra.mxu0 %v13936_v60  ;;  %v14062_v60 = vld [vmem:[#allocation3 + $0xc98] sm:$0xff] }
 0xaac   :  { %14598 = vmatprep.subr.bf16.mxu0 %v13944_v1 }
 0xaaf   :  { %14599 = vmatpush1.bf16.msra.mxu0 %v13943_v2 }
 0xab0   :  { %14600 = vmatprep.subr.bf16.mxu0 %v13951_v35  ;;  %v14070_v35 = vld [vmem:[#allocation3 + $0xcd8] sm:$0xff] }
 0xab3   :  { %14601 = vmatpush1.bf16.msra.mxu0 %v13950_v53 }
 0xab4   :  { %14602 = vmatprep.subr.bf16.mxu0 %v13958_v8 }
 0xab7   :  { %14603 = vmatpush1.bf16.msra.mxu0 %v13957_v9 }
 0xab8   :  { %14604 = vmatprep.subr.bf16.mxu0 %v13965_v38 }
 0xabb   :  { %14605 = vmatpush1.bf16.msra.mxu0 %v13964_v22  ;;  %v14069_v22 = vld [vmem:[#allocation3 + $0xcd0] sm:$0xff] }
 0xabc   :  { %14606 = vmatprep.subr.bf16.mxu0 %v13972_v12 }
 0xabf   :  { %14607 = vmatpush1.bf16.msra.mxu0 %v13971_v7 }
 0xac0   :  { %14608 = vmatprep.subr.bf16.mxu0 %v13979_v20  ;;  %v14077_v20 = vld [vmem:[#allocation3 + $0xd10] sm:$0xff] }
 0xac3   :  { %14609 = vmatpush1.bf16.msra.mxu0 %v13978_v50 }
 0xac4   :  { %14610 = vmatprep.subr.bf16.mxu0 %v13986_v54  ;;  %v14076_v54 = vld [vmem:[#allocation3 + $0xd08] sm:$0xff] }
 0xac7   :  { %14611 = vmatpush1.bf16.msra.mxu0 %v13985_v62  ;;  %v14084_v62 = vld [vmem:[#allocation3 + $0xd48] sm:$0xff] }
 0xac8   :  { %14612 = vmatprep.subr.bf16.mxu0 %v13993_v41  ;;  %v14083_v41 = vld [vmem:[#allocation3 + $0xd40] sm:$0xff] }
 0xacb   :  { %14613 = vmatpush1.bf16.msra.mxu0 %v13992_v36  ;;  %v14091_v36 = vld [vmem:[#allocation3 + $0xd80] sm:$0xff] }
 0xacc   :  { %14625 = vmatprep.subr.bf16.mxu0 %v14000_v52  ;;  %v14090_v52 = vld [vmem:[#allocation3 + $0xd78] sm:$0xff] }
 0xace   :  { %14615 = vmatmul.mubr.bf16.vlgmr.msra.gmra.mrb[16].mxu0 %v20204_v25  ;;  %v14027_v25 = vld [vmem:[#allocation3 + $0xb80] sm:$0xff] }
 0xacf   :  { %14626 = vmatpush1.bf16.msra.mxu0 %v13999_v11  ;;  %14657 = vmatprep.mubr.bf16.mxu0 %v20208_v5  ;;  %v14035_v5 = vld [vmem:[#allocation3 + $0xbc0] sm:$0xff]  ;;  %v14098_v11 = vld [vmem:[#allocation3 + $0xdb8] sm:$0xff] }
 0xad0   :  { %14627 = vmatprep.subr.bf16.mxu0 %v14007_v57 }
 0xad3   :  { %14628 = vmatpush1.bf16.msra.mxu0 %v14006_v31 }
 0xad4   :  { %14629 = vmatprep.subr.bf16.mxu0 %v14014_v16 }
 0xad7   :  { %14630 = vmatpush1.bf16.msra.mxu0 %v14013_v23 }
 0xad8   :  { %14631 = vmatprep.subr.bf16.mxu0 %v14021_v14  ;;  %v14097_v14 = vld [vmem:[#allocation3 + $0xdb0] sm:$0xff] }
 0xadb   :  { %14632 = vmatpush1.bf16.msra.mxu0 %v14020_v45 }
 0xadc   :  { %14633 = vmatprep.subr.bf16.mxu0 %v14028_v46  ;;  %v14105_v46 = vld [vmem:[#allocation3 + $0xdf0] sm:$0xff] }
 0xadf   :  { %14634 = vmatpush1.bf16.msra.mxu0 %v14027_v25 }
 0xae0   :  { %14635 = vmatprep.subr.bf16.mxu0 %v14035_v5  ;;  %v14104_v5 = vld [vmem:[#allocation3 + $0xde8] sm:$0xff] }
 0xae1   :  { %v14315_v24 = vpop.f32.mrb[12].mxu0  ;;  %v14487_v47 = vpop.f32.mrb[20].mxu1 }
 0xae2   :  { %v15245_v39 = vadd.f32 %v14315_v24, %v14120_v34  ;;  %v15249_v43 = vadd.f32 %v14487_v47, %v14128_v3  ;;  %v14317_v51 = vpop.f32.mrb[13].mxu0  ;;  %v14489_v49 = vpop.f32.mrb[21].mxu1 }
 0xae3   :  { %v15246_v40 = vadd.f32 %v14317_v51, %v14124_v6  ;;  %v15250_v26 = vadd.f32 %v14489_v49, %v14132_v33  ;;  %v14319_v4 = vpop.f32.mrb[14].mxu0  ;;  %v14491_v10 = vpop.f32.mrb[22].mxu1  ;;  %14636 = vmatpush1.bf16.msra.mxu0 %v14034_v32 }
 0xae4   :  { %15466 = vtanh.f32 %v15245_v39  ;;  %v15247_v63 = vadd.f32 %v14319_v4, %v14120_v34  ;;  %v14321_v42 = vpop.f32.mrb[15].mxu0  ;;  %v14493_v18 = vpop.f32.mrb[23].mxu1  ;;  %14637 = vmatprep.subr.bf16.mxu0 %v14042_v17  ;;  %v15251_v29 = vadd.f32 %v14491_v10, %v14128_v3  ;;  %v14144_v34 = vrot.slane %v20238_v15, %v20008_v0 }
 0xae5   :  { %15468 = vtanh.f32 %v15249_v43  ;;  %v15248_v44 = vadd.f32 %v14321_v42, %v14124_v6  ;;  %v15252_v27 = vadd.f32 %v14493_v18, %v14132_v33 }
 0xae6   :  { %15470 = vtanh.f32 %v15246_v40 }
 0xae7   :  { %15472 = vtanh.f32 %v15250_v26  ;;  %14638 = vmatpush1.bf16.msra.mxu0 %v14041_v13 }
 0xae8   :  { %15474 = vtanh.f32 %v15247_v63  ;;  %14639 = vmatprep.subr.bf16.mxu0 %v14049_v19 }
 0xae9   :  { %15476 = vtanh.f32 %v15251_v29 }
 0xaea   :  { %15478 = vtanh.f32 %v15248_v44 }
 0xaeb   :  { %15480 = vtanh.f32 %v15252_v27  ;;  %14640 = vmatpush1.bf16.msra.mxu0 %v14048_v58 }
 0xaec   :  { %14641 = vmatprep.subr.bf16.mxu0 %v14056_v30 }
 0xaee   :  { %v15467_v56 = vpop.eup %15466 }
 0xaef   :  { %v15469_v55 = vpop.eup %15468  ;;  %14642 = vmatpush1.bf16.msra.mxu0 %v14055_v28 }
 0xaf0   :  { %v15471_v37 = vpop.eup %15470  ;;  %14643 = vmatprep.subr.bf16.mxu0 %v14063_v59 }
 0xaf1   :  { %v15473_v1 = vpop.eup %15472  ;;  %v15122_v2 = vpack.c.bf16 %v15471_v37, %v15467_v56  ;;  %v14140_v37 = vrot.slane %v20238_v15, %v20011_v48 }
 0xaf2   :  { %v15475_v53 = vpop.eup %15474  ;;  %v15123_v8 = vpack.c.bf16 %v15473_v1, %v15469_v55  ;;  %v14136_v55 = vrot.slane %v20238_v15, %v20005_v61 }
 0xaf3   :  { %v15477_v9 = vpop.eup %15476  ;;  %14890 = vst [vmem:[#allocation5] sm:$0xff] %v15122_v2  ;;  %14644 = vmatpush1.bf16.msra.mxu0 %v14062_v60 }
 0xaf4   :  { %v15479_v38 = vpop.eup %15478  ;;  %14891 = vst [vmem:[#allocation5 + $0x8] sm:$0xff] %v15123_v8  ;;  %14645 = vmatprep.subr.bf16.mxu0 %v14070_v35 }
 0xaf5   :  { %v15481_v12 = vpop.eup %15480  ;;  %v15126_v7 = vpack.c.bf16 %v15479_v38, %v15475_v53 }
 0xaf6   :  { %v15127_v50 = vpack.c.bf16 %v15481_v12, %v15477_v9 }
 0xaf7   :  { %14895 = vst [vmem:[#allocation5 + $0x1c] sm:$0xff] %v15126_v7  ;;  %14646 = vmatpush1.bf16.msra.mxu0 %v14069_v22 }
 0xaf8   :  { %14896 = vst [vmem:[#allocation5 + $0x24] sm:$0xff] %v15127_v50  ;;  %14647 = vmatprep.subr.bf16.mxu0 %v14077_v20 }
 0xafb   :  { %14648 = vmatpush1.bf16.msra.mxu0 %v14076_v54 }
 0xafc   :  { %14649 = vmatprep.subr.bf16.mxu0 %v14084_v62 }
 0xaff   :  { %14650 = vmatpush1.bf16.msra.mxu0 %v14083_v41 }
 0xb00   :  { %14651 = vmatprep.subr.bf16.mxu0 %v14091_v36 }
 0xb01   :  { %v15149_v57 = vpop.f32.mrb[24].mxu1 }
 0xb02   :  { %v15150_v31 = vpop.f32.mrb[25].mxu1 }
 0xb03   :  { %14652 = vmatpush1.bf16.msra.mxu0 %v14090_v52  ;;  %v15151_v16 = vadd.f32 %v15150_v31, %v15149_v57  ;;  %v15152_v23 = vpop.f32.mrb[26].mxu1 }
 0xb04   :  { %14653 = vmatprep.subr.bf16.mxu0 %v14098_v11  ;;  %v15153_v45 = vpop.f32.mrb[27].mxu1 }
 0xb05   :  { %v15154_v25 = vadd.f32 %v15153_v45, %v15152_v23  ;;  %v14703_v3 = vadd.f32 %v15151_v16, %v14144_v34 }
 0xb07   :  { %14654 = vmatpush1.bf16.msra.mxu0 %v14097_v14  ;;  %v14706_v32 = vadd.f32 %v15154_v25, %v14144_v34 }
 0xb08   :  { %14655 = vmatprep.subr.bf16.mxu0 %v14105_v46 }
 0xb0b   :  { %14656 = vmatpush1.bf16.msra.mxu0 %v14104_v5 }
 0xb0e   :  { %14658 = vmatmul.mubr.bf16.vlgmr.msra.gmra.mrb[16].mxu0 %v20216_v21 }
 0xb21   :  { %v15171_v6 = vpop.f32.mrb[28].mxu1 }
 0xb22   :  { %v15172_v33 = vpop.f32.mrb[29].mxu1 }
 0xb23   :  { %v15173_v24 = vadd.f32 %v15172_v33, %v15171_v6  ;;  %v15174_v47 = vpop.f32.mrb[30].mxu1 }
 0xb24   :  { %v15175_v17 = vpop.f32.mrb[31].mxu1 }
 0xb25   :  { %v14744_v39 = vadd.f32 %v15173_v24, %v14703_v3  ;;  %v15176_v43 = vadd.f32 %v15175_v17, %v15174_v47 }
 0xb27   :  { %v14747_v51 = vadd.f32 %v15176_v43, %v14706_v32 }
 0xb41   :  { %v15193_v49 = vpop.f32.mrb[32].mxu1 }
 0xb42   :  { %v15194_v40 = vpop.f32.mrb[33].mxu1 }
 0xb43   :  { %v15195_v26 = vadd.f32 %v15194_v40, %v15193_v49  ;;  %v15196_v4 = vpop.f32.mrb[34].mxu1 }
 0xb44   :  { %v15197_v10 = vpop.f32.mrb[35].mxu1 }
 0xb45   :  { %v14785_v63 = vadd.f32 %v15195_v26, %v14744_v39  ;;  %v15198_v21 = vadd.f32 %v15197_v10, %v15196_v4 }
 0xb47   :  { %v14788_v42 = vadd.f32 %v15198_v21, %v14747_v51 }
 0xb61   :  { %v15215_v18 = vpop.f32.mrb[36].mxu1 }
 0xb62   :  { %v15216_v0 = vpop.f32.mrb[37].mxu1 }
 0xb63   :  { %v15217_v13 = vadd.f32 %v15216_v0, %v15215_v18  ;;  %v15218_v29 = vpop.f32.mrb[38].mxu1 }
 0xb64   :  { %v15219_v19 = vpop.f32.mrb[39].mxu1 }
 0xb65   :  { %v14826_v44 = vadd.f32 %v15217_v13, %v14785_v63  ;;  %v15220_v27 = vadd.f32 %v15219_v19, %v15218_v29 }
 0xb67   :  { %15482 = vtanh.f32 %v14826_v44  ;;  %v14829_v58 = vadd.f32 %v15220_v27, %v14788_v42 }
 0xb69   :  { %15484 = vtanh.f32 %v14829_v58 }
 0xb71   :  { %v15483_v30 = vpop.eup %15482 }
 0xb72   :  { %v15125_v28 = vpack.c.bf16 %v15483_v30, %v15483_v30 }
 0xb73   :  { %v15485_v59 = vpop.eup %15484 }
 0xb74   :  { %14894 = vst.msk [vmem:[#allocation5 + $0x18] sm:$0xf] %vm14893_vm0, %v15125_v28  ;;  %v15129_v56 = vpack.c.bf16 %v15485_v59, %v15485_v59 }
 0xb76   :  { %14898 = vst.msk [vmem:[#allocation5 + $0x34] sm:$0xf] %vm14893_vm0, %v15129_v56 }
 0xbe1   :  { %v14659_v60 = vpop.f32.mrb[16].mxu0 }
 0xbe2   :  { %v15253_v1 = vadd.f32 %v14659_v60, %v14136_v55  ;;  %v14661_v2 = vpop.f32.mrb[17].mxu0 }
 0xbe3   :  { %v15254_v35 = vadd.f32 %v14661_v2, %v14140_v37  ;;  %v14663_v53 = vpop.f32.mrb[18].mxu0 }
 0xbe4   :  { %15486 = vtanh.f32 %v15253_v1  ;;  %v15255_v8 = vadd.f32 %v14663_v53, %v14136_v55  ;;  %v14665_v9 = vpop.f32.mrb[19].mxu0 }
 0xbe5   :  { %15488 = vtanh.f32 %v15254_v35  ;;  %v15256_v38 = vadd.f32 %v14665_v9, %v14140_v37 }
 0xbe6   :  { %15490 = vtanh.f32 %v15255_v8 }
 0xbe7   :  { %15492 = vtanh.f32 %v15256_v38 }
 0xbee   :  { %v15487_v22 = vpop.eup %15486 }
 0xbef   :  { %v15489_v12 = vpop.eup %15488 }
 0xbf0   :  { %v15491_v61 = vpop.eup %15490  ;;  %v15124_v7 = vpack.c.bf16 %v15489_v12, %v15487_v22 }
 0xbf1   :  { %v15493_v20 = vpop.eup %15492 }
 0xbf2   :  { %14892 = vst [vmem:[#allocation5 + $0x10] sm:$0xff] %v15124_v7  ;;  %v15128_v48 = vpack.c.bf16 %v15493_v20, %v15491_v61 }
 0xbf4   :  { %14897 = vst [vmem:[#allocation5 + $0x2c] sm:$0xff] %v15128_v48 }
 0xbf5   :  { %15505 = shalt.err (!%p15502_p4)
}
 0xbf6   :  { %s15506_s5 = scalar_lea.hbm %s20274_s7, 896 }
 0xbf7   :  { %p15507_p5 = scmp.ne.s32.totalorder %s20274_s7, %s15506_s5  ;;  %p15510_p6 = scmp.lt.u32.totalorder %s15506_s5, %s20274_s7 }
 0xbf9   :  { %p15512_p7 = pnand %p15510_p6, %p15507_p5 }
 0xbfb   :  { %15515 = shalt.err (!%p15512_p7)
}
 0xbfc   :  { %s15527_s9 = smov 448   ;;  %s15528_s10 = smov 28  }
 0xbfd   :  { %14910 = dma.vmem_to_hbm [thread:$0]  %s14905_s24, 896, %s20274_s7, [#allocation6], %s15527_s9, %s15527_s9, %s15528_s10  }
 0xbfe   :  { %15520 = dma.done.wait [#allocation6], 896  }
 0xbff   :  { %15521 = vsyncadd [#allocation6], 4294966400 }
 0xc00   :  { %14914 = vsyncpa [#allocation6], 1 }
 0xc01   :  { %14915 = vsyncmov [#allocation4] }
 0xc04   :  { %s14916_s12 = vpop.sfrf %14915 }
 0xc05   :  { %p15120_p8 = scmp.ne.s32.totalorder %s14916_s12, 0 }
 0xc07   :  { %14920 = shalt.err (%p15120_p8)  }
 0xc08   :  { %14922 = vsyncmov [#allocation4 + $0x1] }
 0xc0b   :  { %s14923_s13 = vpop.sfrf %14922 }
 0xc0c   :  { %p15121_p9 = scmp.ne.s32.totalorder %s14923_s13, 0 }
 0xc0e   :  { %14927 = shalt.err (%p15121_p9)  }

</bundles_post_ra>
